<compile_context>
chip_gen: v7x
topology: tpu7x:2x2x1
jax: 0.10.0
libtpu: 0.0.40
codegen_flags: <defaults>
</compile_context>

<pallas_src>
import numpy as np
import jax
import jax.numpy as jnp
from jax.experimental import pallas as pl
from jax.experimental.pallas import tpu as pltpu

IN_CHANNELS = 21          # forced by `x.reshape(-1, act_dim, 21)` in the PyTorch code
ACT_DIM = 6
HIDDEN = 32               # module default is 256; small size for the demo
GRAPHS_PER_SAMPLE = 2     # graphs inside one forward: N_nodes = GRAPHS * ACT_DIM
N_NODES = GRAPHS_PER_SAMPLE * ACT_DIM            # 12

GCN_GROUP_SAMPLES = 8                             # samples sharing one block-diag A
GROUP_NODES = GCN_GROUP_SAMPLES * N_NODES         # 96  (adjacency is 96x96)
GROUP_GRAPHS = GCN_GROUP_SAMPLES * GRAPHS_PER_SAMPLE   # 16 (readout is 16x96)

SAMPLES_PER_BLOCK = 256                           # per grid step: 3072 node rows,
                                                  # 512 MLP rows (>=128 v5e, >=256 v6e/v7x)
GROUPS_PER_BLOCK = SAMPLES_PER_BLOCK // GCN_GROUP_SAMPLES   # 32


def gnn_critic2_kernel(adj_ref, readout_ref, state_ref, action_ref,
                       wg_ref, bg_ref, w1x_ref, w1a_ref, b1_ref,
                       w2_ref, b2_ref, w3_ref, b3_ref, out_ref, x_scr):
    # VMEM-resident constants (constant index_maps -> loaded once per step).
    adj = adj_ref[...]                                   # (96, 96)  bf16
    rdo = readout_ref[...]                               # (16, 96)  bf16
    wg = wg_ref[...]                                     # (21, 21)  bf16
    # Hoisted bias broadcast (JAX does not CSE broadcast_in_dim inside loops).
    bg = jnp.broadcast_to(bg_ref[...], (GROUP_NODES, IN_CHANNELS))     # f32

    # ---- GCNConv + skip + per-graph readout, one 8-sample group at a time ----
    #   h = A_norm @ (X @ Wg) + bg ; node = relu(h) + X ; x = sum over act_dim nodes
    # A_norm / readout are block-diagonal per 8-sample group, so the cost is
    # linear in the batch (no kron growth).  Static, tile-aligned slices; the
    # Python loop fully unrolls at trace time (32 iterations).
    for grp in range(GROUPS_PER_BLOCK):
        n0 = grp * GROUP_NODES
        st = state_ref[n0:n0 + GROUP_NODES, :]                          # (96, 21) bf16
        xw = jnp.dot(st, wg, preferred_element_type=jnp.float32)        # (96, 21) f32
        h = jnp.dot(adj, xw.astype(jnp.bfloat16),
                    preferred_element_type=jnp.float32)                 # (96, 21) f32
        node = jnp.maximum(h + bg, 0.0) + st.astype(jnp.float32)        # relu + skip
        r0 = grp * GROUP_GRAPHS
        x_scr[r0:r0 + GROUP_GRAPHS, :] = jnp.dot(                        # (16, 21) f32
            rdo, node.astype(jnp.bfloat16), preferred_element_type=jnp.float32)

    # ---- MLP head on the whole 512-graph block ----
    # lin1 on concat([x, action]) as a split matmul (no in-kernel concat).
    x = x_scr[...].astype(jnp.bfloat16)                                  # (512, 21)
    act = action_ref[...]                                                # (512, 6) bf16
    h1 = (jnp.dot(x, w1x_ref[...], preferred_element_type=jnp.float32)
          + jnp.dot(act, w1a_ref[...], preferred_element_type=jnp.float32)
          + b1_ref[...])
    h1 = jnp.maximum(h1, 0.0).astype(jnp.bfloat16)                       # (512, H)
    h2 = jnp.maximum(
        jnp.dot(h1, w2_ref[...], preferred_element_type=jnp.float32) + b2_ref[...],
        0.0).astype(jnp.bfloat16)                                        # (512, H)
    # lin3: narrow (512, 1) f32 result -> 4 B/graph writeback (no lane padding).
    out_ref[...] = (jnp.dot(h2, w3_ref[...], preferred_element_type=jnp.float32)
                    + b3_ref[...])


# --------------------------------------------------------------------------
# Static precompute (out of the hot path: depends only on edge_index / shapes)
# --------------------------------------------------------------------------
def build_gcn_adjacency_np(edge_index, num_nodes):
    """Dense GCN-normalized adjacency D^-1/2 (A + I) D^-1/2 (numpy, one-time)."""
    src = np.asarray(edge_index[0]);  dst = np.asarray(edge_index[1])
    a = np.zeros((num_nodes, num_nodes), np.float32)
    np.add.at(a, (dst, src), 1.0)        # duplicate edges accumulate (PyG semantics)
    a += np.eye(num_nodes, dtype=np.float32)
    deg = a.sum(axis=1)
    dinv = np.where(deg > 0, 1.0 / np.sqrt(deg), 0.0).astype(np.float32)
    return dinv[:, None] * a * dinv[None, :]


def precompute_graph_constants(edge_index, num_nodes, act_dim,
                               group_samples=GCN_GROUP_SAMPLES):
    """Block-diagonal adjacency + readout matrices for ONE 8-sample group (bf16)."""
    a_one = build_gcn_adjacency_np(edge_index, num_nodes)             # (12, 12)
    graphs = num_nodes // act_dim
    r_one = (np.arange(num_nodes)[None, :] // act_dim
             == np.arange(graphs)[:, None]).astype(np.float32)        # (2, 12)
    eye_g = np.eye(group_samples, dtype=np.float32)
    adj_grp = np.kron(eye_g, a_one)                                    # (96, 96)
    readout_grp = np.kron(eye_g, r_one)                                # (16, 96)
    return (jnp.asarray(adj_grp, dtype=jnp.bfloat16),
            jnp.asarray(readout_grp, dtype=jnp.bfloat16))


def prepare_kernel_params(params):
    """One-time repack: bf16 MXU weights, f32 biases (VPU adds stay f32)."""
    bf = lambda w: jnp.asarray(w, jnp.bfloat16)
    f32 = lambda b: jnp.asarray(b, jnp.float32)
    return (bf(params["wg"]), f32(params["bg"]),
            bf(params["w1x"]), bf(params["w1a"]), f32(params["b1"]),
            bf(params["w2"]), f32(params["b2"]),
            bf(params["w3"]), f32(params["b3"]))


# --------------------------------------------------------------------------
# Batched forward: states (S, N, C), actions (S, G, A) -> q (S, G)
# --------------------------------------------------------------------------
def gnn_critic2_forward_batched(states, actions, adj_grp, readout_grp, kparams):
    s, n, c = states.shape
    _, g, a = actions.shape
    spb = SAMPLES_PER_BLOCK

    # Pad the sample axis to a multiple of SAMPLES_PER_BLOCK (static shapes).
    pad = (-s) % spb
    if pad:
        states = jnp.concatenate(
            [states, jnp.zeros((pad, n, c), states.dtype)], axis=0)
        actions = jnp.concatenate(
            [actions, jnp.zeros((pad, g, a), actions.dtype)], axis=0)
    sp = s + pad
    num_blocks = sp // spb   # NOTE(v7x): size batches so this is a multiple of 2
                             # and both TensorCores get blocks.

    # bf16 streamed inputs: halves HBM/DMA/VMEM bytes; MXU-native on all gens.
    states_flat = states.reshape(sp * n, c).astype(jnp.bfloat16)   # nodes on sublanes
    actions_flat = actions.reshape(sp * g, a).astype(jnp.bfloat16)

    (wg, bg, w1x, w1a, b1, w2, b2, w3, b3) = kparams
    hidden = w2.shape[0]

    def const2d(arr):
        # Constant block index -> stays VMEM-resident across grid steps.
        return pl.BlockSpec(arr.shape, lambda i: (0, 0))

    args = (adj_grp, readout_grp, states_flat, actions_flat,
            wg, bg, w1x, w1a, b1, w2, b2, w3, b3)

    flops = 2 * num_blocks * (
        spb * n * c * c                                         # X @ Wg
        + GROUPS_PER_BLOCK * GROUP_NODES * GROUP_NODES * c      # block-diag A_norm
        + GROUPS_PER_BLOCK * GROUP_GRAPHS * GROUP_NODES * c     # readout
        + spb * g * (c * hidden + a * hidden + hidden * hidden + hidden))
    bytes_accessed = int(sum(int(x.size) * x.dtype.itemsize for x in args)
                         + sp * g * 4)

    out = pl.pallas_call(
        gnn_critic2_kernel,
        out_shape=jax.ShapeDtypeStruct((sp * g, 1), jnp.float32),
        grid=(num_blocks,),
        in_specs=[
            const2d(adj_grp),                                # 96x96 group adjacency
            const2d(readout_grp),                            # 16x96 group readout
            pl.BlockSpec((spb * n, c), lambda i: (i, 0)),    # streamed states
            pl.BlockSpec((spb * g, a), lambda i: (i, 0)),    # streamed actions
            const2d(wg), const2d(bg),
            const2d(w1x), const2d(w1a), const2d(b1),
            const2d(w2), const2d(b2), const2d(w3), const2d(b3),
        ],
        out_specs=pl.BlockSpec((spb * g, 1), lambda i: (i, 0)),   # narrow q tile
        scratch_shapes=[pltpu.VMEM((spb * g, c), jnp.float32)],   # per-graph readout x
        compiler_params=pltpu.CompilerParams(
            dimension_semantics=("parallel",)),
        cost_estimate=pl.CostEstimate(flops=int(flops), transcendentals=0,
                                      bytes_accessed=bytes_accessed),
    )(*args)

    return out.reshape(sp, g)[:s]


# --------------------------------------------------------------------------
# Pure-JAX f32 reference mirroring the PyTorch forward
# --------------------------------------------------------------------------
def ref_forward_batched(states, actions, edge_index, params, act_dim=ACT_DIM):
    n = states.shape[1]
    a_norm = jnp.asarray(build_gcn_adjacency_np(edge_index, n))

    def one(state, action):
        out = jnp.maximum(a_norm @ (state @ params["wg"]) + params["bg"][0], 0.0)
        x = out + state
        x = x.reshape(-1, act_dim, state.shape[-1]).sum(axis=1)
        concat = jnp.concatenate([x, action], axis=-1)
        w1 = jnp.concatenate([params["w1x"], params["w1a"]], axis=0)
        h1 = jnp.maximum(concat @ w1 + params["b1"][0], 0.0)
        h2 = jnp.maximum(h1 @ params["w2"] + params["b2"][0], 0.0)
        return (h2 @ params["w3"] + params["b3"][0])[:, 0]

    return jax.vmap(one)(states, actions)


def init_params(key, in_channels=IN_CHANNELS, act_dim=ACT_DIM, hidden=HIDDEN):
    ks = jax.random.split(key, 8)
    s = 0.1
    return {
        "wg":  s * jax.random.normal(ks[0], (in_channels, in_channels), jnp.float32),
        "bg":  s * jax.random.normal(ks[1], (1, in_channels), jnp.float32),
        # lin1 weight split into the state-readout part and the action part
        "w1x": s * jax.random.normal(ks[2], (in_channels, hidden), jnp.float32),
        "w1a": s * jax.random.normal(ks[3], (act_dim, hidden), jnp.float32),
        "b1":  s * jax.random.normal(ks[4], (1, hidden), jnp.float32),
        "w2":  s * jax.random.normal(ks[5], (hidden, hidden), jnp.float32),
        "b2":  s * jax.random.normal(ks[6], (1, hidden), jnp.float32),
        "w3":  s * jax.random.normal(ks[7], (hidden, 1), jnp.float32),
        "b3":  jnp.zeros((1, 1), jnp.float32),
    }


if __name__ == "__main__":
    key = jax.random.PRNGKey(0)
    k_state, k_action, k_param = jax.random.split(key, 3)

    params = init_params(k_param)

    num_samples = 300     # pads to 512 samples -> grid of 2 blocks (v7x-friendly)
    states = jax.random.normal(
        k_state, (num_samples, N_NODES, IN_CHANNELS), jnp.float32)
    actions = jax.random.normal(
        k_action, (num_samples, GRAPHS_PER_SAMPLE, ACT_DIM), jnp.float32)

    # Deterministic bidirectional ring inside each of the GRAPHS_PER_SAMPLE graphs.
    src_list, dst_list = [], []
    for bidx in range(GRAPHS_PER_SAMPLE):
        off = bidx * ACT_DIM
        for i in range(ACT_DIM):
            j = (i + 1) % ACT_DIM
            src_list += [off + i, off + j]
            dst_list += [off + j, off + i]
    edge_index = np.array([src_list, dst_list], dtype=np.int32)

    # One-time static precompute (out of the per-forward hot path).
    adj_grp, readout_grp = precompute_graph_constants(edge_index, N_NODES, ACT_DIM)
    kparams = prepare_kernel_params(params)

    fwd = jax.jit(gnn_critic2_forward_batched)
    q = fwd(states, actions, adj_grp, readout_grp, kparams)
    q = jax.block_until_ready(q)

    q_ref = ref_forward_batched(states, actions, edge_index, params)
    assert q.shape == (num_samples, GRAPHS_PER_SAMPLE)
    # bf16 MXU operands with f32 accumulation -> loosened parity tolerance.
    np.testing.assert_allclose(np.asarray(q, np.float32), np.asarray(q_ref),
                               rtol=5e-2, atol=7.5e-2)

    print("KERNEL_OK")
</pallas_src>

<mosaic_0001>
module attributes {stable_mosaic.version = 11 : i64} {
  func.func @gnn_critic2_kernel(%arg0: i32, %arg1: memref<96x96xbf16, #tpu.memory_space<vmem>>, %arg2: memref<16x96xbf16, #tpu.memory_space<vmem>>, %arg3: memref<3072x21xbf16, #tpu.memory_space<vmem>>, %arg4: memref<512x6xbf16, #tpu.memory_space<vmem>>, %arg5: memref<21x21xbf16, #tpu.memory_space<vmem>>, %arg6: memref<1x21xf32, #tpu.memory_space<vmem>>, %arg7: memref<21x32xbf16, #tpu.memory_space<vmem>>, %arg8: memref<6x32xbf16, #tpu.memory_space<vmem>>, %arg9: memref<1x32xf32, #tpu.memory_space<vmem>>, %arg10: memref<32x32xbf16, #tpu.memory_space<vmem>>, %arg11: memref<1x32xf32, #tpu.memory_space<vmem>>, %arg12: memref<32x1xbf16, #tpu.memory_space<vmem>>, %arg13: memref<1x1xf32, #tpu.memory_space<vmem>>, %arg14: memref<512x1xf32, #tpu.memory_space<vmem>>, %arg15: memref<512x21xf32, #tpu.memory_space<vmem>>) attributes {dimension_semantics = [#tpu.dimension_semantics<parallel>], iteration_bounds = array<i64: 2>, scalar_prefetch = 0 : i64, scratch_operands = 1 : i64, tpu.core_type = #tpu.core_type<tc>, window_params = [{pipeline_mode = #tpu.pipeline_mode<synchronous>, transform_indices = @transform_0, window_bounds = array<i64: 96, 96>}, {pipeline_mode = #tpu.pipeline_mode<synchronous>, transform_indices = @transform_1, window_bounds = array<i64: 16, 96>}, {transform_indices = @transform_2, window_bounds = array<i64: 3072, 21>}, {transform_indices = @transform_3, window_bounds = array<i64: 512, 6>}, {pipeline_mode = #tpu.pipeline_mode<synchronous>, transform_indices = @transform_4, window_bounds = array<i64: 21, 21>}, {pipeline_mode = #tpu.pipeline_mode<synchronous>, transform_indices = @transform_5, window_bounds = array<i64: 1, 21>}, {pipeline_mode = #tpu.pipeline_mode<synchronous>, transform_indices = @transform_6, window_bounds = array<i64: 21, 32>}, {pipeline_mode = #tpu.pipeline_mode<synchronous>, transform_indices = @transform_7, window_bounds = array<i64: 6, 32>}, {pipeline_mode = #tpu.pipeline_mode<synchronous>, transform_indices = @transform_8, window_bounds = array<i64: 1, 32>}, {pipeline_mode = #tpu.pipeline_mode<synchronous>, transform_indices = @transform_9, window_bounds = array<i64: 32, 32>}, {pipeline_mode = #tpu.pipeline_mode<synchronous>, transform_indices = @transform_10, window_bounds = array<i64: 1, 32>}, {pipeline_mode = #tpu.pipeline_mode<synchronous>, transform_indices = @transform_11, window_bounds = array<i64: 32, 1>}, {pipeline_mode = #tpu.pipeline_mode<synchronous>, transform_indices = @transform_12, window_bounds = array<i64: 1, 1>}, {transform_indices = @transform_13, window_bounds = array<i64: 512, 1>}]} {
    %c0 = arith.constant 0 : index
    %c0_0 = arith.constant 0 : index
    %0 = vector.load %arg1[%c0, %c0_0] : memref<96x96xbf16, #tpu.memory_space<vmem>>, vector<96x96xbf16>
    %c0_1 = arith.constant 0 : index
    %c0_2 = arith.constant 0 : index
    %1 = vector.load %arg2[%c0_1, %c0_2] : memref<16x96xbf16, #tpu.memory_space<vmem>>, vector<16x96xbf16>
    %c0_3 = arith.constant 0 : index
    %c0_4 = arith.constant 0 : index
    %2 = vector.load %arg5[%c0_3, %c0_4] : memref<21x21xbf16, #tpu.memory_space<vmem>>, vector<21x21xbf16>
    %c0_5 = arith.constant 0 : index
    %c0_6 = arith.constant 0 : index
    %3 = vector.load %arg6[%c0_5, %c0_6] : memref<1x21xf32, #tpu.memory_space<vmem>>, vector<1x21xf32>
    %4 = vector.shape_cast %3 : vector<1x21xf32> to vector<1x21xf32>
    %5 = vector.broadcast %4 : vector<1x21xf32> to vector<96x21xf32>
    %c0_7 = arith.constant 0 : index
    %c0_8 = arith.constant 0 : index
    %6 = vector.load %arg3[%c0_7, %c0_8] : memref<3072x21xbf16, #tpu.memory_space<vmem>>, vector<96x21xbf16>
    %cst = arith.constant dense<0.000000e+00> : vector<96x21xf32>
    %7 = tpu.matmul %6, %2, %cst {dimension_numbers = #tpu.dot_dimension_numbers<[1], [0], [0], [1], [0, 0, 1, 1], [], []>} : vector<96x21xbf16>, vector<21x21xbf16>, vector<96x21xf32> -> vector<96x21xf32>
    %8 = arith.truncf %7 : vector<96x21xf32> to vector<96x21xbf16>
    %cst_9 = arith.constant dense<0.000000e+00> : vector<96x21xf32>
    %9 = tpu.matmul %0, %8, %cst_9 {dimension_numbers = #tpu.dot_dimension_numbers<[1], [0], [0], [1], [0, 0, 1, 1], [], []>} : vector<96x96xbf16>, vector<96x21xbf16>, vector<96x21xf32> -> vector<96x21xf32>
    %10 = arith.addf %9, %5 : vector<96x21xf32>
    %cst_10 = arith.constant 0.000000e+00 : f32
    %11 = vector.broadcast %cst_10 : f32 to vector<96x21xf32>
    %12 = arith.maximumf %10, %11 : vector<96x21xf32>
    %13 = arith.extf %6 : vector<96x21xbf16> to vector<96x21xf32>
    %14 = arith.addf %12, %13 : vector<96x21xf32>
    %15 = arith.truncf %14 : vector<96x21xf32> to vector<96x21xbf16>
    %cst_11 = arith.constant dense<0.000000e+00> : vector<16x21xf32>
    %16 = tpu.matmul %1, %15, %cst_11 {dimension_numbers = #tpu.dot_dimension_numbers<[1], [0], [0], [1], [0, 0, 1, 1], [], []>} : vector<16x96xbf16>, vector<96x21xbf16>, vector<16x21xf32> -> vector<16x21xf32>
    %c0_12 = arith.constant 0 : index
    %c0_13 = arith.constant 0 : index
    %17 = vector.load %arg15[%c0_12, %c0_13] : memref<512x21xf32, #tpu.memory_space<vmem>>, vector<16x21xf32>
    tpu.vector_store %arg15[%c0_12, %c0_13], %16 {strides = array<i32>} : memref<512x21xf32, #tpu.memory_space<vmem>>, vector<16x21xf32>,
    %c96 = arith.constant 96 : index
    %c0_14 = arith.constant 0 : index
    %18 = vector.load %arg3[%c96, %c0_14] : memref<3072x21xbf16, #tpu.memory_space<vmem>>, vector<96x21xbf16>
    %cst_15 = arith.constant dense<0.000000e+00> : vector<96x21xf32>
    %19 = tpu.matmul %18, %2, %cst_15 {dimension_numbers = #tpu.dot_dimension_numbers<[1], [0], [0], [1], [0, 0, 1, 1], [], []>} : vector<96x21xbf16>, vector<21x21xbf16>, vector<96x21xf32> -> vector<96x21xf32>
    %20 = arith.truncf %19 : vector<96x21xf32> to vector<96x21xbf16>
    %cst_16 = arith.constant dense<0.000000e+00> : vector<96x21xf32>
    %21 = tpu.matmul %0, %20, %cst_16 {dimension_numbers = #tpu.dot_dimension_numbers<[1], [0], [0], [1], [0, 0, 1, 1], [], []>} : vector<96x96xbf16>, vector<96x21xbf16>, vector<96x21xf32> -> vector<96x21xf32>
    %22 = arith.addf %21, %5 : vector<96x21xf32>
    %cst_17 = arith.constant 0.000000e+00 : f32
    %23 = vector.broadcast %cst_17 : f32 to vector<96x21xf32>
    %24 = arith.maximumf %22, %23 : vector<96x21xf32>
    %25 = arith.extf %18 : vector<96x21xbf16> to vector<96x21xf32>
    %26 = arith.addf %24, %25 : vector<96x21xf32>
    %27 = arith.truncf %26 : vector<96x21xf32> to vector<96x21xbf16>
    %cst_18 = arith.constant dense<0.000000e+00> : vector<16x21xf32>
    %28 = tpu.matmul %1, %27, %cst_18 {dimension_numbers = #tpu.dot_dimension_numbers<[1], [0], [0], [1], [0, 0, 1, 1], [], []>} : vector<16x96xbf16>, vector<96x21xbf16>, vector<16x21xf32> -> vector<16x21xf32>
    %c16 = arith.constant 16 : index
    %c0_19 = arith.constant 0 : index
    %29 = vector.load %arg15[%c16, %c0_19] : memref<512x21xf32, #tpu.memory_space<vmem>>, vector<16x21xf32>
    tpu.vector_store %arg15[%c16, %c0_19], %28 {strides = array<i32>} : memref<512x21xf32, #tpu.memory_space<vmem>>, vector<16x21xf32>,
    %c192 = arith.constant 192 : index
    %c0_20 = arith.constant 0 : index
    %30 = vector.load %arg3[%c192, %c0_20] : memref<3072x21xbf16, #tpu.memory_space<vmem>>, vector<96x21xbf16>
    %cst_21 = arith.constant dense<0.000000e+00> : vector<96x21xf32>
    %31 = tpu.matmul %30, %2, %cst_21 {dimension_numbers = #tpu.dot_dimension_numbers<[1], [0], [0], [1], [0, 0, 1, 1], [], []>} : vector<96x21xbf16>, vector<21x21xbf16>, vector<96x21xf32> -> vector<96x21xf32>
    %32 = arith.truncf %31 : vector<96x21xf32> to vector<96x21xbf16>
    %cst_22 = arith.constant dense<0.000000e+00> : vector<96x21xf32>
    %33 = tpu.matmul %0, %32, %cst_22 {dimension_numbers = #tpu.dot_dimension_numbers<[1], [0], [0], [1], [0, 0, 1, 1], [], []>} : vector<96x96xbf16>, vector<96x21xbf16>, vector<96x21xf32> -> vector<96x21xf32>
    %34 = arith.addf %33, %5 : vector<96x21xf32>
    %cst_23 = arith.constant 0.000000e+00 : f32
    %35 = vector.broadcast %cst_23 : f32 to vector<96x21xf32>
    %36 = arith.maximumf %34, %35 : vector<96x21xf32>
    %37 = arith.extf %30 : vector<96x21xbf16> to vector<96x21xf32>
    %38 = arith.addf %36, %37 : vector<96x21xf32>
    %39 = arith.truncf %38 : vector<96x21xf32> to vector<96x21xbf16>
    %cst_24 = arith.constant dense<0.000000e+00> : vector<16x21xf32>
    %40 = tpu.matmul %1, %39, %cst_24 {dimension_numbers = #tpu.dot_dimension_numbers<[1], [0], [0], [1], [0, 0, 1, 1], [], []>} : vector<16x96xbf16>, vector<96x21xbf16>, vector<16x21xf32> -> vector<16x21xf32>
    %c32 = arith.constant 32 : index
    %c0_25 = arith.constant 0 : index
    %41 = vector.load %arg15[%c32, %c0_25] : memref<512x21xf32, #tpu.memory_space<vmem>>, vector<16x21xf32>
    tpu.vector_store %arg15[%c32, %c0_25], %40 {strides = array<i32>} : memref<512x21xf32, #tpu.memory_space<vmem>>, vector<16x21xf32>,
    %c288 = arith.constant 288 : index
    %c0_26 = arith.constant 0 : index
    %42 = vector.load %arg3[%c288, %c0_26] : memref<3072x21xbf16, #tpu.memory_space<vmem>>, vector<96x21xbf16>
    %cst_27 = arith.constant dense<0.000000e+00> : vector<96x21xf32>
    %43 = tpu.matmul %42, %2, %cst_27 {dimension_numbers = #tpu.dot_dimension_numbers<[1], [0], [0], [1], [0, 0, 1, 1], [], []>} : vector<96x21xbf16>, vector<21x21xbf16>, vector<96x21xf32> -> vector<96x21xf32>
    %44 = arith.truncf %43 : vector<96x21xf32> to vector<96x21xbf16>
    %cst_28 = arith.constant dense<0.000000e+00> : vector<96x21xf32>
    %45 = tpu.matmul %0, %44, %cst_28 {dimension_numbers = #tpu.dot_dimension_numbers<[1], [0], [0], [1], [0, 0, 1, 1], [], []>} : vector<96x96xbf16>, vector<96x21xbf16>, vector<96x21xf32> -> vector<96x21xf32>
    %46 = arith.addf %45, %5 : vector<96x21xf32>
    %cst_29 = arith.constant 0.000000e+00 : f32
    %47 = vector.broadcast %cst_29 : f32 to vector<96x21xf32>
    %48 = arith.maximumf %46, %47 : vector<96x21xf32>
    %49 = arith.extf %42 : vector<96x21xbf16> to vector<96x21xf32>
    %50 = arith.addf %48, %49 : vector<96x21xf32>
    %51 = arith.truncf %50 : vector<96x21xf32> to vector<96x21xbf16>
    %cst_30 = arith.constant dense<0.000000e+00> : vector<16x21xf32>
    %52 = tpu.matmul %1, %51, %cst_30 {dimension_numbers = #tpu.dot_dimension_numbers<[1], [0], [0], [1], [0, 0, 1, 1], [], []>} : vector<16x96xbf16>, vector<96x21xbf16>, vector<16x21xf32> -> vector<16x21xf32>
    %c48 = arith.constant 48 : index
    %c0_31 = arith.constant 0 : index
    %53 = vector.load %arg15[%c48, %c0_31] : memref<512x21xf32, #tpu.memory_space<vmem>>, vector<16x21xf32>
    tpu.vector_store %arg15[%c48, %c0_31], %52 {strides = array<i32>} : memref<512x21xf32, #tpu.memory_space<vmem>>, vector<16x21xf32>,
    %c384 = arith.constant 384 : index
    %c0_32 = arith.constant 0 : index
    %54 = vector.load %arg3[%c384, %c0_32] : memref<3072x21xbf16, #tpu.memory_space<vmem>>, vector<96x21xbf16>
    %cst_33 = arith.constant dense<0.000000e+00> : vector<96x21xf32>
    %55 = tpu.matmul %54, %2, %cst_33 {dimension_numbers = #tpu.dot_dimension_numbers<[1], [0], [0], [1], [0, 0, 1, 1], [], []>} : vector<96x21xbf16>, vector<21x21xbf16>, vector<96x21xf32> -> vector<96x21xf32>
    %56 = arith.truncf %55 : vector<96x21xf32> to vector<96x21xbf16>
    %cst_34 = arith.constant dense<0.000000e+00> : vector<96x21xf32>
    %57 = tpu.matmul %0, %56, %cst_34 {dimension_numbers = #tpu.dot_dimension_numbers<[1], [0], [0], [1], [0, 0, 1, 1], [], []>} : vector<96x96xbf16>, vector<96x21xbf16>, vector<96x21xf32> -> vector<96x21xf32>
    %58 = arith.addf %57, %5 : vector<96x21xf32>
    %cst_35 = arith.constant 0.000000e+00 : f32
    %59 = vector.broadcast %cst_35 : f32 to vector<96x21xf32>
    %60 = arith.maximumf %58, %59 : vector<96x21xf32>
    %61 = arith.extf %54 : vector<96x21xbf16> to vector<96x21xf32>
    %62 = arith.addf %60, %61 : vector<96x21xf32>
    %63 = arith.truncf %62 : vector<96x21xf32> to vector<96x21xbf16>
    %cst_36 = arith.constant dense<0.000000e+00> : vector<16x21xf32>
    %64 = tpu.matmul %1, %63, %cst_36 {dimension_numbers = #tpu.dot_dimension_numbers<[1], [0], [0], [1], [0, 0, 1, 1], [], []>} : vector<16x96xbf16>, vector<96x21xbf16>, vector<16x21xf32> -> vector<16x21xf32>
    %c64 = arith.constant 64 : index
    %c0_37 = arith.constant 0 : index
    %65 = vector.load %arg15[%c64, %c0_37] : memref<512x21xf32, #tpu.memory_space<vmem>>, vector<16x21xf32>
    tpu.vector_store %arg15[%c64, %c0_37], %64 {strides = array<i32>} : memref<512x21xf32, #tpu.memory_space<vmem>>, vector<16x21xf32>,
    %c480 = arith.constant 480 : index
    %c0_38 = arith.constant 0 : index
    %66 = vector.load %arg3[%c480, %c0_38] : memref<3072x21xbf16, #tpu.memory_space<vmem>>, vector<96x21xbf16>
    %cst_39 = arith.constant dense<0.000000e+00> : vector<96x21xf32>
    %67 = tpu.matmul %66, %2, %cst_39 {dimension_numbers = #tpu.dot_dimension_numbers<[1], [0], [0], [1], [0, 0, 1, 1], [], []>} : vector<96x21xbf16>, vector<21x21xbf16>, vector<96x21xf32> -> vector<96x21xf32>
    %68 = arith.truncf %67 : vector<96x21xf32> to vector<96x21xbf16>
    %cst_40 = arith.constant dense<0.000000e+00> : vector<96x21xf32>
    %69 = tpu.matmul %0, %68, %cst_40 {dimension_numbers = #tpu.dot_dimension_numbers<[1], [0], [0], [1], [0, 0, 1, 1], [], []>} : vector<96x96xbf16>, vector<96x21xbf16>, vector<96x21xf32> -> vector<96x21xf32>
    %70 = arith.addf %69, %5 : vector<96x21xf32>
    %cst_41 = arith.constant 0.000000e+00 : f32
    %71 = vector.broadcast %cst_41 : f32 to vector<96x21xf32>
    %72 = arith.maximumf %70, %71 : vector<96x21xf32>
    %73 = arith.extf %66 : vector<96x21xbf16> to vector<96x21xf32>
    %74 = arith.addf %72, %73 : vector<96x21xf32>
    %75 = arith.truncf %74 : vector<96x21xf32> to vector<96x21xbf16>
    %cst_42 = arith.constant dense<0.000000e+00> : vector<16x21xf32>
    %76 = tpu.matmul %1, %75, %cst_42 {dimension_numbers = #tpu.dot_dimension_numbers<[1], [0], [0], [1], [0, 0, 1, 1], [], []>} : vector<16x96xbf16>, vector<96x21xbf16>, vector<16x21xf32> -> vector<16x21xf32>
    %c80 = arith.constant 80 : index
    %c0_43 = arith.constant 0 : index
    %77 = vector.load %arg15[%c80, %c0_43] : memref<512x21xf32, #tpu.memory_space<vmem>>, vector<16x21xf32>
    tpu.vector_store %arg15[%c80, %c0_43], %76 {strides = array<i32>} : memref<512x21xf32, #tpu.memory_space<vmem>>, vector<16x21xf32>,
    %c576 = arith.constant 576 : index
    %c0_44 = arith.constant 0 : index
    %78 = vector.load %arg3[%c576, %c0_44] : memref<3072x21xbf16, #tpu.memory_space<vmem>>, vector<96x21xbf16>
    %cst_45 = arith.constant dense<0.000000e+00> : vector<96x21xf32>
    %79 = tpu.matmul %78, %2, %cst_45 {dimension_numbers = #tpu.dot_dimension_numbers<[1], [0], [0], [1], [0, 0, 1, 1], [], []>} : vector<96x21xbf16>, vector<21x21xbf16>, vector<96x21xf32> -> vector<96x21xf32>
    %80 = arith.truncf %79 : vector<96x21xf32> to vector<96x21xbf16>
    %cst_46 = arith.constant dense<0.000000e+00> : vector<96x21xf32>
    %81 = tpu.matmul %0, %80, %cst_46 {dimension_numbers = #tpu.dot_dimension_numbers<[1], [0], [0], [1], [0, 0, 1, 1], [], []>} : vector<96x96xbf16>, vector<96x21xbf16>, vector<96x21xf32> -> vector<96x21xf32>
    %82 = arith.addf %81, %5 : vector<96x21xf32>
    %cst_47 = arith.constant 0.000000e+00 : f32
    %83 = vector.broadcast %cst_47 : f32 to vector<96x21xf32>
    %84 = arith.maximumf %82, %83 : vector<96x21xf32>
    %85 = arith.extf %78 : vector<96x21xbf16> to vector<96x21xf32>
    %86 = arith.addf %84, %85 : vector<96x21xf32>
    %87 = arith.truncf %86 : vector<96x21xf32> to vector<96x21xbf16>
    %cst_48 = arith.constant dense<0.000000e+00> : vector<16x21xf32>
    %88 = tpu.matmul %1, %87, %cst_48 {dimension_numbers = #tpu.dot_dimension_numbers<[1], [0], [0], [1], [0, 0, 1, 1], [], []>} : vector<16x96xbf16>, vector<96x21xbf16>, vector<16x21xf32> -> vector<16x21xf32>
    %c96_49 = arith.constant 96 : index
    %c0_50 = arith.constant 0 : index
    %89 = vector.load %arg15[%c96_49, %c0_50] : memref<512x21xf32, #tpu.memory_space<vmem>>, vector<16x21xf32>
    tpu.vector_store %arg15[%c96_49, %c0_50], %88 {strides = array<i32>} : memref<512x21xf32, #tpu.memory_space<vmem>>, vector<16x21xf32>,
    %c672 = arith.constant 672 : index
    %c0_51 = arith.constant 0 : index
    %90 = vector.load %arg3[%c672, %c0_51] : memref<3072x21xbf16, #tpu.memory_space<vmem>>, vector<96x21xbf16>
    %cst_52 = arith.constant dense<0.000000e+00> : vector<96x21xf32>
    %91 = tpu.matmul %90, %2, %cst_52 {dimension_numbers = #tpu.dot_dimension_numbers<[1], [0], [0], [1], [0, 0, 1, 1], [], []>} : vector<96x21xbf16>, vector<21x21xbf16>, vector<96x21xf32> -> vector<96x21xf32>
    %92 = arith.truncf %91 : vector<96x21xf32> to vector<96x21xbf16>
    %cst_53 = arith.constant dense<0.000000e+00> : vector<96x21xf32>
    %93 = tpu.matmul %0, %92, %cst_53 {dimension_numbers = #tpu.dot_dimension_numbers<[1], [0], [0], [1], [0, 0, 1, 1], [], []>} : vector<96x96xbf16>, vector<96x21xbf16>, vector<96x21xf32> -> vector<96x21xf32>
    %94 = arith.addf %93, %5 : vector<96x21xf32>
    %cst_54 = arith.constant 0.000000e+00 : f32
    %95 = vector.broadcast %cst_54 : f32 to vector<96x21xf32>
    %96 = arith.maximumf %94, %95 : vector<96x21xf32>
    %97 = arith.extf %90 : vector<96x21xbf16> to vector<96x21xf32>
    %98 = arith.addf %96, %97 : vector<96x21xf32>
    %99 = arith.truncf %98 : vector<96x21xf32> to vector<96x21xbf16>
    %cst_55 = arith.constant dense<0.000000e+00> : vector<16x21xf32>
    %100 = tpu.matmul %1, %99, %cst_55 {dimension_numbers = #tpu.dot_dimension_numbers<[1], [0], [0], [1], [0, 0, 1, 1], [], []>} : vector<16x96xbf16>, vector<96x21xbf16>, vector<16x21xf32> -> vector<16x21xf32>
    %c112 = arith.constant 112 : index
    %c0_56 = arith.constant 0 : index
    %101 = vector.load %arg15[%c112, %c0_56] : memref<512x21xf32, #tpu.memory_space<vmem>>, vector<16x21xf32>
    tpu.vector_store %arg15[%c112, %c0_56], %100 {strides = array<i32>} : memref<512x21xf32, #tpu.memory_space<vmem>>, vector<16x21xf32>,
    %c768 = arith.constant 768 : index
    %c0_57 = arith.constant 0 : index
    %102 = vector.load %arg3[%c768, %c0_57] : memref<3072x21xbf16, #tpu.memory_space<vmem>>, vector<96x21xbf16>
    %cst_58 = arith.constant dense<0.000000e+00> : vector<96x21xf32>
    %103 = tpu.matmul %102, %2, %cst_58 {dimension_numbers = #tpu.dot_dimension_numbers<[1], [0], [0], [1], [0, 0, 1, 1], [], []>} : vector<96x21xbf16>, vector<21x21xbf16>, vector<96x21xf32> -> vector<96x21xf32>
    %104 = arith.truncf %103 : vector<96x21xf32> to vector<96x21xbf16>
    %cst_59 = arith.constant dense<0.000000e+00> : vector<96x21xf32>
    %105 = tpu.matmul %0, %104, %cst_59 {dimension_numbers = #tpu.dot_dimension_numbers<[1], [0], [0], [1], [0, 0, 1, 1], [], []>} : vector<96x96xbf16>, vector<96x21xbf16>, vector<96x21xf32> -> vector<96x21xf32>
    %106 = arith.addf %105, %5 : vector<96x21xf32>
    %cst_60 = arith.constant 0.000000e+00 : f32
    %107 = vector.broadcast %cst_60 : f32 to vector<96x21xf32>
    %108 = arith.maximumf %106, %107 : vector<96x21xf32>
    %109 = arith.extf %102 : vector<96x21xbf16> to vector<96x21xf32>
    %110 = arith.addf %108, %109 : vector<96x21xf32>
    %111 = arith.truncf %110 : vector<96x21xf32> to vector<96x21xbf16>
    %cst_61 = arith.constant dense<0.000000e+00> : vector<16x21xf32>
    %112 = tpu.matmul %1, %111, %cst_61 {dimension_numbers = #tpu.dot_dimension_numbers<[1], [0], [0], [1], [0, 0, 1, 1], [], []>} : vector<16x96xbf16>, vector<96x21xbf16>, vector<16x21xf32> -> vector<16x21xf32>
    %c128 = arith.constant 128 : index
    %c0_62 = arith.constant 0 : index
    %113 = vector.load %arg15[%c128, %c0_62] : memref<512x21xf32, #tpu.memory_space<vmem>>, vector<16x21xf32>
    tpu.vector_store %arg15[%c128, %c0_62], %112 {strides = array<i32>} : memref<512x21xf32, #tpu.memory_space<vmem>>, vector<16x21xf32>,
    %c864 = arith.constant 864 : index
    %c0_63 = arith.constant 0 : index
    %114 = vector.load %arg3[%c864, %c0_63] : memref<3072x21xbf16, #tpu.memory_space<vmem>>, vector<96x21xbf16>
    %cst_64 = arith.constant dense<0.000000e+00> : vector<96x21xf32>
    %115 = tpu.matmul %114, %2, %cst_64 {dimension_numbers = #tpu.dot_dimension_numbers<[1], [0], [0], [1], [0, 0, 1, 1], [], []>} : vector<96x21xbf16>, vector<21x21xbf16>, vector<96x21xf32> -> vector<96x21xf32>
    %116 = arith.truncf %115 : vector<96x21xf32> to vector<96x21xbf16>
    %cst_65 = arith.constant dense<0.000000e+00> : vector<96x21xf32>
    %117 = tpu.matmul %0, %116, %cst_65 {dimension_numbers = #tpu.dot_dimension_numbers<[1], [0], [0], [1], [0, 0, 1, 1], [], []>} : vector<96x96xbf16>, vector<96x21xbf16>, vector<96x21xf32> -> vector<96x21xf32>
    %118 = arith.addf %117, %5 : vector<96x21xf32>
    %cst_66 = arith.constant 0.000000e+00 : f32
    %119 = vector.broadcast %cst_66 : f32 to vector<96x21xf32>
    %120 = arith.maximumf %118, %119 : vector<96x21xf32>
    %121 = arith.extf %114 : vector<96x21xbf16> to vector<96x21xf32>
    %122 = arith.addf %120, %121 : vector<96x21xf32>
    %123 = arith.truncf %122 : vector<96x21xf32> to vector<96x21xbf16>
    %cst_67 = arith.constant dense<0.000000e+00> : vector<16x21xf32>
    %124 = tpu.matmul %1, %123, %cst_67 {dimension_numbers = #tpu.dot_dimension_numbers<[1], [0], [0], [1], [0, 0, 1, 1], [], []>} : vector<16x96xbf16>, vector<96x21xbf16>, vector<16x21xf32> -> vector<16x21xf32>
    %c144 = arith.constant 144 : index
    %c0_68 = arith.constant 0 : index
    %125 = vector.load %arg15[%c144, %c0_68] : memref<512x21xf32, #tpu.memory_space<vmem>>, vector<16x21xf32>
    tpu.vector_store %arg15[%c144, %c0_68], %124 {strides = array<i32>} : memref<512x21xf32, #tpu.memory_space<vmem>>, vector<16x21xf32>,
    %c960 = arith.constant 960 : index
    %c0_69 = arith.constant 0 : index
    %126 = vector.load %arg3[%c960, %c0_69] : memref<3072x21xbf16, #tpu.memory_space<vmem>>, vector<96x21xbf16>
    %cst_70 = arith.constant dense<0.000000e+00> : vector<96x21xf32>
    %127 = tpu.matmul %126, %2, %cst_70 {dimension_numbers = #tpu.dot_dimension_numbers<[1], [0], [0], [1], [0, 0, 1, 1], [], []>} : vector<96x21xbf16>, vector<21x21xbf16>, vector<96x21xf32> -> vector<96x21xf32>
    %128 = arith.truncf %127 : vector<96x21xf32> to vector<96x21xbf16>
    %cst_71 = arith.constant dense<0.000000e+00> : vector<96x21xf32>
    %129 = tpu.matmul %0, %128, %cst_71 {dimension_numbers = #tpu.dot_dimension_numbers<[1], [0], [0], [1], [0, 0, 1, 1], [], []>} : vector<96x96xbf16>, vector<96x21xbf16>, vector<96x21xf32> -> vector<96x21xf32>
    %130 = arith.addf %129, %5 : vector<96x21xf32>
    %cst_72 = arith.constant 0.000000e+00 : f32
    %131 = vector.broadcast %cst_72 : f32 to vector<96x21xf32>
    %132 = arith.maximumf %130, %131 : vector<96x21xf32>
    %133 = arith.extf %126 : vector<96x21xbf16> to vector<96x21xf32>
    %134 = arith.addf %132, %133 : vector<96x21xf32>
    %135 = arith.truncf %134 : vector<96x21xf32> to vector<96x21xbf16>
    %cst_73 = arith.constant dense<0.000000e+00> : vector<16x21xf32>
    %136 = tpu.matmul %1, %135, %cst_73 {dimension_numbers = #tpu.dot_dimension_numbers<[1], [0], [0], [1], [0, 0, 1, 1], [], []>} : vector<16x96xbf16>, vector<96x21xbf16>, vector<16x21xf32> -> vector<16x21xf32>
    %c160 = arith.constant 160 : index
    %c0_74 = arith.constant 0 : index
    %137 = vector.load %arg15[%c160, %c0_74] : memref<512x21xf32, #tpu.memory_space<vmem>>, vector<16x21xf32>
    tpu.vector_store %arg15[%c160, %c0_74], %136 {strides = array<i32>} : memref<512x21xf32, #tpu.memory_space<vmem>>, vector<16x21xf32>,
    %c1056 = arith.constant 1056 : index
    %c0_75 = arith.constant 0 : index
    %138 = vector.load %arg3[%c1056, %c0_75] : memref<3072x21xbf16, #tpu.memory_space<vmem>>, vector<96x21xbf16>
    %cst_76 = arith.constant dense<0.000000e+00> : vector<96x21xf32>
    %139 = tpu.matmul %138, %2, %cst_76 {dimension_numbers = #tpu.dot_dimension_numbers<[1], [0], [0], [1], [0, 0, 1, 1], [], []>} : vector<96x21xbf16>, vector<21x21xbf16>, vector<96x21xf32> -> vector<96x21xf32>
    %140 = arith.truncf %139 : vector<96x21xf32> to vector<96x21xbf16>
    %cst_77 = arith.constant dense<0.000000e+00> : vector<96x21xf32>
    %141 = tpu.matmul %0, %140, %cst_77 {dimension_numbers = #tpu.dot_dimension_numbers<[1], [0], [0], [1], [0, 0, 1, 1], [], []>} : vector<96x96xbf16>, vector<96x21xbf16>, vector<96x21xf32> -> vector<96x21xf32>
    %142 = arith.addf %141, %5 : vector<96x21xf32>
    %cst_78 = arith.constant 0.000000e+00 : f32
    %143 = vector.broadcast %cst_78 : f32 to vector<96x21xf32>
    %144 = arith.maximumf %142, %143 : vector<96x21xf32>
    %145 = arith.extf %138 : vector<96x21xbf16> to vector<96x21xf32>
    %146 = arith.addf %144, %145 : vector<96x21xf32>
    %147 = arith.truncf %146 : vector<96x21xf32> to vector<96x21xbf16>
    %cst_79 = arith.constant dense<0.000000e+00> : vector<16x21xf32>
    %148 = tpu.matmul %1, %147, %cst_79 {dimension_numbers = #tpu.dot_dimension_numbers<[1], [0], [0], [1], [0, 0, 1, 1], [], []>} : vector<16x96xbf16>, vector<96x21xbf16>, vector<16x21xf32> -> vector<16x21xf32>
    %c176 = arith.constant 176 : index
    %c0_80 = arith.constant 0 : index
    %149 = vector.load %arg15[%c176, %c0_80] : memref<512x21xf32, #tpu.memory_space<vmem>>, vector<16x21xf32>
    tpu.vector_store %arg15[%c176, %c0_80], %148 {strides = array<i32>} : memref<512x21xf32, #tpu.memory_space<vmem>>, vector<16x21xf32>,
    %c1152 = arith.constant 1152 : index
    %c0_81 = arith.constant 0 : index
    %150 = vector.load %arg3[%c1152, %c0_81] : memref<3072x21xbf16, #tpu.memory_space<vmem>>, vector<96x21xbf16>
    %cst_82 = arith.constant dense<0.000000e+00> : vector<96x21xf32>
    %151 = tpu.matmul %150, %2, %cst_82 {dimension_numbers = #tpu.dot_dimension_numbers<[1], [0], [0], [1], [0, 0, 1, 1], [], []>} : vector<96x21xbf16>, vector<21x21xbf16>, vector<96x21xf32> -> vector<96x21xf32>
    %152 = arith.truncf %151 : vector<96x21xf32> to vector<96x21xbf16>
    %cst_83 = arith.constant dense<0.000000e+00> : vector<96x21xf32>
    %153 = tpu.matmul %0, %152, %cst_83 {dimension_numbers = #tpu.dot_dimension_numbers<[1], [0], [0], [1], [0, 0, 1, 1], [], []>} : vector<96x96xbf16>, vector<96x21xbf16>, vector<96x21xf32> -> vector<96x21xf32>
    %154 = arith.addf %153, %5 : vector<96x21xf32>
    %cst_84 = arith.constant 0.000000e+00 : f32
    %155 = vector.broadcast %cst_84 : f32 to vector<96x21xf32>
    %156 = arith.maximumf %154, %155 : vector<96x21xf32>
    %157 = arith.extf %150 : vector<96x21xbf16> to vector<96x21xf32>
    %158 = arith.addf %156, %157 : vector<96x21xf32>
    %159 = arith.truncf %158 : vector<96x21xf32> to vector<96x21xbf16>
    %cst_85 = arith.constant dense<0.000000e+00> : vector<16x21xf32>
    %160 = tpu.matmul %1, %159, %cst_85 {dimension_numbers = #tpu.dot_dimension_numbers<[1], [0], [0], [1], [0, 0, 1, 1], [], []>} : vector<16x96xbf16>, vector<96x21xbf16>, vector<16x21xf32> -> vector<16x21xf32>
    %c192_86 = arith.constant 192 : index
    %c0_87 = arith.constant 0 : index
    %161 = vector.load %arg15[%c192_86, %c0_87] : memref<512x21xf32, #tpu.memory_space<vmem>>, vector<16x21xf32>
    tpu.vector_store %arg15[%c192_86, %c0_87], %160 {strides = array<i32>} : memref<512x21xf32, #tpu.memory_space<vmem>>, vector<16x21xf32>,
    %c1248 = arith.constant 1248 : index
    %c0_88 = arith.constant 0 : index
    %162 = vector.load %arg3[%c1248, %c0_88] : memref<3072x21xbf16, #tpu.memory_space<vmem>>, vector<96x21xbf16>
    %cst_89 = arith.constant dense<0.000000e+00> : vector<96x21xf32>
    %163 = tpu.matmul %162, %2, %cst_89 {dimension_numbers = #tpu.dot_dimension_numbers<[1], [0], [0], [1], [0, 0, 1, 1], [], []>} : vector<96x21xbf16>, vector<21x21xbf16>, vector<96x21xf32> -> vector<96x21xf32>
    %164 = arith.truncf %163 : vector<96x21xf32> to vector<96x21xbf16>
    %cst_90 = arith.constant dense<0.000000e+00> : vector<96x21xf32>
    %165 = tpu.matmul %0, %164, %cst_90 {dimension_numbers = #tpu.dot_dimension_numbers<[1], [0], [0], [1], [0, 0, 1, 1], [], []>} : vector<96x96xbf16>, vector<96x21xbf16>, vector<96x21xf32> -> vector<96x21xf32>
    %166 = arith.addf %165, %5 : vector<96x21xf32>
    %cst_91 = arith.constant 0.000000e+00 : f32
    %167 = vector.broadcast %cst_91 : f32 to vector<96x21xf32>
    %168 = arith.maximumf %166, %167 : vector<96x21xf32>
    %169 = arith.extf %162 : vector<96x21xbf16> to vector<96x21xf32>
    %170 = arith.addf %168, %169 : vector<96x21xf32>
    %171 = arith.truncf %170 : vector<96x21xf32> to vector<96x21xbf16>
    %cst_92 = arith.constant dense<0.000000e+00> : vector<16x21xf32>
    %172 = tpu.matmul %1, %171, %cst_92 {dimension_numbers = #tpu.dot_dimension_numbers<[1], [0], [0], [1], [0, 0, 1, 1], [], []>} : vector<16x96xbf16>, vector<96x21xbf16>, vector<16x21xf32> -> vector<16x21xf32>
    %c208 = arith.constant 208 : index
    %c0_93 = arith.constant 0 : index
    %173 = vector.load %arg15[%c208, %c0_93] : memref<512x21xf32, #tpu.memory_space<vmem>>, vector<16x21xf32>
    tpu.vector_store %arg15[%c208, %c0_93], %172 {strides = array<i32>} : memref<512x21xf32, #tpu.memory_space<vmem>>, vector<16x21xf32>,
    %c1344 = arith.constant 1344 : index
    %c0_94 = arith.constant 0 : index
    %174 = vector.load %arg3[%c1344, %c0_94] : memref<3072x21xbf16, #tpu.memory_space<vmem>>, vector<96x21xbf16>
    %cst_95 = arith.constant dense<0.000000e+00> : vector<96x21xf32>
    %175 = tpu.matmul %174, %2, %cst_95 {dimension_numbers = #tpu.dot_dimension_numbers<[1], [0], [0], [1], [0, 0, 1, 1], [], []>} : vector<96x21xbf16>, vector<21x21xbf16>, vector<96x21xf32> -> vector<96x21xf32>
    %176 = arith.truncf %175 : vector<96x21xf32> to vector<96x21xbf16>
    %cst_96 = arith.constant dense<0.000000e+00> : vector<96x21xf32>
    %177 = tpu.matmul %0, %176, %cst_96 {dimension_numbers = #tpu.dot_dimension_numbers<[1], [0], [0], [1], [0, 0, 1, 1], [], []>} : vector<96x96xbf16>, vector<96x21xbf16>, vector<96x21xf32> -> vector<96x21xf32>
    %178 = arith.addf %177, %5 : vector<96x21xf32>
    %cst_97 = arith.constant 0.000000e+00 : f32
    %179 = vector.broadcast %cst_97 : f32 to vector<96x21xf32>
    %180 = arith.maximumf %178, %179 : vector<96x21xf32>
    %181 = arith.extf %174 : vector<96x21xbf16> to vector<96x21xf32>
    %182 = arith.addf %180, %181 : vector<96x21xf32>
    %183 = arith.truncf %182 : vector<96x21xf32> to vector<96x21xbf16>
    %cst_98 = arith.constant dense<0.000000e+00> : vector<16x21xf32>
    %184 = tpu.matmul %1, %183, %cst_98 {dimension_numbers = #tpu.dot_dimension_numbers<[1], [0], [0], [1], [0, 0, 1, 1], [], []>} : vector<16x96xbf16>, vector<96x21xbf16>, vector<16x21xf32> -> vector<16x21xf32>
    %c224 = arith.constant 224 : index
    %c0_99 = arith.constant 0 : index
    %185 = vector.load %arg15[%c224, %c0_99] : memref<512x21xf32, #tpu.memory_space<vmem>>, vector<16x21xf32>
    tpu.vector_store %arg15[%c224, %c0_99], %184 {strides = array<i32>} : memref<512x21xf32, #tpu.memory_space<vmem>>, vector<16x21xf32>,
    %c1440 = arith.constant 1440 : index
    %c0_100 = arith.constant 0 : index
    %186 = vector.load %arg3[%c1440, %c0_100] : memref<3072x21xbf16, #tpu.memory_space<vmem>>, vector<96x21xbf16>
    %cst_101 = arith.constant dense<0.000000e+00> : vector<96x21xf32>
    %187 = tpu.matmul %186, %2, %cst_101 {dimension_numbers = #tpu.dot_dimension_numbers<[1], [0], [0], [1], [0, 0, 1, 1], [], []>} : vector<96x21xbf16>, vector<21x21xbf16>, vector<96x21xf32> -> vector<96x21xf32>
    %188 = arith.truncf %187 : vector<96x21xf32> to vector<96x21xbf16>
    %cst_102 = arith.constant dense<0.000000e+00> : vector<96x21xf32>
    %189 = tpu.matmul %0, %188, %cst_102 {dimension_numbers = #tpu.dot_dimension_numbers<[1], [0], [0], [1], [0, 0, 1, 1], [], []>} : vector<96x96xbf16>, vector<96x21xbf16>, vector<96x21xf32> -> vector<96x21xf32>
    %190 = arith.addf %189, %5 : vector<96x21xf32>
    %cst_103 = arith.constant 0.000000e+00 : f32
    %191 = vector.broadcast %cst_103 : f32 to vector<96x21xf32>
    %192 = arith.maximumf %190, %191 : vector<96x21xf32>
    %193 = arith.extf %186 : vector<96x21xbf16> to vector<96x21xf32>
    %194 = arith.addf %192, %193 : vector<96x21xf32>
    %195 = arith.truncf %194 : vector<96x21xf32> to vector<96x21xbf16>
    %cst_104 = arith.constant dense<0.000000e+00> : vector<16x21xf32>
    %196 = tpu.matmul %1, %195, %cst_104 {dimension_numbers = #tpu.dot_dimension_numbers<[1], [0], [0], [1], [0, 0, 1, 1], [], []>} : vector<16x96xbf16>, vector<96x21xbf16>, vector<16x21xf32> -> vector<16x21xf32>
    %c240 = arith.constant 240 : index
    %c0_105 = arith.constant 0 : index
    %197 = vector.load %arg15[%c240, %c0_105] : memref<512x21xf32, #tpu.memory_space<vmem>>, vector<16x21xf32>
    tpu.vector_store %arg15[%c240, %c0_105], %196 {strides = array<i32>} : memref<512x21xf32, #tpu.memory_space<vmem>>, vector<16x21xf32>,
    %c1536 = arith.constant 1536 : index
    %c0_106 = arith.constant 0 : index
    %198 = vector.load %arg3[%c1536, %c0_106] : memref<3072x21xbf16, #tpu.memory_space<vmem>>, vector<96x21xbf16>
    %cst_107 = arith.constant dense<0.000000e+00> : vector<96x21xf32>
    %199 = tpu.matmul %198, %2, %cst_107 {dimension_numbers = #tpu.dot_dimension_numbers<[1], [0], [0], [1], [0, 0, 1, 1], [], []>} : vector<96x21xbf16>, vector<21x21xbf16>, vector<96x21xf32> -> vector<96x21xf32>
    %200 = arith.truncf %199 : vector<96x21xf32> to vector<96x21xbf16>
    %cst_108 = arith.constant dense<0.000000e+00> : vector<96x21xf32>
    %201 = tpu.matmul %0, %200, %cst_108 {dimension_numbers = #tpu.dot_dimension_numbers<[1], [0], [0], [1], [0, 0, 1, 1], [], []>} : vector<96x96xbf16>, vector<96x21xbf16>, vector<96x21xf32> -> vector<96x21xf32>
    %202 = arith.addf %201, %5 : vector<96x21xf32>
    %cst_109 = arith.constant 0.000000e+00 : f32
    %203 = vector.broadcast %cst_109 : f32 to vector<96x21xf32>
    %204 = arith.maximumf %202, %203 : vector<96x21xf32>
    %205 = arith.extf %198 : vector<96x21xbf16> to vector<96x21xf32>
    %206 = arith.addf %204, %205 : vector<96x21xf32>
    %207 = arith.truncf %206 : vector<96x21xf32> to vector<96x21xbf16>
    %cst_110 = arith.constant dense<0.000000e+00> : vector<16x21xf32>
    %208 = tpu.matmul %1, %207, %cst_110 {dimension_numbers = #tpu.dot_dimension_numbers<[1], [0], [0], [1], [0, 0, 1, 1], [], []>} : vector<16x96xbf16>, vector<96x21xbf16>, vector<16x21xf32> -> vector<16x21xf32>
    %c256 = arith.constant 256 : index
    %c0_111 = arith.constant 0 : index
    %209 = vector.load %arg15[%c256, %c0_111] : memref<512x21xf32, #tpu.memory_space<vmem>>, vector<16x21xf32>
    tpu.vector_store %arg15[%c256, %c0_111], %208 {strides = array<i32>} : memref<512x21xf32, #tpu.memory_space<vmem>>, vector<16x21xf32>,
    %c1632 = arith.constant 1632 : index
    %c0_112 = arith.constant 0 : index
    %210 = vector.load %arg3[%c1632, %c0_112] : memref<3072x21xbf16, #tpu.memory_space<vmem>>, vector<96x21xbf16>
    %cst_113 = arith.constant dense<0.000000e+00> : vector<96x21xf32>
    %211 = tpu.matmul %210, %2, %cst_113 {dimension_numbers = #tpu.dot_dimension_numbers<[1], [0], [0], [1], [0, 0, 1, 1], [], []>} : vector<96x21xbf16>, vector<21x21xbf16>, vector<96x21xf32> -> vector<96x21xf32>
    %212 = arith.truncf %211 : vector<96x21xf32> to vector<96x21xbf16>
    %cst_114 = arith.constant dense<0.000000e+00> : vector<96x21xf32>
    %213 = tpu.matmul %0, %212, %cst_114 {dimension_numbers = #tpu.dot_dimension_numbers<[1], [0], [0], [1], [0, 0, 1, 1], [], []>} : vector<96x96xbf16>, vector<96x21xbf16>, vector<96x21xf32> -> vector<96x21xf32>
    %214 = arith.addf %213, %5 : vector<96x21xf32>
    %cst_115 = arith.constant 0.000000e+00 : f32
    %215 = vector.broadcast %cst_115 : f32 to vector<96x21xf32>
    %216 = arith.maximumf %214, %215 : vector<96x21xf32>
    %217 = arith.extf %210 : vector<96x21xbf16> to vector<96x21xf32>
    %218 = arith.addf %216, %217 : vector<96x21xf32>
    %219 = arith.truncf %218 : vector<96x21xf32> to vector<96x21xbf16>
    %cst_116 = arith.constant dense<0.000000e+00> : vector<16x21xf32>
    %220 = tpu.matmul %1, %219, %cst_116 {dimension_numbers = #tpu.dot_dimension_numbers<[1], [0], [0], [1], [0, 0, 1, 1], [], []>} : vector<16x96xbf16>, vector<96x21xbf16>, vector<16x21xf32> -> vector<16x21xf32>
    %c272 = arith.constant 272 : index
    %c0_117 = arith.constant 0 : index
    %221 = vector.load %arg15[%c272, %c0_117] : memref<512x21xf32, #tpu.memory_space<vmem>>, vector<16x21xf32>
    tpu.vector_store %arg15[%c272, %c0_117], %220 {strides = array<i32>} : memref<512x21xf32, #tpu.memory_space<vmem>>, vector<16x21xf32>,
    %c1728 = arith.constant 1728 : index
    %c0_118 = arith.constant 0 : index
    %222 = vector.load %arg3[%c1728, %c0_118] : memref<3072x21xbf16, #tpu.memory_space<vmem>>, vector<96x21xbf16>
    %cst_119 = arith.constant dense<0.000000e+00> : vector<96x21xf32>
    %223 = tpu.matmul %222, %2, %cst_119 {dimension_numbers = #tpu.dot_dimension_numbers<[1], [0], [0], [1], [0, 0, 1, 1], [], []>} : vector<96x21xbf16>, vector<21x21xbf16>, vector<96x21xf32> -> vector<96x21xf32>
    %224 = arith.truncf %223 : vector<96x21xf32> to vector<96x21xbf16>
    %cst_120 = arith.constant dense<0.000000e+00> : vector<96x21xf32>
    %225 = tpu.matmul %0, %224, %cst_120 {dimension_numbers = #tpu.dot_dimension_numbers<[1], [0], [0], [1], [0, 0, 1, 1], [], []>} : vector<96x96xbf16>, vector<96x21xbf16>, vector<96x21xf32> -> vector<96x21xf32>
    %226 = arith.addf %225, %5 : vector<96x21xf32>
    %cst_121 = arith.constant 0.000000e+00 : f32
    %227 = vector.broadcast %cst_121 : f32 to vector<96x21xf32>
    %228 = arith.maximumf %226, %227 : vector<96x21xf32>
    %229 = arith.extf %222 : vector<96x21xbf16> to vector<96x21xf32>
    %230 = arith.addf %228, %229 : vector<96x21xf32>
    %231 = arith.truncf %230 : vector<96x21xf32> to vector<96x21xbf16>
    %cst_122 = arith.constant dense<0.000000e+00> : vector<16x21xf32>
    %232 = tpu.matmul %1, %231, %cst_122 {dimension_numbers = #tpu.dot_dimension_numbers<[1], [0], [0], [1], [0, 0, 1, 1], [], []>} : vector<16x96xbf16>, vector<96x21xbf16>, vector<16x21xf32> -> vector<16x21xf32>
    %c288_123 = arith.constant 288 : index
    %c0_124 = arith.constant 0 : index
    %233 = vector.load %arg15[%c288_123, %c0_124] : memref<512x21xf32, #tpu.memory_space<vmem>>, vector<16x21xf32>
    tpu.vector_store %arg15[%c288_123, %c0_124], %232 {strides = array<i32>} : memref<512x21xf32, #tpu.memory_space<vmem>>, vector<16x21xf32>,
    %c1824 = arith.constant 1824 : index
    %c0_125 = arith.constant 0 : index
    %234 = vector.load %arg3[%c1824, %c0_125] : memref<3072x21xbf16, #tpu.memory_space<vmem>>, vector<96x21xbf16>
    %cst_126 = arith.constant dense<0.000000e+00> : vector<96x21xf32>
    %235 = tpu.matmul %234, %2, %cst_126 {dimension_numbers = #tpu.dot_dimension_numbers<[1], [0], [0], [1], [0, 0, 1, 1], [], []>} : vector<96x21xbf16>, vector<21x21xbf16>, vector<96x21xf32> -> vector<96x21xf32>
    %236 = arith.truncf %235 : vector<96x21xf32> to vector<96x21xbf16>
    %cst_127 = arith.constant dense<0.000000e+00> : vector<96x21xf32>
    %237 = tpu.matmul %0, %236, %cst_127 {dimension_numbers = #tpu.dot_dimension_numbers<[1], [0], [0], [1], [0, 0, 1, 1], [], []>} : vector<96x96xbf16>, vector<96x21xbf16>, vector<96x21xf32> -> vector<96x21xf32>
    %238 = arith.addf %237, %5 : vector<96x21xf32>
    %cst_128 = arith.constant 0.000000e+00 : f32
    %239 = vector.broadcast %cst_128 : f32 to vector<96x21xf32>
    %240 = arith.maximumf %238, %239 : vector<96x21xf32>
    %241 = arith.extf %234 : vector<96x21xbf16> to vector<96x21xf32>
    %242 = arith.addf %240, %241 : vector<96x21xf32>
    %243 = arith.truncf %242 : vector<96x21xf32> to vector<96x21xbf16>
    %cst_129 = arith.constant dense<0.000000e+00> : vector<16x21xf32>
    %244 = tpu.matmul %1, %243, %cst_129 {dimension_numbers = #tpu.dot_dimension_numbers<[1], [0], [0], [1], [0, 0, 1, 1], [], []>} : vector<16x96xbf16>, vector<96x21xbf16>, vector<16x21xf32> -> vector<16x21xf32>
    %c304 = arith.constant 304 : index
    %c0_130 = arith.constant 0 : index
    %245 = vector.load %arg15[%c304, %c0_130] : memref<512x21xf32, #tpu.memory_space<vmem>>, vector<16x21xf32>
    tpu.vector_store %arg15[%c304, %c0_130], %244 {strides = array<i32>} : memref<512x21xf32, #tpu.memory_space<vmem>>, vector<16x21xf32>,
    %c1920 = arith.constant 1920 : index
    %c0_131 = arith.constant 0 : index
    %246 = vector.load %arg3[%c1920, %c0_131] : memref<3072x21xbf16, #tpu.memory_space<vmem>>, vector<96x21xbf16>
    %cst_132 = arith.constant dense<0.000000e+00> : vector<96x21xf32>
    %247 = tpu.matmul %246, %2, %cst_132 {dimension_numbers = #tpu.dot_dimension_numbers<[1], [0], [0], [1], [0, 0, 1, 1], [], []>} : vector<96x21xbf16>, vector<21x21xbf16>, vector<96x21xf32> -> vector<96x21xf32>
    %248 = arith.truncf %247 : vector<96x21xf32> to vector<96x21xbf16>
    %cst_133 = arith.constant dense<0.000000e+00> : vector<96x21xf32>
    %249 = tpu.matmul %0, %248, %cst_133 {dimension_numbers = #tpu.dot_dimension_numbers<[1], [0], [0], [1], [0, 0, 1, 1], [], []>} : vector<96x96xbf16>, vector<96x21xbf16>, vector<96x21xf32> -> vector<96x21xf32>
    %250 = arith.addf %249, %5 : vector<96x21xf32>
    %cst_134 = arith.constant 0.000000e+00 : f32
    %251 = vector.broadcast %cst_134 : f32 to vector<96x21xf32>
    %252 = arith.maximumf %250, %251 : vector<96x21xf32>
    %253 = arith.extf %246 : vector<96x21xbf16> to vector<96x21xf32>
    %254 = arith.addf %252, %253 : vector<96x21xf32>
    %255 = arith.truncf %254 : vector<96x21xf32> to vector<96x21xbf16>
    %cst_135 = arith.constant dense<0.000000e+00> : vector<16x21xf32>
    %256 = tpu.matmul %1, %255, %cst_135 {dimension_numbers = #tpu.dot_dimension_numbers<[1], [0], [0], [1], [0, 0, 1, 1], [], []>} : vector<16x96xbf16>, vector<96x21xbf16>, vector<16x21xf32> -> vector<16x21xf32>
    %c320 = arith.constant 320 : index
    %c0_136 = arith.constant 0 : index
    %257 = vector.load %arg15[%c320, %c0_136] : memref<512x21xf32, #tpu.memory_space<vmem>>, vector<16x21xf32>
    tpu.vector_store %arg15[%c320, %c0_136], %256 {strides = array<i32>} : memref<512x21xf32, #tpu.memory_space<vmem>>, vector<16x21xf32>,
    %c2016 = arith.constant 2016 : index
    %c0_137 = arith.constant 0 : index
    %258 = vector.load %arg3[%c2016, %c0_137] : memref<3072x21xbf16, #tpu.memory_space<vmem>>, vector<96x21xbf16>
    %cst_138 = arith.constant dense<0.000000e+00> : vector<96x21xf32>
    %259 = tpu.matmul %258, %2, %cst_138 {dimension_numbers = #tpu.dot_dimension_numbers<[1], [0], [0], [1], [0, 0, 1, 1], [], []>} : vector<96x21xbf16>, vector<21x21xbf16>, vector<96x21xf32> -> vector<96x21xf32>
    %260 = arith.truncf %259 : vector<96x21xf32> to vector<96x21xbf16>
    %cst_139 = arith.constant dense<0.000000e+00> : vector<96x21xf32>
    %261 = tpu.matmul %0, %260, %cst_139 {dimension_numbers = #tpu.dot_dimension_numbers<[1], [0], [0], [1], [0, 0, 1, 1], [], []>} : vector<96x96xbf16>, vector<96x21xbf16>, vector<96x21xf32> -> vector<96x21xf32>
    %262 = arith.addf %261, %5 : vector<96x21xf32>
    %cst_140 = arith.constant 0.000000e+00 : f32
    %263 = vector.broadcast %cst_140 : f32 to vector<96x21xf32>
    %264 = arith.maximumf %262, %263 : vector<96x21xf32>
    %265 = arith.extf %258 : vector<96x21xbf16> to vector<96x21xf32>
    %266 = arith.addf %264, %265 : vector<96x21xf32>
    %267 = arith.truncf %266 : vector<96x21xf32> to vector<96x21xbf16>
    %cst_141 = arith.constant dense<0.000000e+00> : vector<16x21xf32>
    %268 = tpu.matmul %1, %267, %cst_141 {dimension_numbers = #tpu.dot_dimension_numbers<[1], [0], [0], [1], [0, 0, 1, 1], [], []>} : vector<16x96xbf16>, vector<96x21xbf16>, vector<16x21xf32> -> vector<16x21xf32>
    %c336 = arith.constant 336 : index
    %c0_142 = arith.constant 0 : index
    %269 = vector.load %arg15[%c336, %c0_142] : memref<512x21xf32, #tpu.memory_space<vmem>>, vector<16x21xf32>
    tpu.vector_store %arg15[%c336, %c0_142], %268 {strides = array<i32>} : memref<512x21xf32, #tpu.memory_space<vmem>>, vector<16x21xf32>,
    %c2112 = arith.constant 2112 : index
    %c0_143 = arith.constant 0 : index
    %270 = vector.load %arg3[%c2112, %c0_143] : memref<3072x21xbf16, #tpu.memory_space<vmem>>, vector<96x21xbf16>
    %cst_144 = arith.constant dense<0.000000e+00> : vector<96x21xf32>
    %271 = tpu.matmul %270, %2, %cst_144 {dimension_numbers = #tpu.dot_dimension_numbers<[1], [0], [0], [1], [0, 0, 1, 1], [], []>} : vector<96x21xbf16>, vector<21x21xbf16>, vector<96x21xf32> -> vector<96x21xf32>
    %272 = arith.truncf %271 : vector<96x21xf32> to vector<96x21xbf16>
    %cst_145 = arith.constant dense<0.000000e+00> : vector<96x21xf32>
    %273 = tpu.matmul %0, %272, %cst_145 {dimension_numbers = #tpu.dot_dimension_numbers<[1], [0], [0], [1], [0, 0, 1, 1], [], []>} : vector<96x96xbf16>, vector<96x21xbf16>, vector<96x21xf32> -> vector<96x21xf32>
    %274 = arith.addf %273, %5 : vector<96x21xf32>
    %cst_146 = arith.constant 0.000000e+00 : f32
    %275 = vector.broadcast %cst_146 : f32 to vector<96x21xf32>
    %276 = arith.maximumf %274, %275 : vector<96x21xf32>
    %277 = arith.extf %270 : vector<96x21xbf16> to vector<96x21xf32>
    %278 = arith.addf %276, %277 : vector<96x21xf32>
    %279 = arith.truncf %278 : vector<96x21xf32> to vector<96x21xbf16>
    %cst_147 = arith.constant dense<0.000000e+00> : vector<16x21xf32>
    %280 = tpu.matmul %1, %279, %cst_147 {dimension_numbers = #tpu.dot_dimension_numbers<[1], [0], [0], [1], [0, 0, 1, 1], [], []>} : vector<16x96xbf16>, vector<96x21xbf16>, vector<16x21xf32> -> vector<16x21xf32>
    %c352 = arith.constant 352 : index
    %c0_148 = arith.constant 0 : index
    %281 = vector.load %arg15[%c352, %c0_148] : memref<512x21xf32, #tpu.memory_space<vmem>>, vector<16x21xf32>
    tpu.vector_store %arg15[%c352, %c0_148], %280 {strides = array<i32>} : memref<512x21xf32, #tpu.memory_space<vmem>>, vector<16x21xf32>,
    %c2208 = arith.constant 2208 : index
    %c0_149 = arith.constant 0 : index
    %282 = vector.load %arg3[%c2208, %c0_149] : memref<3072x21xbf16, #tpu.memory_space<vmem>>, vector<96x21xbf16>
    %cst_150 = arith.constant dense<0.000000e+00> : vector<96x21xf32>
    %283 = tpu.matmul %282, %2, %cst_150 {dimension_numbers = #tpu.dot_dimension_numbers<[1], [0], [0], [1], [0, 0, 1, 1], [], []>} : vector<96x21xbf16>, vector<21x21xbf16>, vector<96x21xf32> -> vector<96x21xf32>
    %284 = arith.truncf %283 : vector<96x21xf32> to vector<96x21xbf16>
    %cst_151 = arith.constant dense<0.000000e+00> : vector<96x21xf32>
    %285 = tpu.matmul %0, %284, %cst_151 {dimension_numbers = #tpu.dot_dimension_numbers<[1], [0], [0], [1], [0, 0, 1, 1], [], []>} : vector<96x96xbf16>, vector<96x21xbf16>, vector<96x21xf32> -> vector<96x21xf32>
    %286 = arith.addf %285, %5 : vector<96x21xf32>
    %cst_152 = arith.constant 0.000000e+00 : f32
    %287 = vector.broadcast %cst_152 : f32 to vector<96x21xf32>
    %288 = arith.maximumf %286, %287 : vector<96x21xf32>
    %289 = arith.extf %282 : vector<96x21xbf16> to vector<96x21xf32>
    %290 = arith.addf %288, %289 : vector<96x21xf32>
    %291 = arith.truncf %290 : vector<96x21xf32> to vector<96x21xbf16>
    %cst_153 = arith.constant dense<0.000000e+00> : vector<16x21xf32>
    %292 = tpu.matmul %1, %291, %cst_153 {dimension_numbers = #tpu.dot_dimension_numbers<[1], [0], [0], [1], [0, 0, 1, 1], [], []>} : vector<16x96xbf16>, vector<96x21xbf16>, vector<16x21xf32> -> vector<16x21xf32>
    %c368 = arith.constant 368 : index
    %c0_154 = arith.constant 0 : index
    %293 = vector.load %arg15[%c368, %c0_154] : memref<512x21xf32, #tpu.memory_space<vmem>>, vector<16x21xf32>
    tpu.vector_store %arg15[%c368, %c0_154], %292 {strides = array<i32>} : memref<512x21xf32, #tpu.memory_space<vmem>>, vector<16x21xf32>,
    %c2304 = arith.constant 2304 : index
    %c0_155 = arith.constant 0 : index
    %294 = vector.load %arg3[%c2304, %c0_155] : memref<3072x21xbf16, #tpu.memory_space<vmem>>, vector<96x21xbf16>
    %cst_156 = arith.constant dense<0.000000e+00> : vector<96x21xf32>
    %295 = tpu.matmul %294, %2, %cst_156 {dimension_numbers = #tpu.dot_dimension_numbers<[1], [0], [0], [1], [0, 0, 1, 1], [], []>} : vector<96x21xbf16>, vector<21x21xbf16>, vector<96x21xf32> -> vector<96x21xf32>
    %296 = arith.truncf %295 : vector<96x21xf32> to vector<96x21xbf16>
    %cst_157 = arith.constant dense<0.000000e+00> : vector<96x21xf32>
    %297 = tpu.matmul %0, %296, %cst_157 {dimension_numbers = #tpu.dot_dimension_numbers<[1], [0], [0], [1], [0, 0, 1, 1], [], []>} : vector<96x96xbf16>, vector<96x21xbf16>, vector<96x21xf32> -> vector<96x21xf32>
    %298 = arith.addf %297, %5 : vector<96x21xf32>
    %cst_158 = arith.constant 0.000000e+00 : f32
    %299 = vector.broadcast %cst_158 : f32 to vector<96x21xf32>
    %300 = arith.maximumf %298, %299 : vector<96x21xf32>
    %301 = arith.extf %294 : vector<96x21xbf16> to vector<96x21xf32>
    %302 = arith.addf %300, %301 : vector<96x21xf32>
    %303 = arith.truncf %302 : vector<96x21xf32> to vector<96x21xbf16>
    %cst_159 = arith.constant dense<0.000000e+00> : vector<16x21xf32>
    %304 = tpu.matmul %1, %303, %cst_159 {dimension_numbers = #tpu.dot_dimension_numbers<[1], [0], [0], [1], [0, 0, 1, 1], [], []>} : vector<16x96xbf16>, vector<96x21xbf16>, vector<16x21xf32> -> vector<16x21xf32>
    %c384_160 = arith.constant 384 : index
    %c0_161 = arith.constant 0 : index
    %305 = vector.load %arg15[%c384_160, %c0_161] : memref<512x21xf32, #tpu.memory_space<vmem>>, vector<16x21xf32>
    tpu.vector_store %arg15[%c384_160, %c0_161], %304 {strides = array<i32>} : memref<512x21xf32, #tpu.memory_space<vmem>>, vector<16x21xf32>,
    %c2400 = arith.constant 2400 : index
    %c0_162 = arith.constant 0 : index
    %306 = vector.load %arg3[%c2400, %c0_162] : memref<3072x21xbf16, #tpu.memory_space<vmem>>, vector<96x21xbf16>
    %cst_163 = arith.constant dense<0.000000e+00> : vector<96x21xf32>
    %307 = tpu.matmul %306, %2, %cst_163 {dimension_numbers = #tpu.dot_dimension_numbers<[1], [0], [0], [1], [0, 0, 1, 1], [], []>} : vector<96x21xbf16>, vector<21x21xbf16>, vector<96x21xf32> -> vector<96x21xf32>
    %308 = arith.truncf %307 : vector<96x21xf32> to vector<96x21xbf16>
    %cst_164 = arith.constant dense<0.000000e+00> : vector<96x21xf32>
    %309 = tpu.matmul %0, %308, %cst_164 {dimension_numbers = #tpu.dot_dimension_numbers<[1], [0], [0], [1], [0, 0, 1, 1], [], []>} : vector<96x96xbf16>, vector<96x21xbf16>, vector<96x21xf32> -> vector<96x21xf32>
    %310 = arith.addf %309, %5 : vector<96x21xf32>
    %cst_165 = arith.constant 0.000000e+00 : f32
    %311 = vector.broadcast %cst_165 : f32 to vector<96x21xf32>
    %312 = arith.maximumf %310, %311 : vector<96x21xf32>
    %313 = arith.extf %306 : vector<96x21xbf16> to vector<96x21xf32>
    %314 = arith.addf %312, %313 : vector<96x21xf32>
    %315 = arith.truncf %314 : vector<96x21xf32> to vector<96x21xbf16>
    %cst_166 = arith.constant dense<0.000000e+00> : vector<16x21xf32>
    %316 = tpu.matmul %1, %315, %cst_166 {dimension_numbers = #tpu.dot_dimension_numbers<[1], [0], [0], [1], [0, 0, 1, 1], [], []>} : vector<16x96xbf16>, vector<96x21xbf16>, vector<16x21xf32> -> vector<16x21xf32>
    %c400 = arith.constant 400 : index
    %c0_167 = arith.constant 0 : index
    %317 = vector.load %arg15[%c400, %c0_167] : memref<512x21xf32, #tpu.memory_space<vmem>>, vector<16x21xf32>
    tpu.vector_store %arg15[%c400, %c0_167], %316 {strides = array<i32>} : memref<512x21xf32, #tpu.memory_space<vmem>>, vector<16x21xf32>,
    %c2496 = arith.constant 2496 : index
    %c0_168 = arith.constant 0 : index
    %318 = vector.load %arg3[%c2496, %c0_168] : memref<3072x21xbf16, #tpu.memory_space<vmem>>, vector<96x21xbf16>
    %cst_169 = arith.constant dense<0.000000e+00> : vector<96x21xf32>
    %319 = tpu.matmul %318, %2, %cst_169 {dimension_numbers = #tpu.dot_dimension_numbers<[1], [0], [0], [1], [0, 0, 1, 1], [], []>} : vector<96x21xbf16>, vector<21x21xbf16>, vector<96x21xf32> -> vector<96x21xf32>
    %320 = arith.truncf %319 : vector<96x21xf32> to vector<96x21xbf16>
    %cst_170 = arith.constant dense<0.000000e+00> : vector<96x21xf32>
    %321 = tpu.matmul %0, %320, %cst_170 {dimension_numbers = #tpu.dot_dimension_numbers<[1], [0], [0], [1], [0, 0, 1, 1], [], []>} : vector<96x96xbf16>, vector<96x21xbf16>, vector<96x21xf32> -> vector<96x21xf32>
    %322 = arith.addf %321, %5 : vector<96x21xf32>
    %cst_171 = arith.constant 0.000000e+00 : f32
    %323 = vector.broadcast %cst_171 : f32 to vector<96x21xf32>
    %324 = arith.maximumf %322, %323 : vector<96x21xf32>
    %325 = arith.extf %318 : vector<96x21xbf16> to vector<96x21xf32>
    %326 = arith.addf %324, %325 : vector<96x21xf32>
    %327 = arith.truncf %326 : vector<96x21xf32> to vector<96x21xbf16>
    %cst_172 = arith.constant dense<0.000000e+00> : vector<16x21xf32>
    %328 = tpu.matmul %1, %327, %cst_172 {dimension_numbers = #tpu.dot_dimension_numbers<[1], [0], [0], [1], [0, 0, 1, 1], [], []>} : vector<16x96xbf16>, vector<96x21xbf16>, vector<16x21xf32> -> vector<16x21xf32>
    %c416 = arith.constant 416 : index
    %c0_173 = arith.constant 0 : index
    %329 = vector.load %arg15[%c416, %c0_173] : memref<512x21xf32, #tpu.memory_space<vmem>>, vector<16x21xf32>
    tpu.vector_store %arg15[%c416, %c0_173], %328 {strides = array<i32>} : memref<512x21xf32, #tpu.memory_space<vmem>>, vector<16x21xf32>,
    %c2592 = arith.constant 2592 : index
    %c0_174 = arith.constant 0 : index
    %330 = vector.load %arg3[%c2592, %c0_174] : memref<3072x21xbf16, #tpu.memory_space<vmem>>, vector<96x21xbf16>
    %cst_175 = arith.constant dense<0.000000e+00> : vector<96x21xf32>
    %331 = tpu.matmul %330, %2, %cst_175 {dimension_numbers = #tpu.dot_dimension_numbers<[1], [0], [0], [1], [0, 0, 1, 1], [], []>} : vector<96x21xbf16>, vector<21x21xbf16>, vector<96x21xf32> -> vector<96x21xf32>
    %332 = arith.truncf %331 : vector<96x21xf32> to vector<96x21xbf16>
    %cst_176 = arith.constant dense<0.000000e+00> : vector<96x21xf32>
    %333 = tpu.matmul %0, %332, %cst_176 {dimension_numbers = #tpu.dot_dimension_numbers<[1], [0], [0], [1], [0, 0, 1, 1], [], []>} : vector<96x96xbf16>, vector<96x21xbf16>, vector<96x21xf32> -> vector<96x21xf32>
    %334 = arith.addf %333, %5 : vector<96x21xf32>
    %cst_177 = arith.constant 0.000000e+00 : f32
    %335 = vector.broadcast %cst_177 : f32 to vector<96x21xf32>
    %336 = arith.maximumf %334, %335 : vector<96x21xf32>
    %337 = arith.extf %330 : vector<96x21xbf16> to vector<96x21xf32>
    %338 = arith.addf %336, %337 : vector<96x21xf32>
    %339 = arith.truncf %338 : vector<96x21xf32> to vector<96x21xbf16>
    %cst_178 = arith.constant dense<0.000000e+00> : vector<16x21xf32>
    %340 = tpu.matmul %1, %339, %cst_178 {dimension_numbers = #tpu.dot_dimension_numbers<[1], [0], [0], [1], [0, 0, 1, 1], [], []>} : vector<16x96xbf16>, vector<96x21xbf16>, vector<16x21xf32> -> vector<16x21xf32>
    %c432 = arith.constant 432 : index
    %c0_179 = arith.constant 0 : index
    %341 = vector.load %arg15[%c432, %c0_179] : memref<512x21xf32, #tpu.memory_space<vmem>>, vector<16x21xf32>
    tpu.vector_store %arg15[%c432, %c0_179], %340 {strides = array<i32>} : memref<512x21xf32, #tpu.memory_space<vmem>>, vector<16x21xf32>,
    %c2688 = arith.constant 2688 : index
    %c0_180 = arith.constant 0 : index
    %342 = vector.load %arg3[%c2688, %c0_180] : memref<3072x21xbf16, #tpu.memory_space<vmem>>, vector<96x21xbf16>
    %cst_181 = arith.constant dense<0.000000e+00> : vector<96x21xf32>
    %343 = tpu.matmul %342, %2, %cst_181 {dimension_numbers = #tpu.dot_dimension_numbers<[1], [0], [0], [1], [0, 0, 1, 1], [], []>} : vector<96x21xbf16>, vector<21x21xbf16>, vector<96x21xf32> -> vector<96x21xf32>
    %344 = arith.truncf %343 : vector<96x21xf32> to vector<96x21xbf16>
    %cst_182 = arith.constant dense<0.000000e+00> : vector<96x21xf32>
    %345 = tpu.matmul %0, %344, %cst_182 {dimension_numbers = #tpu.dot_dimension_numbers<[1], [0], [0], [1], [0, 0, 1, 1], [], []>} : vector<96x96xbf16>, vector<96x21xbf16>, vector<96x21xf32> -> vector<96x21xf32>
    %346 = arith.addf %345, %5 : vector<96x21xf32>
    %cst_183 = arith.constant 0.000000e+00 : f32
    %347 = vector.broadcast %cst_183 : f32 to vector<96x21xf32>
    %348 = arith.maximumf %346, %347 : vector<96x21xf32>
    %349 = arith.extf %342 : vector<96x21xbf16> to vector<96x21xf32>
    %350 = arith.addf %348, %349 : vector<96x21xf32>
    %351 = arith.truncf %350 : vector<96x21xf32> to vector<96x21xbf16>
    %cst_184 = arith.constant dense<0.000000e+00> : vector<16x21xf32>
    %352 = tpu.matmul %1, %351, %cst_184 {dimension_numbers = #tpu.dot_dimension_numbers<[1], [0], [0], [1], [0, 0, 1, 1], [], []>} : vector<16x96xbf16>, vector<96x21xbf16>, vector<16x21xf32> -> vector<16x21xf32>
    %c448 = arith.constant 448 : index
    %c0_185 = arith.constant 0 : index
    %353 = vector.load %arg15[%c448, %c0_185] : memref<512x21xf32, #tpu.memory_space<vmem>>, vector<16x21xf32>
    tpu.vector_store %arg15[%c448, %c0_185], %352 {strides = array<i32>} : memref<512x21xf32, #tpu.memory_space<vmem>>, vector<16x21xf32>,
    %c2784 = arith.constant 2784 : index
    %c0_186 = arith.constant 0 : index
    %354 = vector.load %arg3[%c2784, %c0_186] : memref<3072x21xbf16, #tpu.memory_space<vmem>>, vector<96x21xbf16>
    %cst_187 = arith.constant dense<0.000000e+00> : vector<96x21xf32>
    %355 = tpu.matmul %354, %2, %cst_187 {dimension_numbers = #tpu.dot_dimension_numbers<[1], [0], [0], [1], [0, 0, 1, 1], [], []>} : vector<96x21xbf16>, vector<21x21xbf16>, vector<96x21xf32> -> vector<96x21xf32>
    %356 = arith.truncf %355 : vector<96x21xf32> to vector<96x21xbf16>
    %cst_188 = arith.constant dense<0.000000e+00> : vector<96x21xf32>
    %357 = tpu.matmul %0, %356, %cst_188 {dimension_numbers = #tpu.dot_dimension_numbers<[1], [0], [0], [1], [0, 0, 1, 1], [], []>} : vector<96x96xbf16>, vector<96x21xbf16>, vector<96x21xf32> -> vector<96x21xf32>
    %358 = arith.addf %357, %5 : vector<96x21xf32>
    %cst_189 = arith.constant 0.000000e+00 : f32
    %359 = vector.broadcast %cst_189 : f32 to vector<96x21xf32>
    %360 = arith.maximumf %358, %359 : vector<96x21xf32>
    %361 = arith.extf %354 : vector<96x21xbf16> to vector<96x21xf32>
    %362 = arith.addf %360, %361 : vector<96x21xf32>
    %363 = arith.truncf %362 : vector<96x21xf32> to vector<96x21xbf16>
    %cst_190 = arith.constant dense<0.000000e+00> : vector<16x21xf32>
    %364 = tpu.matmul %1, %363, %cst_190 {dimension_numbers = #tpu.dot_dimension_numbers<[1], [0], [0], [1], [0, 0, 1, 1], [], []>} : vector<16x96xbf16>, vector<96x21xbf16>, vector<16x21xf32> -> vector<16x21xf32>
    %c464 = arith.constant 464 : index
    %c0_191 = arith.constant 0 : index
    %365 = vector.load %arg15[%c464, %c0_191] : memref<512x21xf32, #tpu.memory_space<vmem>>, vector<16x21xf32>
    tpu.vector_store %arg15[%c464, %c0_191], %364 {strides = array<i32>} : memref<512x21xf32, #tpu.memory_space<vmem>>, vector<16x21xf32>,
    %c2880 = arith.constant 2880 : index
    %c0_192 = arith.constant 0 : index
    %366 = vector.load %arg3[%c2880, %c0_192] : memref<3072x21xbf16, #tpu.memory_space<vmem>>, vector<96x21xbf16>
    %cst_193 = arith.constant dense<0.000000e+00> : vector<96x21xf32>
    %367 = tpu.matmul %366, %2, %cst_193 {dimension_numbers = #tpu.dot_dimension_numbers<[1], [0], [0], [1], [0, 0, 1, 1], [], []>} : vector<96x21xbf16>, vector<21x21xbf16>, vector<96x21xf32> -> vector<96x21xf32>
    %368 = arith.truncf %367 : vector<96x21xf32> to vector<96x21xbf16>
    %cst_194 = arith.constant dense<0.000000e+00> : vector<96x21xf32>
    %369 = tpu.matmul %0, %368, %cst_194 {dimension_numbers = #tpu.dot_dimension_numbers<[1], [0], [0], [1], [0, 0, 1, 1], [], []>} : vector<96x96xbf16>, vector<96x21xbf16>, vector<96x21xf32> -> vector<96x21xf32>
    %370 = arith.addf %369, %5 : vector<96x21xf32>
    %cst_195 = arith.constant 0.000000e+00 : f32
    %371 = vector.broadcast %cst_195 : f32 to vector<96x21xf32>
    %372 = arith.maximumf %370, %371 : vector<96x21xf32>
    %373 = arith.extf %366 : vector<96x21xbf16> to vector<96x21xf32>
    %374 = arith.addf %372, %373 : vector<96x21xf32>
    %375 = arith.truncf %374 : vector<96x21xf32> to vector<96x21xbf16>
    %cst_196 = arith.constant dense<0.000000e+00> : vector<16x21xf32>
    %376 = tpu.matmul %1, %375, %cst_196 {dimension_numbers = #tpu.dot_dimension_numbers<[1], [0], [0], [1], [0, 0, 1, 1], [], []>} : vector<16x96xbf16>, vector<96x21xbf16>, vector<16x21xf32> -> vector<16x21xf32>
    %c480_197 = arith.constant 480 : index
    %c0_198 = arith.constant 0 : index
    %377 = vector.load %arg15[%c480_197, %c0_198] : memref<512x21xf32, #tpu.memory_space<vmem>>, vector<16x21xf32>
    tpu.vector_store %arg15[%c480_197, %c0_198], %376 {strides = array<i32>} : memref<512x21xf32, #tpu.memory_space<vmem>>, vector<16x21xf32>,
    %c2976 = arith.constant 2976 : index
    %c0_199 = arith.constant 0 : index
    %378 = vector.load %arg3[%c2976, %c0_199] : memref<3072x21xbf16, #tpu.memory_space<vmem>>, vector<96x21xbf16>
    %cst_200 = arith.constant dense<0.000000e+00> : vector<96x21xf32>
    %379 = tpu.matmul %378, %2, %cst_200 {dimension_numbers = #tpu.dot_dimension_numbers<[1], [0], [0], [1], [0, 0, 1, 1], [], []>} : vector<96x21xbf16>, vector<21x21xbf16>, vector<96x21xf32> -> vector<96x21xf32>
    %380 = arith.truncf %379 : vector<96x21xf32> to vector<96x21xbf16>
    %cst_201 = arith.constant dense<0.000000e+00> : vector<96x21xf32>
    %381 = tpu.matmul %0, %380, %cst_201 {dimension_numbers = #tpu.dot_dimension_numbers<[1], [0], [0], [1], [0, 0, 1, 1], [], []>} : vector<96x96xbf16>, vector<96x21xbf16>, vector<96x21xf32> -> vector<96x21xf32>
    %382 = arith.addf %381, %5 : vector<96x21xf32>
    %cst_202 = arith.constant 0.000000e+00 : f32
    %383 = vector.broadcast %cst_202 : f32 to vector<96x21xf32>
    %384 = arith.maximumf %382, %383 : vector<96x21xf32>
    %385 = arith.extf %378 : vector<96x21xbf16> to vector<96x21xf32>
    %386 = arith.addf %384, %385 : vector<96x21xf32>
    %387 = arith.truncf %386 : vector<96x21xf32> to vector<96x21xbf16>
    %cst_203 = arith.constant dense<0.000000e+00> : vector<16x21xf32>
    %388 = tpu.matmul %1, %387, %cst_203 {dimension_numbers = #tpu.dot_dimension_numbers<[1], [0], [0], [1], [0, 0, 1, 1], [], []>} : vector<16x96xbf16>, vector<96x21xbf16>, vector<16x21xf32> -> vector<16x21xf32>
    %c496 = arith.constant 496 : index
    %c0_204 = arith.constant 0 : index
    %389 = vector.load %arg15[%c496, %c0_204] : memref<512x21xf32, #tpu.memory_space<vmem>>, vector<16x21xf32>
    tpu.vector_store %arg15[%c496, %c0_204], %388 {strides = array<i32>} : memref<512x21xf32, #tpu.memory_space<vmem>>, vector<16x21xf32>,
    %c0_205 = arith.constant 0 : index
    %c0_206 = arith.constant 0 : index
    %390 = vector.load %arg15[%c0_205, %c0_206] : memref<512x21xf32, #tpu.memory_space<vmem>>, vector<512x21xf32>
    %391 = arith.truncf %390 : vector<512x21xf32> to vector<512x21xbf16>
    %c0_207 = arith.constant 0 : index
    %c0_208 = arith.constant 0 : index
    %392 = vector.load %arg4[%c0_207, %c0_208] : memref<512x6xbf16, #tpu.memory_space<vmem>>, vector<512x6xbf16>
    %c0_209 = arith.constant 0 : index
    %c0_210 = arith.constant 0 : index
    %393 = vector.load %arg7[%c0_209, %c0_210] : memref<21x32xbf16, #tpu.memory_space<vmem>>, vector<21x32xbf16>
    %cst_211 = arith.constant dense<0.000000e+00> : vector<512x32xf32>
    %394 = tpu.matmul %391, %393, %cst_211 {dimension_numbers = #tpu.dot_dimension_numbers<[1], [0], [0], [1], [0, 0, 1, 1], [], []>} : vector<512x21xbf16>, vector<21x32xbf16>, vector<512x32xf32> -> vector<512x32xf32>
    %c0_212 = arith.constant 0 : index
    %c0_213 = arith.constant 0 : index
    %395 = vector.load %arg8[%c0_212, %c0_213] : memref<6x32xbf16, #tpu.memory_space<vmem>>, vector<6x32xbf16>
    %cst_214 = arith.constant dense<0.000000e+00> : vector<512x32xf32>
    %396 = tpu.matmul %392, %395, %cst_214 {dimension_numbers = #tpu.dot_dimension_numbers<[1], [0], [0], [1], [0, 0, 1, 1], [], []>} : vector<512x6xbf16>, vector<6x32xbf16>, vector<512x32xf32> -> vector<512x32xf32>
    %397 = arith.addf %394, %396 : vector<512x32xf32>
    %c0_215 = arith.constant 0 : index
    %c0_216 = arith.constant 0 : index
    %398 = vector.load %arg9[%c0_215, %c0_216] : memref<1x32xf32, #tpu.memory_space<vmem>>, vector<1x32xf32>
    %399 = vector.broadcast %398 : vector<1x32xf32> to vector<512x32xf32>
    %400 = arith.addf %397, %399 : vector<512x32xf32>
    %cst_217 = arith.constant 0.000000e+00 : f32
    %401 = vector.broadcast %cst_217 : f32 to vector<512x32xf32>
    %402 = arith.maximumf %400, %401 : vector<512x32xf32>
    %403 = arith.truncf %402 : vector<512x32xf32> to vector<512x32xbf16>
    %c0_218 = arith.constant 0 : index
    %c0_219 = arith.constant 0 : index
    %404 = vector.load %arg10[%c0_218, %c0_219] : memref<32x32xbf16, #tpu.memory_space<vmem>>, vector<32x32xbf16>
    %cst_220 = arith.constant dense<0.000000e+00> : vector<512x32xf32>
    %405 = tpu.matmul %403, %404, %cst_220 {dimension_numbers = #tpu.dot_dimension_numbers<[1], [0], [0], [1], [0, 0, 1, 1], [], []>} : vector<512x32xbf16>, vector<32x32xbf16>, vector<512x32xf32> -> vector<512x32xf32>
    %c0_221 = arith.constant 0 : index
    %c0_222 = arith.constant 0 : index
    %406 = vector.load %arg11[%c0_221, %c0_222] : memref<1x32xf32, #tpu.memory_space<vmem>>, vector<1x32xf32>
    %407 = vector.broadcast %406 : vector<1x32xf32> to vector<512x32xf32>
    %408 = arith.addf %405, %407 : vector<512x32xf32>
    %cst_223 = arith.constant 0.000000e+00 : f32
    %409 = vector.broadcast %cst_223 : f32 to vector<512x32xf32>
    %410 = arith.maximumf %408, %409 : vector<512x32xf32>
    %411 = arith.truncf %410 : vector<512x32xf32> to vector<512x32xbf16>
    %c0_224 = arith.constant 0 : index
    %c0_225 = arith.constant 0 : index
    %412 = vector.load %arg12[%c0_224, %c0_225] : memref<32x1xbf16, #tpu.memory_space<vmem>>, vector<32x1xbf16>
    %cst_226 = arith.constant dense<0.000000e+00> : vector<512x1xf32>
    %413 = tpu.matmul %411, %412, %cst_226 {dimension_numbers = #tpu.dot_dimension_numbers<[1], [0], [0], [1], [0, 0, 1, 1], [], []>} : vector<512x32xbf16>, vector<32x1xbf16>, vector<512x1xf32> -> vector<512x1xf32>
    %c0_227 = arith.constant 0 : index
    %c0_228 = arith.constant 0 : index
    %414 = vector.load %arg13[%c0_227, %c0_228] : memref<1x1xf32, #tpu.memory_space<vmem>>, vector<1x1xf32>
    %415 = vector.broadcast %414 : vector<1x1xf32> to vector<512x1xf32>
    %416 = arith.addf %413, %415 : vector<512x1xf32>
    %c0_229 = arith.constant 0 : index
    %c0_230 = arith.constant 0 : index
    %417 = vector.load %arg14[%c0_229, %c0_230] : memref<512x1xf32, #tpu.memory_space<vmem>>, vector<512x1xf32>
    tpu.vector_store %arg14[%c0_229, %c0_230], %416 {strides = array<i32>} : memref<512x1xf32, #tpu.memory_space<vmem>>, vector<512x1xf32>,
    return
  }
  func.func @transform_0(%arg0: i32) -> (i32, i32) {
    %c0_i32 = arith.constant 0 : i32
    %c0_i32_0 = arith.constant 0 : i32
    %c0_i32_1 = arith.constant 0 : i32
    return %c0_i32, %c0_i32_0 : i32, i32
  }
  func.func @transform_1(%arg0: i32) -> (i32, i32) {
    %c0_i32 = arith.constant 0 : i32
    %c0_i32_0 = arith.constant 0 : i32
    %c0_i32_1 = arith.constant 0 : i32
    return %c0_i32, %c0_i32_0 : i32, i32
  }
  func.func @transform_2(%arg0: i32) -> (i32, i32) {
    %c0_i32 = arith.constant 0 : i32
    %c0_i32_0 = arith.constant 0 : i32
    return %arg0, %c0_i32 : i32, i32
  }
  func.func @transform_3(%arg0: i32) -> (i32, i32) {
    %c0_i32 = arith.constant 0 : i32
    %c0_i32_0 = arith.constant 0 : i32
    return %arg0, %c0_i32 : i32, i32
  }
  func.func @transform_4(%arg0: i32) -> (i32, i32) {
    %c0_i32 = arith.constant 0 : i32
    %c0_i32_0 = arith.constant 0 : i32
    %c0_i32_1 = arith.constant 0 : i32
    return %c0_i32, %c0_i32_0 : i32, i32
  }
  func.func @transform_5(%arg0: i32) -> (i32, i32) {
    %c0_i32 = arith.constant 0 : i32
    %c0_i32_0 = arith.constant 0 : i32
    %c0_i32_1 = arith.constant 0 : i32
    return %c0_i32, %c0_i32_0 : i32, i32
  }
  func.func @transform_6(%arg0: i32) -> (i32, i32) {
    %c0_i32 = arith.constant 0 : i32
    %c0_i32_0 = arith.constant 0 : i32
    %c0_i32_1 = arith.constant 0 : i32
    return %c0_i32, %c0_i32_0 : i32, i32
  }
  func.func @transform_7(%arg0: i32) -> (i32, i32) {
    %c0_i32 = arith.constant 0 : i32
    %c0_i32_0 = arith.constant 0 : i32
    %c0_i32_1 = arith.constant 0 : i32
    return %c0_i32, %c0_i32_0 : i32, i32
  }
  func.func @transform_8(%arg0: i32) -> (i32, i32) {
    %c0_i32 = arith.constant 0 : i32
    %c0_i32_0 = arith.constant 0 : i32
    %c0_i32_1 = arith.constant 0 : i32
    return %c0_i32, %c0_i32_0 : i32, i32
  }
  func.func @transform_9(%arg0: i32) -> (i32, i32) {
    %c0_i32 = arith.constant 0 : i32
    %c0_i32_0 = arith.constant 0 : i32
    %c0_i32_1 = arith.constant 0 : i32
    return %c0_i32, %c0_i32_0 : i32, i32
  }
  func.func @transform_10(%arg0: i32) -> (i32, i32) {
    %c0_i32 = arith.constant 0 : i32
    %c0_i32_0 = arith.constant 0 : i32
    %c0_i32_1 = arith.constant 0 : i32
    return %c0_i32, %c0_i32_0 : i32, i32
  }
  func.func @transform_11(%arg0: i32) -> (i32, i32) {
    %c0_i32 = arith.constant 0 : i32
    %c0_i32_0 = arith.constant 0 : i32
    %c0_i32_1 = arith.constant 0 : i32
    return %c0_i32, %c0_i32_0 : i32, i32
  }
  func.func @transform_12(%arg0: i32) -> (i32, i32) {
    %c0_i32 = arith.constant 0 : i32
    %c0_i32_0 = arith.constant 0 : i32
    %c0_i32_1 = arith.constant 0 : i32
    return %c0_i32, %c0_i32_0 : i32, i32
  }
  func.func @transform_13(%arg0: i32) -> (i32, i32) {
    %c0_i32 = arith.constant 0 : i32
    %c0_i32_0 = arith.constant 0 : i32
    return %arg0, %c0_i32 : i32, i32
  }
}

</mosaic_0001>

<bundles_post_ra>
// kernel: gnn_critic2_forward_batched.1
= control target key start
LH: loop header
LB: loop body
LE: loop exit
PB: predicated region body
PF: predicated region fallthrough
CT: control target
= control target key end

     0   :  { %s17420_s27 = smov 0   ;;  %s20949_s0 = inlined_call_operand.vmem [shape: bf16[96,96], index: 0, kind: input, shape index: {}]   ;;  %s20950_s1 = inlined_call_operand.vmem [shape: bf16[16,96], index: 1, kind: input, shape index: {}]   ;;  %s20951_s2 = inlined_call_operand.vmem [shape: bf16[6144,21], index: 2, kind: input, shape index: {}]   ;;  %s20952_s3 = inlined_call_operand.vmem [shape: bf16[1024,6], index: 3, kind: input, shape index: {}]   ;;  %s20953_s4 = inlined_call_operand.vmem [shape: bf16[21,21], index: 4, kind: input, shape index: {}]   ;;  %s20954_s5 = inlined_call_operand.vmem [shape: f32[1,21], index: 5, kind: input, shape index: {}]   ;;  %s20955_s6 = inlined_call_operand.vmem [shape: bf16[21,32], index: 6, kind: input, shape index: {}]   ;;  %s20956_s7 = inlined_call_operand.vmem [shape: bf16[6,32], index: 7, kind: input, shape index: {}]   ;;  %s20957_s8 = inlined_call_operand.vmem [shape: f32[1,32], index: 8, kind: input, shape index: {}]   ;;  %s20958_s9 = inlined_call_operand.vmem [shape: bf16[32,32], index: 9, kind: input, shape index: {}]   ;;  %s20959_s10 = inlined_call_operand.vmem [shape: f32[1,32], index: 10, kind: input, shape index: {}]   ;;  %s20960_s11 = inlined_call_operand.vmem [shape: bf16[32,1], index: 11, kind: input, shape index: {}]   ;;  %s20961_s12 = inlined_call_operand.<no memory space> [shape: f32[1,1], index: 12, kind: input, shape index: {}]   ;;  %s20962_s13 = inlined_call_operand.vmem [shape: f32[1024,1], index: 13, kind: output, shape index: {}]  }
   0x1   :  { %v18_v0 = vstv %s20961_s12 }
   0x2   :  { %19 = vst [vmem:[#allocation3] sm:$0x1] %v18_v0 }
   0x3 LB: > { %s12906_s28 = sadd.s32 4294967295, %s17342_s27   ;;  %p12910_p0 = scmp.ge.s32.totalorder %s17342_s27, 1  ;;  %s17342_s27 = sphi %s17420_s27, %s25_s27  }
   0x4   : > { %p401_p1 = scmp.lt.s32.totalorder %s17342_s27, 3 }
   0x6   : > { %p402_p2 = pnand %p12910_p0, %p401_p1 }
   0x7   : > { %v17431_v1 = vld [vmem:[%s20953_s4] sm:$0xff] (!%p402_p2)   ;;  %vm563_vm0 = vcmask (!%p402_p2), 1041408   ;;  %v16843_v2 = vld [vmem:[%s20953_s4 + $0x8] ss:$0 sps:$4 sm:$0x77] (!%p402_p2)   ;;  %vm564_vm1 = vcmask (!%p402_p2), 1042432  }
   0x8   : > { %405 = sbr.rel (%p402_p2) target bundleno = 14520 (0x38b8), region = 72  ;;  %14704 = vmatprep.subr.bf16.mxu0 (!%p402_p2), %v17431_v1  ;;  %v17344_v3 = vmov (!%p402_p2), 65535   ;;  %vm544_vm2 = vcmask (!%p402_p2), 171008   ;;  %v17486_v13 = vld [vmem:[%s20949_s0] sm:$0xff] (!%p402_p2)   ;;  %vm687_vm3 = vcmask (!%p402_p2), 785408   ;;  %v17493_v32 = vld [vmem:[%s20949_s0 + $0x8] sm:$0xff] (!%p402_p2)  }
   0x9   : > { %s450_s15 = smul.u32 (!%p402_p2), 384, %s12906_s28  ;;  %14705 = vmatpush3.bf16.msra.mxu0 (!%p402_p2), %v17431_v1  ;;  %v565_v4 = vsel (!%p402_p2), %vm563_vm0, 4294967295, %v17344_v3  ;;  %14732 = vmatprep.mubr.msk.bf16.mxu1 (!%p402_p2), %vm687_vm3, %v17486_v13  ;;  %v17498_v33 = vld [vmem:[%s20949_s0 + $0x10] sm:$0xff] (!%p402_p2)   ;;  %v17507_v34 = vld [vmem:[%s20949_s0 + $0x18] sm:$0xff] (!%p402_p2)   ;;  %v17512_v35 = vld [vmem:[%s20949_s0 + $0x20] sm:$0xff] (!%p402_p2)   ;;  %v17345_v37 = vmov (!%p402_p2), 0.0  }
   0xa   : > { %v17441_v5 = vsel (!%p402_p2), %vm564_vm1, %v565_v4, 0  ;;  %v17521_v36 = vld [vmem:[%s20949_s0 + $0x28] sm:$0xff] (!%p402_p2)   ;;  %vm17346_vm4 = vmmov (!%p402_p2), 0   ;;  %v17533_v38 = vld [vmem:[%s20954_s5] ss:$0 sm:$0xff] (!%p402_p2)  ;;  %vm10907_vm5 = vcmask (!%p402_p2), 48128  }
   0xb   : > { %p451_p3 = scmp.lt.s32.totalorder (!%p402_p2), %s450_s15, 767  ;;  %v17444_v6 = vand.u32 (!%p402_p2), %v16843_v2, %v17441_v5  ;;  %vm11883_vm6 = vcmask (!%p402_p2), 261120   ;;  %vm12773_vm7 = vcmask (!%p402_p2), 7168  }
   0xd   : > { %14706 = vmatprep.subr.bf16.mxu0 (!%p402_p2), %v17444_v6 }
   0xe   : > { %14707 = vmatpush3.bf16.msra.mxu0 (!%p402_p2), %v17444_v6 }
   0xf   : > { %s20964_s15 = smov (!%p451_p3, %s450_s15), 767  ;;  %14744 = vmatprep.subr.bf16.mxu0 %v17345_v37 }
  0x10   : > { %s12911_s16 = sshll.u32 %s20964_s15, 2 }
  0x11   : > { %s17451_s19 = scalar_lea.vmem %s20951_s2, %s12911_s16 }
  0x12   : > { %v17454_v7 = vld [vmem:[%s17451_s19] sm:$0xff]   ;;  %v17457_v8 = vld [vmem:[%s17451_s19 + $0x8] sm:$0xff]   ;;  %v17460_v9 = vld [vmem:[%s17451_s19 + $0x10] sm:$0xff]  }
  0x13   : > { %14708 = vmatprep.mubr.msk.bf16.mxu0 %vm544_vm2, %v17454_v7  ;;  %v17469_v10 = vld [vmem:[%s17451_s19 + $0x18] sm:$0xff]   ;;  %v17472_v11 = vld [vmem:[%s17451_s19 + $0x20] sm:$0xff]   ;;  %v17479_v12 = vld [vmem:[%s17451_s19 + $0x28] sm:$0xff]   ;;  %v799_v42 = vunpack.c.l.bf16 %v17454_v7  ;;  %v801_v46 = vunpack.c.l.bf16 %v17457_v8  ;;  %v802_v48 = vunpack.c.h.bf16 %v17457_v8  ;;  %v800_v50 = vunpack.c.h.bf16 %v17454_v7 }
  0x14   : > { %14709 = vmatmul.mubr.msk.bf16.vlgmr.msra.gmra.mrb[0].mxu0 %vm544_vm2, %v17457_v8  ;;  %v805_v4 = vunpack.c.l.bf16 %v17469_v10  ;;  %v806_v8 = vunpack.c.h.bf16 %v17469_v10 }
  0x15   : > { %14712 = vmatprep.mubr.msk.bf16.mxu0 %vm544_vm2, %v17460_v9 }
  0x1c   : > { %14713 = vmatmul.mubr.msk.bf16.gmra.mrb[4].mxu0 %vm544_vm2, %v17469_v10 }
  0x1d   : > { %14716 = vmatprep.mubr.msk.bf16.mxu0 %vm544_vm2, %v17472_v11 }
  0x24   : > { %14717 = vmatmul.mubr.msk.bf16.gmra.mrb[8].mxu0 %vm544_vm2, %v17479_v12 }
  0x25   : > { %14756 = vmatprep.mubr.msk.bf16.mxu0 %vm17346_vm4, %v17345_v37 }
  0xe7   : > { %v14710_v14 = vpop.f32.mrb[0].mxu0 }
  0xe8   : > { %v604_v15 = vpop.f32.mrb[1].mxu0 }
  0xe9   : > { %v14711_v16 = vpop.f32.mrb[2].mxu0 }
  0xea   : > { %v652_v17 = vpack.c.bf16 %v14711_v16, %v14710_v14  ;;  %v607_v18 = vpop.f32.mrb[3].mxu0  ;;  %v803_v16 = vunpack.c.l.bf16 %v17460_v9 }
  0xeb   : > { %v651_v19 = vpack.c.bf16 %v607_v18, %v604_v15  ;;  %v804_v18 = vunpack.c.h.bf16 %v17460_v9 }
  0xed   : > { %14720 = vmatprep.subr.bf16.mxu1 %v651_v19 }
  0xee   : > { %14721 = vmatpush3.bf16.msra.mxu1 %v651_v19 }
  0xef   : > { %v14714_v20 = vpop.f32.mrb[4].mxu0  ;;  %14722 = vmatprep.subr.bf16.mxu1 %v652_v17 }
  0xf0   : > { %v620_v21 = vpop.f32.mrb[5].mxu0 }
  0xf1   : > { %v14715_v22 = vpop.f32.mrb[6].mxu0 }
  0xf2   : > { %v654_v23 = vpack.c.bf16 %v14715_v22, %v14714_v20  ;;  %v623_v24 = vpop.f32.mrb[7].mxu0  ;;  %14723 = vmatpush3.bf16.msra.mxu1 %v652_v17 }
  0xf3   : > { %v653_v25 = vpack.c.bf16 %v623_v24, %v620_v21 }
  0xf5   : > { %14724 = vmatprep.subr.bf16.mxu1 %v653_v25 }
  0xf6   : > { %14725 = vmatpush3.bf16.msra.mxu1 %v653_v25 }
  0xf7   : > { %v14718_v26 = vpop.f32.mrb[8].mxu0  ;;  %14726 = vmatprep.subr.bf16.mxu1 %v654_v23 }
  0xf8   : > { %v636_v27 = vpop.f32.mrb[9].mxu0 }
  0xf9   : > { %v14719_v28 = vpop.f32.mrb[10].mxu0 }
  0xfa   : > { %v656_v29 = vpack.c.bf16 %v14719_v28, %v14718_v26  ;;  %v639_v30 = vpop.f32.mrb[11].mxu0  ;;  %14727 = vmatpush3.bf16.msra.mxu1 %v654_v23 }
  0xfb   : > { %v655_v31 = vpack.c.bf16 %v639_v30, %v636_v27 }
  0xfd   : > { %14728 = vmatprep.subr.bf16.mxu1 %v655_v31 }
  0xfe   : > { %14729 = vmatpush3.bf16.msra.mxu1 %v655_v31  ;;  %v809_v31 = vunpack.c.l.bf16 %v17479_v12 }
  0xff   : > { %14730 = vmatprep.subr.bf16.mxu1 %v656_v29 }
 0x102   : > { %14731 = vmatpush3.bf16.msra.mxu1 %v656_v29 }
 0x105   : > { %14733 = vmatmul.mubr.msk.bf16.vlgmr.msra.gmra.mrb[0].mxu1 %vm687_vm3, %v17493_v32 }
 0x106   : > { %14736 = vmatprep.mubr.msk.bf16.mxu1 %vm687_vm3, %v17498_v33 }
 0x10d   : > { %14737 = vmatmul.mubr.msk.bf16.gmra.mrb[4].mxu1 %vm687_vm3, %v17507_v34 }
 0x10e   : > { %14740 = vmatprep.mubr.msk.bf16.mxu1 %vm687_vm3, %v17512_v35 }
 0x115   : > { %14741 = vmatmul.mubr.msk.bf16.gmra.mrb[8].mxu1 %vm687_vm3, %v17521_v36 }
 0x116   : > { %14788 = vmatprep.mubr.msk.bf16.mxu1 %vm687_vm3, %v17486_v13 }
 0x1d8   : > { %v14734_v39 = vpop.f32.mrb[0].mxu1 }
 0x1d9   : > { %v749_v40 = vadd.f32 %v14734_v39, %v17533_v38  ;;  %v740_v41 = vpop.f32.mrb[1].mxu1 }
 0x1da   : > { %v741_v43 = vadd.f32 %v17533_v38, %v740_v41  ;;  %v14735_v44 = vpop.f32.mrb[2].mxu1 }
 0x1db   : > { %v789_v45 = vmax.f32 %v749_v40, 0.0  ;;  %v752_v47 = vadd.f32 %v14735_v44, %v17533_v38  ;;  %v743_v49 = vpop.f32.mrb[3].mxu1  ;;  %v810_v40 = vunpack.c.h.bf16 %v17479_v12 }
 0x1dc   : > { %v787_v51 = vmax.f32 %v741_v43, 0.0  ;;  %v744_v52 = vadd.f32 %v17533_v38, %v743_v49  ;;  %v807_v43 = vunpack.c.l.bf16 %v17472_v11 }
 0x1dd   : > { %v790_v53 = vmax.f32 %v752_v47, 0.0  ;;  %v813_v56 = vadd.f32 %v801_v46, %v789_v45  ;;  %v808_v45 = vunpack.c.h.bf16 %v17472_v11  ;;  %v17565_v11 = vld [vmem:[%s17451_s19 + $0x30] sm:$0xff]  }
 0x1de   : > { %v811_v54 = vadd.f32 %v799_v42, %v787_v51  ;;  %v788_v55 = vmax.f32 %v744_v52, 0.0 }
 0x1df   : > { %v814_v57 = vadd.f32 %v802_v48, %v790_v53  ;;  %v17570_v53 = vld [vmem:[%s20950_s1] sm:$0xff]  }
 0x1e0   : > { %v812_v58 = vadd.f32 %v800_v50, %v788_v55  ;;  %v14738_v59 = vpop.f32.mrb[4].mxu1  ;;  %v17583_v55 = vld [vmem:[%s17451_s19 + $0x40] sm:$0xff]  }
 0x1e1   : > { %v765_v60 = vadd.f32 %v14738_v59, %v17533_v38  ;;  %v756_v61 = vpop.f32.mrb[5].mxu1  ;;  %v824_v62 = vpack.c.bf16 %v814_v57, %v813_v56  ;;  %v17592_v56 = vld [vmem:[%s17451_s19 + $0x48] sm:$0xff]   ;;  %v17595_v57 = vld [vmem:[%s17451_s19 + $0x50] sm:$0xff]  }
 0x1e2   : > { %v757_v63 = vadd.f32 %v17533_v38, %v756_v61  ;;  %v14739_v0 = vpop.f32.mrb[6].mxu1  ;;  %v823_v2 = vpack.c.bf16 %v812_v58, %v811_v54  ;;  %v17579_v54 = vld [vmem:[%s17451_s19 + $0x38] sm:$0xff]  }
 0x1e3   : > { %v793_v3 = vmax.f32 %v765_v60, 0.0  ;;  %v768_v7 = vadd.f32 %v14739_v0, %v17533_v38  ;;  %v759_v14 = vpop.f32.mrb[7].mxu1  ;;  %v17602_v58 = vld [vmem:[%s17451_s19 + $0x58] sm:$0xff]  }
 0x1e4   : > { %v791_v15 = vmax.f32 %v757_v63, 0.0  ;;  %v760_v17 = vadd.f32 %v17533_v38, %v759_v14  ;;  %14745 = vmatpush3.bf16.msra.mxu0 %v823_v2 }
 0x1e5   : > { %v794_v19 = vmax.f32 %v768_v7, 0.0  ;;  %14746 = vmatprep.subr.bf16.mxu0 %v17345_v37  ;;  %v817_v21 = vadd.f32 %v805_v4, %v793_v3 }
 0x1e6   : > { %v792_v20 = vmax.f32 %v760_v17, 0.0  ;;  %v815_v23 = vadd.f32 %v803_v16, %v791_v15 }
 0x1e7   : > { %v818_v22 = vadd.f32 %v806_v8, %v794_v19 }
 0x1e8   : > { %v816_v24 = vadd.f32 %v804_v18, %v792_v20  ;;  %v14742_v25 = vpop.f32.mrb[8].mxu1  ;;  %14747 = vmatpush3.bf16.msra.mxu0 %v824_v62 }
 0x1e9   : > { %v781_v10 = vadd.f32 %v14742_v25, %v17533_v38  ;;  %v772_v26 = vpop.f32.mrb[9].mxu1  ;;  %14748 = vmatprep.subr.bf16.mxu0 %v17345_v37  ;;  %v826_v27 = vpack.c.bf16 %v818_v22, %v817_v21 }
 0x1ea   : > { %v773_v28 = vadd.f32 %v17533_v38, %v772_v26  ;;  %v14743_v9 = vpop.f32.mrb[10].mxu1  ;;  %v825_v29 = vpack.c.bf16 %v816_v24, %v815_v23 }
 0x1eb   : > { %v797_v30 = vmax.f32 %v781_v10, 0.0  ;;  %v784_v39 = vadd.f32 %v14743_v9, %v17533_v38  ;;  %v775_v41 = vpop.f32.mrb[11].mxu1 }
 0x1ec   : > { %v795_v42 = vmax.f32 %v773_v28, 0.0  ;;  %v776_v44 = vadd.f32 %v17533_v38, %v775_v41  ;;  %14749 = vmatpush3.bf16.msra.mxu0 %v825_v29  ;;  %v1122_v29 = vunpack.c.l.bf16 %v17579_v54  ;;  %v1120_v41 = vunpack.c.l.bf16 %v17565_v11 }
 0x1ed   : > { %v798_v46 = vmax.f32 %v784_v39, 0.0  ;;  %14750 = vmatprep.subr.bf16.mxu0 %v17345_v37  ;;  %v821_v48 = vadd.f32 %v809_v31, %v797_v30  ;;  %v1123_v31 = vunpack.c.h.bf16 %v17579_v54 }
 0x1ee   : > { %v796_v47 = vmax.f32 %v776_v44, 0.0  ;;  %v819_v50 = vadd.f32 %v807_v43, %v795_v42  ;;  %v1121_v43 = vunpack.c.h.bf16 %v17565_v11 }
 0x1ef   : > { %v822_v49 = vadd.f32 %v810_v40, %v798_v46 }
 0x1f0   : > { %v820_v51 = vadd.f32 %v808_v45, %v796_v47  ;;  %14751 = vmatpush3.bf16.msra.mxu0 %v826_v27 }
 0x1f1   : > { %14752 = vmatprep.subr.bf16.mxu0 %v17345_v37  ;;  %v828_v12 = vpack.c.bf16 %v822_v49, %v821_v48 }
 0x1f2   : > { %v827_v52 = vpack.c.bf16 %v820_v51, %v819_v50 }
 0x1f4   : > { %14753 = vmatpush3.bf16.msra.mxu0 %v827_v52 }
 0x1f5   : > { %14754 = vmatprep.subr.bf16.mxu0 %v17345_v37 }
 0x1f8   : > { %14755 = vmatpush3.bf16.msra.mxu0 %v828_v12 }
 0x1f9   : > { %14760 = vmatprep.subr.bf16.mxu0 %v17431_v1 }
 0x1fb   : > { %14757 = vmatmul.mubr.msk.bf16.vlgmr.msra.gmra.mrb[12].mxu0 %vm687_vm3, %v17570_v53 }
 0x1fc   : > { %14761 = vmatpush3.bf16.msra.mxu0 %v17431_v1  ;;  %14764 = vmatprep.mubr.msk.bf16.mxu0 %vm544_vm2, %v17565_v11 }
 0x1fd   : > { %14762 = vmatprep.subr.bf16.mxu0 %v17444_v6 }
 0x200   : > { %14763 = vmatpush3.bf16.msra.mxu0 %v17444_v6 }
 0x201   : > { %14800 = vmatprep.subr.bf16.mxu0 %v17345_v37 }
 0x203   : > { %14765 = vmatmul.mubr.msk.bf16.vlgmr.msra.gmra.mrb[16].mxu0 %vm544_vm2, %v17579_v54 }
 0x204   : > { %14768 = vmatprep.mubr.msk.bf16.mxu0 %vm544_vm2, %v17583_v55 }
 0x20b   : > { %14769 = vmatmul.mubr.msk.bf16.gmra.mrb[20].mxu0 %vm544_vm2, %v17592_v56 }
 0x20c   : > { %14772 = vmatprep.mubr.msk.bf16.mxu0 %vm544_vm2, %v17595_v57 }
 0x213   : > { %14773 = vmatmul.mubr.msk.bf16.gmra.mrb[24].mxu0 %vm544_vm2, %v17602_v58 }
 0x214   : > { %14812 = vmatprep.mubr.msk.bf16.mxu0 %vm17346_vm4, %v17345_v37 }
 0x2ce   : > { %v871_v59 = vpop.f32.mrb[12].mxu0 }
 0x2cf   : > { %878 = vst.msk [vmem:[#allocation2] sm:$0xff] %vm544_vm2, %v871_v59  ;;  %v14758_v60 = vpop.f32.mrb[13].mxu0 }
 0x2d0   : > { %v874_v61 = vpop.f32.mrb[14].mxu0 }
 0x2d1   : > { %879 = vst.msk [vmem:[#allocation2 + $0x8] sm:$0xff] %vm544_vm2, %v874_v61  ;;  %v14759_v62 = vpop.f32.mrb[15].mxu0 }
 0x2d2   : > { %v1126_v62 = vunpack.c.l.bf16 %v17592_v56 }
 0x2d6   : > { %v14766_v63 = vpop.f32.mrb[16].mxu0 }
 0x2d7   : > { %v974_v0 = vpop.f32.mrb[17].mxu0 }
 0x2d8   : > { %v14767_v2 = vpop.f32.mrb[18].mxu0 }
 0x2d9   : > { %v1022_v3 = vpack.c.bf16 %v14767_v2, %v14766_v63  ;;  %v977_v4 = vpop.f32.mrb[19].mxu0  ;;  %v1127_v63 = vunpack.c.h.bf16 %v17592_v56 }
 0x2da   : > { %v1021_v7 = vpack.c.bf16 %v977_v4, %v974_v0 }
 0x2dc   : > { %14776 = vmatprep.subr.bf16.mxu1 %v1021_v7 }
 0x2dd   : > { %14777 = vmatpush3.bf16.msra.mxu1 %v1021_v7  ;;  %v1125_v7 = vunpack.c.h.bf16 %v17583_v55 }
 0x2de   : > { %v14770_v8 = vpop.f32.mrb[20].mxu0  ;;  %14778 = vmatprep.subr.bf16.mxu1 %v1022_v3 }
 0x2df   : > { %v990_v14 = vpop.f32.mrb[21].mxu0 }
 0x2e0   : > { %v14771_v15 = vpop.f32.mrb[22].mxu0 }
 0x2e1   : > { %v1024_v16 = vpack.c.bf16 %v14771_v15, %v14770_v8  ;;  %v993_v17 = vpop.f32.mrb[23].mxu0  ;;  %14779 = vmatpush3.bf16.msra.mxu1 %v1022_v3  ;;  %v1124_v3 = vunpack.c.l.bf16 %v17583_v55 }
 0x2e2   : > { %v1023_v18 = vpack.c.bf16 %v993_v17, %v990_v14 }
 0x2e4   : > { %14780 = vmatprep.subr.bf16.mxu1 %v1023_v18 }
 0x2e5   : > { %14781 = vmatpush3.bf16.msra.mxu1 %v1023_v18 }
 0x2e6   : > { %v14774_v19 = vpop.f32.mrb[24].mxu0  ;;  %14782 = vmatprep.subr.bf16.mxu1 %v1024_v16 }
 0x2e7   : > { %v1006_v20 = vpop.f32.mrb[25].mxu0 }
 0x2e8   : > { %v14775_v21 = vpop.f32.mrb[26].mxu0 }
 0x2e9   : > { %v1026_v22 = vpack.c.bf16 %v14775_v21, %v14774_v19  ;;  %v1009_v23 = vpop.f32.mrb[27].mxu0  ;;  %14783 = vmatpush3.bf16.msra.mxu1 %v1024_v16 }
 0x2ea   : > { %v1025_v24 = vpack.c.bf16 %v1009_v23, %v1006_v20 }
 0x2ec   : > { %14784 = vmatprep.subr.bf16.mxu1 %v1025_v24 }
 0x2ed   : > { %14785 = vmatpush3.bf16.msra.mxu1 %v1025_v24 }
 0x2ee   : > { %14786 = vmatprep.subr.bf16.mxu1 %v1026_v22 }
 0x2f1   : > { %14787 = vmatpush3.bf16.msra.mxu1 %v1026_v22 }
 0x2f4   : > { %14789 = vmatmul.mubr.msk.bf16.vlgmr.msra.gmra.mrb[12].mxu1 %vm687_vm3, %v17493_v32 }
 0x2f5   : > { %14792 = vmatprep.mubr.msk.bf16.mxu1 %vm687_vm3, %v17498_v33 }
 0x2fc   : > { %14793 = vmatmul.mubr.msk.bf16.gmra.mrb[16].mxu1 %vm687_vm3, %v17507_v34 }
 0x2fd   : > { %14796 = vmatprep.mubr.msk.bf16.mxu1 %vm687_vm3, %v17512_v35 }
 0x304   : > { %14797 = vmatmul.mubr.msk.bf16.gmra.mrb[20].mxu1 %vm687_vm3, %v17521_v36 }
 0x305   : > { %14844 = vmatprep.mubr.msk.bf16.mxu1 %vm687_vm3, %v17486_v13 }
 0x3c7   : > { %v14790_v25 = vpop.f32.mrb[12].mxu1 }
 0x3c8   : > { %v1070_v10 = vadd.f32 %v14790_v25, %v17533_v38  ;;  %v1061_v26 = vpop.f32.mrb[13].mxu1  ;;  %v1130_v25 = vunpack.c.l.bf16 %v17602_v58 }
 0x3c9   : > { %v1062_v27 = vadd.f32 %v17533_v38, %v1061_v26  ;;  %v14791_v28 = vpop.f32.mrb[14].mxu1  ;;  %v1131_v26 = vunpack.c.h.bf16 %v17602_v58 }
 0x3ca   : > { %v1110_v9 = vmax.f32 %v1070_v10, 0.0  ;;  %v1073_v30 = vadd.f32 %v14791_v28, %v17533_v38  ;;  %v1064_v39 = vpop.f32.mrb[15].mxu1 }
 0x3cb   : > { %v1108_v40 = vmax.f32 %v1062_v27, 0.0  ;;  %v1065_v42 = vadd.f32 %v17533_v38, %v1064_v39 }
 0x3cc   : > { %v1111_v44 = vmax.f32 %v1073_v30, 0.0  ;;  %v1134_v46 = vadd.f32 %v1122_v29, %v1110_v9  ;;  %v1128_v9 = vunpack.c.l.bf16 %v17595_v57  ;;  %v1129_v30 = vunpack.c.h.bf16 %v17595_v57  ;;  %v17652_v57 = vld [vmem:[%s17451_s19 + $0x60] sm:$0xff]  }
 0x3cd   : > { %v1109_v45 = vmax.f32 %v1065_v42, 0.0  ;;  %v1132_v48 = vadd.f32 %v1120_v41, %v1108_v40 }
 0x3ce   : > { %v1135_v47 = vadd.f32 %v1123_v31, %v1111_v44 }
 0x3cf   : > { %v1133_v49 = vadd.f32 %v1121_v43, %v1109_v45  ;;  %v14794_v50 = vpop.f32.mrb[16].mxu1  ;;  %v17661_v45 = vld [vmem:[%s17451_s19 + $0x68] sm:$0xff]  }
 0x3d0   : > { %v1086_v51 = vadd.f32 %v14794_v50, %v17533_v38  ;;  %v1077_v12 = vpop.f32.mrb[17].mxu1  ;;  %v1145_v52 = vpack.c.bf16 %v1135_v47, %v1134_v46  ;;  %v17665_v46 = vld [vmem:[%s17451_s19 + $0x70] sm:$0xff]   ;;  %v17674_v47 = vld [vmem:[%s17451_s19 + $0x78] sm:$0xff]  }
 0x3d1   : > { %v1078_v54 = vadd.f32 %v17533_v38, %v1077_v12  ;;  %v14795_v59 = vpop.f32.mrb[18].mxu1  ;;  %v1144_v60 = vpack.c.bf16 %v1133_v49, %v1132_v48  ;;  %v17677_v48 = vld [vmem:[%s17451_s19 + $0x80] sm:$0xff]   ;;  %v17684_v49 = vld [vmem:[%s17451_s19 + $0x88] sm:$0xff]  }
 0x3d2   : > { %v1114_v61 = vmax.f32 %v1086_v51, 0.0  ;;  %v1089_v11 = vadd.f32 %v14795_v59, %v17533_v38  ;;  %v1080_v0 = vpop.f32.mrb[19].mxu1 }
 0x3d3   : > { %v1112_v2 = vmax.f32 %v1078_v54, 0.0  ;;  %v1081_v4 = vadd.f32 %v17533_v38, %v1080_v0  ;;  %14801 = vmatpush3.bf16.msra.mxu0 %v1144_v60 }
 0x3d4   : > { %v1115_v8 = vmax.f32 %v1089_v11, 0.0  ;;  %14802 = vmatprep.subr.bf16.mxu0 %v17345_v37  ;;  %v1138_v15 = vadd.f32 %v1126_v62, %v1114_v61 }
 0x3d5   : > { %v1113_v14 = vmax.f32 %v1081_v4, 0.0  ;;  %v1136_v17 = vadd.f32 %v1124_v3, %v1112_v2 }
 0x3d6   : > { %v1139_v16 = vadd.f32 %v1127_v63, %v1115_v8 }
 0x3d7   : > { %v1137_v18 = vadd.f32 %v1125_v7, %v1113_v14  ;;  %v14798_v19 = vpop.f32.mrb[20].mxu1  ;;  %14803 = vmatpush3.bf16.msra.mxu0 %v1145_v52 }
 0x3d8   : > { %v1102_v56 = vadd.f32 %v14798_v19, %v17533_v38  ;;  %v1093_v20 = vpop.f32.mrb[21].mxu1  ;;  %14804 = vmatprep.subr.bf16.mxu0 %v17345_v37  ;;  %v1147_v21 = vpack.c.bf16 %v1139_v16, %v1138_v15  ;;  %v17706_v19 = vld [vmem:[%s17451_s19 + $0x90] sm:$0xff]  }
 0x3d9   : > { %v1094_v22 = vadd.f32 %v17533_v38, %v1093_v20  ;;  %v14799_v55 = vpop.f32.mrb[22].mxu1  ;;  %v1146_v23 = vpack.c.bf16 %v1137_v18, %v1136_v17  ;;  %v17723_v20 = vld [vmem:[%s17451_s19 + $0xa8] sm:$0xff]  }
 0x3da   : > { %v1118_v24 = vmax.f32 %v1102_v56, 0.0  ;;  %v1105_v10 = vadd.f32 %v14799_v55, %v17533_v38  ;;  %v1096_v27 = vpop.f32.mrb[23].mxu1  ;;  %v17716_v56 = vld [vmem:[%s17451_s19 + $0xa0] sm:$0xff]  }
 0x3db   : > { %v1116_v28 = vmax.f32 %v1094_v22, 0.0  ;;  %v1097_v29 = vadd.f32 %v17533_v38, %v1096_v27  ;;  %14805 = vmatpush3.bf16.msra.mxu0 %v1146_v23  ;;  %v17733_v22 = vld [vmem:[%s17451_s19 + $0xb8] sm:$0xff]   ;;  %v1435_v27 = vunpack.c.l.bf16 %v17661_v45 }
 0x3dc   : > { %v1119_v31 = vmax.f32 %v1105_v10, 0.0  ;;  %14806 = vmatprep.subr.bf16.mxu0 %v17345_v37  ;;  %v1142_v40 = vadd.f32 %v1130_v25, %v1118_v24 }
 0x3dd   : > { %v1117_v39 = vmax.f32 %v1097_v29, 0.0  ;;  %v1140_v42 = vadd.f32 %v1128_v9, %v1116_v28  ;;  %v1436_v9 = vunpack.c.h.bf16 %v17661_v45 }
 0x3de   : > { %v1143_v41 = vadd.f32 %v1131_v26, %v1119_v31  ;;  %v1433_v31 = vunpack.c.l.bf16 %v17652_v57 }
 0x3df   : > { %v1141_v58 = vadd.f32 %v1129_v30, %v1117_v39  ;;  %14807 = vmatpush3.bf16.msra.mxu0 %v1147_v21  ;;  %v17726_v21 = vld [vmem:[%s17451_s19 + $0xb0] sm:$0xff]  }
 0x3e0   : > { %14808 = vmatprep.subr.bf16.mxu0 %v17345_v37  ;;  %v1149_v43 = vpack.c.bf16 %v1143_v41, %v1142_v40  ;;  %v1434_v40 = vunpack.c.h.bf16 %v17652_v57 }
 0x3e1   : > { %v1148_v44 = vpack.c.bf16 %v1141_v58, %v1140_v42 }
 0x3e3   : > { %14809 = vmatpush3.bf16.msra.mxu0 %v1148_v44 }
 0x3e4   : > { %14810 = vmatprep.subr.bf16.mxu0 %v17345_v37 }
 0x3e7   : > { %14811 = vmatpush3.bf16.msra.mxu0 %v1149_v43 }
 0x3e8   : > { %14816 = vmatprep.subr.bf16.mxu0 %v17431_v1 }
 0x3ea   : > { %14813 = vmatmul.mubr.msk.bf16.vlgmr.msra.gmra.mrb[28].mxu0 %vm687_vm3, %v17570_v53 }
 0x3eb   : > { %14817 = vmatpush3.bf16.msra.mxu0 %v17431_v1  ;;  %14820 = vmatprep.mubr.msk.bf16.mxu0 %vm544_vm2, %v17652_v57 }
 0x3ec   : > { %14818 = vmatprep.subr.bf16.mxu0 %v17444_v6 }
 0x3ef   : > { %14819 = vmatpush3.bf16.msra.mxu0 %v17444_v6 }
 0x3f0   : > { %14856 = vmatprep.subr.bf16.mxu0 %v17345_v37 }
 0x3f2   : > { %14821 = vmatmul.mubr.msk.bf16.vlgmr.msra.gmra.mrb[32].mxu0 %vm544_vm2, %v17661_v45 }
 0x3f3   : > { %14824 = vmatprep.mubr.msk.bf16.mxu0 %vm544_vm2, %v17665_v46 }
 0x3fa   : > { %14825 = vmatmul.mubr.msk.bf16.gmra.mrb[36].mxu0 %vm544_vm2, %v17674_v47 }
 0x3fb   : > { %14828 = vmatprep.mubr.msk.bf16.mxu0 %vm544_vm2, %v17677_v48 }
 0x402   : > { %14829 = vmatmul.mubr.msk.bf16.gmra.mrb[40].mxu0 %vm544_vm2, %v17684_v49 }
 0x403   : > { %14868 = vmatprep.mubr.msk.bf16.mxu0 %vm17346_vm4, %v17345_v37 }
 0x4bd   : > { %v1184_v50 = vpop.f32.mrb[28].mxu0 }
 0x4be   : > { %1191 = vst.msk [vmem:[#allocation2 + $0x10] sm:$0xff] %vm544_vm2, %v1184_v50  ;;  %v14814_v51 = vpop.f32.mrb[29].mxu0 }
 0x4bf   : > { %v1187_v12 = vpop.f32.mrb[30].mxu0 }
 0x4c0   : > { %1192 = vst.msk [vmem:[#allocation2 + $0x18] sm:$0xff] %vm544_vm2, %v1187_v12  ;;  %v14815_v52 = vpop.f32.mrb[31].mxu0 }
 0x4c5   : > { %v14822_v54 = vpop.f32.mrb[32].mxu0 }
 0x4c6   : > { %v1287_v59 = vpop.f32.mrb[33].mxu0 }
 0x4c7   : > { %v14823_v60 = vpop.f32.mrb[34].mxu0 }
 0x4c8   : > { %v1335_v61 = vpack.c.bf16 %v14823_v60, %v14822_v54  ;;  %v1290_v62 = vpop.f32.mrb[35].mxu0 }
 0x4c9   : > { %v1334_v11 = vpack.c.bf16 %v1290_v62, %v1287_v59  ;;  %v1439_v62 = vunpack.c.l.bf16 %v17674_v47 }
 0x4cb   : > { %14832 = vmatprep.subr.bf16.mxu1 %v1334_v11 }
 0x4cc   : > { %14833 = vmatpush3.bf16.msra.mxu1 %v1334_v11  ;;  %v1440_v11 = vunpack.c.h.bf16 %v17674_v47 }
 0x4cd   : > { %v14826_v63 = vpop.f32.mrb[36].mxu0  ;;  %14834 = vmatprep.subr.bf16.mxu1 %v1335_v61 }
 0x4ce   : > { %v1303_v0 = vpop.f32.mrb[37].mxu0 }
 0x4cf   : > { %v14827_v2 = vpop.f32.mrb[38].mxu0 }
 0x4d0   : > { %v1337_v3 = vpack.c.bf16 %v14827_v2, %v14826_v63  ;;  %v1306_v4 = vpop.f32.mrb[39].mxu0  ;;  %14835 = vmatpush3.bf16.msra.mxu1 %v1335_v61  ;;  %v1437_v2 = vunpack.c.l.bf16 %v17665_v46 }
 0x4d1   : > { %v1336_v7 = vpack.c.bf16 %v1306_v4, %v1303_v0  ;;  %v1438_v4 = vunpack.c.h.bf16 %v17665_v46 }
 0x4d3   : > { %14836 = vmatprep.subr.bf16.mxu1 %v1336_v7 }
 0x4d4   : > { %14837 = vmatpush3.bf16.msra.mxu1 %v1336_v7 }
 0x4d5   : > { %v14830_v8 = vpop.f32.mrb[40].mxu0  ;;  %14838 = vmatprep.subr.bf16.mxu1 %v1337_v3 }
 0x4d6   : > { %v1319_v14 = vpop.f32.mrb[41].mxu0 }
 0x4d7   : > { %v14831_v15 = vpop.f32.mrb[42].mxu0 }
 0x4d8   : > { %v1339_v16 = vpack.c.bf16 %v14831_v15, %v14830_v8  ;;  %v1322_v17 = vpop.f32.mrb[43].mxu0  ;;  %14839 = vmatpush3.bf16.msra.mxu1 %v1337_v3 }
 0x4d9   : > { %v1338_v18 = vpack.c.bf16 %v1322_v17, %v1319_v14 }
 0x4db   : > { %14840 = vmatprep.subr.bf16.mxu1 %v1338_v18 }
 0x4dc   : > { %14841 = vmatpush3.bf16.msra.mxu1 %v1338_v18 }
 0x4dd   : > { %14842 = vmatprep.subr.bf16.mxu1 %v1339_v16 }
 0x4e0   : > { %14843 = vmatpush3.bf16.msra.mxu1 %v1339_v16 }
 0x4e1   : > { %14872 = vmatprep.subr.bf16.mxu1 %v17431_v1 }
 0x4e3   : > { %14845 = vmatmul.mubr.msk.bf16.vlgmr.msra.gmra.mrb[24].mxu1 %vm687_vm3, %v17493_v32 }
 0x4e4   : > { %14873 = vmatpush3.bf16.msra.mxu1 %v17431_v1  ;;  %14848 = vmatprep.mubr.msk.bf16.mxu1 %vm687_vm3, %v17498_v33  ;;  %v17713_v1 = vld [vmem:[%s17451_s19 + $0x98] sm:$0xff]  }
 0x4e5   : > { %14874 = vmatprep.subr.bf16.mxu1 %v17444_v6 }
 0x4e8   : > { %14875 = vmatpush3.bf16.msra.mxu1 %v17444_v6 }
 0x4e9   : > { %14912 = vmatprep.subr.bf16.mxu1 %v17345_v37 }
 0x4eb   : > { %14849 = vmatmul.mubr.msk.bf16.gmra.mrb[28].mxu1 %vm687_vm3, %v17507_v34 }
 0x4ec   : > { %14852 = vmatprep.mubr.msk.bf16.mxu1 %vm687_vm3, %v17512_v35 }
 0x4f3   : > { %14853 = vmatmul.mubr.msk.bf16.gmra.mrb[32].mxu1 %vm687_vm3, %v17521_v36 }
 0x4f4   : > { %14876 = vmatprep.mubr.msk.bf16.mxu1 %vm544_vm2, %v17706_v19 }
 0x4fb   : > { %14877 = vmatmul.mubr.msk.bf16.vlgmr.msra.gmra.mrb[36].mxu1 %vm544_vm2, %v17713_v1 }
 0x4fc   : > { %14880 = vmatprep.mubr.msk.bf16.mxu1 %vm544_vm2, %v17716_v56 }
 0x503   : > { %14881 = vmatmul.mubr.msk.bf16.gmra.mrb[40].mxu1 %vm544_vm2, %v17723_v20 }
 0x504   : > { %14884 = vmatprep.mubr.msk.bf16.mxu1 %vm544_vm2, %v17726_v21 }
 0x50b   : > { %14885 = vmatmul.mubr.msk.bf16.gmra.mrb[44].mxu1 %vm544_vm2, %v17733_v22 }
 0x50c   : > { %14924 = vmatprep.mubr.msk.bf16.mxu1 %vm17346_vm4, %v17345_v37 }
 0x5b6   : > { %v14846_v55 = vpop.f32.mrb[24].mxu1 }
 0x5b7   : > { %v1383_v23 = vadd.f32 %v14846_v55, %v17533_v38  ;;  %v1374_v24 = vpop.f32.mrb[25].mxu1 }
 0x5b8   : > { %v1375_v25 = vadd.f32 %v17533_v38, %v1374_v24  ;;  %v14847_v10 = vpop.f32.mrb[26].mxu1 }
 0x5b9   : > { %v1423_v26 = vmax.f32 %v1383_v23, 0.0  ;;  %v1386_v28 = vadd.f32 %v14847_v10, %v17533_v38  ;;  %v1377_v29 = vpop.f32.mrb[27].mxu1 }
 0x5ba   : > { %v1421_v30 = vmax.f32 %v1375_v25, 0.0  ;;  %v1378_v39 = vadd.f32 %v17533_v38, %v1377_v29 }
 0x5bb   : > { %v1424_v41 = vmax.f32 %v1386_v28, 0.0  ;;  %v1447_v58 = vadd.f32 %v1435_v27, %v1423_v26  ;;  %v1443_v26 = vunpack.c.l.bf16 %v17684_v49  ;;  %v1444_v28 = vunpack.c.h.bf16 %v17684_v49 }
 0x5bc   : > { %v1422_v42 = vmax.f32 %v1378_v39, 0.0  ;;  %v1445_v44 = vadd.f32 %v1433_v31, %v1421_v30  ;;  %v1441_v30 = vunpack.c.l.bf16 %v17677_v48  ;;  %v1442_v39 = vunpack.c.h.bf16 %v17677_v48 }
 0x5bd   : > { %v1448_v43 = vadd.f32 %v1436_v9, %v1424_v41 }
 0x5be   : > { %v1446_v50 = vadd.f32 %v1434_v40, %v1422_v42  ;;  %v14850_v51 = vpop.f32.mrb[28].mxu1 }
 0x5bf   : > { %v1399_v12 = vadd.f32 %v14850_v51, %v17533_v38  ;;  %v1390_v52 = vpop.f32.mrb[29].mxu1  ;;  %v1458_v54 = vpack.c.bf16 %v1448_v43, %v1447_v58 }
 0x5c0   : > { %v1391_v45 = vadd.f32 %v17533_v38, %v1390_v52  ;;  %v14851_v59 = vpop.f32.mrb[30].mxu1  ;;  %v1457_v60 = vpack.c.bf16 %v1446_v50, %v1445_v44 }
 0x5c1   : > { %v1427_v61 = vmax.f32 %v1399_v12, 0.0  ;;  %v1402_v57 = vadd.f32 %v14851_v59, %v17533_v38  ;;  %v1393_v63 = vpop.f32.mrb[31].mxu1 }
 0x5c2   : > { %v1425_v0 = vmax.f32 %v1391_v45, 0.0  ;;  %v1394_v3 = vadd.f32 %v17533_v38, %v1393_v63  ;;  %14857 = vmatpush3.bf16.msra.mxu0 %v1457_v60 }
 0x5c3   : > { %v1428_v7 = vmax.f32 %v1402_v57, 0.0  ;;  %14858 = vmatprep.subr.bf16.mxu0 %v17345_v37  ;;  %v1451_v14 = vadd.f32 %v1439_v62, %v1427_v61 }
 0x5c4   : > { %v1426_v8 = vmax.f32 %v1394_v3, 0.0  ;;  %v1449_v16 = vadd.f32 %v1437_v2, %v1425_v0 }
 0x5c5   : > { %v1452_v15 = vadd.f32 %v1440_v11, %v1428_v7 }
 0x5c6   : > { %v1450_v17 = vadd.f32 %v1438_v4, %v1426_v8  ;;  %v14854_v18 = vpop.f32.mrb[32].mxu1  ;;  %14859 = vmatpush3.bf16.msra.mxu0 %v1458_v54 }
 0x5c7   : > { %v1415_v47 = vadd.f32 %v14854_v18, %v17533_v38  ;;  %v1406_v55 = vpop.f32.mrb[33].mxu1  ;;  %14860 = vmatprep.subr.bf16.mxu0 %v17345_v37  ;;  %v1460_v23 = vpack.c.bf16 %v1452_v15, %v1451_v14 }
 0x5c8   : > { %v1407_v24 = vadd.f32 %v17533_v38, %v1406_v55  ;;  %v14855_v46 = vpop.f32.mrb[34].mxu1  ;;  %v1459_v25 = vpack.c.bf16 %v1450_v17, %v1449_v16 }
 0x5c9   : > { %v1431_v10 = vmax.f32 %v1415_v47, 0.0  ;;  %v1418_v27 = vadd.f32 %v14855_v46, %v17533_v38  ;;  %v1409_v9 = vpop.f32.mrb[35].mxu1  ;;  %v1749_v47 = vunpack.c.h.bf16 %v17713_v1 }
 0x5ca   : > { %v1429_v29 = vmax.f32 %v1407_v24, 0.0  ;;  %v1410_v31 = vadd.f32 %v17533_v38, %v1409_v9  ;;  %14861 = vmatpush3.bf16.msra.mxu0 %v1459_v25  ;;  %v1746_v24 = vunpack.c.l.bf16 %v17706_v19  ;;  %v1747_v25 = vunpack.c.h.bf16 %v17706_v19 }
 0x5cb   : > { %v1432_v40 = vmax.f32 %v1418_v27, 0.0  ;;  %14862 = vmatprep.subr.bf16.mxu0 %v17345_v37  ;;  %v1455_v42 = vadd.f32 %v1443_v26, %v1431_v10 }
 0x5cc   : > { %v1430_v41 = vmax.f32 %v1410_v31, 0.0  ;;  %v1453_v43 = vadd.f32 %v1441_v30, %v1429_v29 }
 0x5cd   : > { %v1456_v58 = vadd.f32 %v1444_v28, %v1432_v40 }
 0x5ce   : > { %v1454_v44 = vadd.f32 %v1442_v39, %v1430_v41  ;;  %14863 = vmatpush3.bf16.msra.mxu0 %v1460_v23  ;;  %v14878_v50 = vpop.f32.mrb[36].mxu1 }
 0x5cf   : > { %14864 = vmatprep.subr.bf16.mxu0 %v17345_v37  ;;  %v1600_v49 = vpop.f32.mrb[37].mxu1  ;;  %v1462_v51 = vpack.c.bf16 %v1456_v58, %v1455_v42 }
 0x5d0   : > { %v1461_v12 = vpack.c.bf16 %v1454_v44, %v1453_v43  ;;  %v14879_v52 = vpop.f32.mrb[38].mxu1  ;;  %v1752_v43 = vunpack.c.l.bf16 %v17723_v20  ;;  %v1753_v44 = vunpack.c.h.bf16 %v17723_v20 }
 0x5d1   : > { %v1648_v54 = vpack.c.bf16 %v14879_v52, %v14878_v50  ;;  %v1603_v45 = vpop.f32.mrb[39].mxu1  ;;  %v1751_v52 = vunpack.c.h.bf16 %v17716_v56 }
 0x5d2   : > { %14865 = vmatpush3.bf16.msra.mxu0 %v1461_v12  ;;  %v1647_v48 = vpack.c.bf16 %v1603_v45, %v1600_v49 }
 0x5d3   : > { %14866 = vmatprep.subr.bf16.mxu0 %v17345_v37 }
 0x5d6   : > { %14867 = vmatpush3.bf16.msra.mxu0 %v1462_v51  ;;  %v14882_v59 = vpop.f32.mrb[40].mxu1  ;;  %v1750_v51 = vunpack.c.l.bf16 %v17716_v56 }
 0x5d7   : > { %14888 = vmatprep.subr.bf16.mxu0 %v1647_v48  ;;  %v1616_v60 = vpop.f32.mrb[41].mxu1 }
 0x5d8   : > { %v14883_v61 = vpop.f32.mrb[42].mxu1 }
 0x5d9   : > { %14869 = vmatmul.mubr.msk.bf16.vlgmr.msra.gmra.mrb[44].mxu0 %vm687_vm3, %v17570_v53  ;;  %v1650_v62 = vpack.c.bf16 %v14883_v61, %v14882_v59  ;;  %v1619_v57 = vpop.f32.mrb[43].mxu1 }
 0x5da   : > { %14889 = vmatpush3.bf16.msra.mxu0 %v1647_v48  ;;  %v1649_v11 = vpack.c.bf16 %v1619_v57, %v1616_v60  ;;  %14900 = vmatprep.mubr.msk.bf16.mxu0 %vm687_vm3, %v17486_v13 }
 0x5db   : > { %14890 = vmatprep.subr.bf16.mxu0 %v1648_v54 }
 0x5de   : > { %14891 = vmatpush3.bf16.msra.mxu0 %v1648_v54  ;;  %v14886_v63 = vpop.f32.mrb[44].mxu1 }
 0x5df   : > { %14892 = vmatprep.subr.bf16.mxu0 %v1649_v11  ;;  %v1632_v0 = vpop.f32.mrb[45].mxu1 }
 0x5e0   : > { %v14887_v2 = vpop.f32.mrb[46].mxu1 }
 0x5e1   : > { %v1652_v3 = vpack.c.bf16 %v14887_v2, %v14886_v63  ;;  %v1635_v4 = vpop.f32.mrb[47].mxu1 }
 0x5e2   : > { %14893 = vmatpush3.bf16.msra.mxu0 %v1649_v11  ;;  %v1651_v7 = vpack.c.bf16 %v1635_v4, %v1632_v0 }
 0x5e3   : > { %14894 = vmatprep.subr.bf16.mxu0 %v1650_v62 }
 0x5e6   : > { %14895 = vmatpush3.bf16.msra.mxu0 %v1650_v62 }
 0x5e7   : > { %14896 = vmatprep.subr.bf16.mxu0 %v1651_v7 }
 0x5ea   : > { %14897 = vmatpush3.bf16.msra.mxu0 %v1651_v7  ;;  %v1757_v7 = vunpack.c.h.bf16 %v17733_v22 }
 0x5eb   : > { %14898 = vmatprep.subr.bf16.mxu0 %v1652_v3 }
 0x5ee   : > { %14899 = vmatpush3.bf16.msra.mxu0 %v1652_v3  ;;  %v1756_v3 = vunpack.c.l.bf16 %v17733_v22 }
 0x5f1   : > { %14901 = vmatmul.mubr.msk.bf16.vlgmr.msra.gmra.mrb[48].mxu0 %vm687_vm3, %v17493_v32 }
 0x5f2   : > { %14904 = vmatprep.mubr.msk.bf16.mxu0 %vm687_vm3, %v17498_v33 }
 0x5f9   : > { %14905 = vmatmul.mubr.msk.bf16.gmra.mrb[52].mxu0 %vm687_vm3, %v17507_v34 }
 0x5fa   : > { %14908 = vmatprep.mubr.msk.bf16.mxu0 %vm687_vm3, %v17512_v35 }
 0x601   : > { %14909 = vmatmul.mubr.msk.bf16.gmra.mrb[56].mxu0 %vm687_vm3, %v17521_v36  ;;  %v1748_v36 = vunpack.c.l.bf16 %v17713_v1 }
 0x602   : > { %14956 = vmatprep.mubr.msk.bf16.mxu0 %vm687_vm3, %v17486_v13 }
 0x6ac   : > { %v1497_v8 = vpop.f32.mrb[44].mxu0 }
 0x6ad   : > { %1504 = vst.msk [vmem:[#allocation2 + $0x20] sm:$0xff] %vm544_vm2, %v1497_v8  ;;  %v14870_v14 = vpop.f32.mrb[45].mxu0 }
 0x6ae   : > { %v1500_v32 = vpop.f32.mrb[46].mxu0 }
 0x6af   : > { %1505 = vst.msk [vmem:[#allocation2 + $0x28] sm:$0xff] %vm544_vm2, %v1500_v32  ;;  %v14871_v33 = vpop.f32.mrb[47].mxu0  ;;  %v1754_v32 = vunpack.c.l.bf16 %v17726_v21 }
 0x6c4   : > { %v14902_v15 = vpop.f32.mrb[48].mxu0 }
 0x6c5   : > { %v1696_v34 = vadd.f32 %v14902_v15, %v17533_v38  ;;  %v1687_v16 = vpop.f32.mrb[49].mxu0  ;;  %v1755_v15 = vunpack.c.h.bf16 %v17726_v21  ;;  %v17821_v21 = vld [vmem:[%s20953_s4] sm:$0xff]  }
 0x6c6   : > { %v1688_v35 = vadd.f32 %v17533_v38, %v1687_v16  ;;  %v14903_v17 = vpop.f32.mrb[50].mxu0 }
 0x6c7   : > { %v1736_v18 = vmax.f32 %v1696_v34, 0.0  ;;  %v1699_v13 = vadd.f32 %v14903_v17, %v17533_v38  ;;  %v1690_v55 = vpop.f32.mrb[51].mxu0 }
 0x6c8   : > { %v1734_v23 = vmax.f32 %v1688_v35, 0.0  ;;  %v1691_v46 = vadd.f32 %v17533_v38, %v1690_v55  ;;  %v17834_v55 = vld [vmem:[%s17451_s19 + $0xd0] sm:$0xff]  }
 0x6c9   : > { %v1737_v10 = vmax.f32 %v1699_v13, 0.0  ;;  %v1760_v27 = vadd.f32 %v1748_v36, %v1736_v18 }
 0x6ca   : > { %v1735_v26 = vmax.f32 %v1691_v46, 0.0  ;;  %v1758_v9 = vadd.f32 %v1746_v24, %v1734_v23  ;;  %v17846_v23 = vld [vmem:[%s17451_s19 + $0xe0] sm:$0xff]   ;;  %v17853_v24 = vld [vmem:[%s17451_s19 + $0xe8] sm:$0xff]  }
 0x6cb   : > { %v1761_v28 = vadd.f32 %v1749_v47, %v1737_v10  ;;  %v17830_v47 = vld [vmem:[%s17451_s19 + $0xc8] sm:$0xff]  }
 0x6cc   : > { %v1759_v29 = vadd.f32 %v1747_v25, %v1735_v26  ;;  %v14906_v30 = vpop.f32.mrb[52].mxu0 }
 0x6cd   : > { %v1712_v31 = vadd.f32 %v14906_v30, %v17533_v38  ;;  %v1703_v39 = vpop.f32.mrb[53].mxu0  ;;  %v1771_v40 = vpack.c.bf16 %v1761_v28, %v1760_v27 }
 0x6ce   : > { %v1704_v1 = vadd.f32 %v17533_v38, %v1703_v39  ;;  %v14907_v41 = vpop.f32.mrb[54].mxu0  ;;  %v1770_v42 = vpack.c.bf16 %v1759_v29, %v1758_v9 }
 0x6cf   : > { %v1740_v58 = vmax.f32 %v1712_v31, 0.0  ;;  %v1715_v19 = vadd.f32 %v14907_v41, %v17533_v38  ;;  %v1706_v50 = vpop.f32.mrb[55].mxu0 }
 0x6d0   : > { %v1738_v49 = vmax.f32 %v1704_v1, 0.0  ;;  %v1707_v12 = vadd.f32 %v17533_v38, %v1706_v50  ;;  %14913 = vmatpush3.bf16.msra.mxu1 %v1770_v42 }
 0x6d1   : > { %v1741_v54 = vmax.f32 %v1715_v19, 0.0  ;;  %14914 = vmatprep.subr.bf16.mxu1 %v17345_v37  ;;  %v1764_v48 = vadd.f32 %v1752_v43, %v1740_v58 }
 0x6d2   : > { %v1739_v45 = vmax.f32 %v1707_v12, 0.0  ;;  %v1762_v60 = vadd.f32 %v1750_v51, %v1738_v49  ;;  %v17864_v12 = vld [vmem:[%s20949_s0 + $0x8] sm:$0xff]  }
 0x6d3   : > { %v1765_v59 = vadd.f32 %v1753_v44, %v1741_v54  ;;  %v17878_v54 = vld [vmem:[%s20949_s0 + $0x18] sm:$0xff]  }
 0x6d4   : > { %v1763_v61 = vadd.f32 %v1751_v52, %v1739_v45  ;;  %v14910_v62 = vpop.f32.mrb[56].mxu0  ;;  %14915 = vmatpush3.bf16.msra.mxu1 %v1771_v40  ;;  %v17871_v52 = vld [vmem:[%s20949_s0 + $0x10] sm:$0xff]   ;;  %v17885_v45 = vld [vmem:[%s20949_s0 + $0x20] sm:$0xff]  }
 0x6d5   : > { %v1728_v20 = vadd.f32 %v14910_v62, %v17533_v38  ;;  %v1719_v57 = vpop.f32.mrb[57].mxu0  ;;  %14916 = vmatprep.subr.bf16.mxu1 %v17345_v37  ;;  %v1773_v11 = vpack.c.bf16 %v1765_v59, %v1764_v48  ;;  %v17892_v48 = vld [vmem:[%s20949_s0 + $0x28] sm:$0xff]   ;;  %v17899_v59 = vld [vmem:[%s20949_s0] sm:$0xff]  }
 0x6d6   : > { %v1720_v63 = vadd.f32 %v17533_v38, %v1719_v57  ;;  %v14911_v56 = vpop.f32.mrb[58].mxu0  ;;  %v1772_v0 = vpack.c.bf16 %v1763_v61, %v1762_v60  ;;  %v17906_v61 = vld [vmem:[%s20954_s5] ss:$0 sm:$0xff] }
 0x6d7   : > { %v1744_v2 = vmax.f32 %v1728_v20, 0.0  ;;  %v1731_v4 = vadd.f32 %v14911_v56, %v17533_v38  ;;  %v1722_v8 = vpop.f32.mrb[59].mxu0  ;;  %v2061_v56 = vunpack.c.l.bf16 %v17830_v47 }
 0x6d8   : > { %v1742_v14 = vmax.f32 %v1720_v63, 0.0  ;;  %v1723_v33 = vadd.f32 %v17533_v38, %v1722_v8  ;;  %14917 = vmatpush3.bf16.msra.mxu1 %v1772_v0  ;;  %v17816_v38 = vld [vmem:[%s17451_s19 + $0xc0] sm:$0xff]  }
 0x6d9   : > { %v1745_v34 = vmax.f32 %v1731_v4, 0.0  ;;  %14918 = vmatprep.subr.bf16.mxu1 %v17345_v37  ;;  %v1768_v35 = vadd.f32 %v1756_v3, %v1744_v2  ;;  %v2062_v2 = vunpack.c.h.bf16 %v17830_v47 }
 0x6da   : > { %v1743_v16 = vmax.f32 %v1723_v33, 0.0  ;;  %v1766_v18 = vadd.f32 %v1754_v32, %v1742_v14  ;;  %v2060_v14 = vunpack.c.h.bf16 %v17816_v38 }
 0x6db   : > { %v1769_v17 = vadd.f32 %v1757_v7, %v1745_v34  ;;  %v2059_v7 = vunpack.c.l.bf16 %v17816_v38 }
 0x6dc   : > { %v1767_v36 = vadd.f32 %v1755_v15, %v1743_v16  ;;  %14919 = vmatpush3.bf16.msra.mxu1 %v1773_v11 }
 0x6dd   : > { %14920 = vmatprep.subr.bf16.mxu1 %v17345_v37  ;;  %v1775_v22 = vpack.c.bf16 %v1769_v17, %v1768_v35 }
 0x6de   : > { %v1774_v13 = vpack.c.bf16 %v1767_v36, %v1766_v18 }
 0x6e0   : > { %14921 = vmatpush3.bf16.msra.mxu1 %v1774_v13 }
 0x6e1   : > { %14922 = vmatprep.subr.bf16.mxu1 %v17345_v37 }
 0x6e4   : > { %14923 = vmatpush3.bf16.msra.mxu1 %v1775_v22 }
 0x6e5   : > { %14928 = vmatprep.subr.bf16.mxu1 %v17821_v21 }
 0x6e7   : > { %14925 = vmatmul.mubr.msk.bf16.vlgmr.msra.gmra.mrb[48].mxu1 %vm687_vm3, %v17570_v53  ;;  %v17843_v53 = vld [vmem:[%s17451_s19 + $0xd8] sm:$0xff]  }
 0x6e8   : > { %14929 = vmatpush3.bf16.msra.mxu1 %v17821_v21  ;;  %14932 = vmatprep.mubr.msk.bf16.mxu1 %vm544_vm2, %v17816_v38 }
 0x6e9   : > { %14930 = vmatprep.subr.bf16.mxu1 %v17444_v6 }
 0x6ec   : > { %14931 = vmatpush3.bf16.msra.mxu1 %v17444_v6 }
 0x6ed   : > { %14968 = vmatprep.subr.bf16.mxu1 %v17345_v37 }
 0x6ef   : > { %14933 = vmatmul.mubr.msk.bf16.vlgmr.msra.gmra.mrb[52].mxu1 %vm544_vm2, %v17830_v47 }
 0x6f0   : > { %14936 = vmatprep.mubr.msk.bf16.mxu1 %vm544_vm2, %v17834_v55 }
 0x6f7   : > { %14937 = vmatmul.mubr.msk.bf16.gmra.mrb[56].mxu1 %vm544_vm2, %v17843_v53 }
 0x6f8   : > { %14940 = vmatprep.mubr.msk.bf16.mxu1 %vm544_vm2, %v17846_v23 }
 0x6ff   : > { %14941 = vmatmul.mubr.msk.bf16.gmra.mrb[60].mxu1 %vm544_vm2, %v17853_v24 }
 0x700   : > { %14980 = vmatprep.mubr.msk.bf16.mxu1 %vm17346_vm4, %v17345_v37 }
 0x7ba   : > { %v1810_v46 = vpop.f32.mrb[48].mxu1 }
 0x7bb   : > { %1817 = vst.msk [vmem:[#allocation2 + $0x30] sm:$0xff] %vm544_vm2, %v1810_v46  ;;  %v14926_v25 = vpop.f32.mrb[49].mxu1 }
 0x7bc   : > { %v1813_v10 = vpop.f32.mrb[50].mxu1 }
 0x7bd   : > { %1818 = vst.msk [vmem:[#allocation2 + $0x38] sm:$0xff] %vm544_vm2, %v1813_v10  ;;  %v14927_v26 = vpop.f32.mrb[51].mxu1  ;;  %v2065_v10 = vunpack.c.l.bf16 %v17843_v53 }
 0x7be   : > { %v2066_v26 = vunpack.c.h.bf16 %v17843_v53 }
 0x7c2   : > { %v14934_v27 = vpop.f32.mrb[52].mxu1 }
 0x7c3   : > { %v1913_v28 = vpop.f32.mrb[53].mxu1 }
 0x7c4   : > { %v14935_v9 = vpop.f32.mrb[54].mxu1 }
 0x7c5   : > { %v1961_v29 = vpack.c.bf16 %v14935_v9, %v14934_v27  ;;  %v1916_v30 = vpop.f32.mrb[55].mxu1  ;;  %v2063_v9 = vunpack.c.l.bf16 %v17834_v55 }
 0x7c6   : > { %v1960_v31 = vpack.c.bf16 %v1916_v30, %v1913_v28  ;;  %v2064_v30 = vunpack.c.h.bf16 %v17834_v55 }
 0x7c8   : > { %14944 = vmatprep.subr.bf16.mxu0 %v1960_v31 }
 0x7c9   : > { %14945 = vmatpush3.bf16.msra.mxu0 %v1960_v31 }
 0x7ca   : > { %v14938_v39 = vpop.f32.mrb[56].mxu1  ;;  %14946 = vmatprep.subr.bf16.mxu0 %v1961_v29 }
 0x7cb   : > { %v1929_v40 = vpop.f32.mrb[57].mxu1 }
 0x7cc   : > { %v14939_v1 = vpop.f32.mrb[58].mxu1 }
 0x7cd   : > { %v1963_v41 = vpack.c.bf16 %v14939_v1, %v14938_v39  ;;  %v1932_v42 = vpop.f32.mrb[59].mxu1  ;;  %14947 = vmatpush3.bf16.msra.mxu0 %v1961_v29 }
 0x7ce   : > { %v1962_v58 = vpack.c.bf16 %v1932_v42, %v1929_v40 }
 0x7d0   : > { %14948 = vmatprep.subr.bf16.mxu0 %v1962_v58 }
 0x7d1   : > { %14949 = vmatpush3.bf16.msra.mxu0 %v1962_v58 }
 0x7d2   : > { %v14942_v43 = vpop.f32.mrb[60].mxu1  ;;  %14950 = vmatprep.subr.bf16.mxu0 %v1963_v41 }
 0x7d3   : > { %v1945_v19 = vpop.f32.mrb[61].mxu1 }
 0x7d4   : > { %v14943_v44 = vpop.f32.mrb[62].mxu1 }
 0x7d5   : > { %v1965_v50 = vpack.c.bf16 %v14943_v44, %v14942_v43  ;;  %v1948_v49 = vpop.f32.mrb[63].mxu1  ;;  %14951 = vmatpush3.bf16.msra.mxu0 %v1963_v41 }
 0x7d6   : > { %v1964_v51 = vpack.c.bf16 %v1948_v49, %v1945_v19 }
 0x7d8   : > { %14952 = vmatprep.subr.bf16.mxu0 %v1964_v51 }
 0x7d9   : > { %14953 = vmatpush3.bf16.msra.mxu0 %v1964_v51  ;;  %v2069_v51 = vunpack.c.l.bf16 %v17853_v24 }
 0x7da   : > { %14954 = vmatprep.subr.bf16.mxu0 %v1965_v50 }
 0x7dd   : > { %14955 = vmatpush3.bf16.msra.mxu0 %v1965_v50 }
 0x7e0   : > { %14957 = vmatmul.mubr.msk.bf16.vlgmr.msra.gmra.mrb[60].mxu0 %vm687_vm3, %v17864_v12 }
 0x7e1   : > { %14960 = vmatprep.mubr.msk.bf16.mxu0 %vm687_vm3, %v17871_v52 }
 0x7e8   : > { %14961 = vmatmul.mubr.msk.bf16.gmra.mrb[64].mxu0 %vm687_vm3, %v17878_v54 }
 0x7e9   : > { %14964 = vmatprep.mubr.msk.bf16.mxu0 %vm687_vm3, %v17885_v45 }
 0x7f0   : > { %14965 = vmatmul.mubr.msk.bf16.gmra.mrb[68].mxu0 %vm687_vm3, %v17892_v48 }
 0x7f1   : > { %15012 = vmatprep.mubr.msk.bf16.mxu0 %vm687_vm3, %v17899_v59 }
 0x8b3   : > { %v14958_v60 = vpop.f32.mrb[60].mxu0 }
 0x8b4   : > { %v2009_v62 = vadd.f32 %v17906_v61, %v14958_v60  ;;  %v2000_v20 = vpop.f32.mrb[61].mxu0 }
 0x8b5   : > { %v2001_v57 = vadd.f32 %v17906_v61, %v2000_v20  ;;  %v14959_v11 = vpop.f32.mrb[62].mxu0 }
 0x8b6   : > { %v2049_v63 = vmax.f32 %v2009_v62, 0.0  ;;  %v2012_v0 = vadd.f32 %v17906_v61, %v14959_v11  ;;  %v2003_v3 = vpop.f32.mrb[63].mxu0  ;;  %v2070_v62 = vunpack.c.h.bf16 %v17853_v24  ;;  %v2067_v11 = vunpack.c.l.bf16 %v17846_v23 }
 0x8b7   : > { %v2047_v4 = vmax.f32 %v2001_v57, 0.0  ;;  %v2004_v8 = vadd.f32 %v17906_v61, %v2003_v3 }
 0x8b8   : > { %v2050_v32 = vmax.f32 %v2012_v0, 0.0  ;;  %v2073_v15 = vadd.f32 %v2061_v56, %v2049_v63  ;;  %v2068_v56 = vunpack.c.h.bf16 %v17846_v23  ;;  %v17938_v23 = vld [vmem:[%s17451_s19 + $0xf0] sm:$0xff]  }
 0x8b9   : > { %v2048_v33 = vmax.f32 %v2004_v8, 0.0  ;;  %v2071_v16 = vadd.f32 %v2059_v7, %v2047_v4 }
 0x8ba   : > { %v2074_v34 = vadd.f32 %v2062_v2, %v2050_v32  ;;  %v17944_v32 = vld [vmem:[%s20950_s1] sm:$0xff]  }
 0x8bb   : > { %v2072_v35 = vadd.f32 %v2060_v14, %v2048_v33  ;;  %v14962_v17 = vpop.f32.mrb[64].mxu0  ;;  %v17952_v33 = vld [vmem:[%s17451_s19 + $0xf8] sm:$0xff]  }
 0x8bc   : > { %v2025_v18 = vadd.f32 %v17906_v61, %v14962_v17  ;;  %v2016_v36 = vpop.f32.mrb[65].mxu0  ;;  %v2084_v22 = vpack.c.bf16 %v2074_v34, %v2073_v15  ;;  %v17956_v15 = vld [vmem:[%s17451_s19 + $0x100] sm:$0xff]   ;;  %v17965_v34 = vld [vmem:[%s17451_s19 + $0x108] sm:$0xff]  }
 0x8bd   : > { %v2017_v13 = vadd.f32 %v17906_v61, %v2016_v36  ;;  %v14963_v47 = vpop.f32.mrb[66].mxu0  ;;  %v2083_v46 = vpack.c.bf16 %v2072_v35, %v2071_v16  ;;  %v17968_v16 = vld [vmem:[%s17451_s19 + $0x110] sm:$0xff]   ;;  %v17975_v35 = vld [vmem:[%s17451_s19 + $0x118] sm:$0xff]  }
 0x8be   : > { %v2053_v25 = vmax.f32 %v2025_v18, 0.0  ;;  %v2028_v38 = vadd.f32 %v17906_v61, %v14963_v47  ;;  %v2019_v27 = vpop.f32.mrb[67].mxu0 }
 0x8bf   : > { %v2051_v28 = vmax.f32 %v2017_v13, 0.0  ;;  %v2020_v29 = vadd.f32 %v17906_v61, %v2019_v27  ;;  %14969 = vmatpush3.bf16.msra.mxu1 %v2083_v46 }
 0x8c0   : > { %v2054_v31 = vmax.f32 %v2028_v38, 0.0  ;;  %14970 = vmatprep.subr.bf16.mxu1 %v17345_v37  ;;  %v2077_v40 = vadd.f32 %v2065_v10, %v2053_v25 }
 0x8c1   : > { %v2052_v39 = vmax.f32 %v2020_v29, 0.0  ;;  %v2075_v41 = vadd.f32 %v2063_v9, %v2051_v28 }
 0x8c2   : > { %v2078_v1 = vadd.f32 %v2066_v26, %v2054_v31 }
 0x8c3   : > { %v2076_v42 = vadd.f32 %v2064_v30, %v2052_v39  ;;  %v14966_v58 = vpop.f32.mrb[68].mxu0  ;;  %14971 = vmatpush3.bf16.msra.mxu1 %v2084_v22 }
 0x8c4   : > { %v2041_v53 = vadd.f32 %v17906_v61, %v14966_v58  ;;  %v2032_v43 = vpop.f32.mrb[69].mxu0  ;;  %14972 = vmatprep.subr.bf16.mxu1 %v17345_v37  ;;  %v2086_v19 = vpack.c.bf16 %v2078_v1, %v2077_v40  ;;  %v17997_v58 = vld [vmem:[%s17451_s19 + $0x120] sm:$0xff]  }
 0x8c5   : > { %v2033_v44 = vadd.f32 %v17906_v61, %v2032_v43  ;;  %v14967_v55 = vpop.f32.mrb[70].mxu0  ;;  %v2085_v50 = vpack.c.bf16 %v2076_v42, %v2075_v41  ;;  %v18007_v43 = vld [vmem:[%s17451_s19 + $0x130] sm:$0xff]  }
 0x8c6   : > { %v2057_v49 = vmax.f32 %v2041_v53, 0.0  ;;  %v2044_v60 = vadd.f32 %v17906_v61, %v14967_v55  ;;  %v2035_v20 = vpop.f32.mrb[71].mxu0  ;;  %v18004_v53 = vld [vmem:[%s17451_s19 + $0x128] sm:$0xff]  }
 0x8c7   : > { %v2055_v57 = vmax.f32 %v2033_v44, 0.0  ;;  %v2036_v63 = vadd.f32 %v17906_v61, %v2035_v20  ;;  %14973 = vmatpush3.bf16.msra.mxu1 %v2085_v50  ;;  %v18017_v44 = vld [vmem:[%s17451_s19 + $0x140] sm:$0xff]   ;;  %v18024_v55 = vld [vmem:[%s17451_s19 + $0x148] sm:$0xff]  }
 0x8c8   : > { %v2058_v0 = vmax.f32 %v2044_v60, 0.0  ;;  %14974 = vmatprep.subr.bf16.mxu1 %v17345_v37  ;;  %v2081_v3 = vadd.f32 %v2069_v51, %v2057_v49 }
 0x8c9   : > { %v2056_v2 = vmax.f32 %v2036_v63, 0.0  ;;  %v2079_v7 = vadd.f32 %v2067_v11, %v2055_v57  ;;  %v2374_v57 = vunpack.c.l.bf16 %v17952_v33  ;;  %v2375_v63 = vunpack.c.h.bf16 %v17952_v33 }
 0x8ca   : > { %v2082_v4 = vadd.f32 %v2070_v62, %v2058_v0 }
 0x8cb   : > { %v2080_v8 = vadd.f32 %v2068_v56, %v2056_v2  ;;  %14975 = vmatpush3.bf16.msra.mxu1 %v2086_v19  ;;  %v18014_v19 = vld [vmem:[%s17451_s19 + $0x138] sm:$0xff]   ;;  %v2372_v2 = vunpack.c.l.bf16 %v17938_v23 }
 0x8cc   : > { %14976 = vmatprep.subr.bf16.mxu1 %v17345_v37  ;;  %v2088_v24 = vpack.c.bf16 %v2082_v4, %v2081_v3  ;;  %v2373_v4 = vunpack.c.h.bf16 %v17938_v23 }
 0x8cd   : > { %v2087_v14 = vpack.c.bf16 %v2080_v8, %v2079_v7 }
 0x8cf   : > { %14977 = vmatpush3.bf16.msra.mxu1 %v2087_v14 }
 0x8d0   : > { %14978 = vmatprep.subr.bf16.mxu1 %v17345_v37 }
 0x8d3   : > { %14979 = vmatpush3.bf16.msra.mxu1 %v2088_v24 }
 0x8d4   : > { %14984 = vmatprep.subr.bf16.mxu1 %v17821_v21 }
 0x8d6   : > { %14981 = vmatmul.mubr.msk.bf16.vlgmr.msra.gmra.mrb[64].mxu1 %vm687_vm3, %v17944_v32 }
 0x8d7   : > { %14985 = vmatpush3.bf16.msra.mxu1 %v17821_v21  ;;  %14988 = vmatprep.mubr.msk.bf16.mxu1 %vm544_vm2, %v17938_v23 }
 0x8d8   : > { %14986 = vmatprep.subr.bf16.mxu1 %v17444_v6 }
 0x8db   : > { %14987 = vmatpush3.bf16.msra.mxu1 %v17444_v6 }
 0x8dc   : > { %15024 = vmatprep.subr.bf16.mxu1 %v17345_v37 }
 0x8de   : > { %14989 = vmatmul.mubr.msk.bf16.vlgmr.msra.gmra.mrb[68].mxu1 %vm544_vm2, %v17952_v33 }
 0x8df   : > { %14992 = vmatprep.mubr.msk.bf16.mxu1 %vm544_vm2, %v17956_v15 }
 0x8e6   : > { %14993 = vmatmul.mubr.msk.bf16.gmra.mrb[72].mxu1 %vm544_vm2, %v17965_v34 }
 0x8e7   : > { %14996 = vmatprep.mubr.msk.bf16.mxu1 %vm544_vm2, %v17968_v16 }
 0x8ee   : > { %14997 = vmatmul.mubr.msk.bf16.gmra.mrb[76].mxu1 %vm544_vm2, %v17975_v35 }
 0x8ef   : > { %15036 = vmatprep.mubr.msk.bf16.mxu1 %vm17346_vm4, %v17345_v37 }
 0x9a9   : > { %v2123_v17 = vpop.f32.mrb[64].mxu1 }
 0x9aa   : > { %2130 = vst.msk [vmem:[#allocation2 + $0x40] sm:$0xff] %vm544_vm2, %v2123_v17  ;;  %v14982_v18 = vpop.f32.mrb[65].mxu1 }
 0x9ab   : > { %v2126_v36 = vpop.f32.mrb[66].mxu1 }
 0x9ac   : > { %2131 = vst.msk [vmem:[#allocation2 + $0x48] sm:$0xff] %vm544_vm2, %v2126_v36  ;;  %v14983_v22 = vpop.f32.mrb[67].mxu1 }
 0x9b1   : > { %v14990_v13 = vpop.f32.mrb[68].mxu1 }
 0x9b2   : > { %v2226_v47 = vpop.f32.mrb[69].mxu1 }
 0x9b3   : > { %v14991_v46 = vpop.f32.mrb[70].mxu1 }
 0x9b4   : > { %v2274_v25 = vpack.c.bf16 %v14991_v46, %v14990_v13  ;;  %v2229_v10 = vpop.f32.mrb[71].mxu1 }
 0x9b5   : > { %v2273_v38 = vpack.c.bf16 %v2229_v10, %v2226_v47 }
 0x9b7   : > { %15000 = vmatprep.subr.bf16.mxu0 %v2273_v38 }
 0x9b8   : > { %15001 = vmatpush3.bf16.msra.mxu0 %v2273_v38  ;;  %v2378_v38 = vunpack.c.l.bf16 %v17965_v34 }
 0x9b9   : > { %v14994_v26 = vpop.f32.mrb[72].mxu1  ;;  %15002 = vmatprep.subr.bf16.mxu0 %v2274_v25 }
 0x9ba   : > { %v2242_v27 = vpop.f32.mrb[73].mxu1 }
 0x9bb   : > { %v14995_v28 = vpop.f32.mrb[74].mxu1 }
 0x9bc   : > { %v2276_v9 = vpack.c.bf16 %v14995_v28, %v14994_v26  ;;  %v2245_v29 = vpop.f32.mrb[75].mxu1  ;;  %15003 = vmatpush3.bf16.msra.mxu0 %v2274_v25  ;;  %v2379_v26 = vunpack.c.h.bf16 %v17965_v34 }
 0x9bd   : > { %v2275_v30 = vpack.c.bf16 %v2245_v29, %v2242_v27 }
 0x9bf   : > { %15004 = vmatprep.subr.bf16.mxu0 %v2275_v30 }
 0x9c0   : > { %15005 = vmatpush3.bf16.msra.mxu0 %v2275_v30  ;;  %v2377_v30 = vunpack.c.h.bf16 %v17956_v15 }
 0x9c1   : > { %v14998_v31 = vpop.f32.mrb[76].mxu1  ;;  %15006 = vmatprep.subr.bf16.mxu0 %v2276_v9 }
 0x9c2   : > { %v2258_v39 = vpop.f32.mrb[77].mxu1 }
 0x9c3   : > { %v14999_v40 = vpop.f32.mrb[78].mxu1 }
 0x9c4   : > { %v2278_v1 = vpack.c.bf16 %v14999_v40, %v14998_v31  ;;  %v2261_v41 = vpop.f32.mrb[79].mxu1  ;;  %15007 = vmatpush3.bf16.msra.mxu0 %v2276_v9  ;;  %v2376_v9 = vunpack.c.l.bf16 %v17956_v15 }
 0x9c5   : > { %v2277_v42 = vpack.c.bf16 %v2261_v41, %v2258_v39 }
 0x9c7   : > { %15008 = vmatprep.subr.bf16.mxu0 %v2277_v42 }
 0x9c8   : > { %15009 = vmatpush3.bf16.msra.mxu0 %v2277_v42 }
 0x9c9   : > { %15010 = vmatprep.subr.bf16.mxu0 %v2278_v1 }
 0x9cc   : > { %15011 = vmatpush3.bf16.msra.mxu0 %v2278_v1 }
 0x9cd   : > { %15040 = vmatprep.subr.bf16.mxu0 %v17821_v21 }
 0x9cf   : > { %15013 = vmatmul.mubr.msk.bf16.vlgmr.msra.gmra.mrb[72].mxu0 %vm687_vm3, %v17864_v12 }
 0x9d0   : > { %15041 = vmatpush3.bf16.msra.mxu0 %v17821_v21  ;;  %15016 = vmatprep.mubr.msk.bf16.mxu0 %vm687_vm3, %v17871_v52 }
 0x9d1   : > { %15042 = vmatprep.subr.bf16.mxu0 %v17444_v6 }
 0x9d4   : > { %15043 = vmatpush3.bf16.msra.mxu0 %v17444_v6 }
 0x9d5   : > { %15080 = vmatprep.subr.bf16.mxu0 %v17345_v37 }
 0x9d7   : > { %15017 = vmatmul.mubr.msk.bf16.gmra.mrb[76].mxu0 %vm687_vm3, %v17878_v54 }
 0x9d8   : > { %15020 = vmatprep.mubr.msk.bf16.mxu0 %vm687_vm3, %v17885_v45 }
 0x9df   : > { %15021 = vmatmul.mubr.msk.bf16.gmra.mrb[80].mxu0 %vm687_vm3, %v17892_v48 }
 0x9e0   : > { %15044 = vmatprep.mubr.msk.bf16.mxu0 %vm544_vm2, %v17997_v58 }
 0x9e7   : > { %15045 = vmatmul.mubr.msk.bf16.vlgmr.msra.gmra.mrb[84].mxu0 %vm544_vm2, %v18004_v53 }
 0x9e8   : > { %15048 = vmatprep.mubr.msk.bf16.mxu0 %vm544_vm2, %v18007_v43 }
 0x9ef   : > { %15049 = vmatmul.mubr.msk.bf16.gmra.mrb[88].mxu0 %vm544_vm2, %v18014_v19 }
 0x9f0   : > { %15052 = vmatprep.mubr.msk.bf16.mxu0 %vm544_vm2, %v18017_v44 }
 0x9f7   : > { %15053 = vmatmul.mubr.msk.bf16.gmra.mrb[92].mxu0 %vm544_vm2, %v18024_v55 }
 0x9f8   : > { %15092 = vmatprep.mubr.msk.bf16.mxu0 %vm17346_vm4, %v17345_v37 }
 0xaa2   : > { %v15014_v50 = vpop.f32.mrb[72].mxu0 }
 0xaa3   : > { %v2322_v49 = vadd.f32 %v17906_v61, %v15014_v50  ;;  %v2313_v51 = vpop.f32.mrb[73].mxu0 }
 0xaa4   : > { %v2314_v60 = vadd.f32 %v17906_v61, %v2313_v51  ;;  %v15015_v62 = vpop.f32.mrb[74].mxu0 }
 0xaa5   : > { %v2362_v20 = vmax.f32 %v2322_v49, 0.0  ;;  %v2325_v11 = vadd.f32 %v17906_v61, %v15015_v62  ;;  %v2316_v56 = vpop.f32.mrb[75].mxu0 }
 0xaa6   : > { %v2360_v0 = vmax.f32 %v2314_v60, 0.0  ;;  %v2317_v3 = vadd.f32 %v17906_v61, %v2316_v56 }
 0xaa7   : > { %v2363_v7 = vmax.f32 %v2325_v11, 0.0  ;;  %v2386_v24 = vadd.f32 %v2374_v57, %v2362_v20  ;;  %v2382_v57 = vunpack.c.l.bf16 %v17975_v35 }
 0xaa8   : > { %v2361_v8 = vmax.f32 %v2317_v3, 0.0  ;;  %v2384_v17 = vadd.f32 %v2372_v2, %v2360_v0  ;;  %v2380_v2 = vunpack.c.l.bf16 %v17968_v16 }
 0xaa9   : > { %v2387_v14 = vadd.f32 %v2375_v63, %v2363_v7  ;;  %v2383_v63 = vunpack.c.h.bf16 %v17975_v35 }
 0xaaa   : > { %v2385_v18 = vadd.f32 %v2373_v4, %v2361_v8  ;;  %v15018_v36 = vpop.f32.mrb[76].mxu0  ;;  %v2381_v4 = vunpack.c.h.bf16 %v17968_v16 }
 0xaab   : > { %v2338_v22 = vadd.f32 %v17906_v61, %v15018_v36  ;;  %v2329_v13 = vpop.f32.mrb[77].mxu0  ;;  %v2397_v47 = vpack.c.bf16 %v2387_v14, %v2386_v24 }
 0xaac   : > { %v2330_v33 = vadd.f32 %v17906_v61, %v2329_v13  ;;  %v15019_v46 = vpop.f32.mrb[78].mxu0  ;;  %v2396_v25 = vpack.c.bf16 %v2385_v18, %v2384_v17 }
 0xaad   : > { %v2366_v10 = vmax.f32 %v2338_v22, 0.0  ;;  %v2341_v23 = vadd.f32 %v17906_v61, %v15019_v46  ;;  %v2332_v27 = vpop.f32.mrb[79].mxu0 }
 0xaae   : > { %v2364_v28 = vmax.f32 %v2330_v33, 0.0  ;;  %v2333_v29 = vadd.f32 %v17906_v61, %v2332_v27  ;;  %15025 = vmatpush3.bf16.msra.mxu1 %v2396_v25 }
 0xaaf   : > { %v2367_v31 = vmax.f32 %v2341_v23, 0.0  ;;  %15026 = vmatprep.subr.bf16.mxu1 %v17345_v37  ;;  %v2390_v40 = vadd.f32 %v2378_v38, %v2366_v10 }
 0xab0   : > { %v2365_v39 = vmax.f32 %v2333_v29, 0.0  ;;  %v2388_v41 = vadd.f32 %v2376_v9, %v2364_v28 }
 0xab1   : > { %v2391_v1 = vadd.f32 %v2379_v26, %v2367_v31 }
 0xab2   : > { %v2389_v42 = vadd.f32 %v2377_v30, %v2365_v39  ;;  %v15022_v50 = vpop.f32.mrb[80].mxu0  ;;  %15027 = vmatpush3.bf16.msra.mxu1 %v2397_v47 }
 0xab3   : > { %v2354_v34 = vadd.f32 %v17906_v61, %v15022_v50  ;;  %v2345_v49 = vpop.f32.mrb[81].mxu0  ;;  %15028 = vmatprep.subr.bf16.mxu1 %v17345_v37  ;;  %v2399_v51 = vpack.c.bf16 %v2391_v1, %v2390_v40 }
 0xab4   : > { %v2346_v60 = vadd.f32 %v17906_v61, %v2345_v49  ;;  %v15023_v15 = vpop.f32.mrb[82].mxu0  ;;  %v2398_v62 = vpack.c.bf16 %v2389_v42, %v2388_v41 }
 0xab5   : > { %v2370_v20 = vmax.f32 %v2354_v34, 0.0  ;;  %v2357_v11 = vadd.f32 %v17906_v61, %v15023_v15  ;;  %v2348_v56 = vpop.f32.mrb[83].mxu0 }
 0xab6   : > { %v2368_v0 = vmax.f32 %v2346_v60, 0.0  ;;  %v2349_v3 = vadd.f32 %v17906_v61, %v2348_v56  ;;  %15029 = vmatpush3.bf16.msra.mxu1 %v2398_v62  ;;  %v2687_v62 = vunpack.c.l.bf16 %v18004_v53  ;;  %v2685_v56 = vunpack.c.l.bf16 %v17997_v58 }
 0xab7   : > { %v2371_v7 = vmax.f32 %v2357_v11, 0.0  ;;  %15030 = vmatprep.subr.bf16.mxu1 %v17345_v37  ;;  %v2394_v24 = vadd.f32 %v2382_v57, %v2370_v20  ;;  %v2688_v57 = vunpack.c.h.bf16 %v18004_v53 }
 0xab8   : > { %v2369_v8 = vmax.f32 %v2349_v3, 0.0  ;;  %v2392_v17 = vadd.f32 %v2380_v2, %v2368_v0  ;;  %v2686_v2 = vunpack.c.h.bf16 %v17997_v58 }
 0xab9   : > { %v2395_v14 = vadd.f32 %v2383_v63, %v2371_v7 }
 0xaba   : > { %v2393_v18 = vadd.f32 %v2381_v4, %v2369_v8  ;;  %15031 = vmatpush3.bf16.msra.mxu1 %v2399_v51  ;;  %v15046_v36 = vpop.f32.mrb[84].mxu0 }
 0xabb   : > { %15032 = vmatprep.subr.bf16.mxu1 %v17345_v37  ;;  %v2539_v35 = vpop.f32.mrb[85].mxu0  ;;  %v2401_v22 = vpack.c.bf16 %v2395_v14, %v2394_v24 }
 0xabc   : > { %v2400_v13 = vpack.c.bf16 %v2393_v18, %v2392_v17  ;;  %v15047_v47 = vpop.f32.mrb[86].mxu0 }
 0xabd   : > { %v2587_v33 = vpack.c.bf16 %v15047_v47, %v15046_v36  ;;  %v2542_v46 = vpop.f32.mrb[87].mxu0 }
 0xabe   : > { %15033 = vmatpush3.bf16.msra.mxu1 %v2400_v13  ;;  %v2586_v16 = vpack.c.bf16 %v2542_v46, %v2539_v35  ;;  %v2692_v46 = vunpack.c.h.bf16 %v18014_v19 }
 0xabf   : > { %15034 = vmatprep.subr.bf16.mxu1 %v17345_v37 }
 0xac2   : > { %15035 = vmatpush3.bf16.msra.mxu1 %v2401_v22  ;;  %v15050_v25 = vpop.f32.mrb[88].mxu0 }
 0xac3   : > { %15056 = vmatprep.subr.bf16.mxu1 %v2586_v16  ;;  %v2555_v10 = vpop.f32.mrb[89].mxu0 }
 0xac4   : > { %v15051_v38 = vpop.f32.mrb[90].mxu0 }
 0xac5   : > { %15037 = vmatmul.mubr.msk.bf16.vlgmr.msra.gmra.mrb[80].mxu1 %vm687_vm3, %v17944_v32  ;;  %v2589_v23 = vpack.c.bf16 %v15051_v38, %v15050_v25  ;;  %v2558_v26 = vpop.f32.mrb[91].mxu0 }
 0xac6   : > { %15057 = vmatpush3.bf16.msra.mxu1 %v2586_v16  ;;  %v2588_v27 = vpack.c.bf16 %v2558_v26, %v2555_v10  ;;  %15068 = vmatprep.mubr.msk.bf16.mxu1 %vm687_vm3, %v17899_v59  ;;  %v2689_v10 = vunpack.c.l.bf16 %v18007_v43 }
 0xac7   : > { %15058 = vmatprep.subr.bf16.mxu1 %v2587_v33 }
 0xaca   : > { %15059 = vmatpush3.bf16.msra.mxu1 %v2587_v33  ;;  %v15054_v28 = vpop.f32.mrb[92].mxu0  ;;  %v2691_v33 = vunpack.c.l.bf16 %v18014_v19 }
 0xacb   : > { %15060 = vmatprep.subr.bf16.mxu1 %v2588_v27  ;;  %v2571_v9 = vpop.f32.mrb[93].mxu0 }
 0xacc   : > { %v15055_v29 = vpop.f32.mrb[94].mxu0 }
 0xacd   : > { %v2591_v30 = vpack.c.bf16 %v15055_v29, %v15054_v28  ;;  %v2574_v31 = vpop.f32.mrb[95].mxu0 }
 0xace   : > { %15061 = vmatpush3.bf16.msra.mxu1 %v2588_v27  ;;  %v2590_v39 = vpack.c.bf16 %v2574_v31, %v2571_v9 }
 0xacf   : > { %15062 = vmatprep.subr.bf16.mxu1 %v2589_v23 }
 0xad2   : > { %15063 = vmatpush3.bf16.msra.mxu1 %v2589_v23  ;;  %v2690_v23 = vunpack.c.h.bf16 %v18007_v43 }
 0xad3   : > { %15064 = vmatprep.subr.bf16.mxu1 %v2590_v39 }
 0xad6   : > { %15065 = vmatpush3.bf16.msra.mxu1 %v2590_v39 }
 0xad7   : > { %15066 = vmatprep.subr.bf16.mxu1 %v2591_v30 }
 0xada   : > { %15067 = vmatpush3.bf16.msra.mxu1 %v2591_v30 }
 0xadd   : > { %15069 = vmatmul.mubr.msk.bf16.vlgmr.msra.gmra.mrb[84].mxu1 %vm687_vm3, %v17864_v12 }
 0xade   : > { %15072 = vmatprep.mubr.msk.bf16.mxu1 %vm687_vm3, %v17871_v52 }
 0xae5   : > { %15073 = vmatmul.mubr.msk.bf16.gmra.mrb[88].mxu1 %vm687_vm3, %v17878_v54 }
 0xae6   : > { %15076 = vmatprep.mubr.msk.bf16.mxu1 %vm687_vm3, %v17885_v45 }
 0xaed   : > { %15077 = vmatmul.mubr.msk.bf16.gmra.mrb[92].mxu1 %vm687_vm3, %v17892_v48 }
 0xaee   : > { %15124 = vmatprep.mubr.msk.bf16.mxu1 %vm687_vm3, %v17899_v59 }
 0xb98   : > { %v2436_v40 = vpop.f32.mrb[80].mxu1 }
 0xb99   : > { %2443 = vst.msk [vmem:[#allocation2 + $0x50] sm:$0xff] %vm544_vm2, %v2436_v40  ;;  %v15038_v1 = vpop.f32.mrb[81].mxu1 }
 0xb9a   : > { %v2439_v41 = vpop.f32.mrb[82].mxu1 }
 0xb9b   : > { %2444 = vst.msk [vmem:[#allocation2 + $0x58] sm:$0xff] %vm544_vm2, %v2439_v41  ;;  %v15039_v42 = vpop.f32.mrb[83].mxu1 }
 0xbb0   : > { %v15070_v50 = vpop.f32.mrb[84].mxu1 }
 0xbb1   : > { %v2635_v34 = vadd.f32 %v17906_v61, %v15070_v50  ;;  %v2626_v49 = vpop.f32.mrb[85].mxu1  ;;  %v2695_v50 = vunpack.c.l.bf16 %v18024_v55 }
 0xbb2   : > { %v2627_v51 = vadd.f32 %v17906_v61, %v2626_v49  ;;  %v15071_v60 = vpop.f32.mrb[86].mxu1  ;;  %v2696_v49 = vunpack.c.h.bf16 %v18024_v55 }
 0xbb3   : > { %v2675_v15 = vmax.f32 %v2635_v34, 0.0  ;;  %v2638_v20 = vadd.f32 %v17906_v61, %v15071_v60  ;;  %v2629_v11 = vpop.f32.mrb[87].mxu1 }
 0xbb4   : > { %v2673_v63 = vmax.f32 %v2627_v51, 0.0  ;;  %v2630_v0 = vadd.f32 %v17906_v61, %v2629_v11 }
 0xbb5   : > { %v2676_v3 = vmax.f32 %v2638_v20, 0.0  ;;  %v2699_v7 = vadd.f32 %v2687_v62, %v2675_v15  ;;  %v2693_v15 = vunpack.c.l.bf16 %v18017_v44  ;;  %v2694_v20 = vunpack.c.h.bf16 %v18017_v44  ;;  %v18107_v44 = vld [vmem:[%s17451_s19 + $0x150] sm:$0xff]  }
 0xbb6   : > { %v2674_v4 = vmax.f32 %v2630_v0, 0.0  ;;  %v2697_v24 = vadd.f32 %v2685_v56, %v2673_v63 }
 0xbb7   : > { %v2700_v8 = vadd.f32 %v2688_v57, %v2676_v3 }
 0xbb8   : > { %v2698_v14 = vadd.f32 %v2686_v2, %v2674_v4  ;;  %v15074_v17 = vpop.f32.mrb[88].mxu1  ;;  %v18116_v4 = vld [vmem:[%s17451_s19 + $0x158] sm:$0xff]  }
 0xbb9   : > { %v2651_v18 = vadd.f32 %v17906_v61, %v15074_v17  ;;  %v2642_v36 = vpop.f32.mrb[89].mxu1  ;;  %v2710_v35 = vpack.c.bf16 %v2700_v8, %v2699_v7  ;;  %v18120_v7 = vld [vmem:[%s17451_s19 + $0x160] sm:$0xff]   ;;  %v18132_v8 = vld [vmem:[%s17451_s19 + $0x170] sm:$0xff]  }
 0xbba   : > { %v2643_v53 = vadd.f32 %v17906_v61, %v2642_v36  ;;  %v15075_v22 = vpop.f32.mrb[90].mxu1  ;;  %v2709_v13 = vpack.c.bf16 %v2698_v14, %v2697_v24  ;;  %v18139_v24 = vld [vmem:[%s17451_s19 + $0x178] sm:$0xff]  }
 0xbbb   : > { %v2679_v47 = vmax.f32 %v2651_v18, 0.0  ;;  %v2654_v58 = vadd.f32 %v17906_v61, %v15075_v22  ;;  %v2645_v16 = vpop.f32.mrb[91].mxu1 }
 0xbbc   : > { %v2677_v25 = vmax.f32 %v2643_v53, 0.0  ;;  %v2646_v38 = vadd.f32 %v17906_v61, %v2645_v16  ;;  %15081 = vmatpush3.bf16.msra.mxu0 %v2709_v13 }
 0xbbd   : > { %v2680_v26 = vmax.f32 %v2654_v58, 0.0  ;;  %15082 = vmatprep.subr.bf16.mxu0 %v17345_v37  ;;  %v2703_v28 = vadd.f32 %v2691_v33, %v2679_v47 }
 0xbbe   : > { %v2678_v27 = vmax.f32 %v2646_v38, 0.0  ;;  %v2701_v29 = vadd.f32 %v2689_v10, %v2677_v25 }
 0xbbf   : > { %v2704_v9 = vadd.f32 %v2692_v46, %v2680_v26 }
 0xbc0   : > { %v2702_v30 = vadd.f32 %v2690_v23, %v2678_v27  ;;  %v15078_v31 = vpop.f32.mrb[92].mxu1  ;;  %15083 = vmatpush3.bf16.msra.mxu0 %v2710_v35 }
 0xbc1   : > { %v2667_v19 = vadd.f32 %v17906_v61, %v15078_v31  ;;  %v2658_v39 = vpop.f32.mrb[93].mxu1  ;;  %15084 = vmatprep.subr.bf16.mxu0 %v17345_v37  ;;  %v2712_v40 = vpack.c.bf16 %v2704_v9, %v2703_v28 }
 0xbc2   : > { %v2659_v1 = vadd.f32 %v17906_v61, %v2658_v39  ;;  %v15079_v43 = vpop.f32.mrb[94].mxu1  ;;  %v2711_v41 = vpack.c.bf16 %v2702_v30, %v2701_v29 }
 0xbc3   : > { %v2683_v42 = vmax.f32 %v2667_v19, 0.0  ;;  %v2670_v34 = vadd.f32 %v17906_v61, %v15079_v43  ;;  %v2661_v51 = vpop.f32.mrb[95].mxu1 }
 0xbc4   : > { %v2681_v60 = vmax.f32 %v2659_v1, 0.0  ;;  %v2662_v62 = vadd.f32 %v17906_v61, %v2661_v51  ;;  %15085 = vmatpush3.bf16.msra.mxu0 %v2711_v41  ;;  %v2999_v41 = vunpack.c.h.bf16 %v18107_v44 }
 0xbc5   : > { %v2684_v57 = vmax.f32 %v2670_v34, 0.0  ;;  %15086 = vmatprep.subr.bf16.mxu0 %v17345_v37  ;;  %v2707_v63 = vadd.f32 %v2695_v50, %v2683_v42 }
 0xbc6   : > { %v2682_v11 = vmax.f32 %v2662_v62, 0.0  ;;  %v2705_v0 = vadd.f32 %v2693_v15, %v2681_v60 }
 0xbc7   : > { %v2708_v56 = vadd.f32 %v2696_v49, %v2684_v57 }
 0xbc8   : > { %v2706_v55 = vadd.f32 %v2694_v20, %v2682_v11  ;;  %15087 = vmatpush3.bf16.msra.mxu0 %v2712_v40  ;;  %v3000_v40 = vunpack.c.l.bf16 %v18116_v4 }
 0xbc9   : > { %15088 = vmatprep.subr.bf16.mxu0 %v17345_v37  ;;  %v2714_v2 = vpack.c.bf16 %v2708_v56, %v2707_v63 }
 0xbca   : > { %v2713_v3 = vpack.c.bf16 %v2706_v55, %v2705_v0 }
 0xbcc   : > { %15089 = vmatpush3.bf16.msra.mxu0 %v2713_v3 }
 0xbcd   : > { %15090 = vmatprep.subr.bf16.mxu0 %v17345_v37 }
 0xbd0   : > { %15091 = vmatpush3.bf16.msra.mxu0 %v2714_v2 }
 0xbd1   : > { %15096 = vmatprep.subr.bf16.mxu0 %v17821_v21 }
 0xbd3   : > { %15093 = vmatmul.mubr.msk.bf16.vlgmr.msra.gmra.mrb[96].mxu0 %vm687_vm3, %v17944_v32 }
 0xbd4   : > { %15097 = vmatpush3.bf16.msra.mxu0 %v17821_v21  ;;  %15100 = vmatprep.mubr.msk.bf16.mxu0 %vm544_vm2, %v18107_v44  ;;  %v18129_v21 = vld [vmem:[%s17451_s19 + $0x168] sm:$0xff]  }
 0xbd5   : > { %15098 = vmatprep.subr.bf16.mxu0 %v17444_v6  ;;  %v3004_v55 = vunpack.c.l.bf16 %v18129_v21  ;;  %v3005_v3 = vunpack.c.h.bf16 %v18129_v21 }
 0xbd8   : > { %15099 = vmatpush3.bf16.msra.mxu0 %v17444_v6 }
 0xbd9   : > { %15136 = vmatprep.subr.bf16.mxu0 %v17345_v37 }
 0xbdb   : > { %15101 = vmatmul.mubr.msk.bf16.vlgmr.msra.gmra.mrb[100].mxu0 %vm544_vm2, %v18116_v4 }
 0xbdc   : > { %15104 = vmatprep.mubr.msk.bf16.mxu0 %vm544_vm2, %v18120_v7 }
 0xbe3   : > { %15105 = vmatmul.mubr.msk.bf16.gmra.mrb[104].mxu0 %vm544_vm2, %v18129_v21 }
 0xbe4   : > { %15108 = vmatprep.mubr.msk.bf16.mxu0 %vm544_vm2, %v18132_v8 }
 0xbeb   : > { %15109 = vmatmul.mubr.msk.bf16.gmra.mrb[108].mxu0 %vm544_vm2, %v18139_v24 }
 0xbec   : > { %15148 = vmatprep.mubr.msk.bf16.mxu0 %vm17346_vm4, %v17345_v37 }
 0xca6   : > { %v2749_v14 = vpop.f32.mrb[96].mxu0 }
 0xca7   : > { %2756 = vst.msk [vmem:[#allocation2 + $0x60] sm:$0xff] %vm544_vm2, %v2749_v14  ;;  %v15094_v17 = vpop.f32.mrb[97].mxu0  ;;  %v3002_v14 = vunpack.c.l.bf16 %v18120_v7 }
 0xca8   : > { %v2752_v18 = vpop.f32.mrb[98].mxu0 }
 0xca9   : > { %2757 = vst.msk [vmem:[#allocation2 + $0x68] sm:$0xff] %vm544_vm2, %v2752_v18  ;;  %v15095_v36 = vpop.f32.mrb[99].mxu0  ;;  %v3003_v18 = vunpack.c.h.bf16 %v18120_v7 }
 0xcae   : > { %v15102_v35 = vpop.f32.mrb[100].mxu0 }
 0xcaf   : > { %v2852_v53 = vpop.f32.mrb[101].mxu0 }
 0xcb0   : > { %v15103_v22 = vpop.f32.mrb[102].mxu0 }
 0xcb1   : > { %v2900_v13 = vpack.c.bf16 %v15103_v22, %v15102_v35  ;;  %v2855_v47 = vpop.f32.mrb[103].mxu0 }
 0xcb2   : > { %v2899_v33 = vpack.c.bf16 %v2855_v47, %v2852_v53 }
 0xcb4   : > { %15112 = vmatprep.subr.bf16.mxu1 %v2899_v33 }
 0xcb5   : > { %15113 = vmatpush3.bf16.msra.mxu1 %v2899_v33 }
 0xcb6   : > { %v15106_v58 = vpop.f32.mrb[104].mxu0  ;;  %15114 = vmatprep.subr.bf16.mxu1 %v2900_v13 }
 0xcb7   : > { %v2868_v46 = vpop.f32.mrb[105].mxu0 }
 0xcb8   : > { %v15107_v16 = vpop.f32.mrb[106].mxu0 }
 0xcb9   : > { %v2902_v25 = vpack.c.bf16 %v15107_v16, %v15106_v58  ;;  %v2871_v10 = vpop.f32.mrb[107].mxu0  ;;  %15115 = vmatpush3.bf16.msra.mxu1 %v2900_v13 }
 0xcba   : > { %v2901_v38 = vpack.c.bf16 %v2871_v10, %v2868_v46 }
 0xcbc   : > { %15116 = vmatprep.subr.bf16.mxu1 %v2901_v38 }
 0xcbd   : > { %15117 = vmatpush3.bf16.msra.mxu1 %v2901_v38  ;;  %v3008_v38 = vunpack.c.l.bf16 %v18139_v24 }
 0xcbe   : > { %v15110_v23 = vpop.f32.mrb[108].mxu0  ;;  %15118 = vmatprep.subr.bf16.mxu1 %v2902_v25 }
 0xcbf   : > { %v2884_v26 = vpop.f32.mrb[109].mxu0 }
 0xcc0   : > { %v15111_v27 = vpop.f32.mrb[110].mxu0 }
 0xcc1   : > { %v2904_v28 = vpack.c.bf16 %v15111_v27, %v15110_v23  ;;  %v2887_v9 = vpop.f32.mrb[111].mxu0  ;;  %15119 = vmatpush3.bf16.msra.mxu1 %v2902_v25 }
 0xcc2   : > { %v2903_v29 = vpack.c.bf16 %v2887_v9, %v2884_v26  ;;  %v3009_v26 = vunpack.c.h.bf16 %v18139_v24  ;;  %v3006_v9 = vunpack.c.l.bf16 %v18132_v8 }
 0xcc4   : > { %15120 = vmatprep.subr.bf16.mxu1 %v2903_v29 }
 0xcc5   : > { %15121 = vmatpush3.bf16.msra.mxu1 %v2903_v29 }
 0xcc6   : > { %15122 = vmatprep.subr.bf16.mxu1 %v2904_v28 }
 0xcc9   : > { %15123 = vmatpush3.bf16.msra.mxu1 %v2904_v28 }
 0xccc   : > { %15125 = vmatmul.mubr.msk.bf16.vlgmr.msra.gmra.mrb[96].mxu1 %vm687_vm3, %v17864_v12 }
 0xccd   : > { %15128 = vmatprep.mubr.msk.bf16.mxu1 %vm687_vm3, %v17871_v52 }
 0xcd4   : > { %15129 = vmatmul.mubr.msk.bf16.gmra.mrb[100].mxu1 %vm687_vm3, %v17878_v54 }
 0xcd5   : > { %15132 = vmatprep.mubr.msk.bf16.mxu1 %vm687_vm3, %v17885_v45  ;;  %v3001_v45 = vunpack.c.h.bf16 %v18116_v4 }
 0xcdc   : > { %15133 = vmatmul.mubr.msk.bf16.gmra.mrb[104].mxu1 %vm687_vm3, %v17892_v48  ;;  %v2998_v48 = vunpack.c.l.bf16 %v18107_v44 }
 0xcdd   : > { %15180 = vmatprep.mubr.msk.bf16.mxu1 %vm687_vm3, %v17899_v59 }
 0xd9f   : > { %v15126_v30 = vpop.f32.mrb[96].mxu1 }
 0xda0   : > { %v2948_v31 = vadd.f32 %v17906_v61, %v15126_v30  ;;  %v2939_v19 = vpop.f32.mrb[97].mxu1  ;;  %v3007_v30 = vunpack.c.h.bf16 %v18132_v8  ;;  %v18194_v8 = vld [vmem:[%s20953_s4] sm:$0xff]  }
 0xda1   : > { %v2940_v12 = vadd.f32 %v17906_v61, %v2939_v19  ;;  %v15127_v39 = vpop.f32.mrb[98].mxu1 }
 0xda2   : > { %v2988_v52 = vmax.f32 %v2948_v31, 0.0  ;;  %v2951_v54 = vadd.f32 %v17906_v61, %v15127_v39  ;;  %v2942_v1 = vpop.f32.mrb[99].mxu1 }
 0xda3   : > { %v2986_v43 = vmax.f32 %v2940_v12, 0.0  ;;  %v2943_v59 = vadd.f32 %v17906_v61, %v2942_v1  ;;  %v18207_v1 = vld [vmem:[%s17451_s19 + $0x190] sm:$0xff]  }
 0xda4   : > { %v2989_v42 = vmax.f32 %v2951_v54, 0.0  ;;  %v3012_v34 = vadd.f32 %v3000_v40, %v2988_v52 }
 0xda5   : > { %v2987_v50 = vmax.f32 %v2943_v59, 0.0  ;;  %v3010_v51 = vadd.f32 %v2998_v48, %v2986_v43  ;;  %v18219_v43 = vld [vmem:[%s17451_s19 + $0x1a0] sm:$0xff]   ;;  %v18226_v48 = vld [vmem:[%s17451_s19 + $0x1a8] sm:$0xff]  }
 0xda6   : > { %v3013_v49 = vadd.f32 %v3001_v45, %v2989_v42  ;;  %v18203_v45 = vld [vmem:[%s17451_s19 + $0x188] sm:$0xff]  }
 0xda7   : > { %v3011_v60 = vadd.f32 %v2999_v41, %v2987_v50  ;;  %v15130_v15 = vpop.f32.mrb[100].mxu1 }
 0xda8   : > { %v2964_v62 = vadd.f32 %v17906_v61, %v15130_v15  ;;  %v2955_v20 = vpop.f32.mrb[101].mxu1  ;;  %v3023_v57 = vpack.c.bf16 %v3013_v49, %v3012_v34 }
 0xda9   : > { %v2956_v11 = vadd.f32 %v17906_v61, %v2955_v20  ;;  %v15131_v63 = vpop.f32.mrb[102].mxu1  ;;  %v3022_v56 = vpack.c.bf16 %v3011_v60, %v3010_v51 }
 0xdaa   : > { %v2992_v0 = vmax.f32 %v2964_v62, 0.0  ;;  %v2967_v2 = vadd.f32 %v17906_v61, %v15131_v63  ;;  %v2958_v44 = vpop.f32.mrb[103].mxu1 }
 0xdab   : > { %v2990_v4 = vmax.f32 %v2956_v11, 0.0  ;;  %v2959_v17 = vadd.f32 %v17906_v61, %v2958_v44  ;;  %15137 = vmatpush3.bf16.msra.mxu0 %v3022_v56 }
 0xdac   : > { %v2993_v36 = vmax.f32 %v2967_v2, 0.0  ;;  %15138 = vmatprep.subr.bf16.mxu0 %v17345_v37  ;;  %v3016_v53 = vadd.f32 %v3004_v55, %v2992_v0 }
 0xdad   : > { %v2991_v35 = vmax.f32 %v2959_v17, 0.0  ;;  %v3014_v13 = vadd.f32 %v3002_v14, %v2990_v4  ;;  %v18238_v17 = vld [vmem:[%s20949_s0 + $0x8] sm:$0xff]  }
 0xdae   : > { %v3017_v22 = vadd.f32 %v3005_v3, %v2993_v36  ;;  %v18256_v36 = vld [vmem:[%s20949_s0 + $0x18] sm:$0xff]  }
 0xdaf   : > { %v3015_v47 = vadd.f32 %v3003_v18, %v2991_v35  ;;  %v15134_v33 = vpop.f32.mrb[104].mxu1  ;;  %15139 = vmatpush3.bf16.msra.mxu0 %v3023_v57  ;;  %v18246_v18 = vld [vmem:[%s20949_s0 + $0x10] sm:$0xff]   ;;  %v18263_v35 = vld [vmem:[%s20949_s0 + $0x20] sm:$0xff]  }
 0xdb0   : > { %v2980_v21 = vadd.f32 %v17906_v61, %v15134_v33  ;;  %v2971_v58 = vpop.f32.mrb[105].mxu1  ;;  %15140 = vmatprep.subr.bf16.mxu0 %v17345_v37  ;;  %v3025_v46 = vpack.c.bf16 %v3017_v22, %v3016_v53  ;;  %v18268_v53 = vld [vmem:[%s17451_s19 + $0x1b0] sm:$0xff]   ;;  %v18273_v22 = vld [vmem:[%s20949_s0 + $0x28] sm:$0xff]  }
 0xdb1   : > { %v2972_v16 = vadd.f32 %v17906_v61, %v2971_v58  ;;  %v15135_v7 = vpop.f32.mrb[106].mxu1  ;;  %v3024_v25 = vpack.c.bf16 %v3015_v47, %v3014_v13  ;;  %v18280_v13 = vld [vmem:[%s17451_s19 + $0x1b8] sm:$0xff]   ;;  %v18283_v47 = vld [vmem:[%s17451_s19 + $0x1c0] sm:$0xff]   ;;  %v18290_v33 = vld [vmem:[%s17451_s19 + $0x1c8] sm:$0xff]  }
 0xdb2   : > { %v2996_v10 = vmax.f32 %v2980_v21, 0.0  ;;  %v2983_v23 = vadd.f32 %v17906_v61, %v15135_v7  ;;  %v2974_v27 = vpop.f32.mrb[107].mxu1  ;;  %v18293_v21 = vld [vmem:[%s17451_s19 + $0x1d0] sm:$0xff]   ;;  %v18300_v58 = vld [vmem:[%s17451_s19 + $0x1d8] sm:$0xff]  }
 0xdb3   : > { %v2994_v28 = vmax.f32 %v2972_v16, 0.0  ;;  %v2975_v29 = vadd.f32 %v17906_v61, %v2974_v27  ;;  %15141 = vmatpush3.bf16.msra.mxu0 %v3024_v25  ;;  %v18189_v61 = vld [vmem:[%s17451_s19 + $0x180] sm:$0xff]  }
 0xdb4   : > { %v2997_v31 = vmax.f32 %v2983_v23, 0.0  ;;  %15142 = vmatprep.subr.bf16.mxu0 %v17345_v37  ;;  %v3020_v12 = vadd.f32 %v3008_v38, %v2996_v10  ;;  %v18309_v16 = vld [vmem:[%s20954_s5] ss:$0 sm:$0xff] }
 0xdb5   : > { %v2995_v19 = vmax.f32 %v2975_v29, 0.0  ;;  %v3018_v52 = vadd.f32 %v3006_v9, %v2994_v28  ;;  %v3314_v28 = vunpack.c.h.bf16 %v18203_v45 }
 0xdb6   : > { %v3021_v39 = vadd.f32 %v3009_v26, %v2997_v31  ;;  %v3313_v26 = vunpack.c.l.bf16 %v18203_v45 }
 0xdb7   : > { %v3019_v40 = vadd.f32 %v3007_v30, %v2995_v19  ;;  %15143 = vmatpush3.bf16.msra.mxu0 %v3025_v46  ;;  %v3311_v30 = vunpack.c.l.bf16 %v18189_v61  ;;  %v3312_v19 = vunpack.c.h.bf16 %v18189_v61 }
 0xdb8   : > { %15144 = vmatprep.subr.bf16.mxu0 %v17345_v37  ;;  %v3027_v24 = vpack.c.bf16 %v3021_v39, %v3020_v12 }
 0xdb9   : > { %v3026_v54 = vpack.c.bf16 %v3019_v40, %v3018_v52 }
 0xdbb   : > { %15145 = vmatpush3.bf16.msra.mxu0 %v3026_v54 }
 0xdbc   : > { %15146 = vmatprep.subr.bf16.mxu0 %v17345_v37 }
 0xdbf   : > { %15147 = vmatpush3.bf16.msra.mxu0 %v3027_v24 }
 0xdc0   : > { %15152 = vmatprep.subr.bf16.mxu0 %v18194_v8 }
 0xdc2   : > { %15149 = vmatmul.mubr.msk.bf16.vlgmr.msra.gmra.mrb[112].mxu0 %vm687_vm3, %v17944_v32  ;;  %v18216_v32 = vld [vmem:[%s17451_s19 + $0x198] sm:$0xff]  }
 0xdc3   : > { %15153 = vmatpush3.bf16.msra.mxu0 %v18194_v8  ;;  %15156 = vmatprep.mubr.msk.bf16.mxu0 %vm544_vm2, %v18189_v61 }
 0xdc4   : > { %15154 = vmatprep.subr.bf16.mxu0 %v17444_v6 }
 0xdc7   : > { %15155 = vmatpush3.bf16.msra.mxu0 %v17444_v6 }
 0xdc8   : > { %15192 = vmatprep.subr.bf16.mxu0 %v17345_v37 }
 0xdca   : > { %15157 = vmatmul.mubr.msk.bf16.vlgmr.msra.gmra.mrb[116].mxu0 %vm544_vm2, %v18203_v45 }
 0xdcb   : > { %15160 = vmatprep.mubr.msk.bf16.mxu0 %vm544_vm2, %v18207_v1 }
 0xdd2   : > { %15161 = vmatmul.mubr.msk.bf16.gmra.mrb[120].mxu0 %vm544_vm2, %v18216_v32 }
 0xdd3   : > { %15164 = vmatprep.mubr.msk.bf16.mxu0 %vm544_vm2, %v18219_v43 }
 0xdda   : > { %15165 = vmatmul.mubr.msk.bf16.gmra.mrb[124].mxu0 %vm544_vm2, %v18226_v48 }
 0xddb   : > { %15204 = vmatprep.mubr.msk.bf16.mxu0 %vm17346_vm4, %v17345_v37 }
 0xe95   : > { %v3062_v59 = vpop.f32.mrb[112].mxu0 }
 0xe96   : > { %3069 = vst.msk [vmem:[#allocation2 + $0x70] sm:$0xff] %vm544_vm2, %v3062_v59  ;;  %v15150_v41 = vpop.f32.mrb[113].mxu0 }
 0xe97   : > { %v3065_v42 = vpop.f32.mrb[114].mxu0 }
 0xe98   : > { %3070 = vst.msk [vmem:[#allocation2 + $0x78] sm:$0xff] %vm544_vm2, %v3065_v42  ;;  %v15151_v50 = vpop.f32.mrb[115].mxu0 }
 0xe9d   : > { %v15158_v34 = vpop.f32.mrb[116].mxu0 }
 0xe9e   : > { %v3165_v49 = vpop.f32.mrb[117].mxu0 }
 0xe9f   : > { %v15159_v51 = vpop.f32.mrb[118].mxu0 }
 0xea0   : > { %v3213_v60 = vpack.c.bf16 %v15159_v51, %v15158_v34  ;;  %v3168_v15 = vpop.f32.mrb[119].mxu0 }
 0xea1   : > { %v3212_v62 = vpack.c.bf16 %v3168_v15, %v3165_v49  ;;  %v3318_v15 = vunpack.c.h.bf16 %v18216_v32 }
 0xea3   : > { %15168 = vmatprep.subr.bf16.mxu1 %v3212_v62 }
 0xea4   : > { %15169 = vmatpush3.bf16.msra.mxu1 %v3212_v62 }
 0xea5   : > { %v15162_v20 = vpop.f32.mrb[120].mxu0  ;;  %15170 = vmatprep.subr.bf16.mxu1 %v3213_v60 }
 0xea6   : > { %v3181_v57 = vpop.f32.mrb[121].mxu0 }
 0xea7   : > { %v15163_v11 = vpop.f32.mrb[122].mxu0 }
 0xea8   : > { %v3215_v63 = vpack.c.bf16 %v15163_v11, %v15162_v20  ;;  %v3184_v56 = vpop.f32.mrb[123].mxu0  ;;  %15171 = vmatpush3.bf16.msra.mxu1 %v3213_v60  ;;  %v3317_v60 = vunpack.c.l.bf16 %v18216_v32 }
 0xea9   : > { %v3214_v0 = vpack.c.bf16 %v3184_v56, %v3181_v57  ;;  %v3315_v57 = vunpack.c.l.bf16 %v18207_v1 }
 0xeab   : > { %15172 = vmatprep.subr.bf16.mxu1 %v3214_v0 }
 0xeac   : > { %15173 = vmatpush3.bf16.msra.mxu1 %v3214_v0 }
 0xead   : > { %v15166_v55 = vpop.f32.mrb[124].mxu0  ;;  %15174 = vmatprep.subr.bf16.mxu1 %v3215_v63 }
 0xeae   : > { %v3197_v2 = vpop.f32.mrb[125].mxu0 }
 0xeaf   : > { %v15167_v3 = vpop.f32.mrb[126].mxu0 }
 0xeb0   : > { %v3217_v44 = vpack.c.bf16 %v15167_v3, %v15166_v55  ;;  %v3200_v4 = vpop.f32.mrb[127].mxu0  ;;  %15175 = vmatpush3.bf16.msra.mxu1 %v3215_v63  ;;  %v3316_v63 = vunpack.c.h.bf16 %v18207_v1 }
 0xeb1   : > { %v3216_v14 = vpack.c.bf16 %v3200_v4, %v3197_v2 }
 0xeb3   : > { %15176 = vmatprep.subr.bf16.mxu1 %v3216_v14 }
 0xeb4   : > { %15177 = vmatpush3.bf16.msra.mxu1 %v3216_v14 }
 0xeb5   : > { %15178 = vmatprep.subr.bf16.mxu1 %v3217_v44 }
 0xeb8   : > { %15179 = vmatpush3.bf16.msra.mxu1 %v3217_v44 }
 0xeb9   : > { %15208 = vmatprep.subr.bf16.mxu1 %v18194_v8 }
 0xebb   : > { %15181 = vmatmul.mubr.msk.bf16.vlgmr.msra.gmra.mrb[108].mxu1 %vm687_vm3, %v18238_v17 }
 0xebc   : > { %15209 = vmatpush3.bf16.msra.mxu1 %v18194_v8  ;;  %15184 = vmatprep.mubr.msk.bf16.mxu1 %vm687_vm3, %v18246_v18 }
 0xebd   : > { %15210 = vmatprep.subr.bf16.mxu1 %v17444_v6 }
 0xec0   : > { %15211 = vmatpush3.bf16.msra.mxu1 %v17444_v6 }
 0xec1   : > { %15248 = vmatprep.subr.bf16.mxu1 %v17345_v37 }
 0xec3   : > { %15185 = vmatmul.mubr.msk.bf16.gmra.mrb[112].mxu1 %vm687_vm3, %v18256_v36 }
 0xec4   : > { %15188 = vmatprep.mubr.msk.bf16.mxu1 %vm687_vm3, %v18263_v35 }
 0xecb   : > { %15189 = vmatmul.mubr.msk.bf16.gmra.mrb[116].mxu1 %vm687_vm3, %v18273_v22 }
 0xecc   : > { %15212 = vmatprep.mubr.msk.bf16.mxu1 %vm544_vm2, %v18268_v53 }
 0xed3   : > { %15213 = vmatmul.mubr.msk.bf16.vlgmr.msra.gmra.mrb[120].mxu1 %vm544_vm2, %v18280_v13 }
 0xed4   : > { %15216 = vmatprep.mubr.msk.bf16.mxu1 %vm544_vm2, %v18283_v47 }
 0xedb   : > { %15217 = vmatmul.mubr.msk.bf16.gmra.mrb[124].mxu1 %vm544_vm2, %v18290_v33 }
 0xedc   : > { %15220 = vmatprep.mubr.msk.bf16.mxu1 %vm544_vm2, %v18293_v21 }
 0xee3   : > { %15221 = vmatmul.mubr.msk.bf16.gmra.mrb[128].mxu1 %vm544_vm2, %v18300_v58 }
 0xee4   : > { %15260 = vmatprep.mubr.msk.bf16.mxu1 %vm17346_vm4, %v17345_v37 }
 0xf8e   : > { %v15182_v46 = vpop.f32.mrb[108].mxu1 }
 0xf8f   : > { %v3261_v7 = vadd.f32 %v18309_v16, %v15182_v46  ;;  %v3252_v25 = vpop.f32.mrb[109].mxu1 }
 0xf90   : > { %v3253_v10 = vadd.f32 %v18309_v16, %v3252_v25  ;;  %v15183_v38 = vpop.f32.mrb[110].mxu1 }
 0xf91   : > { %v3301_v23 = vmax.f32 %v3261_v7, 0.0  ;;  %v3264_v27 = vadd.f32 %v18309_v16, %v15183_v38  ;;  %v3255_v9 = vpop.f32.mrb[111].mxu1  ;;  %v3321_v38 = vunpack.c.l.bf16 %v18226_v48 }
 0xf92   : > { %v3299_v29 = vmax.f32 %v3253_v10, 0.0  ;;  %v3256_v31 = vadd.f32 %v18309_v16, %v3255_v9  ;;  %v3319_v9 = vunpack.c.l.bf16 %v18219_v43 }
 0xf93   : > { %v3302_v12 = vmax.f32 %v3264_v27, 0.0  ;;  %v3325_v52 = vadd.f32 %v3313_v26, %v3301_v23  ;;  %v3322_v26 = vunpack.c.h.bf16 %v18226_v48 }
 0xf94   : > { %v3300_v39 = vmax.f32 %v3256_v31, 0.0  ;;  %v3323_v24 = vadd.f32 %v3311_v30, %v3299_v29  ;;  %v3320_v30 = vunpack.c.h.bf16 %v18219_v43 }
 0xf95   : > { %v3326_v40 = vadd.f32 %v3314_v28, %v3302_v12 }
 0xf96   : > { %v3324_v54 = vadd.f32 %v3312_v19, %v3300_v39  ;;  %v15186_v59 = vpop.f32.mrb[112].mxu1 }
 0xf97   : > { %v3277_v41 = vadd.f32 %v18309_v16, %v15186_v59  ;;  %v3268_v42 = vpop.f32.mrb[113].mxu1  ;;  %v3336_v50 = vpack.c.bf16 %v3326_v40, %v3325_v52 }
 0xf98   : > { %v3269_v45 = vadd.f32 %v18309_v16, %v3268_v42  ;;  %v15187_v34 = vpop.f32.mrb[114].mxu1  ;;  %v3335_v49 = vpack.c.bf16 %v3324_v54, %v3323_v24 }
 0xf99   : > { %v3305_v51 = vmax.f32 %v3277_v41, 0.0  ;;  %v3280_v61 = vadd.f32 %v18309_v16, %v15187_v34  ;;  %v3271_v62 = vpop.f32.mrb[115].mxu1 }
 0xf9a   : > { %v3303_v20 = vmax.f32 %v3269_v45, 0.0  ;;  %v3272_v11 = vadd.f32 %v18309_v16, %v3271_v62  ;;  %15193 = vmatpush3.bf16.msra.mxu0 %v3335_v49  ;;  %v18350_v62 = vld [vmem:[%s20949_s0] sm:$0xff]  }
 0xf9b   : > { %v3306_v56 = vmax.f32 %v3280_v61, 0.0  ;;  %15194 = vmatprep.subr.bf16.mxu0 %v17345_v37  ;;  %v3329_v55 = vadd.f32 %v3317_v60, %v3305_v51  ;;  %v18343_v51 = vld [vmem:[%s20950_s1] sm:$0xff]  }
 0xf9c   : > { %v3304_v0 = vmax.f32 %v3272_v11, 0.0  ;;  %v3327_v3 = vadd.f32 %v3315_v57, %v3303_v20 }
 0xf9d   : > { %v3330_v2 = vadd.f32 %v3318_v15, %v3306_v56 }
 0xf9e   : > { %v3328_v44 = vadd.f32 %v3316_v63, %v3304_v0  ;;  %v15190_v4 = vpop.f32.mrb[116].mxu1  ;;  %15195 = vmatpush3.bf16.msra.mxu0 %v3336_v50 }
 0xf9f   : > { %v3293_v32 = vadd.f32 %v18309_v16, %v15190_v4  ;;  %v3284_v14 = vpop.f32.mrb[117].mxu1  ;;  %15196 = vmatprep.subr.bf16.mxu0 %v17345_v37  ;;  %v3338_v46 = vpack.c.bf16 %v3330_v2, %v3329_v55 }
 0xfa0   : > { %v3285_v7 = vadd.f32 %v18309_v16, %v3284_v14  ;;  %v15191_v1 = vpop.f32.mrb[118].mxu1  ;;  %v3337_v25 = vpack.c.bf16 %v3328_v44, %v3327_v3 }
 0xfa1   : > { %v3309_v10 = vmax.f32 %v3293_v32, 0.0  ;;  %v3296_v23 = vadd.f32 %v18309_v16, %v15191_v1  ;;  %v3287_v27 = vpop.f32.mrb[119].mxu1 }
 0xfa2   : > { %v3307_v28 = vmax.f32 %v3285_v7, 0.0  ;;  %v3288_v29 = vadd.f32 %v18309_v16, %v3287_v27  ;;  %15197 = vmatpush3.bf16.msra.mxu0 %v3337_v25  ;;  %v3626_v25 = vunpack.c.l.bf16 %v18280_v13  ;;  %v3624_v27 = vunpack.c.l.bf16 %v18268_v53 }
 0xfa3   : > { %v3310_v31 = vmax.f32 %v3296_v23, 0.0  ;;  %15198 = vmatprep.subr.bf16.mxu0 %v17345_v37  ;;  %v3333_v12 = vadd.f32 %v3321_v38, %v3309_v10  ;;  %v3627_v38 = vunpack.c.h.bf16 %v18280_v13 }
 0xfa4   : > { %v3308_v19 = vmax.f32 %v3288_v29, 0.0  ;;  %v3331_v52 = vadd.f32 %v3319_v9, %v3307_v28  ;;  %v3625_v9 = vunpack.c.h.bf16 %v18268_v53 }
 0xfa5   : > { %v3334_v39 = vadd.f32 %v3322_v26, %v3310_v31 }
 0xfa6   : > { %v3332_v40 = vadd.f32 %v3320_v30, %v3308_v19  ;;  %15199 = vmatpush3.bf16.msra.mxu0 %v3338_v46  ;;  %v15214_v24 = vpop.f32.mrb[120].mxu1 }
 0xfa7   : > { %15200 = vmatprep.subr.bf16.mxu0 %v17345_v37  ;;  %v3478_v48 = vpop.f32.mrb[121].mxu1  ;;  %v3340_v54 = vpack.c.bf16 %v3334_v39, %v3333_v12 }
 0xfa8   : > { %v3339_v59 = vpack.c.bf16 %v3332_v40, %v3331_v52  ;;  %v15215_v41 = vpop.f32.mrb[122].mxu1 }
 0xfa9   : > { %v3526_v42 = vpack.c.bf16 %v15215_v41, %v15214_v24  ;;  %v3481_v50 = vpop.f32.mrb[123].mxu1 }
 0xfaa   : > { %15201 = vmatpush3.bf16.msra.mxu0 %v3339_v59  ;;  %v3525_v43 = vpack.c.bf16 %v3481_v50, %v3478_v48  ;;  %v3631_v50 = vunpack.c.h.bf16 %v18290_v33 }
 0xfab   : > { %15202 = vmatprep.subr.bf16.mxu0 %v17345_v37 }
 0xfae   : > { %15203 = vmatpush3.bf16.msra.mxu0 %v3340_v54  ;;  %v15218_v45 = vpop.f32.mrb[124].mxu1 }
 0xfaf   : > { %15224 = vmatprep.subr.bf16.mxu0 %v3525_v43  ;;  %v3494_v34 = vpop.f32.mrb[125].mxu1 }
 0xfb0   : > { %v15219_v49 = vpop.f32.mrb[126].mxu1 }
 0xfb1   : > { %15205 = vmatmul.mubr.msk.bf16.vlgmr.msra.gmra.mrb[128].mxu0 %vm687_vm3, %v18343_v51  ;;  %v3528_v60 = vpack.c.bf16 %v15219_v49, %v15218_v45  ;;  %v3497_v61 = vpop.f32.mrb[127].mxu1 }
 0xfb2   : > { %15225 = vmatpush3.bf16.msra.mxu0 %v3525_v43  ;;  %v3527_v15 = vpack.c.bf16 %v3497_v61, %v3494_v34  ;;  %15236 = vmatprep.mubr.msk.bf16.mxu0 %vm687_vm3, %v18350_v62  ;;  %v3628_v34 = vunpack.c.l.bf16 %v18283_v47 }
 0xfb3   : > { %15226 = vmatprep.subr.bf16.mxu0 %v3526_v42 }
 0xfb6   : > { %15227 = vmatpush3.bf16.msra.mxu0 %v3526_v42  ;;  %v15222_v20 = vpop.f32.mrb[128].mxu1  ;;  %v3630_v42 = vunpack.c.l.bf16 %v18290_v33 }
 0xfb7   : > { %15228 = vmatprep.subr.bf16.mxu0 %v3527_v15  ;;  %v3510_v57 = vpop.f32.mrb[129].mxu1 }
 0xfb8   : > { %v15223_v11 = vpop.f32.mrb[130].mxu1 }
 0xfb9   : > { %v3530_v63 = vpack.c.bf16 %v15223_v11, %v15222_v20  ;;  %v3513_v56 = vpop.f32.mrb[131].mxu1 }
 0xfba   : > { %15229 = vmatpush3.bf16.msra.mxu0 %v3527_v15  ;;  %v3529_v0 = vpack.c.bf16 %v3513_v56, %v3510_v57 }
 0xfbb   : > { %15230 = vmatprep.subr.bf16.mxu0 %v3528_v60 }
 0xfbe   : > { %15231 = vmatpush3.bf16.msra.mxu0 %v3528_v60  ;;  %v3629_v60 = vunpack.c.h.bf16 %v18283_v47 }
 0xfbf   : > { %15232 = vmatprep.subr.bf16.mxu0 %v3529_v0 }
 0xfc2   : > { %15233 = vmatpush3.bf16.msra.mxu0 %v3529_v0 }
 0xfc3   : > { %15234 = vmatprep.subr.bf16.mxu0 %v3530_v63 }
 0xfc6   : > { %15235 = vmatpush3.bf16.msra.mxu0 %v3530_v63 }
 0xfc9   : > { %15237 = vmatmul.mubr.msk.bf16.vlgmr.msra.gmra.mrb[132].mxu0 %vm687_vm3, %v18238_v17 }
 0xfca   : > { %15240 = vmatprep.mubr.msk.bf16.mxu0 %vm687_vm3, %v18246_v18 }
 0xfd1   : > { %15241 = vmatmul.mubr.msk.bf16.gmra.mrb[136].mxu0 %vm687_vm3, %v18256_v36 }
 0xfd2   : > { %15244 = vmatprep.mubr.msk.bf16.mxu0 %vm687_vm3, %v18263_v35 }
 0xfd9   : > { %15245 = vmatmul.mubr.msk.bf16.gmra.mrb[140].mxu0 %vm687_vm3, %v18273_v22 }
 0xfda   : > { %15292 = vmatprep.mubr.msk.bf16.mxu0 %vm687_vm3, %v18350_v62 }
0x1084   : > { %v3375_v55 = vpop.f32.mrb[128].mxu0 }
0x1085   : > { %3382 = vst.msk [vmem:[#allocation2 + $0x80] sm:$0xff] %vm544_vm2, %v3375_v55  ;;  %v15206_v2 = vpop.f32.mrb[129].mxu0 }
0x1086   : > { %v3378_v3 = vpop.f32.mrb[130].mxu0 }
0x1087   : > { %3383 = vst.msk [vmem:[#allocation2 + $0x88] sm:$0xff] %vm544_vm2, %v3378_v3  ;;  %v15207_v44 = vpop.f32.mrb[131].mxu0 }
0x109c   : > { %v15238_v4 = vpop.f32.mrb[132].mxu0 }
0x109d   : > { %v3574_v32 = vadd.f32 %v18309_v16, %v15238_v4  ;;  %v3565_v14 = vpop.f32.mrb[133].mxu0  ;;  %v3634_v4 = vunpack.c.l.bf16 %v18300_v58 }
0x109e   : > { %v3566_v46 = vadd.f32 %v18309_v16, %v3565_v14  ;;  %v15239_v7 = vpop.f32.mrb[134].mxu0  ;;  %v3635_v14 = vunpack.c.h.bf16 %v18300_v58 }
0x109f   : > { %v3614_v1 = vmax.f32 %v3574_v32, 0.0  ;;  %v3577_v10 = vadd.f32 %v18309_v16, %v15239_v7  ;;  %v3568_v23 = vpop.f32.mrb[135].mxu0 }
0x10a0   : > { %v3612_v26 = vmax.f32 %v3566_v46, 0.0  ;;  %v3569_v28 = vadd.f32 %v18309_v16, %v3568_v23 }
0x10a1   : > { %v3615_v29 = vmax.f32 %v3577_v10, 0.0  ;;  %v3638_v31 = vadd.f32 %v3626_v25, %v3614_v1  ;;  %v3632_v1 = vunpack.c.l.bf16 %v18293_v21  ;;  %v3633_v10 = vunpack.c.h.bf16 %v18293_v21  ;;  %v18398_v21 = vld [vmem:[%s17451_s19 + $0x1e0] sm:$0xff]  }
0x10a2   : > { %v3613_v30 = vmax.f32 %v3569_v28, 0.0  ;;  %v3636_v12 = vadd.f32 %v3624_v27, %v3612_v26 }
0x10a3   : > { %v3639_v19 = vadd.f32 %v3627_v38, %v3615_v29 }
0x10a4   : > { %v3637_v39 = vadd.f32 %v3625_v9, %v3613_v30  ;;  %v15242_v52 = vpop.f32.mrb[136].mxu0  ;;  %v18407_v30 = vld [vmem:[%s17451_s19 + $0x1e8] sm:$0xff]  }
0x10a5   : > { %v3590_v40 = vadd.f32 %v18309_v16, %v15242_v52  ;;  %v3581_v24 = vpop.f32.mrb[137].mxu0  ;;  %v3649_v48 = vpack.c.bf16 %v3639_v19, %v3638_v31  ;;  %v18411_v31 = vld [vmem:[%s17451_s19 + $0x1f0] sm:$0xff]   ;;  %v18420_v19 = vld [vmem:[%s17451_s19 + $0x1f8] sm:$0xff]  }
0x10a6   : > { %v3582_v13 = vadd.f32 %v18309_v16, %v3581_v24  ;;  %v15243_v54 = vpop.f32.mrb[138].mxu0  ;;  %v3648_v59 = vpack.c.bf16 %v3637_v39, %v3636_v12  ;;  %v18423_v12 = vld [vmem:[%s17451_s19 + $0x200] sm:$0xff]   ;;  %v18430_v39 = vld [vmem:[%s17451_s19 + $0x208] sm:$0xff]  }
0x10a7   : > { %v3618_v41 = vmax.f32 %v3590_v40, 0.0  ;;  %v3593_v53 = vadd.f32 %v18309_v16, %v15243_v54  ;;  %v3584_v43 = vpop.f32.mrb[139].mxu0 }
0x10a8   : > { %v3616_v45 = vmax.f32 %v3582_v13, 0.0  ;;  %v3585_v49 = vadd.f32 %v18309_v16, %v3584_v43  ;;  %15249 = vmatpush3.bf16.msra.mxu1 %v3648_v59 }
0x10a9   : > { %v3619_v61 = vmax.f32 %v3593_v53, 0.0  ;;  %15250 = vmatprep.subr.bf16.mxu1 %v17345_v37  ;;  %v3642_v20 = vadd.f32 %v3630_v42, %v3618_v41 }
0x10aa   : > { %v3617_v15 = vmax.f32 %v3585_v49, 0.0  ;;  %v3640_v11 = vadd.f32 %v3628_v34, %v3616_v45 }
0x10ab   : > { %v3643_v57 = vadd.f32 %v3631_v50, %v3619_v61 }
0x10ac   : > { %v3641_v63 = vadd.f32 %v3629_v60, %v3617_v15  ;;  %v15246_v56 = vpop.f32.mrb[140].mxu0  ;;  %15251 = vmatpush3.bf16.msra.mxu1 %v3649_v48 }
0x10ad   : > { %v3606_v33 = vadd.f32 %v18309_v16, %v15246_v56  ;;  %v3597_v0 = vpop.f32.mrb[141].mxu0  ;;  %15252 = vmatprep.subr.bf16.mxu1 %v17345_v37  ;;  %v3651_v55 = vpack.c.bf16 %v3643_v57, %v3642_v20 }
0x10ae   : > { %v3598_v2 = vadd.f32 %v18309_v16, %v3597_v0  ;;  %v15247_v47 = vpop.f32.mrb[142].mxu0  ;;  %v3650_v3 = vpack.c.bf16 %v3641_v63, %v3640_v11 }
0x10af   : > { %v3622_v44 = vmax.f32 %v3606_v33, 0.0  ;;  %v3609_v32 = vadd.f32 %v18309_v16, %v15247_v47  ;;  %v3600_v46 = vpop.f32.mrb[143].mxu0 }
0x10b0   : > { %v3620_v7 = vmax.f32 %v3598_v2, 0.0  ;;  %v3601_v25 = vadd.f32 %v18309_v16, %v3600_v46  ;;  %15253 = vmatpush3.bf16.msra.mxu1 %v3650_v3  ;;  %v3939_v3 = vunpack.c.l.bf16 %v18407_v30  ;;  %v3937_v46 = vunpack.c.l.bf16 %v18398_v21 }
0x10b1   : > { %v3623_v38 = vmax.f32 %v3609_v32, 0.0  ;;  %15254 = vmatprep.subr.bf16.mxu1 %v17345_v37  ;;  %v3646_v26 = vadd.f32 %v3634_v4, %v3622_v44  ;;  %v3940_v4 = vunpack.c.h.bf16 %v18407_v30 }
0x10b2   : > { %v3621_v23 = vmax.f32 %v3601_v25, 0.0  ;;  %v3644_v28 = vadd.f32 %v3632_v1, %v3620_v7  ;;  %v3938_v1 = vunpack.c.h.bf16 %v18398_v21 }
0x10b3   : > { %v3647_v27 = vadd.f32 %v3635_v14, %v3623_v38 }
0x10b4   : > { %v3645_v58 = vadd.f32 %v3633_v10, %v3621_v23  ;;  %15255 = vmatpush3.bf16.msra.mxu1 %v3651_v55 }
0x10b5   : > { %15256 = vmatprep.subr.bf16.mxu1 %v17345_v37  ;;  %v3653_v9 = vpack.c.bf16 %v3647_v27, %v3646_v26 }
0x10b6   : > { %v3652_v29 = vpack.c.bf16 %v3645_v58, %v3644_v28 }
0x10b8   : > { %15257 = vmatpush3.bf16.msra.mxu1 %v3652_v29 }
0x10b9   : > { %15258 = vmatprep.subr.bf16.mxu1 %v17345_v37 }
0x10bc   : > { %15259 = vmatpush3.bf16.msra.mxu1 %v3653_v9 }
0x10bd   : > { %15264 = vmatprep.subr.bf16.mxu1 %v18194_v8 }
0x10bf   : > { %15261 = vmatmul.mubr.msk.bf16.vlgmr.msra.gmra.mrb[132].mxu1 %vm687_vm3, %v18343_v51 }
0x10c0   : > { %15265 = vmatpush3.bf16.msra.mxu1 %v18194_v8  ;;  %15268 = vmatprep.mubr.msk.bf16.mxu1 %vm544_vm2, %v18398_v21 }
0x10c1   : > { %15266 = vmatprep.subr.bf16.mxu1 %v17444_v6 }
0x10c4   : > { %15267 = vmatpush3.bf16.msra.mxu1 %v17444_v6 }
0x10c5   : > { %15304 = vmatprep.subr.bf16.mxu1 %v17345_v37 }
0x10c7   : > { %15269 = vmatmul.mubr.msk.bf16.vlgmr.msra.gmra.mrb[136].mxu1 %vm544_vm2, %v18407_v30 }
0x10c8   : > { %15272 = vmatprep.mubr.msk.bf16.mxu1 %vm544_vm2, %v18411_v31 }
0x10cf   : > { %15273 = vmatmul.mubr.msk.bf16.gmra.mrb[140].mxu1 %vm544_vm2, %v18420_v19 }
0x10d0   : > { %15276 = vmatprep.mubr.msk.bf16.mxu1 %vm544_vm2, %v18423_v12 }
0x10d7   : > { %15277 = vmatmul.mubr.msk.bf16.gmra.mrb[144].mxu1 %vm544_vm2, %v18430_v39 }
0x10d8   : > { %15316 = vmatprep.mubr.msk.bf16.mxu1 %vm17346_vm4, %v17345_v37 }
0x1192   : > { %v3688_v52 = vpop.f32.mrb[132].mxu1 }
0x1193   : > { %3695 = vst.msk [vmem:[#allocation2 + $0x90] sm:$0xff] %vm544_vm2, %v3688_v52  ;;  %v15262_v40 = vpop.f32.mrb[133].mxu1 }
0x1194   : > { %v3691_v24 = vpop.f32.mrb[134].mxu1 }
0x1195   : > { %3696 = vst.msk [vmem:[#allocation2 + $0x98] sm:$0xff] %vm544_vm2, %v3691_v24  ;;  %v15263_v48 = vpop.f32.mrb[135].mxu1 }
0x1196   : > { %v3943_v48 = vunpack.c.l.bf16 %v18420_v19 }
0x119a   : > { %v15270_v13 = vpop.f32.mrb[136].mxu1 }
0x119b   : > { %v3791_v54 = vpop.f32.mrb[137].mxu1 }
0x119c   : > { %v15271_v59 = vpop.f32.mrb[138].mxu1 }
0x119d   : > { %v3839_v41 = vpack.c.bf16 %v15271_v59, %v15270_v13  ;;  %v3794_v42 = vpop.f32.mrb[139].mxu1  ;;  %v3944_v13 = vunpack.c.h.bf16 %v18420_v19 }
0x119e   : > { %v3838_v53 = vpack.c.bf16 %v3794_v42, %v3791_v54 }
0x11a0   : > { %15280 = vmatprep.subr.bf16.mxu0 %v3838_v53 }
0x11a1   : > { %15281 = vmatpush3.bf16.msra.mxu0 %v3838_v53  ;;  %v3942_v53 = vunpack.c.h.bf16 %v18411_v31 }
0x11a2   : > { %v15274_v50 = vpop.f32.mrb[140].mxu1  ;;  %15282 = vmatprep.subr.bf16.mxu0 %v3839_v41 }
0x11a3   : > { %v3807_v43 = vpop.f32.mrb[141].mxu1 }
0x11a4   : > { %v15275_v45 = vpop.f32.mrb[142].mxu1 }
0x11a5   : > { %v3841_v34 = vpack.c.bf16 %v15275_v45, %v15274_v50  ;;  %v3810_v49 = vpop.f32.mrb[143].mxu1  ;;  %15283 = vmatpush3.bf16.msra.mxu0 %v3839_v41  ;;  %v3941_v41 = vunpack.c.l.bf16 %v18411_v31 }
0x11a6   : > { %v3840_v60 = vpack.c.bf16 %v3810_v49, %v3807_v43 }
0x11a8   : > { %15284 = vmatprep.subr.bf16.mxu0 %v3840_v60 }
0x11a9   : > { %15285 = vmatpush3.bf16.msra.mxu0 %v3840_v60 }
0x11aa   : > { %v15278_v61 = vpop.f32.mrb[144].mxu1  ;;  %15286 = vmatprep.subr.bf16.mxu0 %v3841_v34 }
0x11ab   : > { %v3823_v15 = vpop.f32.mrb[145].mxu1 }
0x11ac   : > { %v15279_v20 = vpop.f32.mrb[146].mxu1 }
0x11ad   : > { %v3843_v57 = vpack.c.bf16 %v15279_v20, %v15278_v61  ;;  %v3826_v11 = vpop.f32.mrb[147].mxu1  ;;  %15287 = vmatpush3.bf16.msra.mxu0 %v3841_v34 }
0x11ae   : > { %v3842_v63 = vpack.c.bf16 %v3826_v11, %v3823_v15 }
0x11b0   : > { %15288 = vmatprep.subr.bf16.mxu0 %v3842_v63 }
0x11b1   : > { %15289 = vmatpush3.bf16.msra.mxu0 %v3842_v63 }
0x11b2   : > { %15290 = vmatprep.subr.bf16.mxu0 %v3843_v57 }
0x11b5   : > { %15291 = vmatpush3.bf16.msra.mxu0 %v3843_v57 }
0x11b8   : > { %15293 = vmatmul.mubr.msk.bf16.vlgmr.msra.gmra.mrb[144].mxu0 %vm687_vm3, %v18238_v17 }
0x11b9   : > { %15296 = vmatprep.mubr.msk.bf16.mxu0 %vm687_vm3, %v18246_v18 }
0x11c0   : > { %15297 = vmatmul.mubr.msk.bf16.gmra.mrb[148].mxu0 %vm687_vm3, %v18256_v36 }
0x11c1   : > { %15300 = vmatprep.mubr.msk.bf16.mxu0 %vm687_vm3, %v18263_v35 }
0x11c8   : > { %15301 = vmatmul.mubr.msk.bf16.gmra.mrb[152].mxu0 %vm687_vm3, %v18273_v22 }
0x11c9   : > { %15348 = vmatprep.mubr.msk.bf16.mxu0 %vm687_vm3, %v18350_v62 }
0x128b   : > { %v15294_v56 = vpop.f32.mrb[144].mxu0 }
0x128c   : > { %v3887_v33 = vadd.f32 %v18309_v16, %v15294_v56  ;;  %v3878_v0 = vpop.f32.mrb[145].mxu0  ;;  %v3947_v56 = vunpack.c.l.bf16 %v18430_v39 }
0x128d   : > { %v3879_v55 = vadd.f32 %v18309_v16, %v3878_v0  ;;  %v15295_v2 = vpop.f32.mrb[146].mxu0  ;;  %v3948_v0 = vunpack.c.h.bf16 %v18430_v39 }
0x128e   : > { %v3927_v47 = vmax.f32 %v3887_v33, 0.0  ;;  %v3890_v44 = vadd.f32 %v18309_v16, %v15295_v2  ;;  %v3881_v32 = vpop.f32.mrb[147].mxu0 }
0x128f   : > { %v3925_v14 = vmax.f32 %v3879_v55, 0.0  ;;  %v3882_v7 = vadd.f32 %v18309_v16, %v3881_v32 }
0x1290   : > { %v3928_v25 = vmax.f32 %v3890_v44, 0.0  ;;  %v3951_v38 = vadd.f32 %v3939_v3, %v3927_v47  ;;  %v3945_v47 = vunpack.c.l.bf16 %v18423_v12  ;;  %v3946_v44 = vunpack.c.h.bf16 %v18423_v12  ;;  %v18480_v12 = vld [vmem:[%s17451_s19 + $0x210] sm:$0xff]  }
0x1291   : > { %v3926_v10 = vmax.f32 %v3882_v7, 0.0  ;;  %v3949_v26 = vadd.f32 %v3937_v46, %v3925_v14 }
0x1292   : > { %v3952_v23 = vadd.f32 %v3940_v4, %v3928_v25 }
0x1293   : > { %v3950_v27 = vadd.f32 %v3938_v1, %v3926_v10  ;;  %v15298_v28 = vpop.f32.mrb[148].mxu0  ;;  %v18489_v10 = vld [vmem:[%s17451_s19 + $0x218] sm:$0xff]  }
0x1294   : > { %v3903_v58 = vadd.f32 %v18309_v16, %v15298_v28  ;;  %v3894_v9 = vpop.f32.mrb[149].mxu0  ;;  %v3962_v29 = vpack.c.bf16 %v3952_v23, %v3951_v38  ;;  %v18493_v38 = vld [vmem:[%s17451_s19 + $0x220] sm:$0xff]   ;;  %v18502_v23 = vld [vmem:[%s17451_s19 + $0x228] sm:$0xff]  }
0x1295   : > { %v3895_v30 = vadd.f32 %v18309_v16, %v3894_v9  ;;  %v15299_v52 = vpop.f32.mrb[150].mxu0  ;;  %v3961_v40 = vpack.c.bf16 %v3950_v27, %v3949_v26  ;;  %v18505_v26 = vld [vmem:[%s17451_s19 + $0x230] sm:$0xff]   ;;  %v18512_v27 = vld [vmem:[%s17451_s19 + $0x238] sm:$0xff]  }
0x1296   : > { %v3931_v24 = vmax.f32 %v3903_v58, 0.0  ;;  %v3906_v21 = vadd.f32 %v18309_v16, %v15299_v52  ;;  %v3897_v54 = vpop.f32.mrb[151].mxu0 }
0x1297   : > { %v3929_v59 = vmax.f32 %v3895_v30, 0.0  ;;  %v3898_v42 = vadd.f32 %v18309_v16, %v3897_v54  ;;  %15305 = vmatpush3.bf16.msra.mxu1 %v3961_v40 }
0x1298   : > { %v3932_v50 = vmax.f32 %v3906_v21, 0.0  ;;  %15306 = vmatprep.subr.bf16.mxu1 %v17345_v37  ;;  %v3955_v45 = vadd.f32 %v3943_v48, %v3931_v24 }
0x1299   : > { %v3930_v43 = vmax.f32 %v3898_v42, 0.0  ;;  %v3953_v49 = vadd.f32 %v3941_v41, %v3929_v59 }
0x129a   : > { %v3956_v34 = vadd.f32 %v3944_v13, %v3932_v50 }
0x129b   : > { %v3954_v60 = vadd.f32 %v3942_v53, %v3930_v43  ;;  %v15302_v61 = vpop.f32.mrb[152].mxu0  ;;  %15307 = vmatpush3.bf16.msra.mxu1 %v3962_v29 }
0x129c   : > { %v3919_v19 = vadd.f32 %v18309_v16, %v15302_v61  ;;  %v3910_v15 = vpop.f32.mrb[153].mxu0  ;;  %15308 = vmatprep.subr.bf16.mxu1 %v17345_v37  ;;  %v3964_v20 = vpack.c.bf16 %v3956_v34, %v3955_v45 }
0x129d   : > { %v3911_v57 = vadd.f32 %v18309_v16, %v3910_v15  ;;  %v15303_v31 = vpop.f32.mrb[154].mxu0  ;;  %v3963_v11 = vpack.c.bf16 %v3954_v60, %v3953_v49 }
0x129e   : > { %v3935_v63 = vmax.f32 %v3919_v19, 0.0  ;;  %v3922_v33 = vadd.f32 %v18309_v16, %v15303_v31  ;;  %v3913_v55 = vpop.f32.mrb[155].mxu0 }
0x129f   : > { %v3933_v2 = vmax.f32 %v3911_v57, 0.0  ;;  %v3914_v3 = vadd.f32 %v18309_v16, %v3913_v55  ;;  %15309 = vmatpush3.bf16.msra.mxu1 %v3963_v11  ;;  %v4252_v11 = vunpack.c.l.bf16 %v18489_v10  ;;  %v4250_v55 = vunpack.c.l.bf16 %v18480_v12 }
0x12a0   : > { %v3936_v4 = vmax.f32 %v3922_v33, 0.0  ;;  %15310 = vmatprep.subr.bf16.mxu1 %v17345_v37  ;;  %v3959_v14 = vadd.f32 %v3947_v56, %v3935_v63  ;;  %v4253_v56 = vunpack.c.h.bf16 %v18489_v10 }
0x12a1   : > { %v3934_v32 = vmax.f32 %v3914_v3, 0.0  ;;  %v3957_v7 = vadd.f32 %v3945_v47, %v3933_v2  ;;  %v4251_v47 = vunpack.c.h.bf16 %v18480_v12 }
0x12a2   : > { %v3960_v46 = vadd.f32 %v3948_v0, %v3936_v4 }
0x12a3   : > { %v3958_v39 = vadd.f32 %v3946_v44, %v3934_v32  ;;  %15311 = vmatpush3.bf16.msra.mxu1 %v3964_v20 }
0x12a4   : > { %15312 = vmatprep.subr.bf16.mxu1 %v17345_v37  ;;  %v3966_v1 = vpack.c.bf16 %v3960_v46, %v3959_v14 }
0x12a5   : > { %v3965_v25 = vpack.c.bf16 %v3958_v39, %v3957_v7 }
0x12a7   : > { %15313 = vmatpush3.bf16.msra.mxu1 %v3965_v25 }
0x12a8   : > { %15314 = vmatprep.subr.bf16.mxu1 %v17345_v37 }
0x12ab   : > { %15315 = vmatpush3.bf16.msra.mxu1 %v3966_v1 }
0x12ac   : > { %15320 = vmatprep.subr.bf16.mxu1 %v18194_v8 }
0x12ae   : > { %15317 = vmatmul.mubr.msk.bf16.vlgmr.msra.gmra.mrb[148].mxu1 %vm687_vm3, %v18343_v51 }
0x12af   : > { %15321 = vmatpush3.bf16.msra.mxu1 %v18194_v8  ;;  %15324 = vmatprep.mubr.msk.bf16.mxu1 %vm544_vm2, %v18480_v12 }
0x12b0   : > { %15322 = vmatprep.subr.bf16.mxu1 %v17444_v6 }
0x12b3   : > { %15323 = vmatpush3.bf16.msra.mxu1 %v17444_v6 }
0x12b4   : > { %15360 = vmatprep.subr.bf16.mxu1 %v17345_v37 }
0x12b6   : > { %15325 = vmatmul.mubr.msk.bf16.vlgmr.msra.gmra.mrb[152].mxu1 %vm544_vm2, %v18489_v10 }
0x12b7   : > { %15328 = vmatprep.mubr.msk.bf16.mxu1 %vm544_vm2, %v18493_v38 }
0x12be   : > { %15329 = vmatmul.mubr.msk.bf16.gmra.mrb[156].mxu1 %vm544_vm2, %v18502_v23 }
0x12bf   : > { %15332 = vmatprep.mubr.msk.bf16.mxu1 %vm544_vm2, %v18505_v26 }
0x12c6   : > { %15333 = vmatmul.mubr.msk.bf16.gmra.mrb[160].mxu1 %vm544_vm2, %v18512_v27 }
0x12c7   : > { %15372 = vmatprep.mubr.msk.bf16.mxu1 %vm17346_vm4, %v17345_v37 }
0x1381   : > { %v4001_v28 = vpop.f32.mrb[148].mxu1 }
0x1382   : > { %4008 = vst.msk [vmem:[#allocation2 + $0xa0] sm:$0xff] %vm544_vm2, %v4001_v28  ;;  %v15318_v58 = vpop.f32.mrb[149].mxu1 }
0x1383   : > { %v4004_v9 = vpop.f32.mrb[150].mxu1 }
0x1384   : > { %4009 = vst.msk [vmem:[#allocation2 + $0xa8] sm:$0xff] %vm544_vm2, %v4004_v9  ;;  %v15319_v29 = vpop.f32.mrb[151].mxu1 }
0x1385   : > { %v4256_v29 = vunpack.c.l.bf16 %v18502_v23 }
0x1389   : > { %v15326_v30 = vpop.f32.mrb[152].mxu1 }
0x138a   : > { %v4104_v52 = vpop.f32.mrb[153].mxu1 }
0x138b   : > { %v15327_v40 = vpop.f32.mrb[154].mxu1 }
0x138c   : > { %v4152_v24 = vpack.c.bf16 %v15327_v40, %v15326_v30  ;;  %v4107_v48 = vpop.f32.mrb[155].mxu1  ;;  %v4257_v30 = vunpack.c.h.bf16 %v18502_v23 }
0x138d   : > { %v4151_v21 = vpack.c.bf16 %v4107_v48, %v4104_v52 }
0x138f   : > { %15336 = vmatprep.subr.bf16.mxu0 %v4151_v21 }
0x1390   : > { %15337 = vmatpush3.bf16.msra.mxu0 %v4151_v21  ;;  %v4255_v21 = vunpack.c.h.bf16 %v18493_v38 }
0x1391   : > { %v15330_v13 = vpop.f32.mrb[156].mxu1  ;;  %15338 = vmatprep.subr.bf16.mxu0 %v4152_v24 }
0x1392   : > { %v4120_v54 = vpop.f32.mrb[157].mxu1 }
0x1393   : > { %v15331_v59 = vpop.f32.mrb[158].mxu1 }
0x1394   : > { %v4154_v41 = vpack.c.bf16 %v15331_v59, %v15330_v13  ;;  %v4123_v42 = vpop.f32.mrb[159].mxu1  ;;  %15339 = vmatpush3.bf16.msra.mxu0 %v4152_v24  ;;  %v4254_v24 = vunpack.c.l.bf16 %v18493_v38 }
0x1395   : > { %v4153_v53 = vpack.c.bf16 %v4123_v42, %v4120_v54 }
0x1397   : > { %15340 = vmatprep.subr.bf16.mxu0 %v4153_v53 }
0x1398   : > { %15341 = vmatpush3.bf16.msra.mxu0 %v4153_v53 }
0x1399   : > { %v15334_v50 = vpop.f32.mrb[160].mxu1  ;;  %15342 = vmatprep.subr.bf16.mxu0 %v4154_v41 }
0x139a   : > { %v4136_v43 = vpop.f32.mrb[161].mxu1 }
0x139b   : > { %v15335_v45 = vpop.f32.mrb[162].mxu1 }
0x139c   : > { %v4156_v34 = vpack.c.bf16 %v15335_v45, %v15334_v50  ;;  %v4139_v49 = vpop.f32.mrb[163].mxu1  ;;  %15343 = vmatpush3.bf16.msra.mxu0 %v4154_v41 }
0x139d   : > { %v4155_v60 = vpack.c.bf16 %v4139_v49, %v4136_v43 }
0x139f   : > { %15344 = vmatprep.subr.bf16.mxu0 %v4155_v60 }
0x13a0   : > { %15345 = vmatpush3.bf16.msra.mxu0 %v4155_v60 }
0x13a1   : > { %15346 = vmatprep.subr.bf16.mxu0 %v4156_v34 }
0x13a4   : > { %15347 = vmatpush3.bf16.msra.mxu0 %v4156_v34 }
0x13a5   : > { %15376 = vmatprep.subr.bf16.mxu0 %v18194_v8 }
0x13a7   : > { %15349 = vmatmul.mubr.msk.bf16.vlgmr.msra.gmra.mrb[156].mxu0 %vm687_vm3, %v18238_v17  ;;  %v18534_v17 = vld [vmem:[%s17451_s19 + $0x240] sm:$0xff]  }
0x13a8   : > { %15377 = vmatpush3.bf16.msra.mxu0 %v18194_v8  ;;  %15352 = vmatprep.mubr.msk.bf16.mxu0 %vm687_vm3, %v18246_v18  ;;  %v18541_v8 = vld [vmem:[%s17451_s19 + $0x248] sm:$0xff]   ;;  %v18544_v18 = vld [vmem:[%s17451_s19 + $0x250] sm:$0xff]  }
0x13a9   : > { %15378 = vmatprep.subr.bf16.mxu0 %v17444_v6 }
0x13ac   : > { %15379 = vmatpush3.bf16.msra.mxu0 %v17444_v6 }
0x13ad   : > { %15416 = vmatprep.subr.bf16.mxu0 %v17345_v37 }
0x13af   : > { %15353 = vmatmul.mubr.msk.bf16.gmra.mrb[160].mxu0 %vm687_vm3, %v18256_v36  ;;  %v18551_v36 = vld [vmem:[%s17451_s19 + $0x258] sm:$0xff]  }
0x13b0   : > { %15356 = vmatprep.mubr.msk.bf16.mxu0 %vm687_vm3, %v18263_v35  ;;  %v18554_v35 = vld [vmem:[%s17451_s19 + $0x260] sm:$0xff]  }
0x13b7   : > { %15357 = vmatmul.mubr.msk.bf16.gmra.mrb[164].mxu0 %vm687_vm3, %v18273_v22  ;;  %v18561_v22 = vld [vmem:[%s17451_s19 + $0x268] sm:$0xff]  }
0x13b8   : > { %15380 = vmatprep.mubr.msk.bf16.mxu0 %vm544_vm2, %v18534_v17 }
0x13bf   : > { %15381 = vmatmul.mubr.msk.bf16.vlgmr.msra.gmra.mrb[168].mxu0 %vm544_vm2, %v18541_v8 }
0x13c0   : > { %15384 = vmatprep.mubr.msk.bf16.mxu0 %vm544_vm2, %v18544_v18 }
0x13c7   : > { %15385 = vmatmul.mubr.msk.bf16.gmra.mrb[172].mxu0 %vm544_vm2, %v18551_v36 }
0x13c8   : > { %15388 = vmatprep.mubr.msk.bf16.mxu0 %vm544_vm2, %v18554_v35 }
0x13cf   : > { %15389 = vmatmul.mubr.msk.bf16.gmra.mrb[176].mxu0 %vm544_vm2, %v18561_v22 }
0x13d0   : > { %15428 = vmatprep.mubr.msk.bf16.mxu0 %vm17346_vm4, %v17345_v37 }
0x147a   : > { %v15350_v61 = vpop.f32.mrb[156].mxu0 }
0x147b   : > { %v4200_v19 = vadd.f32 %v18309_v16, %v15350_v61  ;;  %v4191_v15 = vpop.f32.mrb[157].mxu0  ;;  %v4260_v61 = vunpack.c.l.bf16 %v18512_v27 }
0x147c   : > { %v4192_v20 = vadd.f32 %v18309_v16, %v4191_v15  ;;  %v15351_v57 = vpop.f32.mrb[158].mxu0  ;;  %v4261_v15 = vunpack.c.h.bf16 %v18512_v27 }
0x147d   : > { %v4240_v31 = vmax.f32 %v4200_v19, 0.0  ;;  %v4203_v63 = vadd.f32 %v18309_v16, %v15351_v57  ;;  %v4194_v33 = vpop.f32.mrb[159].mxu0 }
0x147e   : > { %v4238_v0 = vmax.f32 %v4192_v20, 0.0  ;;  %v4195_v2 = vadd.f32 %v18309_v16, %v4194_v33 }
0x147f   : > { %v4241_v3 = vmax.f32 %v4203_v63, 0.0  ;;  %v4264_v4 = vadd.f32 %v4252_v11, %v4240_v31  ;;  %v4258_v31 = vunpack.c.l.bf16 %v18505_v26  ;;  %v4259_v63 = vunpack.c.h.bf16 %v18505_v26 }
0x1480   : > { %v4239_v44 = vmax.f32 %v4195_v2, 0.0  ;;  %v4262_v14 = vadd.f32 %v4250_v55, %v4238_v0 }
0x1481   : > { %v4265_v32 = vadd.f32 %v4253_v56, %v4241_v3 }
0x1482   : > { %v4263_v46 = vadd.f32 %v4251_v47, %v4239_v44  ;;  %v15354_v7 = vpop.f32.mrb[160].mxu0 }
0x1483   : > { %v4216_v39 = vadd.f32 %v18309_v16, %v15354_v7  ;;  %v4207_v1 = vpop.f32.mrb[161].mxu0  ;;  %v4275_v25 = vpack.c.bf16 %v4265_v32, %v4264_v4 }
0x1484   : > { %v4208_v10 = vadd.f32 %v18309_v16, %v4207_v1  ;;  %v15355_v28 = vpop.f32.mrb[162].mxu0  ;;  %v4274_v58 = vpack.c.bf16 %v4263_v46, %v4262_v14 }
0x1485   : > { %v4244_v9 = vmax.f32 %v4216_v39, 0.0  ;;  %v4219_v12 = vadd.f32 %v18309_v16, %v15355_v28  ;;  %v4210_v52 = vpop.f32.mrb[163].mxu0 }
0x1486   : > { %v4242_v40 = vmax.f32 %v4208_v10, 0.0  ;;  %v4211_v48 = vadd.f32 %v18309_v16, %v4210_v52  ;;  %15361 = vmatpush3.bf16.msra.mxu1 %v4274_v58  ;;  %v18610_v52 = vld [vmem:[%s20949_s0 + $0x10] sm:$0xff]  }
0x1487   : > { %v4245_v13 = vmax.f32 %v4219_v12, 0.0  ;;  %15362 = vmatprep.subr.bf16.mxu1 %v17345_v37  ;;  %v4268_v59 = vadd.f32 %v4256_v29, %v4244_v9 }
0x1488   : > { %v4243_v54 = vmax.f32 %v4211_v48, 0.0  ;;  %v4266_v42 = vadd.f32 %v4254_v24, %v4242_v40  ;;  %v18617_v40 = vld [vmem:[%s20949_s0 + $0x18] sm:$0xff]   ;;  %v18624_v24 = vld [vmem:[%s20949_s0 + $0x20] sm:$0xff]   ;;  %v18631_v48 = vld [vmem:[%s20949_s0 + $0x28] sm:$0xff]  }
0x1489   : > { %v4269_v41 = vadd.f32 %v4257_v30, %v4245_v13 }
0x148a   : > { %v4267_v53 = vadd.f32 %v4255_v21, %v4243_v54  ;;  %v15358_v50 = vpop.f32.mrb[164].mxu0  ;;  %15363 = vmatpush3.bf16.msra.mxu1 %v4275_v25 }
0x148b   : > { %v4232_v23 = vadd.f32 %v18309_v16, %v15358_v50  ;;  %v4223_v43 = vpop.f32.mrb[165].mxu0  ;;  %15364 = vmatprep.subr.bf16.mxu1 %v17345_v37  ;;  %v4277_v45 = vpack.c.bf16 %v4269_v41, %v4268_v59 }
0x148c   : > { %v4224_v34 = vadd.f32 %v18309_v16, %v4223_v43  ;;  %v15359_v38 = vpop.f32.mrb[166].mxu0  ;;  %v4276_v49 = vpack.c.bf16 %v4267_v53, %v4266_v42  ;;  %v18642_v42 = vld [vmem:[%s20954_s5] ss:$0 sm:$0xff] }
0x148d   : > { %v4248_v60 = vmax.f32 %v4232_v23, 0.0  ;;  %v4235_v19 = vadd.f32 %v18309_v16, %v15359_v38  ;;  %v4226_v20 = vpop.f32.mrb[167].mxu0  ;;  %v4566_v38 = vunpack.c.h.bf16 %v18541_v8 }
0x148e   : > { %v4246_v57 = vmax.f32 %v4224_v34, 0.0  ;;  %v4227_v11 = vadd.f32 %v18309_v16, %v4226_v20  ;;  %15365 = vmatpush3.bf16.msra.mxu1 %v4276_v49 }
0x148f   : > { %v4249_v56 = vmax.f32 %v4235_v19, 0.0  ;;  %15366 = vmatprep.subr.bf16.mxu1 %v17345_v37  ;;  %v4272_v0 = vadd.f32 %v4260_v61, %v4248_v60  ;;  %v4563_v61 = vunpack.c.l.bf16 %v18534_v17 }
0x1490   : > { %v4247_v33 = vmax.f32 %v4227_v11, 0.0  ;;  %v4270_v2 = vadd.f32 %v4258_v31, %v4246_v57 }
0x1491   : > { %v4273_v55 = vadd.f32 %v4261_v15, %v4249_v56  ;;  %v4564_v15 = vunpack.c.h.bf16 %v18534_v17 }
0x1492   : > { %v4271_v47 = vadd.f32 %v4259_v63, %v4247_v33  ;;  %15367 = vmatpush3.bf16.msra.mxu1 %v4277_v45  ;;  %v15382_v3 = vpop.f32.mrb[168].mxu0  ;;  %v4565_v45 = vunpack.c.l.bf16 %v18541_v8 }
0x1493   : > { %15368 = vmatprep.subr.bf16.mxu1 %v17345_v37  ;;  %v4417_v27 = vpop.f32.mrb[169].mxu0  ;;  %v4279_v44 = vpack.c.bf16 %v4273_v55, %v4272_v0 }
0x1494   : > { %v4278_v4 = vpack.c.bf16 %v4271_v47, %v4270_v2  ;;  %v15383_v32 = vpop.f32.mrb[170].mxu0 }
0x1495   : > { %v4465_v16 = vpack.c.bf16 %v15383_v32, %v15382_v3  ;;  %v4420_v14 = vpop.f32.mrb[171].mxu0 }
0x1496   : > { %15369 = vmatpush3.bf16.msra.mxu1 %v4278_v4  ;;  %v4464_v26 = vpack.c.bf16 %v4420_v14, %v4417_v27  ;;  %v4570_v4 = vunpack.c.h.bf16 %v18551_v36  ;;  %v4567_v14 = vunpack.c.l.bf16 %v18544_v18 }
0x1497   : > { %15370 = vmatprep.subr.bf16.mxu1 %v17345_v37 }
0x149a   : > { %15371 = vmatpush3.bf16.msra.mxu1 %v4279_v44  ;;  %v15386_v46 = vpop.f32.mrb[172].mxu0  ;;  %v4569_v44 = vunpack.c.l.bf16 %v18551_v36 }
0x149b   : > { %15392 = vmatprep.subr.bf16.mxu1 %v4464_v26  ;;  %v4433_v7 = vpop.f32.mrb[173].mxu0 }
0x149c   : > { %v15387_v39 = vpop.f32.mrb[174].mxu0 }
0x149d   : > { %15373 = vmatmul.mubr.msk.bf16.vlgmr.msra.gmra.mrb[164].mxu1 %vm687_vm3, %v18343_v51  ;;  %v4467_v1 = vpack.c.bf16 %v15387_v39, %v15386_v46  ;;  %v4436_v25 = vpop.f32.mrb[175].mxu0  ;;  %v18603_v51 = vld [vmem:[%s20949_s0 + $0x8] sm:$0xff]   ;;  %v4568_v46 = vunpack.c.h.bf16 %v18544_v18 }
0x149e   : > { %15393 = vmatpush3.bf16.msra.mxu1 %v4464_v26  ;;  %v4466_v10 = vpack.c.bf16 %v4436_v25, %v4433_v7  ;;  %15404 = vmatprep.mubr.msk.bf16.mxu1 %vm687_vm3, %v18350_v62 }
0x149f   : > { %15394 = vmatprep.subr.bf16.mxu1 %v4465_v16 }
0x14a2   : > { %15395 = vmatpush3.bf16.msra.mxu1 %v4465_v16  ;;  %v15390_v28 = vpop.f32.mrb[176].mxu0 }
0x14a3   : > { %15396 = vmatprep.subr.bf16.mxu1 %v4466_v10  ;;  %v4449_v58 = vpop.f32.mrb[177].mxu0 }
0x14a4   : > { %v15391_v9 = vpop.f32.mrb[178].mxu0 }
0x14a5   : > { %v4469_v29 = vpack.c.bf16 %v15391_v9, %v15390_v28  ;;  %v4452_v12 = vpop.f32.mrb[179].mxu0 }
0x14a6   : > { %15397 = vmatpush3.bf16.msra.mxu1 %v4466_v10  ;;  %v4468_v30 = vpack.c.bf16 %v4452_v12, %v4449_v58 }
0x14a7   : > { %15398 = vmatprep.subr.bf16.mxu1 %v4467_v1 }
0x14aa   : > { %15399 = vmatpush3.bf16.msra.mxu1 %v4467_v1 }
0x14ab   : > { %15400 = vmatprep.subr.bf16.mxu1 %v4468_v30 }
0x14ae   : > { %15401 = vmatpush3.bf16.msra.mxu1 %v4468_v30 }
0x14af   : > { %15402 = vmatprep.subr.bf16.mxu1 %v4469_v29 }
0x14b2   : > { %15403 = vmatpush3.bf16.msra.mxu1 %v4469_v29 }
0x14b5   : > { %15405 = vmatmul.mubr.msk.bf16.vlgmr.msra.gmra.mrb[168].mxu1 %vm687_vm3, %v18603_v51 }
0x14b6   : > { %15408 = vmatprep.mubr.msk.bf16.mxu1 %vm687_vm3, %v18610_v52 }
0x14bd   : > { %15409 = vmatmul.mubr.msk.bf16.gmra.mrb[172].mxu1 %vm687_vm3, %v18617_v40 }
0x14be   : > { %15412 = vmatprep.mubr.msk.bf16.mxu1 %vm687_vm3, %v18624_v24 }
0x14c5   : > { %15413 = vmatmul.mubr.msk.bf16.gmra.mrb[176].mxu1 %vm687_vm3, %v18631_v48 }
0x14c6   : > { %15460 = vmatprep.mubr.msk.bf16.mxu1 %vm687_vm3, %v18350_v62 }
0x1570   : > { %v4314_v21 = vpop.f32.mrb[164].mxu1 }
0x1571   : > { %4321 = vst.msk [vmem:[#allocation2 + $0xb0] sm:$0xff] %vm544_vm2, %v4314_v21  ;;  %v15374_v13 = vpop.f32.mrb[165].mxu1 }
0x1572   : > { %v4317_v54 = vpop.f32.mrb[166].mxu1  ;;  %v4573_v13 = vunpack.c.l.bf16 %v18561_v22 }
0x1573   : > { %4322 = vst.msk [vmem:[#allocation2 + $0xb8] sm:$0xff] %vm544_vm2, %v4317_v54  ;;  %v15375_v59 = vpop.f32.mrb[167].mxu1 }
0x1574   : > { %v4574_v59 = vunpack.c.h.bf16 %v18561_v22 }
0x1588   : > { %v15406_v41 = vpop.f32.mrb[168].mxu1 }
0x1589   : > { %v4513_v53 = vadd.f32 %v18642_v42, %v15406_v41  ;;  %v4504_v50 = vpop.f32.mrb[169].mxu1 }
0x158a   : > { %v4505_v23 = vadd.f32 %v18642_v42, %v4504_v50  ;;  %v15407_v62 = vpop.f32.mrb[170].mxu1  ;;  %v4571_v50 = vunpack.c.l.bf16 %v18554_v35 }
0x158b   : > { %v4553_v43 = vmax.f32 %v4513_v53, 0.0  ;;  %v4516_v34 = vadd.f32 %v18642_v42, %v15407_v62  ;;  %v4507_v49 = vpop.f32.mrb[171].mxu1  ;;  %v4572_v62 = vunpack.c.h.bf16 %v18554_v35  ;;  %v18674_v35 = vld [vmem:[%s17451_s19 + $0x270] sm:$0xff]  }
0x158c   : > { %v4551_v60 = vmax.f32 %v4505_v23, 0.0  ;;  %v4508_v19 = vadd.f32 %v18642_v42, %v4507_v49 }
0x158d   : > { %v4554_v20 = vmax.f32 %v4516_v34, 0.0  ;;  %v4577_v31 = vadd.f32 %v4565_v45, %v4553_v43 }
0x158e   : > { %v4552_v57 = vmax.f32 %v4508_v19, 0.0  ;;  %v4575_v63 = vadd.f32 %v4563_v61, %v4551_v60  ;;  %v18679_v19 = vld [vmem:[%s20953_s4] sm:$0xff]  }
0x158f   : > { %v4578_v11 = vadd.f32 %v4566_v38, %v4554_v20  ;;  %v18693_v20 = vld [vmem:[%s17451_s19 + $0x278] sm:$0xff]  }
0x1590   : > { %v4576_v56 = vadd.f32 %v4564_v15, %v4552_v57  ;;  %v15410_v33 = vpop.f32.mrb[172].mxu1  ;;  %v18685_v15 = vld [vmem:[%s20950_s1] sm:$0xff]  }
0x1591   : > { %v4529_v0 = vadd.f32 %v18642_v42, %v15410_v33  ;;  %v4520_v55 = vpop.f32.mrb[173].mxu1  ;;  %v4588_v2 = vpack.c.bf16 %v4578_v11, %v4577_v31  ;;  %v18697_v57 = vld [vmem:[%s17451_s19 + $0x280] sm:$0xff]   ;;  %v18706_v31 = vld [vmem:[%s17451_s19 + $0x288] sm:$0xff]   ;;  %v18709_v11 = vld [vmem:[%s17451_s19 + $0x290] sm:$0xff]  }
0x1592   : > { %v4521_v8 = vadd.f32 %v18642_v42, %v4520_v55  ;;  %v15411_v47 = vpop.f32.mrb[174].mxu1  ;;  %v4587_v3 = vpack.c.bf16 %v4576_v56, %v4575_v63  ;;  %v18716_v63 = vld [vmem:[%s17451_s19 + $0x298] sm:$0xff]  }
0x1593   : > { %v4557_v27 = vmax.f32 %v4529_v0, 0.0  ;;  %v4532_v17 = vadd.f32 %v18642_v42, %v15411_v47  ;;  %v4523_v32 = vpop.f32.mrb[175].mxu1 }
0x1594   : > { %v4555_v16 = vmax.f32 %v4521_v8, 0.0  ;;  %v4524_v26 = vadd.f32 %v18642_v42, %v4523_v32  ;;  %15417 = vmatpush3.bf16.msra.mxu0 %v4587_v3 }
0x1595   : > { %v4558_v7 = vmax.f32 %v4532_v17, 0.0  ;;  %15418 = vmatprep.subr.bf16.mxu0 %v17345_v37  ;;  %v4581_v1 = vadd.f32 %v4569_v44, %v4557_v27 }
0x1596   : > { %v4556_v39 = vmax.f32 %v4524_v26, 0.0  ;;  %v4579_v10 = vadd.f32 %v4567_v14, %v4555_v16 }
0x1597   : > { %v4582_v25 = vadd.f32 %v4570_v4, %v4558_v7 }
0x1598   : > { %v4580_v28 = vadd.f32 %v4568_v46, %v4556_v39  ;;  %v15414_v58 = vpop.f32.mrb[176].mxu1  ;;  %15419 = vmatpush3.bf16.msra.mxu0 %v4588_v2 }
0x1599   : > { %v4545_v36 = vadd.f32 %v18642_v42, %v15414_v58  ;;  %v4536_v9 = vpop.f32.mrb[177].mxu1  ;;  %15420 = vmatprep.subr.bf16.mxu0 %v17345_v37  ;;  %v4590_v29 = vpack.c.bf16 %v4582_v25, %v4581_v1 }
0x159a   : > { %v4537_v12 = vadd.f32 %v18642_v42, %v4536_v9  ;;  %v15415_v18 = vpop.f32.mrb[178].mxu1  ;;  %v4589_v30 = vpack.c.bf16 %v4580_v28, %v4579_v10  ;;  %v18737_v28 = vld [vmem:[%s20949_s0] sm:$0xff]  }
0x159b   : > { %v4561_v21 = vmax.f32 %v4545_v36, 0.0  ;;  %v4548_v54 = vadd.f32 %v18642_v42, %v15415_v18  ;;  %v4539_v41 = vpop.f32.mrb[179].mxu1 }
0x159c   : > { %v4559_v53 = vmax.f32 %v4537_v12, 0.0  ;;  %v4540_v23 = vadd.f32 %v18642_v42, %v4539_v41  ;;  %15421 = vmatpush3.bf16.msra.mxu0 %v4589_v30  ;;  %v4878_v30 = vunpack.c.l.bf16 %v18693_v20  ;;  %v4876_v41 = vunpack.c.l.bf16 %v18674_v35 }
0x159d   : > { %v4562_v43 = vmax.f32 %v4548_v54, 0.0  ;;  %15422 = vmatprep.subr.bf16.mxu0 %v17345_v37  ;;  %v4585_v34 = vadd.f32 %v4573_v13, %v4561_v21  ;;  %v4879_v13 = vunpack.c.h.bf16 %v18693_v20 }
0x159e   : > { %v4560_v45 = vmax.f32 %v4540_v23, 0.0  ;;  %v4583_v49 = vadd.f32 %v4571_v50, %v4559_v53  ;;  %v4877_v50 = vunpack.c.h.bf16 %v18674_v35 }
0x159f   : > { %v4586_v38 = vadd.f32 %v4574_v59, %v4562_v43 }
0x15a0   : > { %v4584_v60 = vadd.f32 %v4572_v62, %v4560_v45  ;;  %15423 = vmatpush3.bf16.msra.mxu0 %v4590_v29 }
0x15a1   : > { %15424 = vmatprep.subr.bf16.mxu0 %v17345_v37  ;;  %v4592_v22 = vpack.c.bf16 %v4586_v38, %v4585_v34 }
0x15a2   : > { %v4591_v61 = vpack.c.bf16 %v4584_v60, %v4583_v49 }
0x15a4   : > { %15425 = vmatpush3.bf16.msra.mxu0 %v4591_v61 }
0x15a5   : > { %15426 = vmatprep.subr.bf16.mxu0 %v17345_v37 }
0x15a8   : > { %15427 = vmatpush3.bf16.msra.mxu0 %v4592_v22 }
0x15a9   : > { %15432 = vmatprep.subr.bf16.mxu0 %v18679_v19 }
0x15ab   : > { %15429 = vmatmul.mubr.msk.bf16.vlgmr.msra.gmra.mrb[180].mxu0 %vm687_vm3, %v18685_v15 }
0x15ac   : > { %15433 = vmatpush3.bf16.msra.mxu0 %v18679_v19  ;;  %15436 = vmatprep.mubr.msk.bf16.mxu0 %vm544_vm2, %v18674_v35 }
0x15ad   : > { %15434 = vmatprep.subr.bf16.mxu0 %v17444_v6 }
0x15b0   : > { %15435 = vmatpush3.bf16.msra.mxu0 %v17444_v6 }
0x15b1   : > { %15472 = vmatprep.subr.bf16.mxu0 %v17345_v37 }
0x15b3   : > { %15437 = vmatmul.mubr.msk.bf16.vlgmr.msra.gmra.mrb[184].mxu0 %vm544_vm2, %v18693_v20 }
0x15b4   : > { %15440 = vmatprep.mubr.msk.bf16.mxu0 %vm544_vm2, %v18697_v57 }
0x15bb   : > { %15441 = vmatmul.mubr.msk.bf16.gmra.mrb[188].mxu0 %vm544_vm2, %v18706_v31 }
0x15bc   : > { %15444 = vmatprep.mubr.msk.bf16.mxu0 %vm544_vm2, %v18709_v11 }
0x15c3   : > { %15445 = vmatmul.mubr.msk.bf16.gmra.mrb[192].mxu0 %vm544_vm2, %v18716_v63 }
0x15c4   : > { %15484 = vmatprep.mubr.msk.bf16.mxu0 %vm17346_vm4, %v17345_v37 }
0x167e   : > { %v4627_v56 = vpop.f32.mrb[180].mxu0 }
0x167f   : > { %4634 = vst.msk [vmem:[#allocation2 + $0xc0] sm:$0xff] %vm544_vm2, %v4627_v56  ;;  %v15430_v33 = vpop.f32.mrb[181].mxu0 }
0x1680   : > { %v4630_v0 = vpop.f32.mrb[182].mxu0 }
0x1681   : > { %4635 = vst.msk [vmem:[#allocation2 + $0xc8] sm:$0xff] %vm544_vm2, %v4630_v0  ;;  %v15431_v55 = vpop.f32.mrb[183].mxu0 }
0x1682   : > { %v4882_v55 = vunpack.c.l.bf16 %v18706_v31 }
0x1686   : > { %v15438_v2 = vpop.f32.mrb[184].mxu0 }
0x1687   : > { %v4730_v8 = vpop.f32.mrb[185].mxu0 }
0x1688   : > { %v15439_v47 = vpop.f32.mrb[186].mxu0 }
0x1689   : > { %v4778_v3 = vpack.c.bf16 %v15439_v47, %v15438_v2  ;;  %v4733_v27 = vpop.f32.mrb[187].mxu0  ;;  %v4883_v2 = vunpack.c.h.bf16 %v18706_v31 }
0x168a   : > { %v4777_v44 = vpack.c.bf16 %v4733_v27, %v4730_v8 }
0x168c   : > { %15448 = vmatprep.subr.bf16.mxu1 %v4777_v44 }
0x168d   : > { %15449 = vmatpush3.bf16.msra.mxu1 %v4777_v44  ;;  %v4881_v44 = vunpack.c.h.bf16 %v18697_v57 }
0x168e   : > { %v15442_v17 = vpop.f32.mrb[188].mxu0  ;;  %15450 = vmatprep.subr.bf16.mxu1 %v4778_v3 }
0x168f   : > { %v4746_v4 = vpop.f32.mrb[189].mxu0 }
0x1690   : > { %v15443_v32 = vpop.f32.mrb[190].mxu0 }
0x1691   : > { %v4780_v16 = vpack.c.bf16 %v15443_v32, %v15442_v17  ;;  %v4749_v14 = vpop.f32.mrb[191].mxu0  ;;  %15451 = vmatpush3.bf16.msra.mxu1 %v4778_v3  ;;  %v4880_v3 = vunpack.c.l.bf16 %v18697_v57 }
0x1692   : > { %v4779_v26 = vpack.c.bf16 %v4749_v14, %v4746_v4 }
0x1694   : > { %15452 = vmatprep.subr.bf16.mxu1 %v4779_v26 }
0x1695   : > { %15453 = vmatpush3.bf16.msra.mxu1 %v4779_v26 }
0x1696   : > { %v15446_v46 = vpop.f32.mrb[192].mxu0  ;;  %15454 = vmatprep.subr.bf16.mxu1 %v4780_v16 }
0x1697   : > { %v4762_v7 = vpop.f32.mrb[193].mxu0 }
0x1698   : > { %v15447_v39 = vpop.f32.mrb[194].mxu0 }
0x1699   : > { %v4782_v1 = vpack.c.bf16 %v15447_v39, %v15446_v46  ;;  %v4765_v25 = vpop.f32.mrb[195].mxu0  ;;  %15455 = vmatpush3.bf16.msra.mxu1 %v4780_v16 }
0x169a   : > { %v4781_v10 = vpack.c.bf16 %v4765_v25, %v4762_v7 }
0x169c   : > { %15456 = vmatprep.subr.bf16.mxu1 %v4781_v10 }
0x169d   : > { %15457 = vmatpush3.bf16.msra.mxu1 %v4781_v10 }
0x169e   : > { %15458 = vmatprep.subr.bf16.mxu1 %v4782_v1 }
0x16a1   : > { %15459 = vmatpush3.bf16.msra.mxu1 %v4782_v1 }
0x16a4   : > { %15461 = vmatmul.mubr.msk.bf16.vlgmr.msra.gmra.mrb[180].mxu1 %vm687_vm3, %v18603_v51 }
0x16a5   : > { %15464 = vmatprep.mubr.msk.bf16.mxu1 %vm687_vm3, %v18610_v52 }
0x16ac   : > { %15465 = vmatmul.mubr.msk.bf16.gmra.mrb[184].mxu1 %vm687_vm3, %v18617_v40 }
0x16ad   : > { %15468 = vmatprep.mubr.msk.bf16.mxu1 %vm687_vm3, %v18624_v24 }
0x16b4   : > { %15469 = vmatmul.mubr.msk.bf16.gmra.mrb[188].mxu1 %vm687_vm3, %v18631_v48 }
0x16b5   : > { %15516 = vmatprep.mubr.msk.bf16.mxu1 %vm687_vm3, %v18737_v28 }
0x1777   : > { %v15462_v58 = vpop.f32.mrb[180].mxu1 }
0x1778   : > { %v4826_v36 = vadd.f32 %v18642_v42, %v15462_v58  ;;  %v4817_v9 = vpop.f32.mrb[181].mxu1  ;;  %v4886_v58 = vunpack.c.l.bf16 %v18716_v63 }
0x1779   : > { %v4818_v29 = vadd.f32 %v18642_v42, %v4817_v9  ;;  %v15463_v12 = vpop.f32.mrb[182].mxu1  ;;  %v4887_v9 = vunpack.c.h.bf16 %v18716_v63 }
0x177a   : > { %v4866_v18 = vmax.f32 %v4826_v36, 0.0  ;;  %v4829_v21 = vadd.f32 %v18642_v42, %v15463_v12  ;;  %v4820_v54 = vpop.f32.mrb[183].mxu1 }
0x177b   : > { %v4864_v59 = vmax.f32 %v4818_v29, 0.0  ;;  %v4821_v53 = vadd.f32 %v18642_v42, %v4820_v54 }
0x177c   : > { %v4867_v23 = vmax.f32 %v4829_v21, 0.0  ;;  %v4890_v43 = vadd.f32 %v4878_v30, %v4866_v18  ;;  %v4884_v18 = vunpack.c.l.bf16 %v18709_v11  ;;  %v4885_v21 = vunpack.c.h.bf16 %v18709_v11  ;;  %v18771_v11 = vld [vmem:[%s17451_s19 + $0x2a0] sm:$0xff]  }
0x177d   : > { %v4865_v62 = vmax.f32 %v4821_v53, 0.0  ;;  %v4888_v34 = vadd.f32 %v4876_v41, %v4864_v59 }
0x177e   : > { %v4891_v45 = vadd.f32 %v4879_v13, %v4867_v23 }
0x177f   : > { %v4889_v38 = vadd.f32 %v4877_v50, %v4865_v62  ;;  %v15466_v49 = vpop.f32.mrb[184].mxu1  ;;  %v18780_v62 = vld [vmem:[%s17451_s19 + $0x2a8] sm:$0xff]  }
0x1780   : > { %v4842_v60 = vadd.f32 %v18642_v42, %v15466_v49  ;;  %v4833_v22 = vpop.f32.mrb[185].mxu1  ;;  %v4901_v61 = vpack.c.bf16 %v4891_v45, %v4890_v43  ;;  %v18784_v43 = vld [vmem:[%s17451_s19 + $0x2b0] sm:$0xff]   ;;  %v18793_v45 = vld [vmem:[%s17451_s19 + $0x2b8] sm:$0xff]  }
0x1781   : > { %v4834_v20 = vadd.f32 %v18642_v42, %v4833_v22  ;;  %v15467_v56 = vpop.f32.mrb[186].mxu1  ;;  %v4900_v33 = vpack.c.bf16 %v4889_v38, %v4888_v34  ;;  %v18796_v34 = vld [vmem:[%s17451_s19 + $0x2c0] sm:$0xff]   ;;  %v18803_v38 = vld [vmem:[%s17451_s19 + $0x2c8] sm:$0xff]  }
0x1782   : > { %v4870_v0 = vmax.f32 %v4842_v60, 0.0  ;;  %v4845_v35 = vadd.f32 %v18642_v42, %v15467_v56  ;;  %v4836_v8 = vpop.f32.mrb[187].mxu1 }
0x1783   : > { %v4868_v47 = vmax.f32 %v4834_v20, 0.0  ;;  %v4837_v27 = vadd.f32 %v18642_v42, %v4836_v8  ;;  %15473 = vmatpush3.bf16.msra.mxu0 %v4900_v33 }
0x1784   : > { %v4871_v17 = vmax.f32 %v4845_v35, 0.0  ;;  %15474 = vmatprep.subr.bf16.mxu0 %v17345_v37  ;;  %v4894_v32 = vadd.f32 %v4882_v55, %v4870_v0 }
0x1785   : > { %v4869_v4 = vmax.f32 %v4837_v27, 0.0  ;;  %v4892_v14 = vadd.f32 %v4880_v3, %v4868_v47 }
0x1786   : > { %v4895_v16 = vadd.f32 %v4883_v2, %v4871_v17 }
0x1787   : > { %v4893_v26 = vadd.f32 %v4881_v44, %v4869_v4  ;;  %v15470_v46 = vpop.f32.mrb[188].mxu1  ;;  %15475 = vmatpush3.bf16.msra.mxu0 %v4901_v61 }
0x1788   : > { %v4858_v31 = vadd.f32 %v18642_v42, %v15470_v46  ;;  %v4849_v7 = vpop.f32.mrb[189].mxu1  ;;  %15476 = vmatprep.subr.bf16.mxu0 %v17345_v37  ;;  %v4903_v39 = vpack.c.bf16 %v4895_v16, %v4894_v32  ;;  %v18825_v46 = vld [vmem:[%s17451_s19 + $0x2d0] sm:$0xff]  }
0x1789   : > { %v4850_v1 = vadd.f32 %v18642_v42, %v4849_v7  ;;  %v15471_v57 = vpop.f32.mrb[190].mxu1  ;;  %v4902_v25 = vpack.c.bf16 %v4893_v26, %v4892_v14  ;;  %v18835_v7 = vld [vmem:[%s17451_s19 + $0x2e0] sm:$0xff]  }
0x178a   : > { %v4874_v10 = vmax.f32 %v4858_v31, 0.0  ;;  %v4861_v36 = vadd.f32 %v18642_v42, %v15471_v57  ;;  %v4852_v29 = vpop.f32.mrb[191].mxu1  ;;  %v18832_v31 = vld [vmem:[%s17451_s19 + $0x2d8] sm:$0xff]  }
0x178b   : > { %v4872_v12 = vmax.f32 %v4850_v1, 0.0  ;;  %v4853_v30 = vadd.f32 %v18642_v42, %v4852_v29  ;;  %15477 = vmatpush3.bf16.msra.mxu0 %v4902_v25  ;;  %v18845_v1 = vld [vmem:[%s17451_s19 + $0x2f0] sm:$0xff]   ;;  %v18852_v57 = vld [vmem:[%s17451_s19 + $0x2f8] sm:$0xff]  }
0x178c   : > { %v4875_v13 = vmax.f32 %v4861_v36, 0.0  ;;  %15478 = vmatprep.subr.bf16.mxu0 %v17345_v37  ;;  %v4898_v59 = vadd.f32 %v4886_v58, %v4874_v10 }
0x178d   : > { %v4873_v54 = vmax.f32 %v4853_v30, 0.0  ;;  %v4896_v53 = vadd.f32 %v4884_v18, %v4872_v12  ;;  %v5191_v12 = vunpack.c.l.bf16 %v18780_v62  ;;  %v5192_v30 = vunpack.c.h.bf16 %v18780_v62 }
0x178e   : > { %v4899_v41 = vadd.f32 %v4887_v9, %v4875_v13 }
0x178f   : > { %v4897_v63 = vadd.f32 %v4885_v21, %v4873_v54  ;;  %15479 = vmatpush3.bf16.msra.mxu0 %v4903_v39  ;;  %v18842_v39 = vld [vmem:[%s17451_s19 + $0x2e8] sm:$0xff]   ;;  %v5189_v54 = vunpack.c.l.bf16 %v18771_v11 }
0x1790   : > { %15480 = vmatprep.subr.bf16.mxu0 %v17345_v37  ;;  %v4905_v50 = vpack.c.bf16 %v4899_v41, %v4898_v59  ;;  %v5190_v41 = vunpack.c.h.bf16 %v18771_v11 }
0x1791   : > { %v4904_v23 = vpack.c.bf16 %v4897_v63, %v4896_v53 }
0x1793   : > { %15481 = vmatpush3.bf16.msra.mxu0 %v4904_v23 }
0x1794   : > { %15482 = vmatprep.subr.bf16.mxu0 %v17345_v37 }
0x1797   : > { %15483 = vmatpush3.bf16.msra.mxu0 %v4905_v50 }
0x1798   : > { %15488 = vmatprep.subr.bf16.mxu0 %v18679_v19 }
0x179a   : > { %15485 = vmatmul.mubr.msk.bf16.vlgmr.msra.gmra.mrb[196].mxu0 %vm687_vm3, %v18685_v15 }
0x179b   : > { %15489 = vmatpush3.bf16.msra.mxu0 %v18679_v19  ;;  %15492 = vmatprep.mubr.msk.bf16.mxu0 %vm544_vm2, %v18771_v11 }
0x179c   : > { %15490 = vmatprep.subr.bf16.mxu0 %v17444_v6 }
0x179f   : > { %15491 = vmatpush3.bf16.msra.mxu0 %v17444_v6 }
0x17a0   : > { %15528 = vmatprep.subr.bf16.mxu0 %v17345_v37 }
0x17a2   : > { %15493 = vmatmul.mubr.msk.bf16.vlgmr.msra.gmra.mrb[200].mxu0 %vm544_vm2, %v18780_v62 }
0x17a3   : > { %15496 = vmatprep.mubr.msk.bf16.mxu0 %vm544_vm2, %v18784_v43 }
0x17aa   : > { %15497 = vmatmul.mubr.msk.bf16.gmra.mrb[204].mxu0 %vm544_vm2, %v18793_v45 }
0x17ab   : > { %15500 = vmatprep.mubr.msk.bf16.mxu0 %vm544_vm2, %v18796_v34 }
0x17b2   : > { %15501 = vmatmul.mubr.msk.bf16.gmra.mrb[208].mxu0 %vm544_vm2, %v18803_v38 }
0x17b3   : > { %15540 = vmatprep.mubr.msk.bf16.mxu0 %vm17346_vm4, %v17345_v37 }
0x186d   : > { %v4940_v49 = vpop.f32.mrb[196].mxu0 }
0x186e   : > { %4947 = vst.msk [vmem:[#allocation2 + $0xd0] sm:$0xff] %vm544_vm2, %v4940_v49  ;;  %v15486_v60 = vpop.f32.mrb[197].mxu0 }
0x186f   : > { %v4943_v22 = vpop.f32.mrb[198].mxu0 }
0x1870   : > { %4948 = vst.msk [vmem:[#allocation2 + $0xd8] sm:$0xff] %vm544_vm2, %v4943_v22  ;;  %v15487_v61 = vpop.f32.mrb[199].mxu0 }
0x1875   : > { %v15494_v20 = vpop.f32.mrb[200].mxu0 }
0x1876   : > { %v5043_v56 = vpop.f32.mrb[201].mxu0 }
0x1877   : > { %v15495_v33 = vpop.f32.mrb[202].mxu0 }
0x1878   : > { %v5046_v0 = vpop.f32.mrb[203].mxu0  ;;  %v5091_v55 = vpack.c.bf16 %v15495_v33, %v15494_v20 }
0x1879   : > { %v5090_v35 = vpack.c.bf16 %v5046_v0, %v5043_v56 }
0x187b   : > { %15504 = vmatprep.subr.bf16.mxu1 %v5090_v35 }
0x187c   : > { %15505 = vmatpush3.bf16.msra.mxu1 %v5090_v35  ;;  %v5195_v35 = vunpack.c.l.bf16 %v18793_v45 }
0x187d   : > { %v15498_v2 = vpop.f32.mrb[204].mxu0  ;;  %15506 = vmatprep.subr.bf16.mxu1 %v5091_v55 }
0x187e   : > { %v5059_v8 = vpop.f32.mrb[205].mxu0 }
0x187f   : > { %v15499_v47 = vpop.f32.mrb[206].mxu0 }
0x1880   : > { %v5062_v3 = vpop.f32.mrb[207].mxu0  ;;  %15507 = vmatpush3.bf16.msra.mxu1 %v5091_v55  ;;  %v5093_v27 = vpack.c.bf16 %v15499_v47, %v15498_v2  ;;  %v5196_v2 = vunpack.c.h.bf16 %v18793_v45 }
0x1881   : > { %v5092_v44 = vpack.c.bf16 %v5062_v3, %v5059_v8  ;;  %v5193_v3 = vunpack.c.l.bf16 %v18784_v43 }
0x1883   : > { %15508 = vmatprep.subr.bf16.mxu1 %v5092_v44 }
0x1884   : > { %15509 = vmatpush3.bf16.msra.mxu1 %v5092_v44  ;;  %v5194_v44 = vunpack.c.h.bf16 %v18784_v43 }
0x1885   : > { %v15502_v17 = vpop.f32.mrb[208].mxu0  ;;  %15510 = vmatprep.subr.bf16.mxu1 %v5093_v27 }
0x1886   : > { %v5075_v4 = vpop.f32.mrb[209].mxu0 }
0x1887   : > { %v15503_v32 = vpop.f32.mrb[210].mxu0 }
0x1888   : > { %v5078_v16 = vpop.f32.mrb[211].mxu0  ;;  %15511 = vmatpush3.bf16.msra.mxu1 %v5093_v27  ;;  %v5095_v14 = vpack.c.bf16 %v15503_v32, %v15502_v17 }
0x1889   : > { %v5094_v26 = vpack.c.bf16 %v5078_v16, %v5075_v4 }
0x188b   : > { %15512 = vmatprep.subr.bf16.mxu1 %v5094_v26 }
0x188c   : > { %15513 = vmatpush3.bf16.msra.mxu1 %v5094_v26 }
0x188d   : > { %15514 = vmatprep.subr.bf16.mxu1 %v5095_v14 }
0x1890   : > { %15515 = vmatpush3.bf16.msra.mxu1 %v5095_v14 }
0x1891   : > { %15544 = vmatprep.subr.bf16.mxu1 %v18679_v19 }
0x1893   : > { %15517 = vmatmul.mubr.msk.bf16.vlgmr.msra.gmra.mrb[192].mxu1 %vm687_vm3, %v18603_v51 }
0x1894   : > { %15545 = vmatpush3.bf16.msra.mxu1 %v18679_v19  ;;  %15520 = vmatprep.mubr.msk.bf16.mxu1 %vm687_vm3, %v18610_v52 }
0x1895   : > { %15546 = vmatprep.subr.bf16.mxu1 %v17444_v6 }
0x1898   : > { %15547 = vmatpush3.bf16.msra.mxu1 %v17444_v6 }
0x1899   : > { %15584 = vmatprep.subr.bf16.mxu1 %v17345_v37 }
0x189b   : > { %15521 = vmatmul.mubr.msk.bf16.gmra.mrb[196].mxu1 %vm687_vm3, %v18617_v40 }
0x189c   : > { %15524 = vmatprep.mubr.msk.bf16.mxu1 %vm687_vm3, %v18624_v24 }
0x18a3   : > { %15525 = vmatmul.mubr.msk.bf16.gmra.mrb[200].mxu1 %vm687_vm3, %v18631_v48 }
0x18a4   : > { %15548 = vmatprep.mubr.msk.bf16.mxu1 %vm544_vm2, %v18825_v46 }
0x18ab   : > { %15549 = vmatmul.mubr.msk.bf16.vlgmr.msra.gmra.mrb[204].mxu1 %vm544_vm2, %v18832_v31 }
0x18ac   : > { %15552 = vmatprep.mubr.msk.bf16.mxu1 %vm544_vm2, %v18835_v7 }
0x18b3   : > { %15553 = vmatmul.mubr.msk.bf16.gmra.mrb[208].mxu1 %vm544_vm2, %v18842_v39 }
0x18b4   : > { %15556 = vmatprep.mubr.msk.bf16.mxu1 %vm544_vm2, %v18845_v1 }
0x18bb   : > { %15557 = vmatmul.mubr.msk.bf16.gmra.mrb[212].mxu1 %vm544_vm2, %v18852_v57 }
0x18bc   : > { %15596 = vmatprep.mubr.msk.bf16.mxu1 %vm17346_vm4, %v17345_v37 }
0x1966   : > { %v15518_v25 = vpop.f32.mrb[192].mxu1 }
0x1967   : > { %v5139_v10 = vadd.f32 %v18642_v42, %v15518_v25  ;;  %v5130_v58 = vpop.f32.mrb[193].mxu1 }
0x1968   : > { %v5131_v36 = vadd.f32 %v18642_v42, %v5130_v58  ;;  %v15519_v9 = vpop.f32.mrb[194].mxu1 }
0x1969   : > { %v5179_v29 = vmax.f32 %v5139_v10, 0.0  ;;  %v5142_v18 = vadd.f32 %v18642_v42, %v15519_v9  ;;  %v5133_v21 = vpop.f32.mrb[195].mxu1 }
0x196a   : > { %v5177_v13 = vmax.f32 %v5131_v36, 0.0  ;;  %v5134_v59 = vadd.f32 %v18642_v42, %v5133_v21 }
0x196b   : > { %v5180_v53 = vmax.f32 %v5142_v18, 0.0  ;;  %v5203_v50 = vadd.f32 %v5191_v12, %v5179_v29  ;;  %v5199_v12 = vunpack.c.l.bf16 %v18803_v38 }
0x196c   : > { %v5178_v63 = vmax.f32 %v5134_v59, 0.0  ;;  %v5201_v49 = vadd.f32 %v5189_v54, %v5177_v13  ;;  %v5197_v54 = vunpack.c.l.bf16 %v18796_v34 }
0x196d   : > { %v5204_v23 = vadd.f32 %v5192_v30, %v5180_v53  ;;  %v5200_v30 = vunpack.c.h.bf16 %v18803_v38 }
0x196e   : > { %v5202_v60 = vadd.f32 %v5190_v41, %v5178_v63  ;;  %v15522_v22 = vpop.f32.mrb[196].mxu1  ;;  %v5198_v41 = vunpack.c.h.bf16 %v18796_v34 }
0x196f   : > { %v5155_v61 = vadd.f32 %v18642_v42, %v15522_v22  ;;  %v5146_v20 = vpop.f32.mrb[197].mxu1  ;;  %v5214_v56 = vpack.c.bf16 %v5204_v23, %v5203_v50 }
0x1970   : > { %v5147_v62 = vadd.f32 %v18642_v42, %v5146_v20  ;;  %v15523_v33 = vpop.f32.mrb[198].mxu1  ;;  %v5213_v0 = vpack.c.bf16 %v5202_v60, %v5201_v49 }
0x1971   : > { %v5183_v55 = vmax.f32 %v5155_v61, 0.0  ;;  %v5158_v11 = vadd.f32 %v18642_v42, %v15523_v33  ;;  %v5149_v8 = vpop.f32.mrb[199].mxu1 }
0x1972   : > { %v5181_v47 = vmax.f32 %v5147_v62, 0.0  ;;  %v5150_v27 = vadd.f32 %v18642_v42, %v5149_v8  ;;  %15529 = vmatpush3.bf16.msra.mxu0 %v5213_v0 }
0x1973   : > { %v5184_v17 = vmax.f32 %v5158_v11, 0.0  ;;  %15530 = vmatprep.subr.bf16.mxu0 %v17345_v37  ;;  %v5207_v32 = vadd.f32 %v5195_v35, %v5183_v55 }
0x1974   : > { %v5182_v4 = vmax.f32 %v5150_v27, 0.0  ;;  %v5205_v14 = vadd.f32 %v5193_v3, %v5181_v47 }
0x1975   : > { %v5208_v16 = vadd.f32 %v5196_v2, %v5184_v17 }
0x1976   : > { %v5206_v26 = vadd.f32 %v5194_v44, %v5182_v4  ;;  %v15526_v25 = vpop.f32.mrb[200].mxu1  ;;  %15531 = vmatpush3.bf16.msra.mxu0 %v5214_v56 }
0x1977   : > { %v5171_v45 = vadd.f32 %v18642_v42, %v15526_v25  ;;  %v5162_v10 = vpop.f32.mrb[201].mxu1  ;;  %15532 = vmatprep.subr.bf16.mxu0 %v17345_v37  ;;  %v5216_v58 = vpack.c.bf16 %v5208_v16, %v5207_v32 }
0x1978   : > { %v5163_v36 = vadd.f32 %v18642_v42, %v5162_v10  ;;  %v15527_v43 = vpop.f32.mrb[202].mxu1  ;;  %v5215_v9 = vpack.c.bf16 %v5206_v26, %v5205_v14  ;;  %v5504_v10 = vunpack.c.l.bf16 %v18832_v31 }
0x1979   : > { %v5187_v29 = vmax.f32 %v5171_v45, 0.0  ;;  %v5174_v18 = vadd.f32 %v18642_v42, %v15527_v43  ;;  %v5165_v21 = vpop.f32.mrb[203].mxu1 }
0x197a   : > { %v5185_v13 = vmax.f32 %v5163_v36, 0.0  ;;  %v5166_v59 = vadd.f32 %v18642_v42, %v5165_v21  ;;  %15533 = vmatpush3.bf16.msra.mxu0 %v5215_v9  ;;  %v5505_v36 = vunpack.c.h.bf16 %v18832_v31  ;;  %v5503_v9 = vunpack.c.h.bf16 %v18825_v46 }
0x197b   : > { %v5188_v53 = vmax.f32 %v5174_v18, 0.0  ;;  %15534 = vmatprep.subr.bf16.mxu0 %v17345_v37  ;;  %v5211_v50 = vadd.f32 %v5199_v12, %v5187_v29  ;;  %v5506_v31 = vunpack.c.l.bf16 %v18835_v7 }
0x197c   : > { %v5186_v63 = vmax.f32 %v5166_v59, 0.0  ;;  %v5209_v49 = vadd.f32 %v5197_v54, %v5185_v13 }
0x197d   : > { %v5212_v23 = vadd.f32 %v5200_v30, %v5188_v53  ;;  %v5508_v53 = vunpack.c.l.bf16 %v18842_v39 }
0x197e   : > { %v5210_v60 = vadd.f32 %v5198_v41, %v5186_v63  ;;  %15535 = vmatpush3.bf16.msra.mxu0 %v5216_v58  ;;  %v15550_v22 = vpop.f32.mrb[204].mxu1 }
0x197f   : > { %15536 = vmatprep.subr.bf16.mxu0 %v17345_v37  ;;  %v5356_v38 = vpop.f32.mrb[205].mxu1  ;;  %v5218_v61 = vpack.c.bf16 %v5212_v23, %v5211_v50 }
0x1980   : > { %v5217_v20 = vpack.c.bf16 %v5210_v60, %v5209_v49  ;;  %v15551_v56 = vpop.f32.mrb[206].mxu1 }
0x1981   : > { %v5404_v62 = vpack.c.bf16 %v15551_v56, %v15550_v22  ;;  %v5359_v33 = vpop.f32.mrb[207].mxu1  ;;  %v5509_v22 = vunpack.c.h.bf16 %v18842_v39  ;;  %v5507_v56 = vunpack.c.h.bf16 %v18835_v7  ;;  %v5512_v39 = vunpack.c.l.bf16 %v18852_v57 }
0x1982   : > { %15537 = vmatpush3.bf16.msra.mxu0 %v5217_v20  ;;  %v5403_v34 = vpack.c.bf16 %v5359_v33, %v5356_v38 }
0x1983   : > { %15538 = vmatprep.subr.bf16.mxu0 %v17345_v37 }
0x1986   : > { %15539 = vmatpush3.bf16.msra.mxu0 %v5218_v61  ;;  %v15554_v0 = vpop.f32.mrb[208].mxu1 }
0x1987   : > { %15560 = vmatprep.subr.bf16.mxu0 %v5403_v34  ;;  %v5372_v55 = vpop.f32.mrb[209].mxu1 }
0x1988   : > { %v15555_v35 = vpop.f32.mrb[210].mxu1 }
0x1989   : > { %15541 = vmatmul.mubr.msk.bf16.vlgmr.msra.gmra.mrb[212].mxu0 %vm687_vm3, %v18685_v15  ;;  %v5406_v11 = vpack.c.bf16 %v15555_v35, %v15554_v0  ;;  %v5375_v2 = vpop.f32.mrb[211].mxu1 }
0x198a   : > { %15561 = vmatpush3.bf16.msra.mxu0 %v5403_v34  ;;  %v5405_v8 = vpack.c.bf16 %v5375_v2, %v5372_v55  ;;  %15572 = vmatprep.mubr.msk.bf16.mxu0 %vm687_vm3, %v18737_v28 }
0x198b   : > { %15562 = vmatprep.subr.bf16.mxu0 %v5404_v62 }
0x198e   : > { %15563 = vmatpush3.bf16.msra.mxu0 %v5404_v62  ;;  %v15558_v47 = vpop.f32.mrb[212].mxu1 }
0x198f   : > { %15564 = vmatprep.subr.bf16.mxu0 %v5405_v8  ;;  %v5388_v3 = vpop.f32.mrb[213].mxu1 }
0x1990   : > { %v15559_v27 = vpop.f32.mrb[214].mxu1 }
0x1991   : > { %v5408_v44 = vpack.c.bf16 %v15559_v27, %v15558_v47  ;;  %v5391_v17 = vpop.f32.mrb[215].mxu1  ;;  %v5510_v27 = vunpack.c.l.bf16 %v18845_v1 }
0x1992   : > { %15565 = vmatpush3.bf16.msra.mxu0 %v5405_v8  ;;  %v5407_v4 = vpack.c.bf16 %v5391_v17, %v5388_v3 }
0x1993   : > { %15566 = vmatprep.subr.bf16.mxu0 %v5406_v11 }
0x1996   : > { %15567 = vmatpush3.bf16.msra.mxu0 %v5406_v11 }
0x1997   : > { %15568 = vmatprep.subr.bf16.mxu0 %v5407_v4 }
0x199a   : > { %15569 = vmatpush3.bf16.msra.mxu0 %v5407_v4 }
0x199b   : > { %15570 = vmatprep.subr.bf16.mxu0 %v5408_v44 }
0x199e   : > { %15571 = vmatpush3.bf16.msra.mxu0 %v5408_v44 }
0x19a1   : > { %15573 = vmatmul.mubr.msk.bf16.vlgmr.msra.gmra.mrb[216].mxu0 %vm687_vm3, %v18603_v51 }
0x19a2   : > { %15576 = vmatprep.mubr.msk.bf16.mxu0 %vm687_vm3, %v18610_v52 }
0x19a9   : > { %15577 = vmatmul.mubr.msk.bf16.gmra.mrb[220].mxu0 %vm687_vm3, %v18617_v40 }
0x19aa   : > { %15580 = vmatprep.mubr.msk.bf16.mxu0 %vm687_vm3, %v18624_v24  ;;  %v5502_v24 = vunpack.c.l.bf16 %v18825_v46 }
0x19b1   : > { %15581 = vmatmul.mubr.msk.bf16.gmra.mrb[224].mxu0 %vm687_vm3, %v18631_v48 }
0x19b2   : > { %15628 = vmatprep.mubr.msk.bf16.mxu0 %vm687_vm3, %v18737_v28 }
0x1a5c   : > { %v5253_v32 = vpop.f32.mrb[212].mxu0 }
0x1a5d   : > { %5260 = vst.msk [vmem:[#allocation2 + $0xe0] sm:$0xff] %vm544_vm2, %v5253_v32  ;;  %v15542_v16 = vpop.f32.mrb[213].mxu0  ;;  %v5513_v32 = vunpack.c.h.bf16 %v18852_v57 }
0x1a5e   : > { %v5256_v51 = vpop.f32.mrb[214].mxu0 }
0x1a5f   : > { %5261 = vst.msk [vmem:[#allocation2 + $0xe8] sm:$0xff] %vm544_vm2, %v5256_v51  ;;  %v15543_v52 = vpop.f32.mrb[215].mxu0 }
0x1a74   : > { %v15574_v14 = vpop.f32.mrb[216].mxu0 }
0x1a75   : > { %v5452_v40 = vadd.f32 %v18642_v42, %v15574_v14  ;;  %v5443_v26 = vpop.f32.mrb[217].mxu0  ;;  %v5511_v14 = vunpack.c.h.bf16 %v18845_v1 }
0x1a76   : > { %v5444_v25 = vadd.f32 %v18642_v42, %v5443_v26  ;;  %v15575_v48 = vpop.f32.mrb[218].mxu0 }
0x1a77   : > { %v5492_v45 = vmax.f32 %v5452_v40, 0.0  ;;  %v5455_v58 = vadd.f32 %v18642_v42, %v15575_v48  ;;  %v5446_v43 = vpop.f32.mrb[219].mxu0 }
0x1a78   : > { %v5490_v29 = vmax.f32 %v5444_v25, 0.0  ;;  %v5447_v12 = vadd.f32 %v18642_v42, %v5446_v43  ;;  %v18948_v43 = vld [vmem:[%s17451_s19 + $0x310] sm:$0xff]  }
0x1a79   : > { %v5493_v18 = vmax.f32 %v5455_v58, 0.0  ;;  %v5516_v13 = vadd.f32 %v5504_v10, %v5492_v45 }
0x1a7a   : > { %v5514_v30 = vadd.f32 %v5502_v24, %v5490_v29  ;;  %v5491_v21 = vmax.f32 %v5447_v12, 0.0 }
0x1a7b   : > { %v5517_v54 = vadd.f32 %v5505_v36, %v5493_v18  ;;  %v18944_v36 = vld [vmem:[%s17451_s19 + $0x308] sm:$0xff]  }
0x1a7c   : > { %v5515_v59 = vadd.f32 %v5503_v9, %v5491_v21  ;;  %v15578_v41 = vpop.f32.mrb[220].mxu0  ;;  %v18967_v9 = vld [vmem:[%s17451_s19 + $0x328] sm:$0xff]  }
0x1a7d   : > { %v5468_v63 = vadd.f32 %v18642_v42, %v15578_v41  ;;  %v5459_v50 = vpop.f32.mrb[221].mxu0  ;;  %v5527_v23 = vpack.c.bf16 %v5517_v54, %v5516_v13 }
0x1a7e   : > { %v5460_v46 = vadd.f32 %v18642_v42, %v5459_v50  ;;  %v15579_v49 = vpop.f32.mrb[222].mxu0  ;;  %v5526_v60 = vpack.c.bf16 %v5515_v59, %v5514_v30 }
0x1a7f   : > { %v5496_v38 = vmax.f32 %v5468_v63, 0.0  ;;  %v5471_v61 = vadd.f32 %v18642_v42, %v15579_v49  ;;  %v5462_v20 = vpop.f32.mrb[223].mxu0 }
0x1a80   : > { %v5494_v62 = vmax.f32 %v5460_v46, 0.0  ;;  %v5463_v33 = vadd.f32 %v18642_v42, %v5462_v20  ;;  %15585 = vmatpush3.bf16.msra.mxu1 %v5526_v60 }
0x1a81   : > { %v5520_v34 = vadd.f32 %v5508_v53, %v5496_v38  ;;  %v5497_v0 = vmax.f32 %v5471_v61, 0.0  ;;  %15586 = vmatprep.subr.bf16.mxu1 %v17345_v37 }
0x1a82   : > { %v5518_v55 = vadd.f32 %v5506_v31, %v5494_v62  ;;  %v5495_v35 = vmax.f32 %v5463_v33, 0.0  ;;  %v18978_v62 = vld [vmem:[%s20949_s0 + $0x8] sm:$0xff]   ;;  %v18985_v33 = vld [vmem:[%s20949_s0 + $0x10] sm:$0xff]  }
0x1a83   : > { %v5521_v11 = vadd.f32 %v5509_v22, %v5497_v0  ;;  %v18999_v0 = vld [vmem:[%s20949_s0 + $0x20] sm:$0xff]  }
0x1a84   : > { %v5519_v2 = vadd.f32 %v5507_v56, %v5495_v35  ;;  %v15582_v8 = vpop.f32.mrb[224].mxu0  ;;  %15587 = vmatpush3.bf16.msra.mxu1 %v5527_v23 }
0x1a85   : > { %v5484_v47 = vadd.f32 %v18642_v42, %v15582_v8  ;;  %v5475_v3 = vpop.f32.mrb[225].mxu0  ;;  %15588 = vmatprep.subr.bf16.mxu1 %v17345_v37  ;;  %v5529_v7 = vpack.c.bf16 %v5521_v11, %v5520_v34  ;;  %v18992_v34 = vld [vmem:[%s20949_s0 + $0x18] sm:$0xff]   ;;  %v19015_v11 = vld [vmem:[%s20954_s5] ss:$0 sm:$0xff] }
0x1a86   : > { %v5476_v44 = vadd.f32 %v18642_v42, %v5475_v3  ;;  %v15583_v17 = vpop.f32.mrb[226].mxu0  ;;  %v5528_v4 = vpack.c.bf16 %v5519_v2, %v5518_v55  ;;  %v19006_v55 = vld [vmem:[%s20949_s0 + $0x28] sm:$0xff]  }
0x1a87   : > { %v5500_v16 = vmax.f32 %v5484_v47, 0.0  ;;  %v5487_v51 = vadd.f32 %v18642_v42, %v15583_v17  ;;  %v5478_v52 = vpop.f32.mrb[227].mxu0 }
0x1a88   : > { %v5498_v40 = vmax.f32 %v5476_v44, 0.0  ;;  %v5479_v26 = vadd.f32 %v18642_v42, %v5478_v52  ;;  %15589 = vmatpush3.bf16.msra.mxu1 %v5528_v4  ;;  %v18935_v42 = vld [vmem:[%s17451_s19 + $0x300] sm:$0xff]  }
0x1a89   : > { %v5524_v24 = vadd.f32 %v5512_v39, %v5500_v16  ;;  %v5501_v25 = vmax.f32 %v5487_v51, 0.0  ;;  %15590 = vmatprep.subr.bf16.mxu1 %v17345_v37  ;;  %v5815_v39 = vunpack.c.l.bf16 %v18935_v42  ;;  %v5816_v4 = vunpack.c.h.bf16 %v18935_v42 }
0x1a8a   : > { %v5522_v48 = vadd.f32 %v5510_v27, %v5498_v40  ;;  %v5499_v45 = vmax.f32 %v5479_v26, 0.0  ;;  %v5817_v27 = vunpack.c.l.bf16 %v18944_v36 }
0x1a8b   : > { %v5525_v10 = vadd.f32 %v5513_v32, %v5501_v25 }
0x1a8c   : > { %v5523_v57 = vadd.f32 %v5511_v14, %v5499_v45  ;;  %15591 = vmatpush3.bf16.msra.mxu1 %v5529_v7 }
0x1a8d   : > { %15592 = vmatprep.subr.bf16.mxu1 %v17345_v37  ;;  %v5531_v58 = vpack.c.bf16 %v5525_v10, %v5524_v24 }
0x1a8e   : > { %v5530_v1 = vpack.c.bf16 %v5523_v57, %v5522_v48 }
0x1a90   : > { %15593 = vmatpush3.bf16.msra.mxu1 %v5530_v1 }
0x1a91   : > { %15594 = vmatprep.subr.bf16.mxu1 %v17345_v37 }
0x1a94   : > { %15595 = vmatpush3.bf16.msra.mxu1 %v5531_v58  ;;  %v5819_v58 = vunpack.c.l.bf16 %v18948_v43 }
0x1a95   : > { %15600 = vmatprep.subr.bf16.mxu1 %v18679_v19 }
0x1a97   : > { %15597 = vmatmul.mubr.msk.bf16.vlgmr.msra.gmra.mrb[216].mxu1 %vm687_vm3, %v18685_v15  ;;  %v18960_v15 = vld [vmem:[%s17451_s19 + $0x320] sm:$0xff]  }
0x1a98   : > { %15601 = vmatpush3.bf16.msra.mxu1 %v18679_v19  ;;  %15604 = vmatprep.mubr.msk.bf16.mxu1 %vm544_vm2, %v18935_v42  ;;  %v18957_v19 = vld [vmem:[%s17451_s19 + $0x318] sm:$0xff]  }
0x1a99   : > { %15602 = vmatprep.subr.bf16.mxu1 %v17444_v6  ;;  %v5821_v48 = vunpack.c.l.bf16 %v18957_v19 }
0x1a9c   : > { %15603 = vmatpush3.bf16.msra.mxu1 %v17444_v6 }
0x1a9d   : > { %15640 = vmatprep.subr.bf16.mxu1 %v17345_v37 }
0x1a9f   : > { %15605 = vmatmul.mubr.msk.bf16.vlgmr.msra.gmra.mrb[220].mxu1 %vm544_vm2, %v18944_v36 }
0x1aa0   : > { %15608 = vmatprep.mubr.msk.bf16.mxu1 %vm544_vm2, %v18948_v43 }
0x1aa7   : > { %15609 = vmatmul.mubr.msk.bf16.gmra.mrb[224].mxu1 %vm544_vm2, %v18957_v19 }
0x1aa8   : > { %15612 = vmatprep.mubr.msk.bf16.mxu1 %vm544_vm2, %v18960_v15 }
0x1aaf   : > { %15613 = vmatmul.mubr.msk.bf16.gmra.mrb[228].mxu1 %vm544_vm2, %v18967_v9 }
0x1ab0   : > { %15652 = vmatprep.mubr.msk.bf16.mxu1 %vm17346_vm4, %v17345_v37 }
0x1b6a   : > { %v5566_v29 = vpop.f32.mrb[216].mxu1 }
0x1b6b   : > { %5573 = vst.msk [vmem:[#allocation2 + $0xf0] sm:$0xff] %vm544_vm2, %v5566_v29  ;;  %v15598_v12 = vpop.f32.mrb[217].mxu1  ;;  %v5822_v29 = vunpack.c.h.bf16 %v18957_v19  ;;  %v5825_v19 = vunpack.c.l.bf16 %v18967_v9 }
0x1b6c   : > { %v5569_v18 = vpop.f32.mrb[218].mxu1 }
0x1b6d   : > { %5574 = vst.msk [vmem:[#allocation2 + $0xf8] sm:$0xff] %vm544_vm2, %v5569_v18  ;;  %v15599_v30 = vpop.f32.mrb[219].mxu1 }
0x1b72   : > { %v15606_v21 = vpop.f32.mrb[220].mxu1 }
0x1b73   : > { %v5669_v13 = vpop.f32.mrb[221].mxu1 }
0x1b74   : > { %v15607_v54 = vpop.f32.mrb[222].mxu1 }
0x1b75   : > { %v5717_v59 = vpack.c.bf16 %v15607_v54, %v15606_v21  ;;  %v5672_v41 = vpop.f32.mrb[223].mxu1  ;;  %v5820_v21 = vunpack.c.h.bf16 %v18948_v43 }
0x1b76   : > { %v5716_v53 = vpack.c.bf16 %v5672_v41, %v5669_v13 }
0x1b78   : > { %15616 = vmatprep.subr.bf16.mxu0 %v5716_v53 }
0x1b79   : > { %15617 = vmatpush3.bf16.msra.mxu0 %v5716_v53 }
0x1b7a   : > { %v15610_v63 = vpop.f32.mrb[224].mxu1  ;;  %15618 = vmatprep.subr.bf16.mxu0 %v5717_v59 }
0x1b7b   : > { %v5685_v50 = vpop.f32.mrb[225].mxu1 }
0x1b7c   : > { %v15611_v23 = vpop.f32.mrb[226].mxu1 }
0x1b7d   : > { %v5719_v31 = vpack.c.bf16 %v15611_v23, %v15610_v63  ;;  %v5688_v46 = vpop.f32.mrb[227].mxu1  ;;  %15619 = vmatpush3.bf16.msra.mxu0 %v5717_v59 }
0x1b7e   : > { %v5718_v49 = vpack.c.bf16 %v5688_v46, %v5685_v50 }
0x1b80   : > { %15620 = vmatprep.subr.bf16.mxu0 %v5718_v49 }
0x1b81   : > { %15621 = vmatpush3.bf16.msra.mxu0 %v5718_v49 }
0x1b82   : > { %v15614_v60 = vpop.f32.mrb[228].mxu1  ;;  %15622 = vmatprep.subr.bf16.mxu0 %v5719_v31 }
0x1b83   : > { %v5701_v22 = vpop.f32.mrb[229].mxu1 }
0x1b84   : > { %v15615_v38 = vpop.f32.mrb[230].mxu1 }
0x1b85   : > { %v5721_v61 = vpack.c.bf16 %v15615_v38, %v15614_v60  ;;  %v5704_v20 = vpop.f32.mrb[231].mxu1  ;;  %15623 = vmatpush3.bf16.msra.mxu0 %v5719_v31  ;;  %v5823_v60 = vunpack.c.l.bf16 %v18960_v15 }
0x1b86   : > { %v5720_v56 = vpack.c.bf16 %v5704_v20, %v5701_v22  ;;  %v5826_v20 = vunpack.c.h.bf16 %v18967_v9 }
0x1b88   : > { %15624 = vmatprep.subr.bf16.mxu0 %v5720_v56 }
0x1b89   : > { %15625 = vmatpush3.bf16.msra.mxu0 %v5720_v56 }
0x1b8a   : > { %15626 = vmatprep.subr.bf16.mxu0 %v5721_v61 }
0x1b8d   : > { %15627 = vmatpush3.bf16.msra.mxu0 %v5721_v61 }
0x1b90   : > { %15629 = vmatmul.mubr.msk.bf16.vlgmr.msra.gmra.mrb[228].mxu0 %vm687_vm3, %v18978_v62 }
0x1b91   : > { %15632 = vmatprep.mubr.msk.bf16.mxu0 %vm687_vm3, %v18985_v33 }
0x1b98   : > { %15633 = vmatmul.mubr.msk.bf16.gmra.mrb[232].mxu0 %vm687_vm3, %v18992_v34 }
0x1b99   : > { %15636 = vmatprep.mubr.msk.bf16.mxu0 %vm687_vm3, %v18999_v0 }
0x1ba0   : > { %15637 = vmatmul.mubr.msk.bf16.gmra.mrb[236].mxu0 %vm687_vm3, %v19006_v55 }
0x1ba1   : > { %15684 = vmatprep.mubr.msk.bf16.mxu0 %vm687_vm3, %v18737_v28  ;;  %v5818_v28 = vunpack.c.h.bf16 %v18944_v36 }
0x1c63   : > { %v15630_v35 = vpop.f32.mrb[228].mxu0 }
0x1c64   : > { %v5765_v2 = vadd.f32 %v19015_v11, %v15630_v35  ;;  %v5756_v8 = vpop.f32.mrb[229].mxu0 }
0x1c65   : > { %v5757_v47 = vadd.f32 %v19015_v11, %v5756_v8  ;;  %v15631_v3 = vpop.f32.mrb[230].mxu0  ;;  %v5824_v8 = vunpack.c.h.bf16 %v18960_v15 }
0x1c66   : > { %v5805_v7 = vmax.f32 %v5765_v2, 0.0  ;;  %v5768_v44 = vadd.f32 %v19015_v11, %v15631_v3  ;;  %v5759_v17 = vpop.f32.mrb[231].mxu0 }
0x1c67   : > { %v5803_v32 = vmax.f32 %v5757_v47, 0.0  ;;  %v5760_v16 = vadd.f32 %v19015_v11, %v5759_v17 }
0x1c68   : > { %v5806_v51 = vmax.f32 %v5768_v44, 0.0  ;;  %v5829_v40 = vadd.f32 %v5817_v27, %v5805_v7 }
0x1c69   : > { %v5827_v52 = vadd.f32 %v5815_v39, %v5803_v32  ;;  %v5804_v14 = vmax.f32 %v5760_v16, 0.0  ;;  %v19052_v32 = vld [vmem:[%s20953_s4] sm:$0xff]  }
0x1c6a   : > { %v5830_v26 = vadd.f32 %v5818_v28, %v5806_v51  ;;  %v19058_v16 = vld [vmem:[%s20950_s1] sm:$0xff]   ;;  %v19066_v51 = vld [vmem:[%s17451_s19 + $0x338] sm:$0xff]  }
0x1c6b   : > { %v5828_v24 = vadd.f32 %v5816_v4, %v5804_v14  ;;  %v15634_v25 = vpop.f32.mrb[232].mxu0  ;;  %v19047_v4 = vld [vmem:[%s17451_s19 + $0x330] sm:$0xff]   ;;  %v19079_v14 = vld [vmem:[%s17451_s19 + $0x348] sm:$0xff]  }
0x1c6c   : > { %v5781_v45 = vadd.f32 %v19015_v11, %v15634_v25  ;;  %v5772_v10 = vpop.f32.mrb[233].mxu0  ;;  %v5840_v57 = vpack.c.bf16 %v5830_v26, %v5829_v40  ;;  %v19082_v40 = vld [vmem:[%s17451_s19 + $0x350] sm:$0xff]   ;;  %v19089_v26 = vld [vmem:[%s17451_s19 + $0x358] sm:$0xff]  }
0x1c6d   : > { %v5773_v1 = vadd.f32 %v19015_v11, %v5772_v10  ;;  %v15635_v42 = vpop.f32.mrb[234].mxu0  ;;  %v5839_v36 = vpack.c.bf16 %v5828_v24, %v5827_v52  ;;  %v19070_v52 = vld [vmem:[%s17451_s19 + $0x340] sm:$0xff]  }
0x1c6e   : > { %v5809_v12 = vmax.f32 %v5781_v45, 0.0  ;;  %v5784_v18 = vadd.f32 %v19015_v11, %v15635_v42  ;;  %v5775_v30 = vpop.f32.mrb[235].mxu0 }
0x1c6f   : > { %v5807_v13 = vmax.f32 %v5773_v1, 0.0  ;;  %v5776_v54 = vadd.f32 %v19015_v11, %v5775_v30  ;;  %15641 = vmatpush3.bf16.msra.mxu1 %v5839_v36 }
0x1c70   : > { %v5833_v59 = vadd.f32 %v5821_v48, %v5809_v12  ;;  %v5810_v41 = vmax.f32 %v5784_v18, 0.0  ;;  %15642 = vmatprep.subr.bf16.mxu1 %v17345_v37 }
0x1c71   : > { %v5831_v53 = vadd.f32 %v5819_v58, %v5807_v13  ;;  %v5808_v63 = vmax.f32 %v5776_v54, 0.0 }
0x1c72   : > { %v5834_v50 = vadd.f32 %v5822_v29, %v5810_v41 }
0x1c73   : > { %v5832_v23 = vadd.f32 %v5820_v21, %v5808_v63  ;;  %v15638_v31 = vpop.f32.mrb[236].mxu0  ;;  %15643 = vmatpush3.bf16.msra.mxu1 %v5840_v57 }
0x1c74   : > { %v5797_v46 = vadd.f32 %v19015_v11, %v15638_v31  ;;  %v5788_v49 = vpop.f32.mrb[237].mxu0  ;;  %15644 = vmatprep.subr.bf16.mxu1 %v17345_v37  ;;  %v5842_v43 = vpack.c.bf16 %v5834_v50, %v5833_v59  ;;  %v19118_v31 = vld [vmem:[%s17451_s19 + $0x368] sm:$0xff]  }
0x1c75   : > { %v5789_v22 = vadd.f32 %v19015_v11, %v5788_v49  ;;  %v15639_v38 = vpop.f32.mrb[238].mxu0  ;;  %v5841_v61 = vpack.c.bf16 %v5832_v23, %v5831_v53  ;;  %v19111_v23 = vld [vmem:[%s17451_s19 + $0x360] sm:$0xff]  }
0x1c76   : > { %v5813_v56 = vmax.f32 %v5797_v46, 0.0  ;;  %v5800_v35 = vadd.f32 %v19015_v11, %v15639_v38  ;;  %v5791_v2 = vpop.f32.mrb[239].mxu0  ;;  %v19128_v46 = vld [vmem:[%s17451_s19 + $0x378] sm:$0xff]   ;;  %v19131_v49 = vld [vmem:[%s17451_s19 + $0x380] sm:$0xff]  }
0x1c77   : > { %v5811_v39 = vmax.f32 %v5789_v22, 0.0  ;;  %v5792_v47 = vadd.f32 %v19015_v11, %v5791_v2  ;;  %15645 = vmatpush3.bf16.msra.mxu1 %v5841_v61  ;;  %v6128_v61 = vunpack.c.l.bf16 %v19047_v4  ;;  %v6130_v2 = vunpack.c.l.bf16 %v19066_v51 }
0x1c78   : > { %v5837_v3 = vadd.f32 %v5825_v19, %v5813_v56  ;;  %v5814_v7 = vmax.f32 %v5800_v35, 0.0  ;;  %15646 = vmatprep.subr.bf16.mxu1 %v17345_v37  ;;  %v19121_v19 = vld [vmem:[%s17451_s19 + $0x370] sm:$0xff]  }
0x1c79   : > { %v5835_v27 = vadd.f32 %v5823_v60, %v5811_v39  ;;  %v5812_v44 = vmax.f32 %v5792_v47, 0.0  ;;  %v6131_v39 = vunpack.c.h.bf16 %v19066_v51 }
0x1c7a   : > { %v5838_v28 = vadd.f32 %v5826_v20, %v5814_v7 }
0x1c7b   : > { %v5836_v9 = vadd.f32 %v5824_v8, %v5812_v44  ;;  %15647 = vmatpush3.bf16.msra.mxu1 %v5842_v43  ;;  %v19138_v43 = vld [vmem:[%s17451_s19 + $0x388] sm:$0xff]  }
0x1c7c   : > { %15648 = vmatprep.subr.bf16.mxu1 %v17345_v37  ;;  %v5844_v17 = vpack.c.bf16 %v5838_v28, %v5837_v3  ;;  %v6129_v3 = vunpack.c.h.bf16 %v19047_v4 }
0x1c7d   : > { %v5843_v15 = vpack.c.bf16 %v5836_v9, %v5835_v27 }
0x1c7f   : > { %15649 = vmatpush3.bf16.msra.mxu1 %v5843_v15 }
0x1c80   : > { %15650 = vmatprep.subr.bf16.mxu1 %v17345_v37 }
0x1c83   : > { %15651 = vmatpush3.bf16.msra.mxu1 %v5844_v17 }
0x1c84   : > { %15656 = vmatprep.subr.bf16.mxu1 %v19052_v32 }
0x1c86   : > { %15653 = vmatmul.mubr.msk.bf16.vlgmr.msra.gmra.mrb[232].mxu1 %vm687_vm3, %v19058_v16 }
0x1c87   : > { %15657 = vmatpush3.bf16.msra.mxu1 %v19052_v32  ;;  %15660 = vmatprep.mubr.msk.bf16.mxu1 %vm544_vm2, %v19047_v4 }
0x1c88   : > { %15658 = vmatprep.subr.bf16.mxu1 %v17444_v6 }
0x1c8b   : > { %15659 = vmatpush3.bf16.msra.mxu1 %v17444_v6 }
0x1c8c   : > { %15696 = vmatprep.subr.bf16.mxu1 %v17345_v37 }
0x1c8e   : > { %15661 = vmatmul.mubr.msk.bf16.vlgmr.msra.gmra.mrb[236].mxu1 %vm544_vm2, %v19066_v51  ;;  %v6132_v51 = vunpack.c.l.bf16 %v19070_v52 }
0x1c8f   : > { %15664 = vmatprep.mubr.msk.bf16.mxu1 %vm544_vm2, %v19070_v52 }
0x1c96   : > { %15665 = vmatmul.mubr.msk.bf16.gmra.mrb[240].mxu1 %vm544_vm2, %v19079_v14 }
0x1c97   : > { %15668 = vmatprep.mubr.msk.bf16.mxu1 %vm544_vm2, %v19082_v40 }
0x1c9e   : > { %15669 = vmatmul.mubr.msk.bf16.gmra.mrb[244].mxu1 %vm544_vm2, %v19089_v26 }
0x1c9f   : > { %15708 = vmatprep.mubr.msk.bf16.mxu1 %vm17346_vm4, %v17345_v37 }
0x1d59   : > { %v5879_v24 = vpop.f32.mrb[232].mxu1 }
0x1d5a   : > { %5886 = vst.msk [vmem:[#allocation2 + $0x100] sm:$0xff] %vm544_vm2, %v5879_v24  ;;  %v15654_v25 = vpop.f32.mrb[233].mxu1 }
0x1d5b   : > { %v5882_v48 = vpop.f32.mrb[234].mxu1 }
0x1d5c   : > { %5887 = vst.msk [vmem:[#allocation2 + $0x108] sm:$0xff] %vm544_vm2, %v5882_v48  ;;  %v15655_v45 = vpop.f32.mrb[235].mxu1  ;;  %v6134_v48 = vunpack.c.l.bf16 %v19079_v14 }
0x1d61   : > { %v15662_v10 = vpop.f32.mrb[236].mxu1 }
0x1d62   : > { %v5982_v57 = vpop.f32.mrb[237].mxu1 }
0x1d63   : > { %v15663_v58 = vpop.f32.mrb[238].mxu1 }
0x1d64   : > { %v6030_v1 = vpack.c.bf16 %v15663_v58, %v15662_v10  ;;  %v5985_v42 = vpop.f32.mrb[239].mxu1 }
0x1d65   : > { %v6029_v36 = vpack.c.bf16 %v5985_v42, %v5982_v57  ;;  %v6135_v42 = vunpack.c.h.bf16 %v19079_v14  ;;  %v6138_v14 = vunpack.c.l.bf16 %v19089_v26 }
0x1d67   : > { %15672 = vmatprep.subr.bf16.mxu0 %v6029_v36 }
0x1d68   : > { %15673 = vmatpush3.bf16.msra.mxu0 %v6029_v36 }
0x1d69   : > { %v15666_v29 = vpop.f32.mrb[240].mxu1  ;;  %15674 = vmatprep.subr.bf16.mxu0 %v6030_v1 }
0x1d6a   : > { %v5998_v12 = vpop.f32.mrb[241].mxu1 }
0x1d6b   : > { %v15667_v18 = vpop.f32.mrb[242].mxu1 }
0x1d6c   : > { %v6032_v30 = vpack.c.bf16 %v15667_v18, %v15666_v29  ;;  %v6001_v21 = vpop.f32.mrb[243].mxu1  ;;  %15675 = vmatpush3.bf16.msra.mxu0 %v6030_v1  ;;  %v6133_v18 = vunpack.c.h.bf16 %v19070_v52 }
0x1d6d   : > { %v6031_v13 = vpack.c.bf16 %v6001_v21, %v5998_v12 }
0x1d6f   : > { %15676 = vmatprep.subr.bf16.mxu0 %v6031_v13 }
0x1d70   : > { %15677 = vmatpush3.bf16.msra.mxu0 %v6031_v13 }
0x1d71   : > { %v15670_v54 = vpop.f32.mrb[244].mxu1  ;;  %15678 = vmatprep.subr.bf16.mxu0 %v6032_v30 }
0x1d72   : > { %v6014_v59 = vpop.f32.mrb[245].mxu1 }
0x1d73   : > { %v15671_v41 = vpop.f32.mrb[246].mxu1 }
0x1d74   : > { %v6034_v53 = vpack.c.bf16 %v15671_v41, %v15670_v54  ;;  %v6017_v63 = vpop.f32.mrb[247].mxu1  ;;  %15679 = vmatpush3.bf16.msra.mxu0 %v6032_v30 }
0x1d75   : > { %v6033_v50 = vpack.c.bf16 %v6017_v63, %v6014_v59 }
0x1d77   : > { %15680 = vmatprep.subr.bf16.mxu0 %v6033_v50 }
0x1d78   : > { %15681 = vmatpush3.bf16.msra.mxu0 %v6033_v50 }
0x1d79   : > { %15682 = vmatprep.subr.bf16.mxu0 %v6034_v53 }
0x1d7c   : > { %15683 = vmatpush3.bf16.msra.mxu0 %v6034_v53 }
0x1d7d   : > { %15712 = vmatprep.subr.bf16.mxu0 %v19052_v32 }
0x1d7f   : > { %15685 = vmatmul.mubr.msk.bf16.vlgmr.msra.gmra.mrb[240].mxu0 %vm687_vm3, %v18978_v62 }
0x1d80   : > { %15713 = vmatpush3.bf16.msra.mxu0 %v19052_v32  ;;  %15688 = vmatprep.mubr.msk.bf16.mxu0 %vm687_vm3, %v18985_v33 }
0x1d81   : > { %15714 = vmatprep.subr.bf16.mxu0 %v17444_v6 }
0x1d84   : > { %15715 = vmatpush3.bf16.msra.mxu0 %v17444_v6 }
0x1d85   : > { %15752 = vmatprep.subr.bf16.mxu0 %v17345_v37 }
0x1d87   : > { %15689 = vmatmul.mubr.msk.bf16.gmra.mrb[244].mxu0 %vm687_vm3, %v18992_v34 }
0x1d88   : > { %15692 = vmatprep.mubr.msk.bf16.mxu0 %vm687_vm3, %v18999_v0 }
0x1d8f   : > { %15693 = vmatmul.mubr.msk.bf16.gmra.mrb[248].mxu0 %vm687_vm3, %v19006_v55 }
0x1d90   : > { %15716 = vmatprep.mubr.msk.bf16.mxu0 %vm544_vm2, %v19111_v23 }
0x1d97   : > { %15717 = vmatmul.mubr.msk.bf16.vlgmr.msra.gmra.mrb[252].mxu0 %vm544_vm2, %v19118_v31 }
0x1d98   : > { %15720 = vmatprep.mubr.msk.bf16.mxu0 %vm544_vm2, %v19121_v19 }
0x1d9f   : > { %15721 = vmatmul.mubr.msk.bf16.gmra.mrb[0].mxu0 %vm544_vm2, %v19128_v46 }
0x1da0   : > { %15724 = vmatprep.mubr.msk.bf16.mxu0 %vm544_vm2, %v19131_v49 }
0x1da7   : > { %15725 = vmatmul.mubr.msk.bf16.gmra.mrb[4].mxu0 %vm544_vm2, %v19138_v43 }
0x1da8   : > { %15764 = vmatprep.mubr.msk.bf16.mxu0 %vm17346_vm4, %v17345_v37 }
0x1e52   : > { %v15686_v60 = vpop.f32.mrb[240].mxu0 }
0x1e53   : > { %v6078_v22 = vadd.f32 %v19015_v11, %v15686_v60  ;;  %v6069_v38 = vpop.f32.mrb[241].mxu0 }
0x1e54   : > { %v6070_v20 = vadd.f32 %v19015_v11, %v6069_v38  ;;  %v15687_v56 = vpop.f32.mrb[242].mxu0  ;;  %v6136_v38 = vunpack.c.l.bf16 %v19082_v40 }
0x1e55   : > { %v6118_v35 = vmax.f32 %v6078_v22, 0.0  ;;  %v6081_v8 = vadd.f32 %v19015_v11, %v15687_v56  ;;  %v6072_v47 = vpop.f32.mrb[243].mxu0 }
0x1e56   : > { %v6116_v7 = vmax.f32 %v6070_v20, 0.0  ;;  %v6073_v27 = vadd.f32 %v19015_v11, %v6072_v47  ;;  %v6137_v47 = vunpack.c.h.bf16 %v19082_v40 }
0x1e57   : > { %v6119_v44 = vmax.f32 %v6081_v8, 0.0  ;;  %v6142_v17 = vadd.f32 %v6130_v2, %v6118_v35  ;;  %v6139_v35 = vunpack.c.h.bf16 %v19089_v26 }
0x1e58   : > { %v6140_v28 = vadd.f32 %v6128_v61, %v6116_v7  ;;  %v6117_v9 = vmax.f32 %v6073_v27, 0.0 }
0x1e59   : > { %v6143_v15 = vadd.f32 %v6131_v39, %v6119_v44 }
0x1e5a   : > { %v6141_v24 = vadd.f32 %v6129_v3, %v6117_v9  ;;  %v15690_v25 = vpop.f32.mrb[244].mxu0 }
0x1e5b   : > { %v6094_v45 = vadd.f32 %v19015_v11, %v15690_v25  ;;  %v6085_v10 = vpop.f32.mrb[245].mxu0  ;;  %v6153_v57 = vpack.c.bf16 %v6143_v15, %v6142_v17 }
0x1e5c   : > { %v6086_v4 = vadd.f32 %v19015_v11, %v6085_v10  ;;  %v15691_v58 = vpop.f32.mrb[246].mxu0  ;;  %v6152_v1 = vpack.c.bf16 %v6141_v24, %v6140_v28 }
0x1e5d   : > { %v6122_v36 = vmax.f32 %v6094_v45, 0.0  ;;  %v6097_v29 = vadd.f32 %v19015_v11, %v15691_v58  ;;  %v6088_v12 = vpop.f32.mrb[247].mxu0 }
0x1e5e   : > { %v6120_v30 = vmax.f32 %v6086_v4, 0.0  ;;  %v6089_v21 = vadd.f32 %v19015_v11, %v6088_v12  ;;  %15697 = vmatpush3.bf16.msra.mxu1 %v6152_v1 }
0x1e5f   : > { %v6146_v13 = vadd.f32 %v6134_v48, %v6122_v36  ;;  %v6123_v54 = vmax.f32 %v6097_v29, 0.0  ;;  %15698 = vmatprep.subr.bf16.mxu1 %v17345_v37  ;;  %v19178_v29 = vld [vmem:[%s20949_s0] sm:$0xff]  }
0x1e60   : > { %v6144_v59 = vadd.f32 %v6132_v51, %v6120_v30  ;;  %v6121_v41 = vmax.f32 %v6089_v21, 0.0 }
0x1e61   : > { %v6147_v53 = vadd.f32 %v6135_v42, %v6123_v54 }
0x1e62   : > { %v6145_v63 = vadd.f32 %v6133_v18, %v6121_v41  ;;  %v15694_v50 = vpop.f32.mrb[248].mxu0  ;;  %15699 = vmatpush3.bf16.msra.mxu1 %v6153_v57 }
0x1e63   : > { %v6110_v60 = vadd.f32 %v19015_v11, %v15694_v50  ;;  %v6101_v22 = vpop.f32.mrb[249].mxu0  ;;  %15700 = vmatprep.subr.bf16.mxu1 %v17345_v37  ;;  %v6155_v52 = vpack.c.bf16 %v6147_v53, %v6146_v13 }
0x1e64   : > { %v6102_v61 = vadd.f32 %v19015_v11, %v6101_v22  ;;  %v15695_v20 = vpop.f32.mrb[250].mxu0  ;;  %v6154_v56 = vpack.c.bf16 %v6145_v63, %v6144_v59 }
0x1e65   : > { %v6126_v2 = vmax.f32 %v6110_v60, 0.0  ;;  %v6113_v8 = vadd.f32 %v19015_v11, %v15695_v20  ;;  %v6104_v39 = vpop.f32.mrb[251].mxu0 }
0x1e66   : > { %v6124_v3 = vmax.f32 %v6102_v61, 0.0  ;;  %v6105_v7 = vadd.f32 %v19015_v11, %v6104_v39  ;;  %15701 = vmatpush3.bf16.msra.mxu1 %v6154_v56  ;;  %v6443_v61 = vunpack.c.l.bf16 %v19118_v31  ;;  %v6444_v56 = vunpack.c.h.bf16 %v19118_v31 }
0x1e67   : > { %v6150_v27 = vadd.f32 %v6138_v14, %v6126_v2  ;;  %v6127_v44 = vmax.f32 %v6113_v8, 0.0  ;;  %15702 = vmatprep.subr.bf16.mxu1 %v17345_v37  ;;  %v6441_v8 = vunpack.c.l.bf16 %v19111_v23 }
0x1e68   : > { %v6148_v28 = vadd.f32 %v6136_v38, %v6124_v3  ;;  %v6125_v9 = vmax.f32 %v6105_v7, 0.0 }
0x1e69   : > { %v6151_v17 = vadd.f32 %v6139_v35, %v6127_v44 }
0x1e6a   : > { %v6149_v15 = vadd.f32 %v6137_v47, %v6125_v9  ;;  %15703 = vmatpush3.bf16.msra.mxu1 %v6155_v52  ;;  %v15718_v26 = vpop.f32.mrb[252].mxu0  ;;  %v6442_v47 = vunpack.c.h.bf16 %v19111_v23 }
0x1e6b   : > { %15704 = vmatprep.subr.bf16.mxu1 %v17345_v37  ;;  %v6295_v24 = vpop.f32.mrb[253].mxu0  ;;  %v6157_v25 = vpack.c.bf16 %v6151_v17, %v6150_v27 }
0x1e6c   : > { %v6156_v48 = vpack.c.bf16 %v6149_v15, %v6148_v28  ;;  %v15719_v40 = vpop.f32.mrb[254].mxu0 }
0x1e6d   : > { %v6298_v45 = vpop.f32.mrb[255].mxu0  ;;  %v6343_v10 = vpack.c.bf16 %v15719_v40, %v15718_v26 }
0x1e6e   : > { %15705 = vmatpush3.bf16.msra.mxu1 %v6156_v48  ;;  %v6342_v57 = vpack.c.bf16 %v6298_v45, %v6295_v24  ;;  %v6447_v45 = vunpack.c.l.bf16 %v19128_v46 }
0x1e6f   : > { %15706 = vmatprep.subr.bf16.mxu1 %v17345_v37 }
0x1e72   : > { %15707 = vmatpush3.bf16.msra.mxu1 %v6157_v25  ;;  %v15722_v51 = vpop.f32.mrb[0].mxu0 }
0x1e73   : > { %15728 = vmatprep.subr.bf16.mxu1 %v6342_v57  ;;  %v6311_v4 = vpop.f32.mrb[1].mxu0 }
0x1e74   : > { %v15723_v58 = vpop.f32.mrb[2].mxu0 }
0x1e75   : > { %15709 = vmatmul.mubr.msk.bf16.vlgmr.msra.gmra.mrb[248].mxu1 %vm687_vm3, %v19058_v16  ;;  %v6314_v1 = vpop.f32.mrb[3].mxu0  ;;  %v6345_v42 = vpack.c.bf16 %v15723_v58, %v15722_v51 }
0x1e76   : > { %15729 = vmatpush3.bf16.msra.mxu1 %v6342_v57  ;;  %v6344_v36 = vpack.c.bf16 %v6314_v1, %v6311_v4  ;;  %15740 = vmatprep.mubr.msk.bf16.mxu1 %vm687_vm3, %v19178_v29  ;;  %v6445_v4 = vunpack.c.l.bf16 %v19121_v19  ;;  %v6446_v1 = vunpack.c.h.bf16 %v19121_v19 }
0x1e77   : > { %15730 = vmatprep.subr.bf16.mxu1 %v6343_v10 }
0x1e7a   : > { %15731 = vmatpush3.bf16.msra.mxu1 %v6343_v10  ;;  %v15726_v12 = vpop.f32.mrb[4].mxu0  ;;  %v6448_v10 = vunpack.c.h.bf16 %v19128_v46 }
0x1e7b   : > { %15732 = vmatprep.subr.bf16.mxu1 %v6344_v36  ;;  %v6327_v18 = vpop.f32.mrb[5].mxu0 }
0x1e7c   : > { %v15727_v30 = vpop.f32.mrb[6].mxu0 }
0x1e7d   : > { %v6347_v21 = vpack.c.bf16 %v15727_v30, %v15726_v12  ;;  %v6330_v13 = vpop.f32.mrb[7].mxu0 }
0x1e7e   : > { %15733 = vmatpush3.bf16.msra.mxu1 %v6344_v36  ;;  %v6346_v54 = vpack.c.bf16 %v6330_v13, %v6327_v18 }
0x1e7f   : > { %15734 = vmatprep.subr.bf16.mxu1 %v6345_v42 }
0x1e82   : > { %15735 = vmatpush3.bf16.msra.mxu1 %v6345_v42 }
0x1e83   : > { %15736 = vmatprep.subr.bf16.mxu1 %v6346_v54 }
0x1e86   : > { %15737 = vmatpush3.bf16.msra.mxu1 %v6346_v54 }
0x1e87   : > { %15738 = vmatprep.subr.bf16.mxu1 %v6347_v21 }
0x1e8a   : > { %15739 = vmatpush3.bf16.msra.mxu1 %v6347_v21 }
0x1e8d   : > { %15741 = vmatmul.mubr.msk.bf16.vlgmr.msra.gmra.mrb[252].mxu1 %vm687_vm3, %v18978_v62 }
0x1e8e   : > { %15744 = vmatprep.mubr.msk.bf16.mxu1 %vm687_vm3, %v18985_v33 }
0x1e95   : > { %15745 = vmatmul.mubr.msk.bf16.gmra.mrb[0].mxu1 %vm687_vm3, %v18992_v34 }
0x1e96   : > { %15748 = vmatprep.mubr.msk.bf16.mxu1 %vm687_vm3, %v18999_v0 }
0x1e9d   : > { %15749 = vmatmul.mubr.msk.bf16.gmra.mrb[4].mxu1 %vm687_vm3, %v19006_v55 }
0x1e9e   : > { %15796 = vmatprep.mubr.msk.bf16.mxu1 %vm687_vm3, %v19178_v29 }
0x1f48   : > { %v6192_v59 = vpop.f32.mrb[248].mxu1 }
0x1f49   : > { %6199 = vst.msk [vmem:[#allocation2 + $0x110] sm:$0xff] %vm544_vm2, %v6192_v59  ;;  %v15710_v41 = vpop.f32.mrb[249].mxu1 }
0x1f4a   : > { %v6195_v53 = vpop.f32.mrb[250].mxu1 }
0x1f4b   : > { %6200 = vst.msk [vmem:[#allocation2 + $0x118] sm:$0xff] %vm544_vm2, %v6195_v53  ;;  %v15711_v63 = vpop.f32.mrb[251].mxu1 }
0x1f60   : > { %v15742_v50 = vpop.f32.mrb[252].mxu1 }
0x1f61   : > { %v6391_v14 = vadd.f32 %v19015_v11, %v15742_v50  ;;  %v6382_v60 = vpop.f32.mrb[253].mxu1  ;;  %v6451_v50 = vunpack.c.l.bf16 %v19138_v43 }
0x1f62   : > { %v6383_v22 = vadd.f32 %v19015_v11, %v6382_v60  ;;  %v15743_v52 = vpop.f32.mrb[254].mxu1  ;;  %v6452_v60 = vunpack.c.h.bf16 %v19138_v43 }
0x1f63   : > { %v6431_v38 = vmax.f32 %v6391_v14, 0.0  ;;  %v6394_v20 = vadd.f32 %v19015_v11, %v15743_v52  ;;  %v6385_v35 = vpop.f32.mrb[255].mxu1 }
0x1f64   : > { %v6429_v2 = vmax.f32 %v6383_v22, 0.0  ;;  %v6386_v39 = vadd.f32 %v19015_v11, %v6385_v35 }
0x1f65   : > { %v6432_v3 = vmax.f32 %v6394_v20, 0.0  ;;  %v6455_v27 = vadd.f32 %v6443_v61, %v6431_v38  ;;  %v6449_v38 = vunpack.c.l.bf16 %v19131_v49  ;;  %v6450_v20 = vunpack.c.h.bf16 %v19131_v49  ;;  %v19226_v49 = vld [vmem:[%s17451_s19 + $0x390] sm:$0xff]  }
0x1f66   : > { %v6430_v7 = vmax.f32 %v6386_v39, 0.0  ;;  %v6453_v28 = vadd.f32 %v6441_v8, %v6429_v2 }
0x1f67   : > { %v6456_v44 = vadd.f32 %v6444_v56, %v6432_v3 }
0x1f68   : > { %v6454_v9 = vadd.f32 %v6442_v47, %v6430_v7  ;;  %v15746_v17 = vpop.f32.mrb[0].mxu1  ;;  %v19235_v7 = vld [vmem:[%s17451_s19 + $0x398] sm:$0xff]  }
0x1f69   : > { %v6407_v15 = vadd.f32 %v19015_v11, %v15746_v17  ;;  %v6398_v26 = vpop.f32.mrb[1].mxu1  ;;  %v6466_v24 = vpack.c.bf16 %v6456_v44, %v6455_v27  ;;  %v19239_v27 = vld [vmem:[%s17451_s19 + $0x3a0] sm:$0xff]   ;;  %v19248_v44 = vld [vmem:[%s17451_s19 + $0x3a8] sm:$0xff]  }
0x1f6a   : > { %v6399_v31 = vadd.f32 %v19015_v11, %v6398_v26  ;;  %v15747_v25 = vpop.f32.mrb[2].mxu1  ;;  %v6465_v48 = vpack.c.bf16 %v6454_v9, %v6453_v28  ;;  %v19251_v28 = vld [vmem:[%s17451_s19 + $0x3b0] sm:$0xff]   ;;  %v19258_v9 = vld [vmem:[%s17451_s19 + $0x3b8] sm:$0xff]  }
0x1f6b   : > { %v6435_v40 = vmax.f32 %v6407_v15, 0.0  ;;  %v6410_v23 = vadd.f32 %v19015_v11, %v15747_v25  ;;  %v6401_v57 = vpop.f32.mrb[3].mxu1 }
0x1f6c   : > { %v6433_v51 = vmax.f32 %v6399_v31, 0.0  ;;  %v6402_v58 = vadd.f32 %v19015_v11, %v6401_v57  ;;  %15753 = vmatpush3.bf16.msra.mxu0 %v6465_v48 }
0x1f6d   : > { %v6436_v42 = vmax.f32 %v6410_v23, 0.0  ;;  %15754 = vmatprep.subr.bf16.mxu0 %v17345_v37  ;;  %v6459_v12 = vadd.f32 %v6447_v45, %v6435_v40 }
0x1f6e   : > { %v6434_v36 = vmax.f32 %v6402_v58, 0.0  ;;  %v6457_v30 = vadd.f32 %v6445_v4, %v6433_v51 }
0x1f6f   : > { %v6460_v18 = vadd.f32 %v6448_v10, %v6436_v42 }
0x1f70   : > { %v6458_v21 = vadd.f32 %v6446_v1, %v6434_v36  ;;  %v15750_v13 = vpop.f32.mrb[4].mxu1  ;;  %15755 = vmatpush3.bf16.msra.mxu0 %v6466_v24 }
0x1f71   : > { %v6423_v46 = vadd.f32 %v19015_v11, %v15750_v13  ;;  %v6414_v54 = vpop.f32.mrb[5].mxu1  ;;  %15756 = vmatprep.subr.bf16.mxu0 %v17345_v37  ;;  %v6468_v59 = vpack.c.bf16 %v6460_v18, %v6459_v12 }
0x1f72   : > { %v6415_v41 = vadd.f32 %v19015_v11, %v6414_v54  ;;  %v15751_v19 = vpop.f32.mrb[6].mxu1  ;;  %v6467_v53 = vpack.c.bf16 %v6458_v21, %v6457_v30 }
0x1f73   : > { %v6439_v63 = vmax.f32 %v6423_v46, 0.0  ;;  %v6426_v14 = vadd.f32 %v19015_v11, %v15751_v19  ;;  %v6417_v22 = vpop.f32.mrb[7].mxu1 }
0x1f74   : > { %v6437_v52 = vmax.f32 %v6415_v41, 0.0  ;;  %v6418_v61 = vadd.f32 %v19015_v11, %v6417_v22  ;;  %15757 = vmatpush3.bf16.msra.mxu0 %v6467_v53  ;;  %v6756_v41 = vunpack.c.l.bf16 %v19235_v7 }
0x1f75   : > { %v6440_v56 = vmax.f32 %v6426_v14, 0.0  ;;  %15758 = vmatprep.subr.bf16.mxu0 %v17345_v37  ;;  %v6463_v2 = vadd.f32 %v6451_v50, %v6439_v63  ;;  %v6755_v50 = vunpack.c.h.bf16 %v19226_v49 }
0x1f76   : > { %v6438_v35 = vmax.f32 %v6418_v61, 0.0  ;;  %v6461_v39 = vadd.f32 %v6449_v38, %v6437_v52 }
0x1f77   : > { %v6464_v8 = vadd.f32 %v6452_v60, %v6440_v56 }
0x1f78   : > { %v6462_v43 = vadd.f32 %v6450_v20, %v6438_v35  ;;  %15759 = vmatpush3.bf16.msra.mxu0 %v6468_v59 }
0x1f79   : > { %15760 = vmatprep.subr.bf16.mxu0 %v17345_v37  ;;  %v6470_v47 = vpack.c.bf16 %v6464_v8, %v6463_v2 }
0x1f7a   : > { %v6469_v3 = vpack.c.bf16 %v6462_v43, %v6461_v39 }
0x1f7c   : > { %15761 = vmatpush3.bf16.msra.mxu0 %v6469_v3  ;;  %v6760_v3 = vunpack.c.l.bf16 %v19248_v44 }
0x1f7d   : > { %15762 = vmatprep.subr.bf16.mxu0 %v17345_v37 }
0x1f80   : > { %15763 = vmatpush3.bf16.msra.mxu0 %v6470_v47 }
0x1f81   : > { %15768 = vmatprep.subr.bf16.mxu0 %v19052_v32 }
0x1f83   : > { %15765 = vmatmul.mubr.msk.bf16.vlgmr.msra.gmra.mrb[8].mxu0 %vm687_vm3, %v19058_v16 }
0x1f84   : > { %15769 = vmatpush3.bf16.msra.mxu0 %v19052_v32  ;;  %15772 = vmatprep.mubr.msk.bf16.mxu0 %vm544_vm2, %v19226_v49 }
0x1f85   : > { %15770 = vmatprep.subr.bf16.mxu0 %v17444_v6 }
0x1f88   : > { %15771 = vmatpush3.bf16.msra.mxu0 %v17444_v6 }
0x1f89   : > { %15808 = vmatprep.subr.bf16.mxu0 %v17345_v37 }
0x1f8b   : > { %15773 = vmatmul.mubr.msk.bf16.vlgmr.msra.gmra.mrb[12].mxu0 %vm544_vm2, %v19235_v7 }
0x1f8c   : > { %15776 = vmatprep.mubr.msk.bf16.mxu0 %vm544_vm2, %v19239_v27 }
0x1f93   : > { %15777 = vmatmul.mubr.msk.bf16.gmra.mrb[16].mxu0 %vm544_vm2, %v19248_v44 }
0x1f94   : > { %15780 = vmatprep.mubr.msk.bf16.mxu0 %vm544_vm2, %v19251_v28 }
0x1f9b   : > { %15781 = vmatmul.mubr.msk.bf16.gmra.mrb[20].mxu0 %vm544_vm2, %v19258_v9 }
0x1f9c   : > { %15820 = vmatprep.mubr.msk.bf16.mxu0 %vm17346_vm4, %v17345_v37 }
0x2056   : > { %v6505_v17 = vpop.f32.mrb[8].mxu0 }
0x2057   : > { %6512 = vst.msk [vmem:[#allocation2 + $0x120] sm:$0xff] %vm544_vm2, %v6505_v17  ;;  %v15766_v15 = vpop.f32.mrb[9].mxu0 }
0x2058   : > { %v6508_v26 = vpop.f32.mrb[10].mxu0 }
0x2059   : > { %6513 = vst.msk [vmem:[#allocation2 + $0x128] sm:$0xff] %vm544_vm2, %v6508_v26  ;;  %v15767_v24 = vpop.f32.mrb[11].mxu0  ;;  %v6758_v26 = vunpack.c.l.bf16 %v19239_v27 }
0x205e   : > { %v15774_v31 = vpop.f32.mrb[12].mxu0 }
0x205f   : > { %v6608_v25 = vpop.f32.mrb[13].mxu0 }
0x2060   : > { %v15775_v48 = vpop.f32.mrb[14].mxu0 }
0x2061   : > { %v6656_v40 = vpack.c.bf16 %v15775_v48, %v15774_v31  ;;  %v6611_v45 = vpop.f32.mrb[15].mxu0  ;;  %v6759_v31 = vunpack.c.h.bf16 %v19239_v27 }
0x2062   : > { %v6655_v23 = vpack.c.bf16 %v6611_v45, %v6608_v25 }
0x2064   : > { %15784 = vmatprep.subr.bf16.mxu1 %v6655_v23 }
0x2065   : > { %15785 = vmatpush3.bf16.msra.mxu1 %v6655_v23 }
0x2066   : > { %v15778_v10 = vpop.f32.mrb[16].mxu0  ;;  %15786 = vmatprep.subr.bf16.mxu1 %v6656_v40 }
0x2067   : > { %v6624_v57 = vpop.f32.mrb[17].mxu0 }
0x2068   : > { %v15779_v51 = vpop.f32.mrb[18].mxu0 }
0x2069   : > { %v6658_v4 = vpack.c.bf16 %v15779_v51, %v15778_v10  ;;  %v6627_v58 = vpop.f32.mrb[19].mxu0  ;;  %15787 = vmatpush3.bf16.msra.mxu1 %v6656_v40 }
0x206a   : > { %v6657_v1 = vpack.c.bf16 %v6627_v58, %v6624_v57 }
0x206c   : > { %15788 = vmatprep.subr.bf16.mxu1 %v6657_v1 }
0x206d   : > { %15789 = vmatpush3.bf16.msra.mxu1 %v6657_v1 }
0x206e   : > { %v15782_v42 = vpop.f32.mrb[20].mxu0  ;;  %15790 = vmatprep.subr.bf16.mxu1 %v6658_v4 }
0x206f   : > { %v6640_v36 = vpop.f32.mrb[21].mxu0 }
0x2070   : > { %v15783_v12 = vpop.f32.mrb[22].mxu0 }
0x2071   : > { %v6660_v18 = vpack.c.bf16 %v15783_v12, %v15782_v42  ;;  %v6643_v30 = vpop.f32.mrb[23].mxu0  ;;  %15791 = vmatpush3.bf16.msra.mxu1 %v6658_v4 }
0x2072   : > { %v6659_v21 = vpack.c.bf16 %v6643_v30, %v6640_v36  ;;  %v6764_v36 = vunpack.c.l.bf16 %v19258_v9 }
0x2074   : > { %15792 = vmatprep.subr.bf16.mxu1 %v6659_v21 }
0x2075   : > { %15793 = vmatpush3.bf16.msra.mxu1 %v6659_v21 }
0x2076   : > { %15794 = vmatprep.subr.bf16.mxu1 %v6660_v18 }
0x2079   : > { %15795 = vmatpush3.bf16.msra.mxu1 %v6660_v18  ;;  %v6765_v18 = vunpack.c.h.bf16 %v19258_v9 }
0x207c   : > { %15797 = vmatmul.mubr.msk.bf16.vlgmr.msra.gmra.mrb[8].mxu1 %vm687_vm3, %v18978_v62 }
0x207d   : > { %15800 = vmatprep.mubr.msk.bf16.mxu1 %vm687_vm3, %v18985_v33 }
0x2084   : > { %15801 = vmatmul.mubr.msk.bf16.gmra.mrb[12].mxu1 %vm687_vm3, %v18992_v34 }
0x2085   : > { %15804 = vmatprep.mubr.msk.bf16.mxu1 %vm687_vm3, %v18999_v0  ;;  %v6757_v0 = vunpack.c.h.bf16 %v19235_v7  ;;  %v6761_v7 = vunpack.c.h.bf16 %v19248_v44 }
0x208c   : > { %15805 = vmatmul.mubr.msk.bf16.gmra.mrb[16].mxu1 %vm687_vm3, %v19006_v55  ;;  %v6754_v55 = vunpack.c.l.bf16 %v19226_v49 }
0x208d   : > { %15852 = vmatprep.mubr.msk.bf16.mxu1 %vm687_vm3, %v19178_v29 }
0x214f   : > { %v15798_v13 = vpop.f32.mrb[8].mxu1 }
0x2150   : > { %v6704_v46 = vadd.f32 %v19015_v11, %v15798_v13  ;;  %v6695_v54 = vpop.f32.mrb[9].mxu1  ;;  %v6762_v13 = vunpack.c.l.bf16 %v19251_v28 }
0x2151   : > { %v6696_v62 = vadd.f32 %v19015_v11, %v6695_v54  ;;  %v15799_v59 = vpop.f32.mrb[10].mxu1  ;;  %v6763_v54 = vunpack.c.h.bf16 %v19251_v28  ;;  %v19317_v28 = vld [vmem:[%s17451_s19 + $0x3c8] sm:$0xff]  }
0x2152   : > { %v6744_v33 = vmax.f32 %v6704_v46, 0.0  ;;  %v6707_v34 = vadd.f32 %v19015_v11, %v15799_v59  ;;  %v6698_v19 = vpop.f32.mrb[11].mxu1 }
0x2153   : > { %v6742_v53 = vmax.f32 %v6696_v62, 0.0  ;;  %v6699_v63 = vadd.f32 %v19015_v11, %v6698_v19 }
0x2154   : > { %v6745_v14 = vmax.f32 %v6707_v34, 0.0  ;;  %v6768_v22 = vadd.f32 %v6756_v41, %v6744_v33 }
0x2155   : > { %v6743_v60 = vmax.f32 %v6699_v63, 0.0  ;;  %v6766_v38 = vadd.f32 %v6754_v55, %v6742_v53  ;;  %v19321_v53 = vld [vmem:[%s17451_s19 + $0x3d0] sm:$0xff]   ;;  %v19333_v55 = vld [vmem:[%s17451_s19 + $0x3e0] sm:$0xff]   ;;  %v19340_v63 = vld [vmem:[%s17451_s19 + $0x3e8] sm:$0xff]  }
0x2156   : > { %v6769_v52 = vadd.f32 %v6757_v0, %v6745_v14 }
0x2157   : > { %v6767_v61 = vadd.f32 %v6755_v50, %v6743_v60  ;;  %v15802_v20 = vpop.f32.mrb[12].mxu1 }
0x2158   : > { %v6720_v56 = vadd.f32 %v19015_v11, %v15802_v20  ;;  %v6711_v35 = vpop.f32.mrb[13].mxu1  ;;  %v6779_v2 = vpack.c.bf16 %v6769_v52, %v6768_v22 }
0x2159   : > { %v6712_v8 = vadd.f32 %v19015_v11, %v6711_v35  ;;  %v15803_v39 = vpop.f32.mrb[14].mxu1  ;;  %v6778_v43 = vpack.c.bf16 %v6767_v61, %v6766_v38 }
0x215a   : > { %v6748_v47 = vmax.f32 %v6720_v56, 0.0  ;;  %v6723_v49 = vadd.f32 %v19015_v11, %v15803_v39  ;;  %v6714_v17 = vpop.f32.mrb[15].mxu1 }
0x215b   : > { %v6746_v15 = vmax.f32 %v6712_v8, 0.0  ;;  %v6715_v24 = vadd.f32 %v19015_v11, %v6714_v17  ;;  %15809 = vmatpush3.bf16.msra.mxu0 %v6778_v43 }
0x215c   : > { %v6749_v25 = vmax.f32 %v6723_v49, 0.0  ;;  %15810 = vmatprep.subr.bf16.mxu0 %v17345_v37  ;;  %v6772_v40 = vadd.f32 %v6760_v3, %v6748_v47 }
0x215d   : > { %v6747_v48 = vmax.f32 %v6715_v24, 0.0  ;;  %v6770_v23 = vadd.f32 %v6758_v26, %v6746_v15 }
0x215e   : > { %v6773_v45 = vadd.f32 %v6761_v7, %v6749_v25  ;;  %v19360_v25 = vld [vmem:[%s20949_s0 + $0x10] sm:$0xff]  }
0x215f   : > { %v6771_v10 = vadd.f32 %v6759_v31, %v6747_v48  ;;  %v15806_v57 = vpop.f32.mrb[16].mxu1  ;;  %15811 = vmatpush3.bf16.msra.mxu0 %v6779_v2  ;;  %v19352_v31 = vld [vmem:[%s20949_s0 + $0x8] sm:$0xff]   ;;  %v19377_v48 = vld [vmem:[%s20949_s0 + $0x20] sm:$0xff]  }
0x2160   : > { %v6736_v44 = vadd.f32 %v19015_v11, %v15806_v57  ;;  %v6727_v51 = vpop.f32.mrb[17].mxu1  ;;  %15812 = vmatprep.subr.bf16.mxu0 %v17345_v37  ;;  %v6781_v4 = vpack.c.bf16 %v6773_v45, %v6772_v40  ;;  %v19382_v40 = vld [vmem:[%s17451_s19 + $0x3f0] sm:$0xff]   ;;  %v19387_v45 = vld [vmem:[%s20949_s0 + $0x28] sm:$0xff]  }
0x2161   : > { %v6728_v58 = vadd.f32 %v19015_v11, %v6727_v51  ;;  %v15807_v27 = vpop.f32.mrb[18].mxu1  ;;  %v6780_v1 = vpack.c.bf16 %v6771_v10, %v6770_v23  ;;  %v19394_v23 = vld [vmem:[%s17451_s19 + $0x3f8] sm:$0xff]   ;;  %v19397_v10 = vld [vmem:[%s17451_s19 + $0x400] sm:$0xff]   ;;  %v19404_v57 = vld [vmem:[%s17451_s19 + $0x408] sm:$0xff]  }
0x2162   : > { %v6752_v42 = vmax.f32 %v6736_v44, 0.0  ;;  %v6739_v12 = vadd.f32 %v19015_v11, %v15807_v27  ;;  %v6730_v30 = vpop.f32.mrb[19].mxu1  ;;  %v19407_v44 = vld [vmem:[%s17451_s19 + $0x410] sm:$0xff]   ;;  %v19414_v51 = vld [vmem:[%s17451_s19 + $0x418] sm:$0xff]  }
0x2163   : > { %v6750_v21 = vmax.f32 %v6728_v58, 0.0  ;;  %v6731_v46 = vadd.f32 %v19015_v11, %v6730_v30  ;;  %15813 = vmatpush3.bf16.msra.mxu0 %v6780_v1  ;;  %v19308_v11 = vld [vmem:[%s17451_s19 + $0x3c0] sm:$0xff]  }
0x2164   : > { %v6753_v62 = vmax.f32 %v6739_v12, 0.0  ;;  %15814 = vmatprep.subr.bf16.mxu0 %v17345_v37  ;;  %v6776_v33 = vadd.f32 %v6764_v36, %v6752_v42  ;;  %v19423_v58 = vld [vmem:[%s20954_s5] ss:$0 sm:$0xff] }
0x2165   : > { %v6751_v59 = vmax.f32 %v6731_v46, 0.0  ;;  %v6774_v34 = vadd.f32 %v6762_v13, %v6750_v21  ;;  %v7070_v21 = vunpack.c.h.bf16 %v19317_v28 }
0x2166   : > { %v6777_v41 = vadd.f32 %v6765_v18, %v6753_v62  ;;  %v7069_v18 = vunpack.c.l.bf16 %v19317_v28 }
0x2167   : > { %v6775_v9 = vadd.f32 %v6763_v54, %v6751_v59  ;;  %15815 = vmatpush3.bf16.msra.mxu0 %v6781_v4  ;;  %v7067_v54 = vunpack.c.l.bf16 %v19308_v11  ;;  %v7068_v59 = vunpack.c.h.bf16 %v19308_v11 }
0x2168   : > { %15816 = vmatprep.subr.bf16.mxu0 %v17345_v37  ;;  %v6783_v0 = vpack.c.bf16 %v6777_v41, %v6776_v33 }
0x2169   : > { %v6782_v19 = vpack.c.bf16 %v6775_v9, %v6774_v34 }
0x216b   : > { %15817 = vmatpush3.bf16.msra.mxu0 %v6782_v19 }
0x216c   : > { %15818 = vmatprep.subr.bf16.mxu0 %v17345_v37 }
0x216f   : > { %15819 = vmatpush3.bf16.msra.mxu0 %v6783_v0 }
0x2170   : > { %15824 = vmatprep.subr.bf16.mxu0 %v19052_v32 }
0x2172   : > { %15821 = vmatmul.mubr.msk.bf16.vlgmr.msra.gmra.mrb[24].mxu0 %vm687_vm3, %v19058_v16  ;;  %v19330_v16 = vld [vmem:[%s17451_s19 + $0x3d8] sm:$0xff]  }
0x2173   : > { %15825 = vmatpush3.bf16.msra.mxu0 %v19052_v32  ;;  %15828 = vmatprep.mubr.msk.bf16.mxu0 %vm544_vm2, %v19308_v11 }
0x2174   : > { %15826 = vmatprep.subr.bf16.mxu0 %v17444_v6 }
0x2177   : > { %15827 = vmatpush3.bf16.msra.mxu0 %v17444_v6 }
0x2178   : > { %15864 = vmatprep.subr.bf16.mxu0 %v17345_v37 }
0x217a   : > { %15829 = vmatmul.mubr.msk.bf16.vlgmr.msra.gmra.mrb[28].mxu0 %vm544_vm2, %v19317_v28 }
0x217b   : > { %15832 = vmatprep.mubr.msk.bf16.mxu0 %vm544_vm2, %v19321_v53 }
0x2182   : > { %15833 = vmatmul.mubr.msk.bf16.gmra.mrb[32].mxu0 %vm544_vm2, %v19330_v16 }
0x2183   : > { %15836 = vmatprep.mubr.msk.bf16.mxu0 %vm544_vm2, %v19333_v55 }
0x218a   : > { %15837 = vmatmul.mubr.msk.bf16.gmra.mrb[36].mxu0 %vm544_vm2, %v19340_v63 }
0x218b   : > { %15876 = vmatprep.mubr.msk.bf16.mxu0 %vm17346_vm4, %v17345_v37 }
0x2245   : > { %v6818_v50 = vpop.f32.mrb[24].mxu0 }
0x2246   : > { %6825 = vst.msk [vmem:[#allocation2 + $0x130] sm:$0xff] %vm544_vm2, %v6818_v50  ;;  %v15822_v14 = vpop.f32.mrb[25].mxu0 }
0x2247   : > { %v6821_v60 = vpop.f32.mrb[26].mxu0 }
0x2248   : > { %6826 = vst.msk [vmem:[#allocation2 + $0x138] sm:$0xff] %vm544_vm2, %v6821_v60  ;;  %v15823_v22 = vpop.f32.mrb[27].mxu0 }
0x224d   : > { %v15830_v52 = vpop.f32.mrb[28].mxu0 }
0x224e   : > { %v6921_v38 = vpop.f32.mrb[29].mxu0 }
0x224f   : > { %v15831_v61 = vpop.f32.mrb[30].mxu0 }
0x2250   : > { %v6969_v20 = vpack.c.bf16 %v15831_v61, %v15830_v52  ;;  %v6924_v56 = vpop.f32.mrb[31].mxu0 }
0x2251   : > { %v6968_v35 = vpack.c.bf16 %v6924_v56, %v6921_v38  ;;  %v7074_v56 = vunpack.c.h.bf16 %v19330_v16 }
0x2253   : > { %15840 = vmatprep.subr.bf16.mxu1 %v6968_v35 }
0x2254   : > { %15841 = vmatpush3.bf16.msra.mxu1 %v6968_v35 }
0x2255   : > { %v15834_v2 = vpop.f32.mrb[32].mxu0  ;;  %15842 = vmatprep.subr.bf16.mxu1 %v6969_v20 }
0x2256   : > { %v6937_v8 = vpop.f32.mrb[33].mxu0 }
0x2257   : > { %v15835_v39 = vpop.f32.mrb[34].mxu0 }
0x2258   : > { %v6971_v43 = vpack.c.bf16 %v15835_v39, %v15834_v2  ;;  %v6940_v47 = vpop.f32.mrb[35].mxu0  ;;  %15843 = vmatpush3.bf16.msra.mxu1 %v6969_v20  ;;  %v7073_v20 = vunpack.c.l.bf16 %v19330_v16 }
0x2259   : > { %v6970_v3 = vpack.c.bf16 %v6940_v47, %v6937_v8  ;;  %v7071_v8 = vunpack.c.l.bf16 %v19321_v53 }
0x225b   : > { %15844 = vmatprep.subr.bf16.mxu1 %v6970_v3 }
0x225c   : > { %15845 = vmatpush3.bf16.msra.mxu1 %v6970_v3 }
0x225d   : > { %v15838_v49 = vpop.f32.mrb[36].mxu0  ;;  %15846 = vmatprep.subr.bf16.mxu1 %v6971_v43 }
0x225e   : > { %v6953_v7 = vpop.f32.mrb[37].mxu0 }
0x225f   : > { %v15839_v17 = vpop.f32.mrb[38].mxu0 }
0x2260   : > { %v6973_v15 = vpack.c.bf16 %v15839_v17, %v15838_v49  ;;  %v6956_v26 = vpop.f32.mrb[39].mxu0  ;;  %15847 = vmatpush3.bf16.msra.mxu1 %v6971_v43  ;;  %v7072_v43 = vunpack.c.h.bf16 %v19321_v53 }
0x2261   : > { %v6972_v24 = vpack.c.bf16 %v6956_v26, %v6953_v7 }
0x2263   : > { %15848 = vmatprep.subr.bf16.mxu1 %v6972_v24 }
0x2264   : > { %15849 = vmatpush3.bf16.msra.mxu1 %v6972_v24 }
0x2265   : > { %15850 = vmatprep.subr.bf16.mxu1 %v6973_v15 }
0x2268   : > { %15851 = vmatpush3.bf16.msra.mxu1 %v6973_v15 }
0x2269   : > { %15880 = vmatprep.subr.bf16.mxu1 %v19052_v32 }
0x226b   : > { %15853 = vmatmul.mubr.msk.bf16.vlgmr.msra.gmra.mrb[20].mxu1 %vm687_vm3, %v19352_v31 }
0x226c   : > { %15881 = vmatpush3.bf16.msra.mxu1 %v19052_v32  ;;  %15856 = vmatprep.mubr.msk.bf16.mxu1 %vm687_vm3, %v19360_v25  ;;  %v19370_v32 = vld [vmem:[%s20949_s0 + $0x18] sm:$0xff]  }
0x226d   : > { %15882 = vmatprep.subr.bf16.mxu1 %v17444_v6 }
0x2270   : > { %15883 = vmatpush3.bf16.msra.mxu1 %v17444_v6 }
0x2271   : > { %15920 = vmatprep.subr.bf16.mxu1 %v17345_v37 }
0x2273   : > { %15857 = vmatmul.mubr.msk.bf16.gmra.mrb[24].mxu1 %vm687_vm3, %v19370_v32 }
0x2274   : > { %15860 = vmatprep.mubr.msk.bf16.mxu1 %vm687_vm3, %v19377_v48 }
0x227b   : > { %15861 = vmatmul.mubr.msk.bf16.gmra.mrb[28].mxu1 %vm687_vm3, %v19387_v45 }
0x227c   : > { %15884 = vmatprep.mubr.msk.bf16.mxu1 %vm544_vm2, %v19382_v40 }
0x2283   : > { %15885 = vmatmul.mubr.msk.bf16.vlgmr.msra.gmra.mrb[32].mxu1 %vm544_vm2, %v19394_v23 }
0x2284   : > { %15888 = vmatprep.mubr.msk.bf16.mxu1 %vm544_vm2, %v19397_v10 }
0x228b   : > { %15889 = vmatmul.mubr.msk.bf16.gmra.mrb[36].mxu1 %vm544_vm2, %v19404_v57 }
0x228c   : > { %15892 = vmatprep.mubr.msk.bf16.mxu1 %vm544_vm2, %v19407_v44 }
0x2293   : > { %15893 = vmatmul.mubr.msk.bf16.gmra.mrb[40].mxu1 %vm544_vm2, %v19414_v51 }
0x2294   : > { %15932 = vmatprep.mubr.msk.bf16.mxu1 %vm17346_vm4, %v17345_v37 }
0x233e   : > { %v15854_v4 = vpop.f32.mrb[20].mxu1 }
0x233f   : > { %v7017_v27 = vadd.f32 %v19423_v58, %v15854_v4  ;;  %v7008_v1 = vpop.f32.mrb[21].mxu1 }
0x2340   : > { %v7009_v42 = vadd.f32 %v19423_v58, %v7008_v1  ;;  %v15855_v36 = vpop.f32.mrb[22].mxu1 }
0x2341   : > { %v7057_v12 = vmax.f32 %v7017_v27, 0.0  ;;  %v7020_v30 = vadd.f32 %v19423_v58, %v15855_v36  ;;  %v7011_v13 = vpop.f32.mrb[23].mxu1  ;;  %v7077_v36 = vunpack.c.l.bf16 %v19340_v63 }
0x2342   : > { %v7055_v46 = vmax.f32 %v7009_v42, 0.0  ;;  %v7012_v62 = vadd.f32 %v19423_v58, %v7011_v13  ;;  %v7075_v13 = vunpack.c.l.bf16 %v19333_v55 }
0x2343   : > { %v7058_v33 = vmax.f32 %v7020_v30, 0.0  ;;  %v7081_v34 = vadd.f32 %v7069_v18, %v7057_v12  ;;  %v7078_v18 = vunpack.c.h.bf16 %v19340_v63 }
0x2344   : > { %v7056_v41 = vmax.f32 %v7012_v62, 0.0  ;;  %v7079_v0 = vadd.f32 %v7067_v54, %v7055_v46  ;;  %v7076_v54 = vunpack.c.h.bf16 %v19333_v55 }
0x2345   : > { %v7082_v9 = vadd.f32 %v7070_v21, %v7058_v33 }
0x2346   : > { %v7080_v19 = vadd.f32 %v7068_v59, %v7056_v41  ;;  %v15858_v50 = vpop.f32.mrb[24].mxu1 }
0x2347   : > { %v7033_v14 = vadd.f32 %v19423_v58, %v15858_v50  ;;  %v7024_v60 = vpop.f32.mrb[25].mxu1  ;;  %v7092_v22 = vpack.c.bf16 %v7082_v9, %v7081_v34 }
0x2348   : > { %v7025_v28 = vadd.f32 %v19423_v58, %v7024_v60  ;;  %v15859_v52 = vpop.f32.mrb[26].mxu1  ;;  %v7091_v38 = vpack.c.bf16 %v7080_v19, %v7079_v0 }
0x2349   : > { %v7061_v61 = vmax.f32 %v7033_v14, 0.0  ;;  %v7036_v11 = vadd.f32 %v19423_v58, %v15859_v52  ;;  %v7027_v35 = vpop.f32.mrb[27].mxu1 }
0x234a   : > { %v7059_v2 = vmax.f32 %v7025_v28, 0.0  ;;  %v7028_v39 = vadd.f32 %v19423_v58, %v7027_v35  ;;  %15865 = vmatpush3.bf16.msra.mxu0 %v7091_v38 }
0x234b   : > { %v7062_v47 = vmax.f32 %v7036_v11, 0.0  ;;  %15866 = vmatprep.subr.bf16.mxu0 %v17345_v37  ;;  %v7085_v49 = vadd.f32 %v7073_v20, %v7061_v61  ;;  %v19457_v61 = vld [vmem:[%s20950_s1] sm:$0xff]  }
0x234c   : > { %v7060_v3 = vmax.f32 %v7028_v39, 0.0  ;;  %v7083_v17 = vadd.f32 %v7071_v8, %v7059_v2 }
0x234d   : > { %v7086_v7 = vadd.f32 %v7074_v56, %v7062_v47 }
0x234e   : > { %v7084_v15 = vadd.f32 %v7072_v43, %v7060_v3  ;;  %v15862_v26 = vpop.f32.mrb[28].mxu1  ;;  %15867 = vmatpush3.bf16.msra.mxu0 %v7092_v22 }
0x234f   : > { %v7049_v16 = vadd.f32 %v19423_v58, %v15862_v26  ;;  %v7040_v24 = vpop.f32.mrb[29].mxu1  ;;  %15868 = vmatprep.subr.bf16.mxu0 %v17345_v37  ;;  %v7094_v4 = vpack.c.bf16 %v7086_v7, %v7085_v49 }
0x2350   : > { %v7041_v27 = vadd.f32 %v19423_v58, %v7040_v24  ;;  %v15863_v53 = vpop.f32.mrb[30].mxu1  ;;  %v7093_v1 = vpack.c.bf16 %v7084_v15, %v7083_v17 }
0x2351   : > { %v7065_v42 = vmax.f32 %v7049_v16, 0.0  ;;  %v7052_v12 = vadd.f32 %v19423_v58, %v15863_v53  ;;  %v7043_v30 = vpop.f32.mrb[31].mxu1  ;;  %v7382_v53 = vunpack.c.l.bf16 %v19394_v23 }
0x2352   : > { %v7063_v21 = vmax.f32 %v7041_v27, 0.0  ;;  %v7044_v46 = vadd.f32 %v19423_v58, %v7043_v30  ;;  %15869 = vmatpush3.bf16.msra.mxu0 %v7093_v1  ;;  %v7383_v1 = vunpack.c.h.bf16 %v19394_v23  ;;  %v7381_v30 = vunpack.c.h.bf16 %v19382_v40 }
0x2353   : > { %v7066_v62 = vmax.f32 %v7052_v12, 0.0  ;;  %15870 = vmatprep.subr.bf16.mxu0 %v17345_v37  ;;  %v7089_v33 = vadd.f32 %v7077_v36, %v7065_v42  ;;  %v7380_v12 = vunpack.c.l.bf16 %v19382_v40 }
0x2354   : > { %v7064_v59 = vmax.f32 %v7044_v46, 0.0  ;;  %v7087_v34 = vadd.f32 %v7075_v13, %v7063_v21 }
0x2355   : > { %v7090_v41 = vadd.f32 %v7078_v18, %v7066_v62 }
0x2356   : > { %v7088_v9 = vadd.f32 %v7076_v54, %v7064_v59  ;;  %15871 = vmatpush3.bf16.msra.mxu0 %v7094_v4  ;;  %v15886_v0 = vpop.f32.mrb[32].mxu1 }
0x2357   : > { %15872 = vmatprep.subr.bf16.mxu0 %v17345_v37  ;;  %v7234_v63 = vpop.f32.mrb[33].mxu1  ;;  %v7096_v19 = vpack.c.bf16 %v7090_v41, %v7089_v33 }
0x2358   : > { %v7095_v50 = vpack.c.bf16 %v7088_v9, %v7087_v34  ;;  %v15887_v14 = vpop.f32.mrb[34].mxu1 }
0x2359   : > { %v7282_v60 = vpack.c.bf16 %v15887_v14, %v15886_v0  ;;  %v7237_v22 = vpop.f32.mrb[35].mxu1  ;;  %v7387_v14 = vunpack.c.h.bf16 %v19404_v57 }
0x235a   : > { %15873 = vmatpush3.bf16.msra.mxu0 %v7095_v50  ;;  %v7281_v55 = vpack.c.bf16 %v7237_v22, %v7234_v63  ;;  %v7386_v50 = vunpack.c.l.bf16 %v19404_v57 }
0x235b   : > { %15874 = vmatprep.subr.bf16.mxu0 %v17345_v37 }
0x235e   : > { %15875 = vmatpush3.bf16.msra.mxu0 %v7096_v19  ;;  %v15890_v28 = vpop.f32.mrb[36].mxu1 }
0x235f   : > { %15896 = vmatprep.subr.bf16.mxu0 %v7281_v55  ;;  %v7250_v52 = vpop.f32.mrb[37].mxu1 }
0x2360   : > { %v15891_v38 = vpop.f32.mrb[38].mxu1 }
0x2361   : > { %15877 = vmatmul.mubr.msk.bf16.vlgmr.msra.gmra.mrb[40].mxu0 %vm687_vm3, %v19457_v61  ;;  %v7284_v20 = vpack.c.bf16 %v15891_v38, %v15890_v28  ;;  %v7253_v11 = vpop.f32.mrb[39].mxu1 }
0x2362   : > { %15897 = vmatpush3.bf16.msra.mxu0 %v7281_v55  ;;  %v7283_v56 = vpack.c.bf16 %v7253_v11, %v7250_v52  ;;  %15908 = vmatprep.mubr.msk.bf16.mxu0 %vm687_vm3, %v19178_v29  ;;  %v7384_v55 = vunpack.c.l.bf16 %v19397_v10  ;;  %v7385_v52 = vunpack.c.h.bf16 %v19397_v10 }
0x2363   : > { %15898 = vmatprep.subr.bf16.mxu0 %v7282_v60 }
0x2366   : > { %15899 = vmatpush3.bf16.msra.mxu0 %v7282_v60  ;;  %v15894_v35 = vpop.f32.mrb[40].mxu1 }
0x2367   : > { %15900 = vmatprep.subr.bf16.mxu0 %v7283_v56  ;;  %v7266_v2 = vpop.f32.mrb[41].mxu1 }
0x2368   : > { %v15895_v8 = vpop.f32.mrb[42].mxu1 }
0x2369   : > { %v7286_v39 = vpack.c.bf16 %v15895_v8, %v15894_v35  ;;  %v7269_v43 = vpop.f32.mrb[43].mxu1 }
0x236a   : > { %15901 = vmatpush3.bf16.msra.mxu0 %v7283_v56  ;;  %v7285_v47 = vpack.c.bf16 %v7269_v43, %v7266_v2 }
0x236b   : > { %15902 = vmatprep.subr.bf16.mxu0 %v7284_v20 }
0x236e   : > { %15903 = vmatpush3.bf16.msra.mxu0 %v7284_v20 }
0x236f   : > { %15904 = vmatprep.subr.bf16.mxu0 %v7285_v47 }
0x2372   : > { %15905 = vmatpush3.bf16.msra.mxu0 %v7285_v47 }
0x2373   : > { %15906 = vmatprep.subr.bf16.mxu0 %v7286_v39 }
0x2376   : > { %15907 = vmatpush3.bf16.msra.mxu0 %v7286_v39 }
0x2379   : > { %15909 = vmatmul.mubr.msk.bf16.vlgmr.msra.gmra.mrb[44].mxu0 %vm687_vm3, %v19352_v31 }
0x237a   : > { %15912 = vmatprep.mubr.msk.bf16.mxu0 %vm687_vm3, %v19360_v25 }
0x2381   : > { %15913 = vmatmul.mubr.msk.bf16.gmra.mrb[48].mxu0 %vm687_vm3, %v19370_v32 }
0x2382   : > { %15916 = vmatprep.mubr.msk.bf16.mxu0 %vm687_vm3, %v19377_v48 }
0x2389   : > { %15917 = vmatmul.mubr.msk.bf16.gmra.mrb[52].mxu0 %vm687_vm3, %v19387_v45 }
0x238a   : > { %15964 = vmatprep.mubr.msk.bf16.mxu0 %vm687_vm3, %v19178_v29 }
0x2434   : > { %v7131_v3 = vpop.f32.mrb[40].mxu0 }
0x2435   : > { %7138 = vst.msk [vmem:[#allocation2 + $0x140] sm:$0xff] %vm544_vm2, %v7131_v3  ;;  %v15878_v49 = vpop.f32.mrb[41].mxu0 }
0x2436   : > { %v7134_v7 = vpop.f32.mrb[42].mxu0 }
0x2437   : > { %7139 = vst.msk [vmem:[#allocation2 + $0x148] sm:$0xff] %vm544_vm2, %v7134_v7  ;;  %v15879_v17 = vpop.f32.mrb[43].mxu0  ;;  %v7390_v7 = vunpack.c.l.bf16 %v19414_v51 }
0x244c   : > { %v15910_v15 = vpop.f32.mrb[44].mxu0 }
0x244d   : > { %v7330_v26 = vadd.f32 %v19423_v58, %v15910_v15  ;;  %v7321_v16 = vpop.f32.mrb[45].mxu0  ;;  %v7391_v15 = vunpack.c.h.bf16 %v19414_v51 }
0x244e   : > { %v7322_v24 = vadd.f32 %v19423_v58, %v7321_v16  ;;  %v15911_v4 = vpop.f32.mrb[46].mxu0 }
0x244f   : > { %v7370_v27 = vmax.f32 %v7330_v26, 0.0  ;;  %v7333_v29 = vadd.f32 %v19423_v58, %v15911_v4  ;;  %v7324_v42 = vpop.f32.mrb[47].mxu0 }
0x2450   : > { %v7368_v36 = vmax.f32 %v7322_v24, 0.0  ;;  %v7325_v18 = vadd.f32 %v19423_v58, %v7324_v42  ;;  %v7388_v24 = vunpack.c.l.bf16 %v19407_v44 }
0x2451   : > { %v7371_v21 = vmax.f32 %v7333_v29, 0.0  ;;  %v7394_v46 = vadd.f32 %v7382_v53, %v7370_v27  ;;  %v7389_v27 = vunpack.c.h.bf16 %v19407_v44  ;;  %v19507_v44 = vld [vmem:[%s17451_s19 + $0x420] sm:$0xff]  }
0x2452   : > { %v7369_v13 = vmax.f32 %v7325_v18, 0.0  ;;  %v7392_v62 = vadd.f32 %v7380_v12, %v7368_v36 }
0x2453   : > { %v7395_v54 = vadd.f32 %v7383_v1, %v7371_v21  ;;  %v19521_v21 = vld [vmem:[%s17451_s19 + $0x428] sm:$0xff]  }
0x2454   : > { %v7393_v59 = vadd.f32 %v7381_v30, %v7369_v13  ;;  %v15914_v33 = vpop.f32.mrb[48].mxu0  ;;  %v19512_v30 = vld [vmem:[%s20953_s4] sm:$0xff]   ;;  %v19525_v13 = vld [vmem:[%s17451_s19 + $0x430] sm:$0xff]  }
0x2455   : > { %v7405_v41 = vpack.c.bf16 %v7395_v54, %v7394_v46  ;;  %v7346_v34 = vadd.f32 %v19423_v58, %v15914_v33  ;;  %v7337_v9 = vpop.f32.mrb[49].mxu0  ;;  %v19534_v46 = vld [vmem:[%s17451_s19 + $0x438] sm:$0xff]   ;;  %v19537_v54 = vld [vmem:[%s17451_s19 + $0x440] sm:$0xff]  }
0x2456   : > { %v7404_v23 = vpack.c.bf16 %v7393_v59, %v7392_v62  ;;  %v7338_v0 = vadd.f32 %v19423_v58, %v7337_v9  ;;  %v15915_v63 = vpop.f32.mrb[50].mxu0  ;;  %v19544_v62 = vld [vmem:[%s17451_s19 + $0x448] sm:$0xff]  }
0x2457   : > { %v7374_v19 = vmax.f32 %v7346_v34, 0.0  ;;  %v7349_v40 = vadd.f32 %v19423_v58, %v15915_v63  ;;  %v7340_v60 = vpop.f32.mrb[51].mxu0 }
0x2458   : > { %v7372_v22 = vmax.f32 %v7338_v0, 0.0  ;;  %v7341_v28 = vadd.f32 %v19423_v58, %v7340_v60  ;;  %15921 = vmatpush3.bf16.msra.mxu1 %v7404_v23 }
0x2459   : > { %v7375_v38 = vmax.f32 %v7349_v40, 0.0  ;;  %15922 = vmatprep.subr.bf16.mxu1 %v17345_v37  ;;  %v7398_v11 = vadd.f32 %v7386_v50, %v7374_v19 }
0x245a   : > { %v7373_v20 = vmax.f32 %v7341_v28, 0.0  ;;  %v7396_v35 = vadd.f32 %v7384_v55, %v7372_v22 }
0x245b   : > { %v7399_v56 = vadd.f32 %v7387_v14, %v7375_v38 }
0x245c   : > { %v7397_v2 = vadd.f32 %v7385_v52, %v7373_v20  ;;  %v15918_v8 = vpop.f32.mrb[52].mxu0  ;;  %15923 = vmatpush3.bf16.msra.mxu1 %v7405_v41 }
0x245d   : > { %v7407_v57 = vpack.c.bf16 %v7399_v56, %v7398_v11  ;;  %v7362_v39 = vadd.f32 %v19423_v58, %v15918_v8  ;;  %v7353_v43 = vpop.f32.mrb[53].mxu0  ;;  %15924 = vmatprep.subr.bf16.mxu1 %v17345_v37 }
0x245e   : > { %v7406_v47 = vpack.c.bf16 %v7397_v2, %v7396_v35  ;;  %v7354_v10 = vadd.f32 %v19423_v58, %v7353_v43  ;;  %v15919_v3 = vpop.f32.mrb[54].mxu0  ;;  %v19565_v2 = vld [vmem:[%s20949_s0] sm:$0xff]  }
0x245f   : > { %v7378_v49 = vmax.f32 %v7362_v39, 0.0  ;;  %v7365_v17 = vadd.f32 %v19423_v58, %v15919_v3  ;;  %v7356_v26 = vpop.f32.mrb[55].mxu0  ;;  %v7695_v3 = vunpack.c.l.bf16 %v19521_v21 }
0x2460   : > { %v7376_v16 = vmax.f32 %v7354_v10, 0.0  ;;  %v7357_v4 = vadd.f32 %v19423_v58, %v7356_v26  ;;  %15925 = vmatpush3.bf16.msra.mxu1 %v7406_v47  ;;  %v7693_v26 = vunpack.c.l.bf16 %v19507_v44 }
0x2461   : > { %v7379_v53 = vmax.f32 %v7365_v17, 0.0  ;;  %15926 = vmatprep.subr.bf16.mxu1 %v17345_v37  ;;  %v7402_v1 = vadd.f32 %v7390_v7, %v7378_v49  ;;  %v7696_v7 = vunpack.c.h.bf16 %v19521_v21 }
0x2462   : > { %v7377_v29 = vmax.f32 %v7357_v4, 0.0  ;;  %v7400_v36 = vadd.f32 %v7388_v24, %v7376_v16  ;;  %v7694_v24 = vunpack.c.h.bf16 %v19507_v44 }
0x2463   : > { %v7403_v42 = vadd.f32 %v7391_v15, %v7379_v53 }
0x2464   : > { %v7401_v12 = vadd.f32 %v7389_v27, %v7377_v29  ;;  %15927 = vmatpush3.bf16.msra.mxu1 %v7407_v57 }
0x2465   : > { %v7409_v51 = vpack.c.bf16 %v7403_v42, %v7402_v1  ;;  %15928 = vmatprep.subr.bf16.mxu1 %v17345_v37 }
0x2466   : > { %v7408_v18 = vpack.c.bf16 %v7401_v12, %v7400_v36 }
0x2468   : > { %15929 = vmatpush3.bf16.msra.mxu1 %v7408_v18 }
0x2469   : > { %15930 = vmatprep.subr.bf16.mxu1 %v17345_v37 }
0x246c   : > { %15931 = vmatpush3.bf16.msra.mxu1 %v7409_v51 }
0x246d   : > { %15936 = vmatprep.subr.bf16.mxu1 %v19512_v30 }
0x246f   : > { %15933 = vmatmul.mubr.msk.bf16.vlgmr.msra.gmra.mrb[44].mxu1 %vm687_vm3, %v19457_v61 }
0x2470   : > { %15937 = vmatpush3.bf16.msra.mxu1 %v19512_v30  ;;  %15940 = vmatprep.mubr.msk.bf16.mxu1 %vm544_vm2, %v19507_v44 }
0x2471   : > { %15938 = vmatprep.subr.bf16.mxu1 %v17444_v6 }
0x2474   : > { %15939 = vmatpush3.bf16.msra.mxu1 %v17444_v6 }
0x2475   : > { %15976 = vmatprep.subr.bf16.mxu1 %v17345_v37 }
0x2477   : > { %15941 = vmatmul.mubr.msk.bf16.vlgmr.msra.gmra.mrb[48].mxu1 %vm544_vm2, %v19521_v21 }
0x2478   : > { %15944 = vmatprep.mubr.msk.bf16.mxu1 %vm544_vm2, %v19525_v13 }
0x247f   : > { %15945 = vmatmul.mubr.msk.bf16.gmra.mrb[52].mxu1 %vm544_vm2, %v19534_v46 }
0x2480   : > { %15948 = vmatprep.mubr.msk.bf16.mxu1 %vm544_vm2, %v19537_v54 }
0x2487   : > { %15949 = vmatmul.mubr.msk.bf16.gmra.mrb[56].mxu1 %vm544_vm2, %v19544_v62 }
0x2488   : > { %15988 = vmatprep.mubr.msk.bf16.mxu1 %vm17346_vm4, %v17345_v37 }
0x2542   : > { %v7444_v59 = vpop.f32.mrb[44].mxu1 }
0x2543   : > { %7451 = vst.msk [vmem:[#allocation2 + $0x150] sm:$0xff] %vm544_vm2, %v7444_v59  ;;  %v15934_v33 = vpop.f32.mrb[45].mxu1 }
0x2544   : > { %v7447_v41 = vpop.f32.mrb[46].mxu1 }
0x2545   : > { %7452 = vst.msk [vmem:[#allocation2 + $0x158] sm:$0xff] %vm544_vm2, %v7447_v41  ;;  %v15935_v34 = vpop.f32.mrb[47].mxu1 }
0x2546   : > { %v7699_v34 = vunpack.c.l.bf16 %v19534_v46 }
0x254a   : > { %v15942_v9 = vpop.f32.mrb[48].mxu1 }
0x254b   : > { %v7547_v23 = vpop.f32.mrb[49].mxu1 }
0x254c   : > { %v15943_v0 = vpop.f32.mrb[50].mxu1 }
0x254d   : > { %v7595_v63 = vpack.c.bf16 %v15943_v0, %v15942_v9  ;;  %v7550_v19 = vpop.f32.mrb[51].mxu1  ;;  %v7700_v9 = vunpack.c.h.bf16 %v19534_v46 }
0x254e   : > { %v7594_v50 = vpack.c.bf16 %v7550_v19, %v7547_v23 }
0x2550   : > { %15952 = vmatprep.subr.bf16.mxu0 %v7594_v50 }
0x2551   : > { %15953 = vmatpush3.bf16.msra.mxu0 %v7594_v50  ;;  %v7698_v50 = vunpack.c.h.bf16 %v19525_v13 }
0x2552   : > { %v15946_v40 = vpop.f32.mrb[52].mxu1  ;;  %15954 = vmatprep.subr.bf16.mxu0 %v7595_v63 }
0x2553   : > { %v7563_v14 = vpop.f32.mrb[53].mxu1 }
0x2554   : > { %v15947_v60 = vpop.f32.mrb[54].mxu1 }
0x2555   : > { %v7597_v22 = vpack.c.bf16 %v15947_v60, %v15946_v40  ;;  %v7566_v55 = vpop.f32.mrb[55].mxu1  ;;  %15955 = vmatpush3.bf16.msra.mxu0 %v7595_v63  ;;  %v7697_v63 = vunpack.c.l.bf16 %v19525_v13 }
0x2556   : > { %v7596_v28 = vpack.c.bf16 %v7566_v55, %v7563_v14 }
0x2558   : > { %15956 = vmatprep.subr.bf16.mxu0 %v7596_v28 }
0x2559   : > { %15957 = vmatpush3.bf16.msra.mxu0 %v7596_v28 }
0x255a   : > { %v15950_v52 = vpop.f32.mrb[56].mxu1  ;;  %15958 = vmatprep.subr.bf16.mxu0 %v7597_v22 }
0x255b   : > { %v7579_v38 = vpop.f32.mrb[57].mxu1 }
0x255c   : > { %v15951_v20 = vpop.f32.mrb[58].mxu1 }
0x255d   : > { %v7599_v11 = vpack.c.bf16 %v15951_v20, %v15950_v52  ;;  %v7582_v56 = vpop.f32.mrb[59].mxu1  ;;  %15959 = vmatpush3.bf16.msra.mxu0 %v7597_v22 }
0x255e   : > { %v7598_v35 = vpack.c.bf16 %v7582_v56, %v7579_v38 }
0x2560   : > { %15960 = vmatprep.subr.bf16.mxu0 %v7598_v35 }
0x2561   : > { %15961 = vmatpush3.bf16.msra.mxu0 %v7598_v35 }
0x2562   : > { %15962 = vmatprep.subr.bf16.mxu0 %v7599_v11 }
0x2565   : > { %15963 = vmatpush3.bf16.msra.mxu0 %v7599_v11 }
0x2568   : > { %15965 = vmatmul.mubr.msk.bf16.vlgmr.msra.gmra.mrb[56].mxu0 %vm687_vm3, %v19352_v31 }
0x2569   : > { %15968 = vmatprep.mubr.msk.bf16.mxu0 %vm687_vm3, %v19360_v25 }
0x2570   : > { %15969 = vmatmul.mubr.msk.bf16.gmra.mrb[60].mxu0 %vm687_vm3, %v19370_v32 }
0x2571   : > { %15972 = vmatprep.mubr.msk.bf16.mxu0 %vm687_vm3, %v19377_v48 }
0x2578   : > { %15973 = vmatmul.mubr.msk.bf16.gmra.mrb[64].mxu0 %vm687_vm3, %v19387_v45 }
0x2579   : > { %16020 = vmatprep.mubr.msk.bf16.mxu0 %vm687_vm3, %v19565_v2 }
0x263b   : > { %v15966_v8 = vpop.f32.mrb[56].mxu0 }
0x263c   : > { %v7643_v57 = vadd.f32 %v19423_v58, %v15966_v8  ;;  %v7634_v39 = vpop.f32.mrb[57].mxu0  ;;  %v7703_v8 = vunpack.c.l.bf16 %v19544_v62 }
0x263d   : > { %v7635_v43 = vadd.f32 %v19423_v58, %v7634_v39  ;;  %v15967_v47 = vpop.f32.mrb[58].mxu0  ;;  %v7704_v39 = vunpack.c.h.bf16 %v19544_v62 }
0x263e   : > { %v7683_v10 = vmax.f32 %v7643_v57, 0.0  ;;  %v7646_v49 = vadd.f32 %v19423_v58, %v15967_v47  ;;  %v7637_v17 = vpop.f32.mrb[59].mxu0 }
0x263f   : > { %v7681_v15 = vmax.f32 %v7635_v43, 0.0  ;;  %v7638_v16 = vadd.f32 %v19423_v58, %v7637_v17 }
0x2640   : > { %v7684_v4 = vmax.f32 %v7646_v49, 0.0  ;;  %v7707_v53 = vadd.f32 %v7695_v3, %v7683_v10  ;;  %v7701_v10 = vunpack.c.l.bf16 %v19537_v54  ;;  %v7702_v49 = vunpack.c.h.bf16 %v19537_v54  ;;  %v19599_v54 = vld [vmem:[%s17451_s19 + $0x450] sm:$0xff]  }
0x2641   : > { %v7682_v27 = vmax.f32 %v7638_v16, 0.0  ;;  %v7705_v1 = vadd.f32 %v7693_v26, %v7681_v15 }
0x2642   : > { %v7708_v29 = vadd.f32 %v7696_v7, %v7684_v4 }
0x2643   : > { %v7706_v42 = vadd.f32 %v7694_v24, %v7682_v27  ;;  %v15970_v36 = vpop.f32.mrb[60].mxu0  ;;  %v19608_v27 = vld [vmem:[%s17451_s19 + $0x458] sm:$0xff]  }
0x2644   : > { %v7718_v12 = vpack.c.bf16 %v7708_v29, %v7707_v53  ;;  %v7659_v51 = vadd.f32 %v19423_v58, %v15970_v36  ;;  %v7650_v18 = vpop.f32.mrb[61].mxu0  ;;  %v19612_v53 = vld [vmem:[%s17451_s19 + $0x460] sm:$0xff]   ;;  %v19621_v29 = vld [vmem:[%s17451_s19 + $0x468] sm:$0xff]  }
0x2645   : > { %v7717_v21 = vpack.c.bf16 %v7706_v42, %v7705_v1  ;;  %v7651_v59 = vadd.f32 %v19423_v58, %v7650_v18  ;;  %v15971_v33 = vpop.f32.mrb[62].mxu0  ;;  %v19624_v1 = vld [vmem:[%s17451_s19 + $0x470] sm:$0xff]   ;;  %v19631_v42 = vld [vmem:[%s17451_s19 + $0x478] sm:$0xff]  }
0x2646   : > { %v7687_v41 = vmax.f32 %v7659_v51, 0.0  ;;  %v7662_v44 = vadd.f32 %v19423_v58, %v15971_v33  ;;  %v7653_v23 = vpop.f32.mrb[63].mxu0 }
0x2647   : > { %v7685_v0 = vmax.f32 %v7651_v59, 0.0  ;;  %v7654_v19 = vadd.f32 %v19423_v58, %v7653_v23  ;;  %15977 = vmatpush3.bf16.msra.mxu1 %v7717_v21 }
0x2648   : > { %v7688_v40 = vmax.f32 %v7662_v44, 0.0  ;;  %15978 = vmatprep.subr.bf16.mxu1 %v17345_v37  ;;  %v7711_v60 = vadd.f32 %v7699_v34, %v7687_v41 }
0x2649   : > { %v7686_v14 = vmax.f32 %v7654_v19, 0.0  ;;  %v7709_v55 = vadd.f32 %v7697_v63, %v7685_v0 }
0x264a   : > { %v7712_v22 = vadd.f32 %v7700_v9, %v7688_v40 }
0x264b   : > { %v7710_v28 = vadd.f32 %v7698_v50, %v7686_v14  ;;  %v15974_v52 = vpop.f32.mrb[64].mxu0  ;;  %15979 = vmatpush3.bf16.msra.mxu1 %v7718_v12 }
0x264c   : > { %v7720_v46 = vpack.c.bf16 %v7712_v22, %v7711_v60  ;;  %v7675_v38 = vadd.f32 %v19423_v58, %v15974_v52  ;;  %v7666_v20 = vpop.f32.mrb[65].mxu0  ;;  %15980 = vmatprep.subr.bf16.mxu1 %v17345_v37  ;;  %v19663_v52 = vld [vmem:[%s17451_s19 + $0x490] sm:$0xff]  }
0x264d   : > { %v7719_v11 = vpack.c.bf16 %v7710_v28, %v7709_v55  ;;  %v7667_v13 = vadd.f32 %v19423_v58, %v7666_v20  ;;  %v15975_v56 = vpop.f32.mrb[66].mxu0 }
0x264e   : > { %v7691_v35 = vmax.f32 %v7675_v38, 0.0  ;;  %v7678_v57 = vadd.f32 %v19423_v58, %v15975_v56  ;;  %v7669_v43 = vpop.f32.mrb[67].mxu0 }
0x264f   : > { %v7689_v47 = vmax.f32 %v7667_v13, 0.0  ;;  %v7670_v3 = vadd.f32 %v19423_v58, %v7669_v43  ;;  %15981 = vmatpush3.bf16.msra.mxu1 %v7719_v11 }
0x2650   : > { %v7692_v7 = vmax.f32 %v7678_v57, 0.0  ;;  %15982 = vmatprep.subr.bf16.mxu1 %v17345_v37  ;;  %v7715_v15 = vadd.f32 %v7703_v8, %v7691_v35  ;;  %v8008_v35 = vunpack.c.l.bf16 %v19608_v27  ;;  %v8009_v57 = vunpack.c.h.bf16 %v19608_v27 }
0x2651   : > { %v7690_v17 = vmax.f32 %v7670_v3, 0.0  ;;  %v7713_v16 = vadd.f32 %v7701_v10, %v7689_v47  ;;  %v8006_v47 = vunpack.c.l.bf16 %v19599_v54  ;;  %v8007_v3 = vunpack.c.h.bf16 %v19599_v54 }
0x2652   : > { %v7716_v26 = vadd.f32 %v7704_v39, %v7692_v7 }
0x2653   : > { %v7714_v62 = vadd.f32 %v7702_v49, %v7690_v17  ;;  %15983 = vmatpush3.bf16.msra.mxu1 %v7720_v46 }
0x2654   : > { %v7722_v24 = vpack.c.bf16 %v7716_v26, %v7715_v15  ;;  %15984 = vmatprep.subr.bf16.mxu1 %v17345_v37 }
0x2655   : > { %v7721_v4 = vpack.c.bf16 %v7714_v62, %v7713_v16 }
0x2657   : > { %15985 = vmatpush3.bf16.msra.mxu1 %v7721_v4 }
0x2658   : > { %15986 = vmatprep.subr.bf16.mxu1 %v17345_v37 }
0x265b   : > { %15987 = vmatpush3.bf16.msra.mxu1 %v7722_v24 }
0x265c   : > { %15992 = vmatprep.subr.bf16.mxu1 %v19512_v30 }
0x265e   : > { %15989 = vmatmul.mubr.msk.bf16.vlgmr.msra.gmra.mrb[60].mxu1 %vm687_vm3, %v19457_v61 }
0x265f   : > { %15993 = vmatpush3.bf16.msra.mxu1 %v19512_v30  ;;  %15996 = vmatprep.mubr.msk.bf16.mxu1 %vm544_vm2, %v19599_v54 }
0x2660   : > { %15994 = vmatprep.subr.bf16.mxu1 %v17444_v6 }
0x2663   : > { %15995 = vmatpush3.bf16.msra.mxu1 %v17444_v6 }
0x2664   : > { %16032 = vmatprep.subr.bf16.mxu1 %v17345_v37 }
0x2666   : > { %15997 = vmatmul.mubr.msk.bf16.vlgmr.msra.gmra.mrb[64].mxu1 %vm544_vm2, %v19608_v27 }
0x2667   : > { %16000 = vmatprep.mubr.msk.bf16.mxu1 %vm544_vm2, %v19612_v53 }
0x266e   : > { %16001 = vmatmul.mubr.msk.bf16.gmra.mrb[68].mxu1 %vm544_vm2, %v19621_v29 }
0x266f   : > { %16004 = vmatprep.mubr.msk.bf16.mxu1 %vm544_vm2, %v19624_v1 }
0x2676   : > { %16005 = vmatmul.mubr.msk.bf16.gmra.mrb[72].mxu1 %vm544_vm2, %v19631_v42 }
0x2677   : > { %16044 = vmatprep.mubr.msk.bf16.mxu1 %vm17346_vm4, %v17345_v37 }
0x2731   : > { %v7757_v36 = vpop.f32.mrb[60].mxu1 }
0x2732   : > { %7764 = vst.msk [vmem:[#allocation2 + $0x160] sm:$0xff] %vm544_vm2, %v7757_v36  ;;  %v15990_v12 = vpop.f32.mrb[61].mxu1 }
0x2733   : > { %v7760_v51 = vpop.f32.mrb[62].mxu1 }
0x2734   : > { %7765 = vst.msk [vmem:[#allocation2 + $0x168] sm:$0xff] %vm544_vm2, %v7760_v51  ;;  %v15991_v18 = vpop.f32.mrb[63].mxu1 }
0x2739   : > { %v15998_v21 = vpop.f32.mrb[64].mxu1 }
0x273a   : > { %v7860_v59 = vpop.f32.mrb[65].mxu1 }
0x273b   : > { %v15999_v33 = vpop.f32.mrb[66].mxu1 }
0x273c   : > { %v7908_v41 = vpack.c.bf16 %v15999_v33, %v15998_v21  ;;  %v7863_v34 = vpop.f32.mrb[67].mxu1  ;;  %v8012_v21 = vunpack.c.l.bf16 %v19621_v29 }
0x273d   : > { %v7907_v44 = vpack.c.bf16 %v7863_v34, %v7860_v59  ;;  %v8013_v59 = vunpack.c.h.bf16 %v19621_v29  ;;  %v8010_v34 = vunpack.c.l.bf16 %v19612_v53 }
0x273f   : > { %16008 = vmatprep.subr.bf16.mxu0 %v7907_v44 }
0x2740   : > { %16009 = vmatpush3.bf16.msra.mxu0 %v7907_v44 }
0x2741   : > { %v16002_v9 = vpop.f32.mrb[68].mxu1  ;;  %16010 = vmatprep.subr.bf16.mxu0 %v7908_v41 }
0x2742   : > { %v7876_v23 = vpop.f32.mrb[69].mxu1 }
0x2743   : > { %v16003_v0 = vpop.f32.mrb[70].mxu1 }
0x2744   : > { %v7910_v63 = vpack.c.bf16 %v16003_v0, %v16002_v9  ;;  %v7879_v19 = vpop.f32.mrb[71].mxu1  ;;  %16011 = vmatpush3.bf16.msra.mxu0 %v7908_v41  ;;  %v8011_v9 = vunpack.c.h.bf16 %v19612_v53 }
0x2745   : > { %v7909_v50 = vpack.c.bf16 %v7879_v19, %v7876_v23 }
0x2747   : > { %16012 = vmatprep.subr.bf16.mxu0 %v7909_v50 }
0x2748   : > { %16013 = vmatpush3.bf16.msra.mxu0 %v7909_v50 }
0x2749   : > { %v16006_v40 = vpop.f32.mrb[72].mxu1  ;;  %16014 = vmatprep.subr.bf16.mxu0 %v7910_v63 }
0x274a   : > { %v7892_v14 = vpop.f32.mrb[73].mxu1 }
0x274b   : > { %v16007_v60 = vpop.f32.mrb[74].mxu1 }
0x274c   : > { %v7912_v22 = vpack.c.bf16 %v16007_v60, %v16006_v40  ;;  %v7895_v55 = vpop.f32.mrb[75].mxu1  ;;  %16015 = vmatpush3.bf16.msra.mxu0 %v7910_v63 }
0x274d   : > { %v7911_v28 = vpack.c.bf16 %v7895_v55, %v7892_v14 }
0x274f   : > { %16016 = vmatprep.subr.bf16.mxu0 %v7911_v28 }
0x2750   : > { %16017 = vmatpush3.bf16.msra.mxu0 %v7911_v28 }
0x2751   : > { %16018 = vmatprep.subr.bf16.mxu0 %v7912_v22 }
0x2754   : > { %16019 = vmatpush3.bf16.msra.mxu0 %v7912_v22 }
0x2755   : > { %16048 = vmatprep.subr.bf16.mxu0 %v19512_v30 }
0x2757   : > { %16021 = vmatmul.mubr.msk.bf16.vlgmr.msra.gmra.mrb[68].mxu0 %vm687_vm3, %v19352_v31  ;;  %v19653_v31 = vld [vmem:[%s17451_s19 + $0x480] sm:$0xff]  }
0x2758   : > { %16049 = vmatpush3.bf16.msra.mxu0 %v19512_v30  ;;  %16024 = vmatprep.mubr.msk.bf16.mxu0 %vm687_vm3, %v19360_v25  ;;  %v19660_v25 = vld [vmem:[%s17451_s19 + $0x488] sm:$0xff]  }
0x2759   : > { %16050 = vmatprep.subr.bf16.mxu0 %v17444_v6 }
0x275c   : > { %16051 = vmatpush3.bf16.msra.mxu0 %v17444_v6 }
0x275d   : > { %16088 = vmatprep.subr.bf16.mxu0 %v17345_v37 }
0x275f   : > { %16025 = vmatmul.mubr.msk.bf16.gmra.mrb[72].mxu0 %vm687_vm3, %v19370_v32  ;;  %v19670_v32 = vld [vmem:[%s17451_s19 + $0x498] sm:$0xff]  }
0x2760   : > { %16028 = vmatprep.mubr.msk.bf16.mxu0 %vm687_vm3, %v19377_v48  ;;  %v19673_v48 = vld [vmem:[%s17451_s19 + $0x4a0] sm:$0xff]  }
0x2767   : > { %16029 = vmatmul.mubr.msk.bf16.gmra.mrb[76].mxu0 %vm687_vm3, %v19387_v45  ;;  %v19680_v45 = vld [vmem:[%s17451_s19 + $0x4a8] sm:$0xff]  }
0x2768   : > { %16052 = vmatprep.mubr.msk.bf16.mxu0 %vm544_vm2, %v19653_v31 }
0x276f   : > { %16053 = vmatmul.mubr.msk.bf16.vlgmr.msra.gmra.mrb[80].mxu0 %vm544_vm2, %v19660_v25 }
0x2770   : > { %16056 = vmatprep.mubr.msk.bf16.mxu0 %vm544_vm2, %v19663_v52 }
0x2777   : > { %16057 = vmatmul.mubr.msk.bf16.gmra.mrb[84].mxu0 %vm544_vm2, %v19670_v32 }
0x2778   : > { %16060 = vmatprep.mubr.msk.bf16.mxu0 %vm544_vm2, %v19673_v48 }
0x277f   : > { %16061 = vmatmul.mubr.msk.bf16.gmra.mrb[88].mxu0 %vm544_vm2, %v19680_v45 }
0x2780   : > { %16100 = vmatprep.mubr.msk.bf16.mxu0 %vm17346_vm4, %v17345_v37 }
0x282a   : > { %v16022_v46 = vpop.f32.mrb[68].mxu0 }
0x282b   : > { %v7956_v38 = vadd.f32 %v19423_v58, %v16022_v46  ;;  %v7947_v20 = vpop.f32.mrb[69].mxu0 }
0x282c   : > { %v7948_v11 = vadd.f32 %v19423_v58, %v7947_v20  ;;  %v16023_v13 = vpop.f32.mrb[70].mxu0 }
0x282d   : > { %v7996_v56 = vmax.f32 %v7956_v38, 0.0  ;;  %v7959_v8 = vadd.f32 %v19423_v58, %v16023_v13  ;;  %v7950_v39 = vpop.f32.mrb[71].mxu0  ;;  %v8016_v38 = vunpack.c.l.bf16 %v19631_v42 }
0x282e   : > { %v7994_v43 = vmax.f32 %v7948_v11, 0.0  ;;  %v7951_v10 = vadd.f32 %v19423_v58, %v7950_v39  ;;  %v8017_v11 = vunpack.c.h.bf16 %v19631_v42 }
0x282f   : > { %v7997_v49 = vmax.f32 %v7959_v8, 0.0  ;;  %v8020_v17 = vadd.f32 %v8008_v35, %v7996_v56  ;;  %v8014_v35 = vunpack.c.l.bf16 %v19624_v1 }
0x2830   : > { %v7995_v7 = vmax.f32 %v7951_v10, 0.0  ;;  %v8018_v26 = vadd.f32 %v8006_v47, %v7994_v43 }
0x2831   : > { %v8021_v15 = vadd.f32 %v8009_v57, %v7997_v49  ;;  %v8015_v57 = vunpack.c.h.bf16 %v19624_v1 }
0x2832   : > { %v8019_v16 = vadd.f32 %v8007_v3, %v7995_v7  ;;  %v16026_v62 = vpop.f32.mrb[72].mxu0 }
0x2833   : > { %v8031_v24 = vpack.c.bf16 %v8021_v15, %v8020_v17  ;;  %v7972_v4 = vadd.f32 %v19423_v58, %v16026_v62  ;;  %v7963_v36 = vpop.f32.mrb[73].mxu0 }
0x2834   : > { %v8030_v27 = vpack.c.bf16 %v8019_v16, %v8018_v26  ;;  %v7964_v12 = vadd.f32 %v19423_v58, %v7963_v36  ;;  %v16027_v51 = vpop.f32.mrb[74].mxu0 }
0x2835   : > { %v8000_v18 = vmax.f32 %v7972_v4, 0.0  ;;  %v7975_v54 = vadd.f32 %v19423_v58, %v16027_v51  ;;  %v7966_v33 = vpop.f32.mrb[75].mxu0 }
0x2836   : > { %v7998_v41 = vmax.f32 %v7964_v12, 0.0  ;;  %v7967_v44 = vadd.f32 %v19423_v58, %v7966_v33  ;;  %16033 = vmatpush3.bf16.msra.mxu1 %v8030_v27 }
0x2837   : > { %v8001_v23 = vmax.f32 %v7975_v54, 0.0  ;;  %16034 = vmatprep.subr.bf16.mxu1 %v17345_v37  ;;  %v8024_v63 = vadd.f32 %v8012_v21, %v8000_v18 }
0x2838   : > { %v7999_v0 = vmax.f32 %v7967_v44, 0.0  ;;  %v8022_v50 = vadd.f32 %v8010_v34, %v7998_v41  ;;  %v19729_v41 = vld [vmem:[%s20949_s0 + $0x10] sm:$0xff]   ;;  %v19736_v34 = vld [vmem:[%s20949_s0 + $0x18] sm:$0xff]   ;;  %v19743_v44 = vld [vmem:[%s20949_s0 + $0x20] sm:$0xff]  }
0x2839   : > { %v8025_v19 = vadd.f32 %v8013_v59, %v8001_v23 }
0x283a   : > { %v8023_v40 = vadd.f32 %v8011_v9, %v7999_v0  ;;  %v16030_v14 = vpop.f32.mrb[76].mxu0  ;;  %16035 = vmatpush3.bf16.msra.mxu1 %v8031_v24  ;;  %v19750_v9 = vld [vmem:[%s20949_s0 + $0x28] sm:$0xff]  }
0x283b   : > { %v8033_v29 = vpack.c.bf16 %v8025_v19, %v8024_v63  ;;  %v7988_v60 = vadd.f32 %v19423_v58, %v16030_v14  ;;  %v7979_v22 = vpop.f32.mrb[77].mxu0  ;;  %16036 = vmatprep.subr.bf16.mxu1 %v17345_v37 }
0x283c   : > { %v8032_v55 = vpack.c.bf16 %v8023_v40, %v8022_v50  ;;  %v7980_v53 = vadd.f32 %v19423_v58, %v7979_v22  ;;  %v16031_v28 = vpop.f32.mrb[78].mxu0  ;;  %v19761_v40 = vld [vmem:[%s20954_s5] ss:$0 sm:$0xff] }
0x283d   : > { %v8004_v46 = vmax.f32 %v7988_v60, 0.0  ;;  %v7991_v20 = vadd.f32 %v19423_v58, %v16031_v28  ;;  %v7982_v13 = vpop.f32.mrb[79].mxu0 }
0x283e   : > { %v8002_v56 = vmax.f32 %v7980_v53, 0.0  ;;  %v7983_v8 = vadd.f32 %v19423_v58, %v7982_v13  ;;  %16037 = vmatpush3.bf16.msra.mxu1 %v8032_v55  ;;  %v8321_v53 = vunpack.c.l.bf16 %v19660_v25 }
0x283f   : > { %v8005_v39 = vmax.f32 %v7991_v20, 0.0  ;;  %16038 = vmatprep.subr.bf16.mxu1 %v17345_v37  ;;  %v8028_v47 = vadd.f32 %v8016_v38, %v8004_v46  ;;  %v8322_v46 = vunpack.c.h.bf16 %v19660_v25 }
0x2840   : > { %v8003_v43 = vmax.f32 %v7983_v8, 0.0  ;;  %v8026_v3 = vadd.f32 %v8014_v35, %v8002_v56  ;;  %v8320_v56 = vunpack.c.h.bf16 %v19653_v31 }
0x2841   : > { %v8029_v10 = vadd.f32 %v8017_v11, %v8005_v39  ;;  %v8319_v11 = vunpack.c.l.bf16 %v19653_v31 }
0x2842   : > { %v8027_v49 = vadd.f32 %v8015_v57, %v8003_v43  ;;  %16039 = vmatpush3.bf16.msra.mxu1 %v8033_v29  ;;  %v16054_v7 = vpop.f32.mrb[80].mxu0 }
0x2843   : > { %v8035_v42 = vpack.c.bf16 %v8029_v10, %v8028_v47  ;;  %16040 = vmatprep.subr.bf16.mxu1 %v17345_v37  ;;  %v8173_v17 = vpop.f32.mrb[81].mxu0 }
0x2844   : > { %v8034_v15 = vpack.c.bf16 %v8027_v49, %v8026_v3  ;;  %v16055_v26 = vpop.f32.mrb[82].mxu0 }
0x2845   : > { %v8221_v58 = vpack.c.bf16 %v16055_v26, %v16054_v7  ;;  %v8176_v16 = vpop.f32.mrb[83].mxu0  ;;  %v8325_v26 = vunpack.c.l.bf16 %v19670_v32 }
0x2846   : > { %16041 = vmatpush3.bf16.msra.mxu1 %v8034_v15  ;;  %v8220_v1 = vpack.c.bf16 %v8176_v16, %v8173_v17 }
0x2847   : > { %16042 = vmatprep.subr.bf16.mxu1 %v17345_v37 }
0x284a   : > { %16043 = vmatpush3.bf16.msra.mxu1 %v8035_v42  ;;  %v16058_v62 = vpop.f32.mrb[84].mxu0 }
0x284b   : > { %16064 = vmatprep.subr.bf16.mxu1 %v8220_v1  ;;  %v8189_v24 = vpop.f32.mrb[85].mxu0 }
0x284c   : > { %v16059_v4 = vpop.f32.mrb[86].mxu0 }
0x284d   : > { %16045 = vmatmul.mubr.msk.bf16.vlgmr.msra.gmra.mrb[76].mxu1 %vm687_vm3, %v19457_v61  ;;  %v8223_v36 = vpack.c.bf16 %v16059_v4, %v16058_v62  ;;  %v8192_v27 = vpop.f32.mrb[87].mxu0  ;;  %v19722_v61 = vld [vmem:[%s20949_s0 + $0x8] sm:$0xff]   ;;  %v8323_v62 = vunpack.c.l.bf16 %v19663_v52  ;;  %v8324_v4 = vunpack.c.h.bf16 %v19663_v52 }
0x284e   : > { %16065 = vmatpush3.bf16.msra.mxu1 %v8220_v1  ;;  %v8222_v12 = vpack.c.bf16 %v8192_v27, %v8189_v24  ;;  %16076 = vmatprep.mubr.msk.bf16.mxu1 %vm687_vm3, %v19565_v2 }
0x284f   : > { %16066 = vmatprep.subr.bf16.mxu1 %v8221_v58 }
0x2852   : > { %16067 = vmatpush3.bf16.msra.mxu1 %v8221_v58  ;;  %v16062_v51 = vpop.f32.mrb[88].mxu0  ;;  %v8326_v58 = vunpack.c.h.bf16 %v19670_v32 }
0x2853   : > { %16068 = vmatprep.subr.bf16.mxu1 %v8222_v12  ;;  %v8205_v18 = vpop.f32.mrb[89].mxu0 }
0x2854   : > { %v16063_v21 = vpop.f32.mrb[90].mxu0 }
0x2855   : > { %v8225_v54 = vpack.c.bf16 %v16063_v21, %v16062_v51  ;;  %v8208_v59 = vpop.f32.mrb[91].mxu0 }
0x2856   : > { %16069 = vmatpush3.bf16.msra.mxu1 %v8222_v12  ;;  %v8224_v33 = vpack.c.bf16 %v8208_v59, %v8205_v18 }
0x2857   : > { %16070 = vmatprep.subr.bf16.mxu1 %v8223_v36 }
0x285a   : > { %16071 = vmatpush3.bf16.msra.mxu1 %v8223_v36 }
0x285b   : > { %16072 = vmatprep.subr.bf16.mxu1 %v8224_v33 }
0x285e   : > { %16073 = vmatpush3.bf16.msra.mxu1 %v8224_v33 }
0x285f   : > { %16074 = vmatprep.subr.bf16.mxu1 %v8225_v54 }
0x2862   : > { %16075 = vmatpush3.bf16.msra.mxu1 %v8225_v54 }
0x2865   : > { %16077 = vmatmul.mubr.msk.bf16.vlgmr.msra.gmra.mrb[80].mxu1 %vm687_vm3, %v19722_v61 }
0x2866   : > { %16080 = vmatprep.mubr.msk.bf16.mxu1 %vm687_vm3, %v19729_v41 }
0x286d   : > { %16081 = vmatmul.mubr.msk.bf16.gmra.mrb[84].mxu1 %vm687_vm3, %v19736_v34 }
0x286e   : > { %16084 = vmatprep.mubr.msk.bf16.mxu1 %vm687_vm3, %v19743_v44 }
0x2875   : > { %16085 = vmatmul.mubr.msk.bf16.gmra.mrb[88].mxu1 %vm687_vm3, %v19750_v9 }
0x2876   : > { %16132 = vmatprep.mubr.msk.bf16.mxu1 %vm687_vm3, %v19565_v2 }
0x2920   : > { %v8070_v23 = vpop.f32.mrb[76].mxu1 }
0x2921   : > { %8077 = vst.msk [vmem:[#allocation2 + $0x170] sm:$0xff] %vm544_vm2, %v8070_v23  ;;  %v16046_v0 = vpop.f32.mrb[77].mxu1 }
0x2922   : > { %v8073_v63 = vpop.f32.mrb[78].mxu1 }
0x2923   : > { %8078 = vst.msk [vmem:[#allocation2 + $0x178] sm:$0xff] %vm544_vm2, %v8073_v63  ;;  %v16047_v19 = vpop.f32.mrb[79].mxu1 }
0x2924   : > { %v8329_v19 = vunpack.c.l.bf16 %v19680_v45 }
0x2938   : > { %v16078_v50 = vpop.f32.mrb[80].mxu1 }
0x2939   : > { %v8269_v14 = vadd.f32 %v19761_v40, %v16078_v50  ;;  %v8260_v29 = vpop.f32.mrb[81].mxu1 }
0x293a   : > { %v8261_v60 = vadd.f32 %v19761_v40, %v8260_v29  ;;  %v16079_v22 = vpop.f32.mrb[82].mxu1 }
0x293b   : > { %v8309_v55 = vmax.f32 %v8269_v14, 0.0  ;;  %v8272_v28 = vadd.f32 %v19761_v40, %v16079_v22  ;;  %v8263_v38 = vpop.f32.mrb[83].mxu1  ;;  %v8330_v14 = vunpack.c.h.bf16 %v19680_v45  ;;  %v8327_v22 = vunpack.c.l.bf16 %v19673_v48 }
0x293c   : > { %v8307_v20 = vmax.f32 %v8261_v60, 0.0  ;;  %v8264_v13 = vadd.f32 %v19761_v40, %v8263_v38 }
0x293d   : > { %v8310_v35 = vmax.f32 %v8272_v28, 0.0  ;;  %v8333_v57 = vadd.f32 %v8321_v53, %v8309_v55  ;;  %v8328_v53 = vunpack.c.h.bf16 %v19673_v48  ;;  %v19793_v48 = vld [vmem:[%s17451_s19 + $0x4b0] sm:$0xff]  }
0x293e   : > { %v8308_v8 = vmax.f32 %v8264_v13, 0.0  ;;  %v8331_v43 = vadd.f32 %v8319_v11, %v8307_v20 }
0x293f   : > { %v8334_v39 = vadd.f32 %v8322_v46, %v8310_v35  ;;  %v19799_v35 = vld [vmem:[%s20950_s1] sm:$0xff]  }
0x2940   : > { %v8332_v47 = vadd.f32 %v8320_v56, %v8308_v8  ;;  %v16082_v10 = vpop.f32.mrb[84].mxu1  ;;  %v19807_v8 = vld [vmem:[%s17451_s19 + $0x4b8] sm:$0xff]  }
0x2941   : > { %v8344_v3 = vpack.c.bf16 %v8334_v39, %v8333_v57  ;;  %v8285_v49 = vadd.f32 %v19761_v40, %v16082_v10  ;;  %v8276_v7 = vpop.f32.mrb[85].mxu1  ;;  %v19811_v57 = vld [vmem:[%s17451_s19 + $0x4c0] sm:$0xff]   ;;  %v19823_v39 = vld [vmem:[%s17451_s19 + $0x4d0] sm:$0xff]  }
0x2942   : > { %v8343_v25 = vpack.c.bf16 %v8332_v47, %v8331_v43  ;;  %v8277_v42 = vadd.f32 %v19761_v40, %v8276_v7  ;;  %v16083_v17 = vpop.f32.mrb[86].mxu1  ;;  %v19830_v43 = vld [vmem:[%s17451_s19 + $0x4d8] sm:$0xff]  }
0x2943   : > { %v8313_v15 = vmax.f32 %v8285_v49, 0.0  ;;  %v8288_v31 = vadd.f32 %v19761_v40, %v16083_v17  ;;  %v8279_v16 = vpop.f32.mrb[87].mxu1 }
0x2944   : > { %v8311_v1 = vmax.f32 %v8277_v42, 0.0  ;;  %v8280_v24 = vadd.f32 %v19761_v40, %v8279_v16  ;;  %16089 = vmatpush3.bf16.msra.mxu0 %v8343_v25 }
0x2945   : > { %v8314_v36 = vmax.f32 %v8288_v31, 0.0  ;;  %16090 = vmatprep.subr.bf16.mxu0 %v17345_v37  ;;  %v8337_v12 = vadd.f32 %v8325_v26, %v8313_v15 }
0x2946   : > { %v8312_v27 = vmax.f32 %v8280_v24, 0.0  ;;  %v8335_v18 = vadd.f32 %v8323_v62, %v8311_v1 }
0x2947   : > { %v8338_v51 = vadd.f32 %v8326_v58, %v8314_v36 }
0x2948   : > { %v8336_v21 = vadd.f32 %v8324_v4, %v8312_v27  ;;  %v16086_v54 = vpop.f32.mrb[88].mxu1  ;;  %16091 = vmatpush3.bf16.msra.mxu0 %v8344_v3 }
0x2949   : > { %v8346_v32 = vpack.c.bf16 %v8338_v51, %v8337_v12  ;;  %v8301_v59 = vadd.f32 %v19761_v40, %v16086_v54  ;;  %v8292_v33 = vpop.f32.mrb[89].mxu1  ;;  %16092 = vmatprep.subr.bf16.mxu0 %v17345_v37 }
0x294a   : > { %v8345_v23 = vpack.c.bf16 %v8336_v21, %v8335_v18  ;;  %v8293_v52 = vadd.f32 %v19761_v40, %v8292_v33  ;;  %v16087_v0 = vpop.f32.mrb[90].mxu1 }
0x294b   : > { %v8317_v63 = vmax.f32 %v8301_v59, 0.0  ;;  %v8304_v50 = vadd.f32 %v19761_v40, %v16087_v0  ;;  %v8295_v29 = vpop.f32.mrb[91].mxu1 }
0x294c   : > { %v8315_v60 = vmax.f32 %v8293_v52, 0.0  ;;  %v8296_v55 = vadd.f32 %v19761_v40, %v8295_v29  ;;  %16093 = vmatpush3.bf16.msra.mxu0 %v8345_v23  ;;  %v8634_v52 = vunpack.c.l.bf16 %v19807_v8  ;;  %v8633_v29 = vunpack.c.h.bf16 %v19793_v48 }
0x294d   : > { %v8318_v28 = vmax.f32 %v8304_v50, 0.0  ;;  %16094 = vmatprep.subr.bf16.mxu0 %v17345_v37  ;;  %v8341_v38 = vadd.f32 %v8329_v19, %v8317_v63  ;;  %v8635_v63 = vunpack.c.h.bf16 %v19807_v8 }
0x294e   : > { %v8316_v46 = vmax.f32 %v8296_v55, 0.0  ;;  %v8339_v11 = vadd.f32 %v8327_v22, %v8315_v60 }
0x294f   : > { %v8342_v20 = vadd.f32 %v8330_v14, %v8318_v28  ;;  %v8632_v14 = vunpack.c.l.bf16 %v19793_v48 }
0x2950   : > { %v8340_v13 = vadd.f32 %v8328_v53, %v8316_v46  ;;  %16095 = vmatpush3.bf16.msra.mxu0 %v8346_v32 }
0x2951   : > { %v8348_v45 = vpack.c.bf16 %v8342_v20, %v8341_v38  ;;  %16096 = vmatprep.subr.bf16.mxu0 %v17345_v37 }
0x2952   : > { %v8347_v56 = vpack.c.bf16 %v8340_v13, %v8339_v11 }
0x2954   : > { %16097 = vmatpush3.bf16.msra.mxu0 %v8347_v56 }
0x2955   : > { %16098 = vmatprep.subr.bf16.mxu0 %v17345_v37 }
0x2958   : > { %16099 = vmatpush3.bf16.msra.mxu0 %v8348_v45 }
0x2959   : > { %16104 = vmatprep.subr.bf16.mxu0 %v19512_v30 }
0x295b   : > { %16101 = vmatmul.mubr.msk.bf16.vlgmr.msra.gmra.mrb[92].mxu0 %vm687_vm3, %v19799_v35 }
0x295c   : > { %16105 = vmatpush3.bf16.msra.mxu0 %v19512_v30  ;;  %16108 = vmatprep.mubr.msk.bf16.mxu0 %vm544_vm2, %v19793_v48  ;;  %v19820_v30 = vld [vmem:[%s17451_s19 + $0x4c8] sm:$0xff]  }
0x295d   : > { %16106 = vmatprep.subr.bf16.mxu0 %v17444_v6 }
0x2960   : > { %16107 = vmatpush3.bf16.msra.mxu0 %v17444_v6 }
0x2961   : > { %16144 = vmatprep.subr.bf16.mxu0 %v17345_v37 }
0x2963   : > { %16109 = vmatmul.mubr.msk.bf16.vlgmr.msra.gmra.mrb[96].mxu0 %vm544_vm2, %v19807_v8 }
0x2964   : > { %16112 = vmatprep.mubr.msk.bf16.mxu0 %vm544_vm2, %v19811_v57 }
0x296b   : > { %16113 = vmatmul.mubr.msk.bf16.gmra.mrb[100].mxu0 %vm544_vm2, %v19820_v30 }
0x296c   : > { %16116 = vmatprep.mubr.msk.bf16.mxu0 %vm544_vm2, %v19823_v39 }
0x2973   : > { %16117 = vmatmul.mubr.msk.bf16.gmra.mrb[104].mxu0 %vm544_vm2, %v19830_v43 }
0x2974   : > { %16156 = vmatprep.mubr.msk.bf16.mxu0 %vm17346_vm4, %v17345_v37 }
0x2a2e   : > { %v8383_v47 = vpop.f32.mrb[92].mxu0 }
0x2a2f   : > { %8390 = vst.msk [vmem:[#allocation2 + $0x180] sm:$0xff] %vm544_vm2, %v8383_v47  ;;  %v16102_v10 = vpop.f32.mrb[93].mxu0 }
0x2a30   : > { %v8386_v3 = vpop.f32.mrb[94].mxu0  ;;  %v8638_v10 = vunpack.c.l.bf16 %v19820_v30 }
0x2a31   : > { %8391 = vst.msk [vmem:[#allocation2 + $0x188] sm:$0xff] %vm544_vm2, %v8386_v3  ;;  %v16103_v49 = vpop.f32.mrb[95].mxu0  ;;  %v8639_v3 = vunpack.c.h.bf16 %v19820_v30 }
0x2a36   : > { %v16110_v7 = vpop.f32.mrb[96].mxu0 }
0x2a37   : > { %v8486_v25 = vpop.f32.mrb[97].mxu0 }
0x2a38   : > { %v16111_v42 = vpop.f32.mrb[98].mxu0 }
0x2a39   : > { %v8534_v17 = vpack.c.bf16 %v16111_v42, %v16110_v7  ;;  %v8489_v15 = vpop.f32.mrb[99].mxu0 }
0x2a3a   : > { %v8533_v26 = vpack.c.bf16 %v8489_v15, %v8486_v25  ;;  %v8636_v25 = vunpack.c.l.bf16 %v19811_v57 }
0x2a3c   : > { %16120 = vmatprep.subr.bf16.mxu1 %v8533_v26 }
0x2a3d   : > { %16121 = vmatpush3.bf16.msra.mxu1 %v8533_v26 }
0x2a3e   : > { %v16114_v31 = vpop.f32.mrb[100].mxu0  ;;  %16122 = vmatprep.subr.bf16.mxu1 %v8534_v17 }
0x2a3f   : > { %v8502_v58 = vpop.f32.mrb[101].mxu0 }
0x2a40   : > { %v16115_v16 = vpop.f32.mrb[102].mxu0 }
0x2a41   : > { %v8536_v1 = vpack.c.bf16 %v16115_v16, %v16114_v31  ;;  %v8505_v62 = vpop.f32.mrb[103].mxu0  ;;  %16123 = vmatpush3.bf16.msra.mxu1 %v8534_v17  ;;  %v8637_v17 = vunpack.c.h.bf16 %v19811_v57 }
0x2a42   : > { %v8535_v24 = vpack.c.bf16 %v8505_v62, %v8502_v58 }
0x2a44   : > { %16124 = vmatprep.subr.bf16.mxu1 %v8535_v24 }
0x2a45   : > { %16125 = vmatpush3.bf16.msra.mxu1 %v8535_v24 }
0x2a46   : > { %v16118_v4 = vpop.f32.mrb[104].mxu0  ;;  %16126 = vmatprep.subr.bf16.mxu1 %v8536_v1 }
0x2a47   : > { %v8518_v36 = vpop.f32.mrb[105].mxu0 }
0x2a48   : > { %v16119_v27 = vpop.f32.mrb[106].mxu0 }
0x2a49   : > { %v8538_v12 = vpack.c.bf16 %v16119_v27, %v16118_v4  ;;  %v8521_v51 = vpop.f32.mrb[107].mxu0  ;;  %16127 = vmatpush3.bf16.msra.mxu1 %v8536_v1 }
0x2a4a   : > { %v8537_v18 = vpack.c.bf16 %v8521_v51, %v8518_v36  ;;  %v8642_v51 = vunpack.c.l.bf16 %v19830_v43 }
0x2a4c   : > { %16128 = vmatprep.subr.bf16.mxu1 %v8537_v18 }
0x2a4d   : > { %16129 = vmatpush3.bf16.msra.mxu1 %v8537_v18 }
0x2a4e   : > { %16130 = vmatprep.subr.bf16.mxu1 %v8538_v12 }
0x2a51   : > { %16131 = vmatpush3.bf16.msra.mxu1 %v8538_v12 }
0x2a54   : > { %16133 = vmatmul.mubr.msk.bf16.vlgmr.msra.gmra.mrb[92].mxu1 %vm687_vm3, %v19722_v61 }
0x2a55   : > { %16136 = vmatprep.mubr.msk.bf16.mxu1 %vm687_vm3, %v19729_v41 }
0x2a5c   : > { %16137 = vmatmul.mubr.msk.bf16.gmra.mrb[96].mxu1 %vm687_vm3, %v19736_v34 }
0x2a5d   : > { %16140 = vmatprep.mubr.msk.bf16.mxu1 %vm687_vm3, %v19743_v44 }
0x2a64   : > { %16141 = vmatmul.mubr.msk.bf16.gmra.mrb[100].mxu1 %vm687_vm3, %v19750_v9 }
0x2a65   : > { %16188 = vmatprep.mubr.msk.bf16.mxu1 %vm687_vm3, %v19565_v2 }
0x2b27   : > { %v16134_v21 = vpop.f32.mrb[92].mxu1 }
0x2b28   : > { %v8582_v54 = vadd.f32 %v19761_v40, %v16134_v21  ;;  %v8573_v32 = vpop.f32.mrb[93].mxu1  ;;  %v8643_v21 = vunpack.c.h.bf16 %v19830_v43 }
0x2b29   : > { %v8574_v59 = vadd.f32 %v19761_v40, %v8573_v32  ;;  %v16135_v33 = vpop.f32.mrb[94].mxu1 }
0x2b2a   : > { %v8622_v23 = vmax.f32 %v8582_v54, 0.0  ;;  %v8585_v0 = vadd.f32 %v19761_v40, %v16135_v33  ;;  %v8576_v19 = vpop.f32.mrb[95].mxu1 }
0x2b2b   : > { %v8620_v50 = vmax.f32 %v8574_v59, 0.0  ;;  %v8577_v2 = vadd.f32 %v19761_v40, %v8576_v19  ;;  %v8640_v59 = vunpack.c.l.bf16 %v19823_v39 }
0x2b2c   : > { %v8623_v60 = vmax.f32 %v8585_v0, 0.0  ;;  %v8646_v55 = vadd.f32 %v8634_v52, %v8622_v23  ;;  %v8641_v23 = vunpack.c.h.bf16 %v19823_v39  ;;  %v19880_v39 = vld [vmem:[%s17451_s19 + $0x4e0] sm:$0xff]  }
0x2b2d   : > { %v8621_v22 = vmax.f32 %v8577_v2, 0.0  ;;  %v8644_v28 = vadd.f32 %v8632_v14, %v8620_v50 }
0x2b2e   : > { %v8647_v53 = vadd.f32 %v8635_v63, %v8623_v60  ;;  %v19894_v60 = vld [vmem:[%s17451_s19 + $0x4e8] sm:$0xff]  }
0x2b2f   : > { %v8645_v46 = vadd.f32 %v8633_v29, %v8621_v22  ;;  %v16138_v38 = vpop.f32.mrb[96].mxu1  ;;  %v19885_v29 = vld [vmem:[%s20953_s4] sm:$0xff]   ;;  %v19898_v22 = vld [vmem:[%s17451_s19 + $0x4f0] sm:$0xff]  }
0x2b30   : > { %v8657_v20 = vpack.c.bf16 %v8647_v53, %v8646_v55  ;;  %v8598_v11 = vadd.f32 %v19761_v40, %v16138_v38  ;;  %v8589_v13 = vpop.f32.mrb[97].mxu1  ;;  %v19907_v55 = vld [vmem:[%s17451_s19 + $0x4f8] sm:$0xff]   ;;  %v19910_v53 = vld [vmem:[%s17451_s19 + $0x500] sm:$0xff]  }
0x2b31   : > { %v8656_v45 = vpack.c.bf16 %v8645_v46, %v8644_v28  ;;  %v8590_v56 = vadd.f32 %v19761_v40, %v8589_v13  ;;  %v16139_v8 = vpop.f32.mrb[98].mxu1  ;;  %v19917_v28 = vld [vmem:[%s17451_s19 + $0x508] sm:$0xff]  }
0x2b32   : > { %v8626_v47 = vmax.f32 %v8598_v11, 0.0  ;;  %v8601_v48 = vadd.f32 %v19761_v40, %v16139_v8  ;;  %v8592_v49 = vpop.f32.mrb[99].mxu1 }
0x2b33   : > { %v8624_v7 = vmax.f32 %v8590_v56, 0.0  ;;  %v8593_v42 = vadd.f32 %v19761_v40, %v8592_v49  ;;  %16145 = vmatpush3.bf16.msra.mxu0 %v8656_v45 }
0x2b34   : > { %v8627_v15 = vmax.f32 %v8601_v48, 0.0  ;;  %16146 = vmatprep.subr.bf16.mxu0 %v17345_v37  ;;  %v8650_v31 = vadd.f32 %v8638_v10, %v8626_v47 }
0x2b35   : > { %v8625_v26 = vmax.f32 %v8593_v42, 0.0  ;;  %v8648_v16 = vadd.f32 %v8636_v25, %v8624_v7 }
0x2b36   : > { %v8651_v58 = vadd.f32 %v8639_v3, %v8627_v15 }
0x2b37   : > { %v8649_v1 = vadd.f32 %v8637_v17, %v8625_v26  ;;  %v16142_v62 = vpop.f32.mrb[100].mxu1  ;;  %16147 = vmatpush3.bf16.msra.mxu0 %v8657_v20 }
0x2b38   : > { %v8659_v30 = vpack.c.bf16 %v8651_v58, %v8650_v31  ;;  %v8614_v24 = vadd.f32 %v19761_v40, %v16142_v62  ;;  %v8605_v4 = vpop.f32.mrb[101].mxu1  ;;  %16148 = vmatprep.subr.bf16.mxu0 %v17345_v37  ;;  %v19946_v62 = vld [vmem:[%s17451_s19 + $0x518] sm:$0xff]  }
0x2b39   : > { %v8658_v36 = vpack.c.bf16 %v8649_v1, %v8648_v16  ;;  %v8606_v57 = vadd.f32 %v19761_v40, %v8605_v4  ;;  %v16143_v27 = vpop.f32.mrb[102].mxu1  ;;  %v19939_v1 = vld [vmem:[%s17451_s19 + $0x510] sm:$0xff]  }
0x2b3a   : > { %v8630_v12 = vmax.f32 %v8614_v24, 0.0  ;;  %v8617_v18 = vadd.f32 %v19761_v40, %v16143_v27  ;;  %v8608_v54 = vpop.f32.mrb[103].mxu1  ;;  %v19956_v24 = vld [vmem:[%s17451_s19 + $0x528] sm:$0xff]   ;;  %v19959_v4 = vld [vmem:[%s17451_s19 + $0x530] sm:$0xff]  }
0x2b3b   : > { %v8628_v32 = vmax.f32 %v8606_v57, 0.0  ;;  %v8609_v33 = vadd.f32 %v19761_v40, %v8608_v54  ;;  %16149 = vmatpush3.bf16.msra.mxu0 %v8658_v36  ;;  %v19966_v36 = vld [vmem:[%s17451_s19 + $0x538] sm:$0xff]   ;;  %v8947_v54 = vunpack.c.l.bf16 %v19894_v60 }
0x2b3c   : > { %v8631_v52 = vmax.f32 %v8617_v18, 0.0  ;;  %16150 = vmatprep.subr.bf16.mxu0 %v17345_v37  ;;  %v8654_v63 = vadd.f32 %v8642_v51, %v8630_v12 }
0x2b3d   : > { %v8629_v0 = vmax.f32 %v8609_v33, 0.0  ;;  %v8652_v50 = vadd.f32 %v8640_v59, %v8628_v32  ;;  %v8948_v59 = vunpack.c.h.bf16 %v19894_v60 }
0x2b3e   : > { %v8655_v19 = vadd.f32 %v8643_v21, %v8631_v52  ;;  %v8945_v52 = vunpack.c.l.bf16 %v19880_v39 }
0x2b3f   : > { %v8653_v14 = vadd.f32 %v8641_v23, %v8629_v0  ;;  %16151 = vmatpush3.bf16.msra.mxu0 %v8659_v30  ;;  %v19949_v30 = vld [vmem:[%s17451_s19 + $0x520] sm:$0xff]  }
0x2b40   : > { %v8661_v43 = vpack.c.bf16 %v8655_v19, %v8654_v63  ;;  %16152 = vmatprep.subr.bf16.mxu0 %v17345_v37  ;;  %v8946_v63 = vunpack.c.h.bf16 %v19880_v39 }
0x2b41   : > { %v8660_v2 = vpack.c.bf16 %v8653_v14, %v8652_v50 }
0x2b43   : > { %16153 = vmatpush3.bf16.msra.mxu0 %v8660_v2 }
0x2b44   : > { %16154 = vmatprep.subr.bf16.mxu0 %v17345_v37 }
0x2b47   : > { %16155 = vmatpush3.bf16.msra.mxu0 %v8661_v43 }
0x2b48   : > { %16160 = vmatprep.subr.bf16.mxu0 %v19885_v29 }
0x2b4a   : > { %16157 = vmatmul.mubr.msk.bf16.vlgmr.msra.gmra.mrb[108].mxu0 %vm687_vm3, %v19799_v35 }
0x2b4b   : > { %16161 = vmatpush3.bf16.msra.mxu0 %v19885_v29  ;;  %16164 = vmatprep.mubr.msk.bf16.mxu0 %vm544_vm2, %v19880_v39 }
0x2b4c   : > { %16162 = vmatprep.subr.bf16.mxu0 %v17444_v6 }
0x2b4f   : > { %16163 = vmatpush3.bf16.msra.mxu0 %v17444_v6 }
0x2b50   : > { %16200 = vmatprep.subr.bf16.mxu0 %v17345_v37 }
0x2b52   : > { %16165 = vmatmul.mubr.msk.bf16.vlgmr.msra.gmra.mrb[112].mxu0 %vm544_vm2, %v19894_v60 }
0x2b53   : > { %16168 = vmatprep.mubr.msk.bf16.mxu0 %vm544_vm2, %v19898_v22 }
0x2b5a   : > { %16169 = vmatmul.mubr.msk.bf16.gmra.mrb[116].mxu0 %vm544_vm2, %v19907_v55 }
0x2b5b   : > { %16172 = vmatprep.mubr.msk.bf16.mxu0 %vm544_vm2, %v19910_v53 }
0x2b62   : > { %16173 = vmatmul.mubr.msk.bf16.gmra.mrb[120].mxu0 %vm544_vm2, %v19917_v28 }
0x2b63   : > { %16212 = vmatprep.mubr.msk.bf16.mxu0 %vm17346_vm4, %v17345_v37 }
0x2c1d   : > { %v8696_v46 = vpop.f32.mrb[108].mxu0 }
0x2c1e   : > { %8703 = vst.msk [vmem:[#allocation2 + $0x190] sm:$0xff] %vm544_vm2, %v8696_v46  ;;  %v16158_v38 = vpop.f32.mrb[109].mxu0 }
0x2c1f   : > { %v8699_v20 = vpop.f32.mrb[110].mxu0 }
0x2c20   : > { %8704 = vst.msk [vmem:[#allocation2 + $0x198] sm:$0xff] %vm544_vm2, %v8699_v20  ;;  %v16159_v11 = vpop.f32.mrb[111].mxu0 }
0x2c25   : > { %v16166_v13 = vpop.f32.mrb[112].mxu0 }
0x2c26   : > { %v8799_v45 = vpop.f32.mrb[113].mxu0 }
0x2c27   : > { %v16167_v56 = vpop.f32.mrb[114].mxu0 }
0x2c28   : > { %v8847_v8 = vpack.c.bf16 %v16167_v56, %v16166_v13  ;;  %v8802_v47 = vpop.f32.mrb[115].mxu0 }
0x2c29   : > { %v8846_v10 = vpack.c.bf16 %v8802_v47, %v8799_v45  ;;  %v8951_v47 = vunpack.c.l.bf16 %v19907_v55 }
0x2c2b   : > { %16176 = vmatprep.subr.bf16.mxu1 %v8846_v10 }
0x2c2c   : > { %16177 = vmatpush3.bf16.msra.mxu1 %v8846_v10  ;;  %v8952_v10 = vunpack.c.h.bf16 %v19907_v55 }
0x2c2d   : > { %v16170_v48 = vpop.f32.mrb[116].mxu0  ;;  %16178 = vmatprep.subr.bf16.mxu1 %v8847_v8 }
0x2c2e   : > { %v8815_v3 = vpop.f32.mrb[117].mxu0 }
0x2c2f   : > { %v16171_v49 = vpop.f32.mrb[118].mxu0 }
0x2c30   : > { %v8849_v7 = vpack.c.bf16 %v16171_v49, %v16170_v48  ;;  %v8818_v25 = vpop.f32.mrb[119].mxu0  ;;  %16179 = vmatpush3.bf16.msra.mxu1 %v8847_v8  ;;  %v8949_v49 = vunpack.c.l.bf16 %v19898_v22 }
0x2c31   : > { %v8848_v42 = vpack.c.bf16 %v8818_v25, %v8815_v3  ;;  %v8950_v25 = vunpack.c.h.bf16 %v19898_v22 }
0x2c33   : > { %16180 = vmatprep.subr.bf16.mxu1 %v8848_v42 }
0x2c34   : > { %16181 = vmatpush3.bf16.msra.mxu1 %v8848_v42 }
0x2c35   : > { %v16174_v17 = vpop.f32.mrb[120].mxu0  ;;  %16182 = vmatprep.subr.bf16.mxu1 %v8849_v7 }
0x2c36   : > { %v8831_v15 = vpop.f32.mrb[121].mxu0 }
0x2c37   : > { %v16175_v26 = vpop.f32.mrb[122].mxu0 }
0x2c38   : > { %v8851_v31 = vpack.c.bf16 %v16175_v26, %v16174_v17  ;;  %v8834_v58 = vpop.f32.mrb[123].mxu0  ;;  %16183 = vmatpush3.bf16.msra.mxu1 %v8849_v7 }
0x2c39   : > { %v8850_v16 = vpack.c.bf16 %v8834_v58, %v8831_v15 }
0x2c3b   : > { %16184 = vmatprep.subr.bf16.mxu1 %v8850_v16 }
0x2c3c   : > { %16185 = vmatpush3.bf16.msra.mxu1 %v8850_v16 }
0x2c3d   : > { %16186 = vmatprep.subr.bf16.mxu1 %v8851_v31 }
0x2c40   : > { %16187 = vmatpush3.bf16.msra.mxu1 %v8851_v31 }
0x2c41   : > { %16216 = vmatprep.subr.bf16.mxu1 %v19885_v29 }
0x2c43   : > { %16189 = vmatmul.mubr.msk.bf16.vlgmr.msra.gmra.mrb[104].mxu1 %vm687_vm3, %v19722_v61 }
0x2c44   : > { %16217 = vmatpush3.bf16.msra.mxu1 %v19885_v29  ;;  %16192 = vmatprep.mubr.msk.bf16.mxu1 %vm687_vm3, %v19729_v41 }
0x2c45   : > { %16218 = vmatprep.subr.bf16.mxu1 %v17444_v6 }
0x2c48   : > { %16219 = vmatpush3.bf16.msra.mxu1 %v17444_v6 }
0x2c49   : > { %16256 = vmatprep.subr.bf16.mxu1 %v17345_v37 }
0x2c4b   : > { %16193 = vmatmul.mubr.msk.bf16.gmra.mrb[108].mxu1 %vm687_vm3, %v19736_v34 }
0x2c4c   : > { %16196 = vmatprep.mubr.msk.bf16.mxu1 %vm687_vm3, %v19743_v44 }
0x2c53   : > { %16197 = vmatmul.mubr.msk.bf16.gmra.mrb[112].mxu1 %vm687_vm3, %v19750_v9 }
0x2c54   : > { %16220 = vmatprep.mubr.msk.bf16.mxu1 %vm544_vm2, %v19939_v1 }
0x2c5b   : > { %16221 = vmatmul.mubr.msk.bf16.vlgmr.msra.gmra.mrb[116].mxu1 %vm544_vm2, %v19946_v62 }
0x2c5c   : > { %16224 = vmatprep.mubr.msk.bf16.mxu1 %vm544_vm2, %v19949_v30 }
0x2c63   : > { %16225 = vmatmul.mubr.msk.bf16.gmra.mrb[120].mxu1 %vm544_vm2, %v19956_v24 }
0x2c64   : > { %16228 = vmatprep.mubr.msk.bf16.mxu1 %vm544_vm2, %v19959_v4 }
0x2c6b   : > { %16229 = vmatmul.mubr.msk.bf16.gmra.mrb[124].mxu1 %vm544_vm2, %v19966_v36 }
0x2c6c   : > { %16268 = vmatprep.mubr.msk.bf16.mxu1 %vm17346_vm4, %v17345_v37 }
0x2d16   : > { %v16190_v57 = vpop.f32.mrb[104].mxu1 }
0x2d17   : > { %v8895_v27 = vadd.f32 %v19761_v40, %v16190_v57  ;;  %v8886_v12 = vpop.f32.mrb[105].mxu1 }
0x2d18   : > { %v8887_v51 = vadd.f32 %v19761_v40, %v8886_v12  ;;  %v16191_v18 = vpop.f32.mrb[106].mxu1 }
0x2d19   : > { %v8935_v21 = vmax.f32 %v8895_v27, 0.0  ;;  %v8898_v32 = vadd.f32 %v19761_v40, %v16191_v18  ;;  %v8889_v33 = vpop.f32.mrb[107].mxu1 }
0x2d1a   : > { %v8933_v23 = vmax.f32 %v8887_v51, 0.0  ;;  %v8890_v0 = vadd.f32 %v19761_v40, %v8889_v33 }
0x2d1b   : > { %v8936_v19 = vmax.f32 %v8898_v32, 0.0  ;;  %v8959_v14 = vadd.f32 %v8947_v54, %v8935_v21  ;;  %v8955_v21 = vunpack.c.l.bf16 %v19917_v28  ;;  %v8956_v32 = vunpack.c.h.bf16 %v19917_v28 }
0x2d1c   : > { %v8934_v50 = vmax.f32 %v8890_v0, 0.0  ;;  %v8957_v2 = vadd.f32 %v8945_v52, %v8933_v23  ;;  %v8953_v23 = vunpack.c.l.bf16 %v19910_v53  ;;  %v8954_v0 = vunpack.c.h.bf16 %v19910_v53 }
0x2d1d   : > { %v8960_v43 = vadd.f32 %v8948_v59, %v8936_v19 }
0x2d1e   : > { %v8958_v46 = vadd.f32 %v8946_v63, %v8934_v50  ;;  %v16194_v38 = vpop.f32.mrb[108].mxu1 }
0x2d1f   : > { %v8970_v20 = vpack.c.bf16 %v8960_v43, %v8959_v14  ;;  %v8911_v11 = vadd.f32 %v19761_v40, %v16194_v38  ;;  %v8902_v13 = vpop.f32.mrb[109].mxu1 }
0x2d20   : > { %v8969_v60 = vpack.c.bf16 %v8958_v46, %v8957_v2  ;;  %v8903_v45 = vadd.f32 %v19761_v40, %v8902_v13  ;;  %v16195_v56 = vpop.f32.mrb[110].mxu1 }
0x2d21   : > { %v8939_v8 = vmax.f32 %v8911_v11, 0.0  ;;  %v8914_v39 = vadd.f32 %v19761_v40, %v16195_v56  ;;  %v8905_v48 = vpop.f32.mrb[111].mxu1 }
0x2d22   : > { %v8937_v3 = vmax.f32 %v8903_v45, 0.0  ;;  %v8906_v7 = vadd.f32 %v19761_v40, %v8905_v48  ;;  %16201 = vmatpush3.bf16.msra.mxu0 %v8969_v60  ;;  %v20006_v48 = vld [vmem:[%s20949_s0] sm:$0xff]  }
0x2d23   : > { %v8940_v42 = vmax.f32 %v8914_v39, 0.0  ;;  %16202 = vmatprep.subr.bf16.mxu0 %v17345_v37  ;;  %v8963_v15 = vadd.f32 %v8951_v47, %v8939_v8 }
0x2d24   : > { %v8938_v17 = vmax.f32 %v8906_v7, 0.0  ;;  %v8961_v31 = vadd.f32 %v8949_v49, %v8937_v3 }
0x2d25   : > { %v8964_v26 = vadd.f32 %v8952_v10, %v8940_v42 }
0x2d26   : > { %v8962_v58 = vadd.f32 %v8950_v25, %v8938_v17  ;;  %v16198_v16 = vpop.f32.mrb[112].mxu1  ;;  %16203 = vmatpush3.bf16.msra.mxu0 %v8970_v20 }
0x2d27   : > { %v8972_v55 = vpack.c.bf16 %v8964_v26, %v8963_v15  ;;  %v8927_v57 = vadd.f32 %v19761_v40, %v16198_v16  ;;  %v8918_v27 = vpop.f32.mrb[113].mxu1  ;;  %16204 = vmatprep.subr.bf16.mxu0 %v17345_v37 }
0x2d28   : > { %v8971_v12 = vpack.c.bf16 %v8962_v58, %v8961_v31  ;;  %v8919_v22 = vadd.f32 %v19761_v40, %v8918_v27  ;;  %v16199_v51 = vpop.f32.mrb[114].mxu1  ;;  %v9261_v27 = vunpack.c.h.bf16 %v19946_v62 }
0x2d29   : > { %v8943_v18 = vmax.f32 %v8927_v57, 0.0  ;;  %v8930_v54 = vadd.f32 %v19761_v40, %v16199_v51  ;;  %v8921_v59 = vpop.f32.mrb[115].mxu1  ;;  %v9258_v51 = vunpack.c.l.bf16 %v19939_v1 }
0x2d2a   : > { %v8941_v33 = vmax.f32 %v8919_v22, 0.0  ;;  %v8922_v52 = vadd.f32 %v19761_v40, %v8921_v59  ;;  %16205 = vmatpush3.bf16.msra.mxu0 %v8971_v12 }
0x2d2b   : > { %v8944_v63 = vmax.f32 %v8930_v54, 0.0  ;;  %16206 = vmatprep.subr.bf16.mxu0 %v17345_v37  ;;  %v8967_v50 = vadd.f32 %v8955_v21, %v8943_v18  ;;  %v9259_v21 = vunpack.c.h.bf16 %v19939_v1 }
0x2d2c   : > { %v8942_v19 = vmax.f32 %v8922_v52, 0.0  ;;  %v8965_v43 = vadd.f32 %v8953_v23, %v8941_v33 }
0x2d2d   : > { %v8968_v14 = vadd.f32 %v8956_v32, %v8944_v63 }
0x2d2e   : > { %v8966_v2 = vadd.f32 %v8954_v0, %v8942_v19  ;;  %16207 = vmatpush3.bf16.msra.mxu0 %v8972_v55  ;;  %v16222_v46 = vpop.f32.mrb[116].mxu1 }
0x2d2f   : > { %v8974_v28 = vpack.c.bf16 %v8968_v14, %v8967_v50  ;;  %16208 = vmatprep.subr.bf16.mxu0 %v17345_v37  ;;  %v9112_v38 = vpop.f32.mrb[117].mxu1 }
0x2d30   : > { %v8973_v20 = vpack.c.bf16 %v8966_v2, %v8965_v43  ;;  %v16223_v11 = vpop.f32.mrb[118].mxu1 }
0x2d31   : > { %v9160_v13 = vpack.c.bf16 %v16223_v11, %v16222_v46  ;;  %v9115_v60 = vpop.f32.mrb[119].mxu1  ;;  %v9264_v46 = vunpack.c.l.bf16 %v19956_v24  ;;  %v9262_v11 = vunpack.c.l.bf16 %v19949_v30 }
0x2d32   : > { %16209 = vmatpush3.bf16.msra.mxu0 %v8973_v20  ;;  %v9159_v53 = vpack.c.bf16 %v9115_v60, %v9112_v38  ;;  %v9263_v60 = vunpack.c.h.bf16 %v19949_v30 }
0x2d33   : > { %16210 = vmatprep.subr.bf16.mxu0 %v17345_v37 }
0x2d36   : > { %16211 = vmatpush3.bf16.msra.mxu0 %v8974_v28  ;;  %v16226_v45 = vpop.f32.mrb[120].mxu1  ;;  %v9265_v28 = vunpack.c.h.bf16 %v19956_v24 }
0x2d37   : > { %16232 = vmatprep.subr.bf16.mxu0 %v9159_v53  ;;  %v9128_v56 = vpop.f32.mrb[121].mxu1 }
0x2d38   : > { %v16227_v8 = vpop.f32.mrb[122].mxu1 }
0x2d39   : > { %16213 = vmatmul.mubr.msk.bf16.vlgmr.msra.gmra.mrb[124].mxu0 %vm687_vm3, %v19799_v35  ;;  %v9162_v47 = vpack.c.bf16 %v16227_v8, %v16226_v45  ;;  %v9131_v39 = vpop.f32.mrb[123].mxu1 }
0x2d3a   : > { %16233 = vmatpush3.bf16.msra.mxu0 %v9159_v53  ;;  %v9161_v10 = vpack.c.bf16 %v9131_v39, %v9128_v56  ;;  %16244 = vmatprep.mubr.msk.bf16.mxu0 %vm687_vm3, %v20006_v48 }
0x2d3b   : > { %16234 = vmatprep.subr.bf16.mxu0 %v9160_v13 }
0x2d3e   : > { %16235 = vmatpush3.bf16.msra.mxu0 %v9160_v13  ;;  %v16230_v3 = vpop.f32.mrb[124].mxu1 }
0x2d3f   : > { %16236 = vmatprep.subr.bf16.mxu0 %v9161_v10  ;;  %v9144_v49 = vpop.f32.mrb[125].mxu1 }
0x2d40   : > { %v16231_v7 = vpop.f32.mrb[126].mxu1 }
0x2d41   : > { %v9164_v25 = vpack.c.bf16 %v16231_v7, %v16230_v3  ;;  %v9147_v42 = vpop.f32.mrb[127].mxu1 }
0x2d42   : > { %16237 = vmatpush3.bf16.msra.mxu0 %v9161_v10  ;;  %v9163_v17 = vpack.c.bf16 %v9147_v42, %v9144_v49 }
0x2d43   : > { %16238 = vmatprep.subr.bf16.mxu0 %v9162_v47 }
0x2d46   : > { %16239 = vmatpush3.bf16.msra.mxu0 %v9162_v47 }
0x2d47   : > { %16240 = vmatprep.subr.bf16.mxu0 %v9163_v17 }
0x2d4a   : > { %16241 = vmatpush3.bf16.msra.mxu0 %v9163_v17  ;;  %v9268_v17 = vunpack.c.l.bf16 %v19966_v36 }
0x2d4b   : > { %16242 = vmatprep.subr.bf16.mxu0 %v9164_v25 }
0x2d4e   : > { %16243 = vmatpush3.bf16.msra.mxu0 %v9164_v25 }
0x2d51   : > { %16245 = vmatmul.mubr.msk.bf16.vlgmr.msra.gmra.mrb[128].mxu0 %vm687_vm3, %v19722_v61 }
0x2d52   : > { %16248 = vmatprep.mubr.msk.bf16.mxu0 %vm687_vm3, %v19729_v41 }
0x2d59   : > { %16249 = vmatmul.mubr.msk.bf16.gmra.mrb[132].mxu0 %vm687_vm3, %v19736_v34 }
0x2d5a   : > { %16252 = vmatprep.mubr.msk.bf16.mxu0 %vm687_vm3, %v19743_v44 }
0x2d61   : > { %16253 = vmatmul.mubr.msk.bf16.gmra.mrb[136].mxu0 %vm687_vm3, %v19750_v9  ;;  %v9260_v9 = vunpack.c.l.bf16 %v19946_v62 }
0x2d62   : > { %16300 = vmatprep.mubr.msk.bf16.mxu0 %vm687_vm3, %v20006_v48 }
0x2e0c   : > { %v9009_v15 = vpop.f32.mrb[124].mxu0 }
0x2e0d   : > { %9016 = vst.msk [vmem:[#allocation2 + $0x1a0] sm:$0xff] %vm544_vm2, %v9009_v15  ;;  %v16214_v26 = vpop.f32.mrb[125].mxu0 }
0x2e0e   : > { %v9012_v61 = vpop.f32.mrb[126].mxu0  ;;  %v9269_v26 = vunpack.c.h.bf16 %v19966_v36 }
0x2e0f   : > { %9017 = vst.msk [vmem:[#allocation2 + $0x1a8] sm:$0xff] %vm544_vm2, %v9012_v61  ;;  %v16215_v41 = vpop.f32.mrb[127].mxu0 }
0x2e24   : > { %v16246_v31 = vpop.f32.mrb[128].mxu0 }
0x2e25   : > { %v9208_v34 = vadd.f32 %v19761_v40, %v16246_v31  ;;  %v9199_v58 = vpop.f32.mrb[129].mxu0  ;;  %v9266_v31 = vunpack.c.l.bf16 %v19959_v4 }
0x2e26   : > { %v9200_v44 = vadd.f32 %v19761_v40, %v9199_v58  ;;  %v16247_v16 = vpop.f32.mrb[130].mxu0  ;;  %v9267_v58 = vunpack.c.h.bf16 %v19959_v4  ;;  %v20063_v4 = vld [vmem:[%s17451_s19 + $0x548] sm:$0xff]  }
0x2e27   : > { %v9248_v55 = vmax.f32 %v9208_v34, 0.0  ;;  %v9211_v57 = vadd.f32 %v19761_v40, %v16247_v16  ;;  %v9202_v12 = vpop.f32.mrb[131].mxu0 }
0x2e28   : > { %v9246_v22 = vmax.f32 %v9200_v44, 0.0  ;;  %v9203_v18 = vadd.f32 %v19761_v40, %v9202_v12 }
0x2e29   : > { %v9249_v54 = vmax.f32 %v9211_v57, 0.0  ;;  %v9272_v59 = vadd.f32 %v9260_v9, %v9248_v55 }
0x2e2a   : > { %v9247_v32 = vmax.f32 %v9203_v18, 0.0  ;;  %v9270_v23 = vadd.f32 %v9258_v51, %v9246_v22  ;;  %v20067_v22 = vld [vmem:[%s17451_s19 + $0x550] sm:$0xff]   ;;  %v20079_v51 = vld [vmem:[%s17451_s19 + $0x560] sm:$0xff]   ;;  %v20086_v18 = vld [vmem:[%s17451_s19 + $0x568] sm:$0xff]  }
0x2e2b   : > { %v9273_v33 = vadd.f32 %v9261_v27, %v9249_v54 }
0x2e2c   : > { %v9271_v52 = vadd.f32 %v9259_v21, %v9247_v32  ;;  %v16250_v0 = vpop.f32.mrb[132].mxu0 }
0x2e2d   : > { %v9283_v63 = vpack.c.bf16 %v9273_v33, %v9272_v59  ;;  %v9224_v19 = vadd.f32 %v19761_v40, %v16250_v0  ;;  %v9215_v50 = vpop.f32.mrb[133].mxu0 }
0x2e2e   : > { %v9282_v62 = vpack.c.bf16 %v9271_v52, %v9270_v23  ;;  %v9216_v14 = vadd.f32 %v19761_v40, %v9215_v50  ;;  %v16251_v43 = vpop.f32.mrb[134].mxu0 }
0x2e2f   : > { %v9252_v2 = vmax.f32 %v9224_v19, 0.0  ;;  %v9227_v1 = vadd.f32 %v19761_v40, %v16251_v43  ;;  %v9218_v38 = vpop.f32.mrb[135].mxu0 }
0x2e30   : > { %v9250_v20 = vmax.f32 %v9216_v14, 0.0  ;;  %v9219_v13 = vadd.f32 %v19761_v40, %v9218_v38  ;;  %16257 = vmatpush3.bf16.msra.mxu1 %v9282_v62 }
0x2e31   : > { %v9253_v53 = vmax.f32 %v9227_v1, 0.0  ;;  %16258 = vmatprep.subr.bf16.mxu1 %v17345_v37  ;;  %v9276_v56 = vadd.f32 %v9264_v46, %v9252_v2 }
0x2e32   : > { %v9251_v45 = vmax.f32 %v9219_v13, 0.0  ;;  %v9274_v47 = vadd.f32 %v9262_v11, %v9250_v20 }
0x2e33   : > { %v9277_v8 = vadd.f32 %v9265_v28, %v9253_v53  ;;  %v20104_v53 = vld [vmem:[%s20949_s0 + $0x10] sm:$0xff]  }
0x2e34   : > { %v9275_v39 = vadd.f32 %v9263_v60, %v9251_v45  ;;  %v16254_v10 = vpop.f32.mrb[136].mxu0  ;;  %16259 = vmatpush3.bf16.msra.mxu1 %v9283_v63  ;;  %v20097_v60 = vld [vmem:[%s20949_s0 + $0x8] sm:$0xff]   ;;  %v20111_v45 = vld [vmem:[%s20949_s0 + $0x18] sm:$0xff]  }
0x2e35   : > { %v9285_v24 = vpack.c.bf16 %v9277_v8, %v9276_v56  ;;  %v9240_v3 = vadd.f32 %v19761_v40, %v16254_v10  ;;  %v9231_v49 = vpop.f32.mrb[137].mxu0  ;;  %16260 = vmatprep.subr.bf16.mxu1 %v17345_v37  ;;  %v20118_v56 = vld [vmem:[%s20949_s0 + $0x20] sm:$0xff]   ;;  %v20125_v8 = vld [vmem:[%s20949_s0 + $0x28] sm:$0xff]  }
0x2e36   : > { %v9284_v7 = vpack.c.bf16 %v9275_v39, %v9274_v47  ;;  %v9232_v30 = vadd.f32 %v19761_v40, %v9231_v49  ;;  %v16255_v25 = vpop.f32.mrb[138].mxu0  ;;  %v20134_v39 = vld [vmem:[%s20954_s5] ss:$0 sm:$0xff] }
0x2e37   : > { %v9256_v42 = vmax.f32 %v9240_v3, 0.0  ;;  %v9243_v15 = vadd.f32 %v19761_v40, %v16255_v25  ;;  %v9234_v61 = vpop.f32.mrb[139].mxu0 }
0x2e38   : > { %v9254_v41 = vmax.f32 %v9232_v30, 0.0  ;;  %v9235_v34 = vadd.f32 %v19761_v40, %v9234_v61  ;;  %16261 = vmatpush3.bf16.msra.mxu1 %v9284_v7  ;;  %v20054_v40 = vld [vmem:[%s17451_s19 + $0x540] sm:$0xff]   ;;  %v9573_v30 = vunpack.c.l.bf16 %v20063_v4 }
0x2e39   : > { %v9257_v44 = vmax.f32 %v9243_v15, 0.0  ;;  %16262 = vmatprep.subr.bf16.mxu1 %v17345_v37  ;;  %v9280_v55 = vadd.f32 %v9268_v17, %v9256_v42  ;;  %v9574_v42 = vunpack.c.h.bf16 %v20063_v4 }
0x2e3a   : > { %v9255_v16 = vmax.f32 %v9235_v34, 0.0  ;;  %v9278_v57 = vadd.f32 %v9266_v31, %v9254_v41  ;;  %v9572_v41 = vunpack.c.h.bf16 %v20054_v40 }
0x2e3b   : > { %v9281_v9 = vadd.f32 %v9269_v26, %v9257_v44  ;;  %v9571_v26 = vunpack.c.l.bf16 %v20054_v40 }
0x2e3c   : > { %v9279_v36 = vadd.f32 %v9267_v58, %v9255_v16  ;;  %16263 = vmatpush3.bf16.msra.mxu1 %v9285_v24 }
0x2e3d   : > { %v9287_v27 = vpack.c.bf16 %v9281_v9, %v9280_v55  ;;  %16264 = vmatprep.subr.bf16.mxu1 %v17345_v37 }
0x2e3e   : > { %v9286_v12 = vpack.c.bf16 %v9279_v36, %v9278_v57 }
0x2e40   : > { %16265 = vmatpush3.bf16.msra.mxu1 %v9286_v12 }
0x2e41   : > { %16266 = vmatprep.subr.bf16.mxu1 %v17345_v37 }
0x2e44   : > { %16267 = vmatpush3.bf16.msra.mxu1 %v9287_v27 }
0x2e45   : > { %16272 = vmatprep.subr.bf16.mxu1 %v19885_v29 }
0x2e47   : > { %16269 = vmatmul.mubr.msk.bf16.vlgmr.msra.gmra.mrb[128].mxu1 %vm687_vm3, %v19799_v35  ;;  %v20076_v35 = vld [vmem:[%s17451_s19 + $0x558] sm:$0xff]  }
0x2e48   : > { %16273 = vmatpush3.bf16.msra.mxu1 %v19885_v29  ;;  %16276 = vmatprep.mubr.msk.bf16.mxu1 %vm544_vm2, %v20054_v40 }
0x2e49   : > { %16274 = vmatprep.subr.bf16.mxu1 %v17444_v6 }
0x2e4c   : > { %16275 = vmatpush3.bf16.msra.mxu1 %v17444_v6 }
0x2e4d   : > { %16312 = vmatprep.subr.bf16.mxu1 %v17345_v37 }
0x2e4f   : > { %16277 = vmatmul.mubr.msk.bf16.vlgmr.msra.gmra.mrb[132].mxu1 %vm544_vm2, %v20063_v4 }
0x2e50   : > { %16280 = vmatprep.mubr.msk.bf16.mxu1 %vm544_vm2, %v20067_v22 }
0x2e57   : > { %16281 = vmatmul.mubr.msk.bf16.gmra.mrb[136].mxu1 %vm544_vm2, %v20076_v35 }
0x2e58   : > { %16284 = vmatprep.mubr.msk.bf16.mxu1 %vm544_vm2, %v20079_v51 }
0x2e5f   : > { %16285 = vmatmul.mubr.msk.bf16.gmra.mrb[140].mxu1 %vm544_vm2, %v20086_v18 }
0x2e60   : > { %16324 = vmatprep.mubr.msk.bf16.mxu1 %vm17346_vm4, %v17345_v37 }
0x2f1a   : > { %v9322_v21 = vpop.f32.mrb[128].mxu1 }
0x2f1b   : > { %9329 = vst.msk [vmem:[#allocation2 + $0x1b0] sm:$0xff] %vm544_vm2, %v9322_v21  ;;  %v16270_v54 = vpop.f32.mrb[129].mxu1 }
0x2f1c   : > { %v9325_v32 = vpop.f32.mrb[130].mxu1 }
0x2f1d   : > { %9330 = vst.msk [vmem:[#allocation2 + $0x1b8] sm:$0xff] %vm544_vm2, %v9325_v32  ;;  %v16271_v59 = vpop.f32.mrb[131].mxu1  ;;  %v9577_v32 = vunpack.c.l.bf16 %v20076_v35 }
0x2f1e   : > { %v9578_v59 = vunpack.c.h.bf16 %v20076_v35 }
0x2f22   : > { %v16278_v33 = vpop.f32.mrb[132].mxu1 }
0x2f23   : > { %v9425_v23 = vpop.f32.mrb[133].mxu1 }
0x2f24   : > { %v16279_v52 = vpop.f32.mrb[134].mxu1 }
0x2f25   : > { %v9473_v0 = vpack.c.bf16 %v16279_v52, %v16278_v33  ;;  %v9428_v63 = vpop.f32.mrb[135].mxu1  ;;  %v9575_v52 = vunpack.c.l.bf16 %v20067_v22 }
0x2f26   : > { %v9472_v19 = vpack.c.bf16 %v9428_v63, %v9425_v23  ;;  %v9576_v63 = vunpack.c.h.bf16 %v20067_v22 }
0x2f28   : > { %16288 = vmatprep.subr.bf16.mxu0 %v9472_v19 }
0x2f29   : > { %16289 = vmatpush3.bf16.msra.mxu0 %v9472_v19 }
0x2f2a   : > { %v16282_v50 = vpop.f32.mrb[136].mxu1  ;;  %16290 = vmatprep.subr.bf16.mxu0 %v9473_v0 }
0x2f2b   : > { %v9441_v62 = vpop.f32.mrb[137].mxu1 }
0x2f2c   : > { %v16283_v14 = vpop.f32.mrb[138].mxu1 }
0x2f2d   : > { %v9475_v43 = vpack.c.bf16 %v16283_v14, %v16282_v50  ;;  %v9444_v2 = vpop.f32.mrb[139].mxu1  ;;  %16291 = vmatpush3.bf16.msra.mxu0 %v9473_v0 }
0x2f2e   : > { %v9474_v46 = vpack.c.bf16 %v9444_v2, %v9441_v62 }
0x2f30   : > { %16292 = vmatprep.subr.bf16.mxu0 %v9474_v46 }
0x2f31   : > { %16293 = vmatpush3.bf16.msra.mxu0 %v9474_v46 }
0x2f32   : > { %v16286_v1 = vpop.f32.mrb[140].mxu1  ;;  %16294 = vmatprep.subr.bf16.mxu0 %v9475_v43 }
0x2f33   : > { %v9457_v28 = vpop.f32.mrb[141].mxu1 }
0x2f34   : > { %v16287_v38 = vpop.f32.mrb[142].mxu1 }
0x2f35   : > { %v9477_v20 = vpack.c.bf16 %v16287_v38, %v16286_v1  ;;  %v9460_v11 = vpop.f32.mrb[143].mxu1  ;;  %16295 = vmatpush3.bf16.msra.mxu0 %v9475_v43 }
0x2f36   : > { %v9476_v13 = vpack.c.bf16 %v9460_v11, %v9457_v28 }
0x2f38   : > { %16296 = vmatprep.subr.bf16.mxu0 %v9476_v13 }
0x2f39   : > { %16297 = vmatpush3.bf16.msra.mxu0 %v9476_v13  ;;  %v9581_v13 = vunpack.c.l.bf16 %v20086_v18 }
0x2f3a   : > { %16298 = vmatprep.subr.bf16.mxu0 %v9477_v20 }
0x2f3d   : > { %16299 = vmatpush3.bf16.msra.mxu0 %v9477_v20 }
0x2f40   : > { %16301 = vmatmul.mubr.msk.bf16.vlgmr.msra.gmra.mrb[140].mxu0 %vm687_vm3, %v20097_v60 }
0x2f41   : > { %16304 = vmatprep.mubr.msk.bf16.mxu0 %vm687_vm3, %v20104_v53 }
0x2f48   : > { %16305 = vmatmul.mubr.msk.bf16.gmra.mrb[144].mxu0 %vm687_vm3, %v20111_v45 }
0x2f49   : > { %16308 = vmatprep.mubr.msk.bf16.mxu0 %vm687_vm3, %v20118_v56 }
0x2f50   : > { %16309 = vmatmul.mubr.msk.bf16.gmra.mrb[148].mxu0 %vm687_vm3, %v20125_v8 }
0x2f51   : > { %16356 = vmatprep.mubr.msk.bf16.mxu0 %vm687_vm3, %v20006_v48 }
0x3013   : > { %v16302_v47 = vpop.f32.mrb[140].mxu0 }
0x3014   : > { %v9521_v10 = vadd.f32 %v20134_v39, %v16302_v47  ;;  %v9512_v24 = vpop.f32.mrb[141].mxu0 }
0x3015   : > { %v9513_v3 = vadd.f32 %v20134_v39, %v9512_v24  ;;  %v16303_v49 = vpop.f32.mrb[142].mxu0 }
0x3016   : > { %v9561_v7 = vmax.f32 %v9521_v10, 0.0  ;;  %v9524_v25 = vadd.f32 %v20134_v39, %v16303_v49  ;;  %v9515_v17 = vpop.f32.mrb[143].mxu0  ;;  %v9582_v10 = vunpack.c.h.bf16 %v20086_v18  ;;  %v9579_v49 = vunpack.c.l.bf16 %v20079_v51 }
0x3017   : > { %v9559_v15 = vmax.f32 %v9513_v3, 0.0  ;;  %v9516_v61 = vadd.f32 %v20134_v39, %v9515_v17 }
0x3018   : > { %v9562_v31 = vmax.f32 %v9524_v25, 0.0  ;;  %v9585_v58 = vadd.f32 %v9573_v30, %v9561_v7  ;;  %v9580_v30 = vunpack.c.h.bf16 %v20079_v51  ;;  %v20166_v51 = vld [vmem:[%s17451_s19 + $0x570] sm:$0xff]  }
0x3019   : > { %v9560_v34 = vmax.f32 %v9516_v61, 0.0  ;;  %v9583_v16 = vadd.f32 %v9571_v26, %v9559_v15 }
0x301a   : > { %v9586_v44 = vadd.f32 %v9574_v42, %v9562_v31  ;;  %v20172_v31 = vld [vmem:[%s20950_s1] sm:$0xff]  }
0x301b   : > { %v9584_v55 = vadd.f32 %v9572_v41, %v9560_v34  ;;  %v16306_v9 = vpop.f32.mrb[144].mxu0  ;;  %v20180_v34 = vld [vmem:[%s17451_s19 + $0x578] sm:$0xff]  }
0x301c   : > { %v9596_v57 = vpack.c.bf16 %v9586_v44, %v9585_v58  ;;  %v9537_v36 = vadd.f32 %v20134_v39, %v16306_v9  ;;  %v9528_v27 = vpop.f32.mrb[145].mxu0  ;;  %v20184_v58 = vld [vmem:[%s17451_s19 + $0x580] sm:$0xff]   ;;  %v20193_v44 = vld [vmem:[%s17451_s19 + $0x588] sm:$0xff]  }
0x301d   : > { %v9595_v12 = vpack.c.bf16 %v9584_v55, %v9583_v16  ;;  %v9529_v4 = vadd.f32 %v20134_v39, %v9528_v27  ;;  %v16307_v21 = vpop.f32.mrb[146].mxu0  ;;  %v20196_v16 = vld [vmem:[%s17451_s19 + $0x590] sm:$0xff]   ;;  %v20203_v55 = vld [vmem:[%s17451_s19 + $0x598] sm:$0xff]  }
0x301e   : > { %v9565_v54 = vmax.f32 %v9537_v36, 0.0  ;;  %v9540_v40 = vadd.f32 %v20134_v39, %v16307_v21  ;;  %v9531_v33 = vpop.f32.mrb[147].mxu0 }
0x301f   : > { %v9563_v23 = vmax.f32 %v9529_v4, 0.0  ;;  %v9532_v0 = vadd.f32 %v20134_v39, %v9531_v33  ;;  %16313 = vmatpush3.bf16.msra.mxu1 %v9595_v12 }
0x3020   : > { %v9566_v19 = vmax.f32 %v9540_v40, 0.0  ;;  %16314 = vmatprep.subr.bf16.mxu1 %v17345_v37  ;;  %v9589_v62 = vadd.f32 %v9577_v32, %v9565_v54 }
0x3021   : > { %v9564_v50 = vmax.f32 %v9532_v0, 0.0  ;;  %v9587_v43 = vadd.f32 %v9575_v52, %v9563_v23 }
0x3022   : > { %v9590_v14 = vadd.f32 %v9578_v59, %v9566_v19 }
0x3023   : > { %v9588_v2 = vadd.f32 %v9576_v63, %v9564_v50  ;;  %v16310_v46 = vpop.f32.mrb[148].mxu0  ;;  %16315 = vmatpush3.bf16.msra.mxu1 %v9596_v57 }
0x3024   : > { %v9598_v35 = vpack.c.bf16 %v9590_v14, %v9589_v62  ;;  %v9553_v1 = vadd.f32 %v20134_v39, %v16310_v46  ;;  %v9544_v28 = vpop.f32.mrb[149].mxu0  ;;  %16316 = vmatprep.subr.bf16.mxu1 %v17345_v37  ;;  %v20225_v46 = vld [vmem:[%s17451_s19 + $0x5a0] sm:$0xff]  }
0x3025   : > { %v9597_v38 = vpack.c.bf16 %v9588_v2, %v9587_v43  ;;  %v9545_v22 = vadd.f32 %v20134_v39, %v9544_v28  ;;  %v16311_v20 = vpop.f32.mrb[150].mxu0  ;;  %v20245_v28 = vld [vmem:[%s17451_s19 + $0x5c0] sm:$0xff]  }
0x3026   : > { %v9569_v11 = vmax.f32 %v9553_v1, 0.0  ;;  %v9556_v47 = vadd.f32 %v20134_v39, %v16311_v20  ;;  %v9547_v24 = vpop.f32.mrb[151].mxu0  ;;  %v20242_v1 = vld [vmem:[%s17451_s19 + $0x5b8] sm:$0xff]  }
0x3027   : > { %v9567_v3 = vmax.f32 %v9545_v22, 0.0  ;;  %v9548_v7 = vadd.f32 %v20134_v39, %v9547_v24  ;;  %16317 = vmatpush3.bf16.msra.mxu1 %v9597_v38  ;;  %v20252_v38 = vld [vmem:[%s17451_s19 + $0x5c8] sm:$0xff]   ;;  %v9886_v24 = vunpack.c.l.bf16 %v20180_v34 }
0x3028   : > { %v9570_v25 = vmax.f32 %v9556_v47, 0.0  ;;  %16318 = vmatprep.subr.bf16.mxu1 %v17345_v37  ;;  %v9593_v17 = vadd.f32 %v9581_v13, %v9569_v11 }
0x3029   : > { %v9568_v42 = vmax.f32 %v9548_v7, 0.0  ;;  %v9591_v26 = vadd.f32 %v9579_v49, %v9567_v3  ;;  %v9887_v49 = vunpack.c.h.bf16 %v20180_v34 }
0x302a   : > { %v9594_v15 = vadd.f32 %v9582_v10, %v9570_v25  ;;  %v9884_v25 = vunpack.c.l.bf16 %v20166_v51 }
0x302b   : > { %v9592_v61 = vadd.f32 %v9580_v30, %v9568_v42  ;;  %16319 = vmatpush3.bf16.msra.mxu1 %v9598_v35  ;;  %v20235_v35 = vld [vmem:[%s17451_s19 + $0x5b0] sm:$0xff]  }
0x302c   : > { %v9600_v18 = vpack.c.bf16 %v9594_v15, %v9593_v17  ;;  %16320 = vmatprep.subr.bf16.mxu1 %v17345_v37  ;;  %v9885_v17 = vunpack.c.h.bf16 %v20166_v51 }
0x302d   : > { %v9599_v41 = vpack.c.bf16 %v9592_v61, %v9591_v26 }
0x302f   : > { %16321 = vmatpush3.bf16.msra.mxu1 %v9599_v41 }
0x3030   : > { %16322 = vmatprep.subr.bf16.mxu1 %v17345_v37 }
0x3033   : > { %16323 = vmatpush3.bf16.msra.mxu1 %v9600_v18 }
0x3034   : > { %16328 = vmatprep.subr.bf16.mxu1 %v19885_v29 }
0x3036   : > { %16325 = vmatmul.mubr.msk.bf16.vlgmr.msra.gmra.mrb[144].mxu1 %vm687_vm3, %v20172_v31 }
0x3037   : > { %16329 = vmatpush3.bf16.msra.mxu1 %v19885_v29  ;;  %16332 = vmatprep.mubr.msk.bf16.mxu1 %vm544_vm2, %v20166_v51 }
0x3038   : > { %16330 = vmatprep.subr.bf16.mxu1 %v17444_v6 }
0x303b   : > { %16331 = vmatpush3.bf16.msra.mxu1 %v17444_v6 }
0x303c   : > { %16368 = vmatprep.subr.bf16.mxu1 %v17345_v37 }
0x303e   : > { %16333 = vmatmul.mubr.msk.bf16.vlgmr.msra.gmra.mrb[148].mxu1 %vm544_vm2, %v20180_v34 }
0x303f   : > { %16336 = vmatprep.mubr.msk.bf16.mxu1 %vm544_vm2, %v20184_v58 }
0x3046   : > { %16337 = vmatmul.mubr.msk.bf16.gmra.mrb[152].mxu1 %vm544_vm2, %v20193_v44 }
0x3047   : > { %16340 = vmatprep.mubr.msk.bf16.mxu1 %vm544_vm2, %v20196_v16 }
0x304e   : > { %16341 = vmatmul.mubr.msk.bf16.gmra.mrb[156].mxu1 %vm544_vm2, %v20203_v55 }
0x304f   : > { %16380 = vmatprep.mubr.msk.bf16.mxu1 %vm17346_vm4, %v17345_v37 }
0x3109   : > { %v9635_v9 = vpop.f32.mrb[144].mxu1 }
0x310a   : > { %9642 = vst.msk [vmem:[#allocation2 + $0x1c0] sm:$0xff] %vm544_vm2, %v9635_v9  ;;  %v16326_v57 = vpop.f32.mrb[145].mxu1 }
0x310b   : > { %v9638_v36 = vpop.f32.mrb[146].mxu1 }
0x310c   : > { %9643 = vst.msk [vmem:[#allocation2 + $0x1c8] sm:$0xff] %vm544_vm2, %v9638_v36  ;;  %v16327_v27 = vpop.f32.mrb[147].mxu1 }
0x3111   : > { %v16334_v12 = vpop.f32.mrb[148].mxu1 }
0x3112   : > { %v9738_v4 = vpop.f32.mrb[149].mxu1 }
0x3113   : > { %v16335_v21 = vpop.f32.mrb[150].mxu1 }
0x3114   : > { %v9786_v54 = vpack.c.bf16 %v16335_v21, %v16334_v12  ;;  %v9741_v32 = vpop.f32.mrb[151].mxu1 }
0x3115   : > { %v9785_v40 = vpack.c.bf16 %v9741_v32, %v9738_v4  ;;  %v9890_v32 = vunpack.c.l.bf16 %v20193_v44 }
0x3117   : > { %16344 = vmatprep.subr.bf16.mxu0 %v9785_v40 }
0x3118   : > { %16345 = vmatpush3.bf16.msra.mxu0 %v9785_v40  ;;  %v9891_v40 = vunpack.c.h.bf16 %v20193_v44 }
0x3119   : > { %v16338_v59 = vpop.f32.mrb[152].mxu1  ;;  %16346 = vmatprep.subr.bf16.mxu0 %v9786_v54 }
0x311a   : > { %v9754_v33 = vpop.f32.mrb[153].mxu1 }
0x311b   : > { %v16339_v23 = vpop.f32.mrb[154].mxu1 }
0x311c   : > { %v9788_v52 = vpack.c.bf16 %v16339_v23, %v16338_v59  ;;  %v9757_v0 = vpop.f32.mrb[155].mxu1  ;;  %16347 = vmatpush3.bf16.msra.mxu0 %v9786_v54  ;;  %v9888_v23 = vunpack.c.l.bf16 %v20184_v58 }
0x311d   : > { %v9787_v63 = vpack.c.bf16 %v9757_v0, %v9754_v33  ;;  %v9889_v0 = vunpack.c.h.bf16 %v20184_v58 }
0x311f   : > { %16348 = vmatprep.subr.bf16.mxu0 %v9787_v63 }
0x3120   : > { %16349 = vmatpush3.bf16.msra.mxu0 %v9787_v63 }
0x3121   : > { %v16342_v19 = vpop.f32.mrb[156].mxu1  ;;  %16350 = vmatprep.subr.bf16.mxu0 %v9788_v52 }
0x3122   : > { %v9770_v50 = vpop.f32.mrb[157].mxu1 }
0x3123   : > { %v16343_v62 = vpop.f32.mrb[158].mxu1 }
0x3124   : > { %v9790_v14 = vpack.c.bf16 %v16343_v62, %v16342_v19  ;;  %v9773_v43 = vpop.f32.mrb[159].mxu1  ;;  %16351 = vmatpush3.bf16.msra.mxu0 %v9788_v52 }
0x3125   : > { %v9789_v2 = vpack.c.bf16 %v9773_v43, %v9770_v50 }
0x3127   : > { %16352 = vmatprep.subr.bf16.mxu0 %v9789_v2 }
0x3128   : > { %16353 = vmatpush3.bf16.msra.mxu0 %v9789_v2 }
0x3129   : > { %16354 = vmatprep.subr.bf16.mxu0 %v9790_v14 }
0x312c   : > { %16355 = vmatpush3.bf16.msra.mxu0 %v9790_v14 }
0x312d   : > { %16384 = vmatprep.subr.bf16.mxu0 %v19885_v29 }
0x312f   : > { %16357 = vmatmul.mubr.msk.bf16.vlgmr.msra.gmra.mrb[152].mxu0 %vm687_vm3, %v20097_v60 }
0x3130   : > { %16385 = vmatpush3.bf16.msra.mxu0 %v19885_v29  ;;  %16360 = vmatprep.mubr.msk.bf16.mxu0 %vm687_vm3, %v20104_v53  ;;  %v20232_v29 = vld [vmem:[%s17451_s19 + $0x5a8] sm:$0xff]  }
0x3131   : > { %16386 = vmatprep.subr.bf16.mxu0 %v17444_v6 }
0x3134   : > { %16387 = vmatpush3.bf16.msra.mxu0 %v17444_v6 }
0x3135   : > { %16424 = vmatprep.subr.bf16.mxu0 %v17345_v37 }
0x3137   : > { %16361 = vmatmul.mubr.msk.bf16.gmra.mrb[156].mxu0 %vm687_vm3, %v20111_v45 }
0x3138   : > { %16364 = vmatprep.mubr.msk.bf16.mxu0 %vm687_vm3, %v20118_v56 }
0x313f   : > { %16365 = vmatmul.mubr.msk.bf16.gmra.mrb[160].mxu0 %vm687_vm3, %v20125_v8 }
0x3140   : > { %16388 = vmatprep.mubr.msk.bf16.mxu0 %vm544_vm2, %v20225_v46 }
0x3147   : > { %16389 = vmatmul.mubr.msk.bf16.vlgmr.msra.gmra.mrb[164].mxu0 %vm544_vm2, %v20232_v29 }
0x3148   : > { %16392 = vmatprep.mubr.msk.bf16.mxu0 %vm544_vm2, %v20235_v35 }
0x314f   : > { %16393 = vmatmul.mubr.msk.bf16.gmra.mrb[168].mxu0 %vm544_vm2, %v20242_v1 }
0x3150   : > { %16396 = vmatprep.mubr.msk.bf16.mxu0 %vm544_vm2, %v20245_v28 }
0x3157   : > { %16397 = vmatmul.mubr.msk.bf16.gmra.mrb[172].mxu0 %vm544_vm2, %v20252_v38 }
0x3158   : > { %16436 = vmatprep.mubr.msk.bf16.mxu0 %vm17346_vm4, %v17345_v37 }
0x3202   : > { %v16358_v22 = vpop.f32.mrb[152].mxu0 }
0x3203   : > { %v9834_v20 = vadd.f32 %v20134_v39, %v16358_v22  ;;  %v9825_v11 = vpop.f32.mrb[153].mxu0 }
0x3204   : > { %v9826_v13 = vadd.f32 %v20134_v39, %v9825_v11  ;;  %v16359_v47 = vpop.f32.mrb[154].mxu0 }
0x3205   : > { %v9874_v10 = vmax.f32 %v9834_v20, 0.0  ;;  %v9837_v3 = vadd.f32 %v20134_v39, %v16359_v47  ;;  %v9828_v7 = vpop.f32.mrb[155].mxu0 }
0x3206   : > { %v9872_v30 = vmax.f32 %v9826_v13, 0.0  ;;  %v9829_v42 = vadd.f32 %v20134_v39, %v9828_v7 }
0x3207   : > { %v9875_v15 = vmax.f32 %v9837_v3, 0.0  ;;  %v9898_v61 = vadd.f32 %v9886_v24, %v9874_v10  ;;  %v9894_v10 = vunpack.c.l.bf16 %v20203_v55  ;;  %v9895_v3 = vunpack.c.h.bf16 %v20203_v55 }
0x3208   : > { %v9873_v26 = vmax.f32 %v9829_v42, 0.0  ;;  %v9896_v41 = vadd.f32 %v9884_v25, %v9872_v30  ;;  %v9892_v30 = vunpack.c.l.bf16 %v20196_v16  ;;  %v9893_v42 = vunpack.c.h.bf16 %v20196_v16 }
0x3209   : > { %v9899_v18 = vadd.f32 %v9887_v49, %v9875_v15 }
0x320a   : > { %v9897_v9 = vadd.f32 %v9885_v17, %v9873_v26  ;;  %v16362_v57 = vpop.f32.mrb[156].mxu0 }
0x320b   : > { %v9909_v36 = vpack.c.bf16 %v9899_v18, %v9898_v61  ;;  %v9850_v27 = vadd.f32 %v20134_v39, %v16362_v57  ;;  %v9841_v12 = vpop.f32.mrb[157].mxu0 }
0x320c   : > { %v9908_v34 = vpack.c.bf16 %v9897_v9, %v9896_v41  ;;  %v9842_v4 = vadd.f32 %v20134_v39, %v9841_v12  ;;  %v16363_v21 = vpop.f32.mrb[158].mxu0 }
0x320d   : > { %v9878_v54 = vmax.f32 %v9850_v27, 0.0  ;;  %v9853_v51 = vadd.f32 %v20134_v39, %v16363_v21  ;;  %v9844_v59 = vpop.f32.mrb[159].mxu0 }
0x320e   : > { %v9876_v33 = vmax.f32 %v9842_v4, 0.0  ;;  %v9845_v52 = vadd.f32 %v20134_v39, %v9844_v59  ;;  %16369 = vmatpush3.bf16.msra.mxu1 %v9908_v34 }
0x320f   : > { %v9879_v63 = vmax.f32 %v9853_v51, 0.0  ;;  %16370 = vmatprep.subr.bf16.mxu1 %v17345_v37  ;;  %v9902_v50 = vadd.f32 %v9890_v32, %v9878_v54 }
0x3210   : > { %v9877_v19 = vmax.f32 %v9845_v52, 0.0  ;;  %v9900_v14 = vadd.f32 %v9888_v23, %v9876_v33 }
0x3211   : > { %v9903_v62 = vadd.f32 %v9891_v40, %v9879_v63 }
0x3212   : > { %v9901_v43 = vadd.f32 %v9889_v0, %v9877_v19  ;;  %v16366_v2 = vpop.f32.mrb[160].mxu0  ;;  %16371 = vmatpush3.bf16.msra.mxu1 %v9909_v36 }
0x3213   : > { %v9911_v44 = vpack.c.bf16 %v9903_v62, %v9902_v50  ;;  %v9866_v22 = vadd.f32 %v20134_v39, %v16366_v2  ;;  %v9857_v20 = vpop.f32.mrb[161].mxu0  ;;  %16372 = vmatprep.subr.bf16.mxu1 %v17345_v37 }
0x3214   : > { %v9910_v11 = vpack.c.bf16 %v9901_v43, %v9900_v14  ;;  %v9858_v58 = vadd.f32 %v20134_v39, %v9857_v20  ;;  %v16367_v13 = vpop.f32.mrb[162].mxu0 }
0x3215   : > { %v9882_v47 = vmax.f32 %v9866_v22, 0.0  ;;  %v9869_v24 = vadd.f32 %v20134_v39, %v16367_v13  ;;  %v9860_v49 = vpop.f32.mrb[163].mxu0  ;;  %v10200_v13 = vunpack.c.h.bf16 %v20232_v29 }
0x3216   : > { %v9880_v7 = vmax.f32 %v9858_v58, 0.0  ;;  %v9861_v25 = vadd.f32 %v20134_v39, %v9860_v49  ;;  %16373 = vmatpush3.bf16.msra.mxu1 %v9910_v11  ;;  %v10199_v58 = vunpack.c.l.bf16 %v20232_v29  ;;  %v10198_v49 = vunpack.c.h.bf16 %v20225_v46 }
0x3217   : > { %v9883_v17 = vmax.f32 %v9869_v24, 0.0  ;;  %16374 = vmatprep.subr.bf16.mxu1 %v17345_v37  ;;  %v9906_v26 = vadd.f32 %v9894_v10, %v9882_v47  ;;  %v10197_v24 = vunpack.c.l.bf16 %v20225_v46 }
0x3218   : > { %v9881_v15 = vmax.f32 %v9861_v25, 0.0  ;;  %v9904_v18 = vadd.f32 %v9892_v30, %v9880_v7 }
0x3219   : > { %v9907_v61 = vadd.f32 %v9895_v3, %v9883_v17 }
0x321a   : > { %v9905_v41 = vadd.f32 %v9893_v42, %v9881_v15  ;;  %16375 = vmatpush3.bf16.msra.mxu1 %v9911_v44  ;;  %v16390_v9 = vpop.f32.mrb[164].mxu0 }
0x321b   : > { %v9913_v55 = vpack.c.bf16 %v9907_v61, %v9906_v26  ;;  %16376 = vmatprep.subr.bf16.mxu1 %v17345_v37  ;;  %v10051_v57 = vpop.f32.mrb[165].mxu0 }
0x321c   : > { %v9912_v36 = vpack.c.bf16 %v9905_v41, %v9904_v18  ;;  %v16391_v27 = vpop.f32.mrb[166].mxu0 }
0x321d   : > { %v10099_v12 = vpack.c.bf16 %v16391_v27, %v16390_v9  ;;  %v10054_v34 = vpop.f32.mrb[167].mxu0  ;;  %v10204_v27 = vunpack.c.h.bf16 %v20242_v1 }
0x321e   : > { %16377 = vmatpush3.bf16.msra.mxu1 %v9912_v36  ;;  %v10098_v16 = vpack.c.bf16 %v10054_v34, %v10051_v57  ;;  %v10203_v36 = vunpack.c.l.bf16 %v20242_v1 }
0x321f   : > { %16378 = vmatprep.subr.bf16.mxu1 %v17345_v37 }
0x3222   : > { %16379 = vmatpush3.bf16.msra.mxu1 %v9913_v55  ;;  %v16394_v4 = vpop.f32.mrb[168].mxu0 }
0x3223   : > { %16400 = vmatprep.subr.bf16.mxu1 %v10098_v16  ;;  %v10067_v21 = vpop.f32.mrb[169].mxu0 }
0x3224   : > { %v16395_v54 = vpop.f32.mrb[170].mxu0 }
0x3225   : > { %16381 = vmatmul.mubr.msk.bf16.vlgmr.msra.gmra.mrb[160].mxu1 %vm687_vm3, %v20172_v31  ;;  %v10101_v32 = vpack.c.bf16 %v16395_v54, %v16394_v4  ;;  %v10070_v51 = vpop.f32.mrb[171].mxu0 }
0x3226   : > { %16401 = vmatpush3.bf16.msra.mxu1 %v10098_v16  ;;  %v10100_v40 = vpack.c.bf16 %v10070_v51, %v10067_v21  ;;  %16412 = vmatprep.mubr.msk.bf16.mxu1 %vm687_vm3, %v20006_v48  ;;  %v10201_v16 = vunpack.c.l.bf16 %v20235_v35  ;;  %v10202_v21 = vunpack.c.h.bf16 %v20235_v35 }
0x3227   : > { %16402 = vmatprep.subr.bf16.mxu1 %v10099_v12 }
0x322a   : > { %16403 = vmatpush3.bf16.msra.mxu1 %v10099_v12  ;;  %v16398_v59 = vpop.f32.mrb[172].mxu0 }
0x322b   : > { %16404 = vmatprep.subr.bf16.mxu1 %v10100_v40  ;;  %v10083_v33 = vpop.f32.mrb[173].mxu0 }
0x322c   : > { %v16399_v23 = vpop.f32.mrb[174].mxu0 }
0x322d   : > { %v10103_v52 = vpack.c.bf16 %v16399_v23, %v16398_v59  ;;  %v10086_v0 = vpop.f32.mrb[175].mxu0 }
0x322e   : > { %16405 = vmatpush3.bf16.msra.mxu1 %v10100_v40  ;;  %v10102_v63 = vpack.c.bf16 %v10086_v0, %v10083_v33 }
0x322f   : > { %16406 = vmatprep.subr.bf16.mxu1 %v10101_v32 }
0x3232   : > { %16407 = vmatpush3.bf16.msra.mxu1 %v10101_v32 }
0x3233   : > { %16408 = vmatprep.subr.bf16.mxu1 %v10102_v63 }
0x3236   : > { %16409 = vmatpush3.bf16.msra.mxu1 %v10102_v63 }
0x3237   : > { %16410 = vmatprep.subr.bf16.mxu1 %v10103_v52 }
0x323a   : > { %16411 = vmatpush3.bf16.msra.mxu1 %v10103_v52 }
0x323d   : > { %16413 = vmatmul.mubr.msk.bf16.vlgmr.msra.gmra.mrb[164].mxu1 %vm687_vm3, %v20097_v60 }
0x323e   : > { %16416 = vmatprep.mubr.msk.bf16.mxu1 %vm687_vm3, %v20104_v53 }
0x3245   : > { %16417 = vmatmul.mubr.msk.bf16.gmra.mrb[168].mxu1 %vm687_vm3, %v20111_v45 }
0x3246   : > { %16420 = vmatprep.mubr.msk.bf16.mxu1 %vm687_vm3, %v20118_v56 }
0x324d   : > { %16421 = vmatmul.mubr.msk.bf16.gmra.mrb[172].mxu1 %vm687_vm3, %v20125_v8 }
0x324e   : > { %16468 = vmatprep.mubr.msk.bf16.mxu1 %vm687_vm3, %v20006_v48 }
0x32f8   : > { %v9948_v19 = vpop.f32.mrb[160].mxu1 }
0x32f9   : > { %9955 = vst.msk [vmem:[#allocation2 + $0x1d0] sm:$0xff] %vm544_vm2, %v9948_v19  ;;  %v16382_v50 = vpop.f32.mrb[161].mxu1 }
0x32fa   : > { %v9951_v62 = vpop.f32.mrb[162].mxu1 }
0x32fb   : > { %9956 = vst.msk [vmem:[#allocation2 + $0x1d8] sm:$0xff] %vm544_vm2, %v9951_v62  ;;  %v16383_v14 = vpop.f32.mrb[163].mxu1  ;;  %v10207_v62 = vunpack.c.l.bf16 %v20252_v38 }
0x3310   : > { %v16414_v43 = vpop.f32.mrb[164].mxu1 }
0x3311   : > { %v10147_v2 = vadd.f32 %v20134_v39, %v16414_v43  ;;  %v10138_v44 = vpop.f32.mrb[165].mxu1  ;;  %v10208_v43 = vunpack.c.h.bf16 %v20252_v38 }
0x3312   : > { %v10139_v22 = vadd.f32 %v20134_v39, %v10138_v44  ;;  %v16415_v20 = vpop.f32.mrb[166].mxu1 }
0x3313   : > { %v10187_v11 = vmax.f32 %v10147_v2, 0.0  ;;  %v10150_v48 = vadd.f32 %v20134_v39, %v16415_v20  ;;  %v10141_v47 = vpop.f32.mrb[167].mxu1 }
0x3314   : > { %v10185_v10 = vmax.f32 %v10139_v22, 0.0  ;;  %v10142_v3 = vadd.f32 %v20134_v39, %v10141_v47  ;;  %v10205_v22 = vunpack.c.l.bf16 %v20245_v28 }
0x3315   : > { %v10188_v7 = vmax.f32 %v10150_v48, 0.0  ;;  %v10211_v25 = vadd.f32 %v10199_v58, %v10187_v11  ;;  %v10206_v11 = vunpack.c.h.bf16 %v20245_v28  ;;  %v20335_v28 = vld [vmem:[%s17451_s19 + $0x5d0] sm:$0xff]  }
0x3316   : > { %v10186_v30 = vmax.f32 %v10142_v3, 0.0  ;;  %v10209_v17 = vadd.f32 %v10197_v24, %v10185_v10 }
0x3317   : > { %v10212_v42 = vadd.f32 %v10200_v13, %v10188_v7  ;;  %v20345_v7 = vld [vmem:[%s17451_s19 + $0x5d8] sm:$0xff]  }
0x3318   : > { %v10210_v15 = vadd.f32 %v10198_v49, %v10186_v30  ;;  %v16418_v26 = vpop.f32.mrb[168].mxu1  ;;  %v17334_v49 = vld [vmem:[%s20953_s4] sm:$0xff]  }
0x3319   : > { %v10222_v61 = vpack.c.bf16 %v10212_v42, %v10211_v25  ;;  %v10163_v18 = vadd.f32 %v20134_v39, %v16418_v26  ;;  %v10154_v41 = vpop.f32.mrb[169].mxu1  ;;  %v20349_v30 = vld [vmem:[%s17451_s19 + $0x5e0] sm:$0xff]   ;;  %v20358_v25 = vld [vmem:[%s17451_s19 + $0x5e8] sm:$0xff]   ;;  %v20361_v42 = vld [vmem:[%s17451_s19 + $0x5f0] sm:$0xff]  }
0x331a   : > { %v10221_v29 = vpack.c.bf16 %v10210_v15, %v10209_v17  ;;  %v10155_v9 = vadd.f32 %v20134_v39, %v10154_v41  ;;  %v16419_v55 = vpop.f32.mrb[170].mxu1  ;;  %v20368_v17 = vld [vmem:[%s17451_s19 + $0x5f8] sm:$0xff]   ;;  %s12912_s19 = sshll.u32 %s12906_s28, 6 }
0x331b   : > { %v10191_v57 = vmax.f32 %v10163_v18, 0.0  ;;  %v10166_v46 = vadd.f32 %v20134_v39, %v16419_v55  ;;  %v10157_v12 = vpop.f32.mrb[171].mxu1  ;;  %p457_p4 = scmp.lt.s32.totalorder %s12912_s19, 127 }
0x331c   : > { %v10189_v34 = vmax.f32 %v10155_v9, 0.0  ;;  %v10158_v4 = vadd.f32 %v20134_v39, %v10157_v12  ;;  %16425 = vmatpush3.bf16.msra.mxu0 %v10221_v29 }
0x331d   : > { %v10192_v54 = vmax.f32 %v10166_v46, 0.0  ;;  %16426 = vmatprep.subr.bf16.mxu0 %v17345_v37  ;;  %v10215_v51 = vadd.f32 %v10203_v36, %v10191_v57  ;;  %s20966_s19 = smov (!%p457_p4, %s12912_s19), 127 }
0x331e   : > { %v10190_v32 = vmax.f32 %v10158_v4, 0.0  ;;  %v10213_v59 = vadd.f32 %v10201_v16, %v10189_v34  ;;  %s12913_s25 = sshll.u32 %s20966_s19, 2  ;;  %s12915_s16 = sshll.u32 %s20966_s19, 3 }
0x331f   : > { %v10216_v40 = vadd.f32 %v10204_v27, %v10192_v54  ;;  %s20394_s30 = scalar_lea.vmem %s20952_s3, %s12913_s25  ;;  %s20752_s20 = scalar_lea.vmem %s20962_s13, %s12915_s16 }
0x3320   : > { %v10214_v33 = vadd.f32 %v10202_v21, %v10190_v32  ;;  %v16422_v23 = vpop.f32.mrb[172].mxu1  ;;  %16427 = vmatpush3.bf16.msra.mxu0 %v10222_v61 }
0x3321   : > { %v10224_v1 = vpack.c.bf16 %v10216_v40, %v10215_v51  ;;  %v10179_v52 = vadd.f32 %v20134_v39, %v16422_v23  ;;  %v10170_v0 = vpop.f32.mrb[173].mxu1  ;;  %16428 = vmatprep.subr.bf16.mxu0 %v17345_v37 }
0x3322   : > { %v10223_v63 = vpack.c.bf16 %v10214_v33, %v10213_v59  ;;  %v10171_v35 = vadd.f32 %v20134_v39, %v10170_v0  ;;  %v16423_v19 = vpop.f32.mrb[174].mxu1  ;;  %v10512_v33 = vunpack.c.l.bf16 %v20345_v7 }
0x3323   : > { %v10195_v50 = vmax.f32 %v10179_v52, 0.0  ;;  %v10182_v14 = vadd.f32 %v20134_v39, %v16423_v19  ;;  %v10173_v2 = vpop.f32.mrb[175].mxu1  ;;  %v10511_v19 = vunpack.c.h.bf16 %v20335_v28 }
0x3324   : > { %v10193_v44 = vmax.f32 %v10171_v35, 0.0  ;;  %v10174_v20 = vadd.f32 %v20134_v39, %v10173_v2  ;;  %16429 = vmatpush3.bf16.msra.mxu0 %v10223_v63  ;;  %v10510_v63 = vunpack.c.l.bf16 %v20335_v28 }
0x3325   : > { %v10196_v58 = vmax.f32 %v10182_v14, 0.0  ;;  %16430 = vmatprep.subr.bf16.mxu0 %v17345_v37  ;;  %v10219_v13 = vadd.f32 %v10207_v62, %v10195_v50 }
0x3326   : > { %v10194_v48 = vmax.f32 %v10174_v20, 0.0  ;;  %v10217_v10 = vadd.f32 %v10205_v22, %v10193_v44 }
0x3327   : > { %v10220_v47 = vadd.f32 %v10208_v43, %v10196_v58 }
0x3328   : > { %v10218_v24 = vadd.f32 %v10206_v11, %v10194_v48  ;;  %16431 = vmatpush3.bf16.msra.mxu0 %v10224_v1  ;;  %v10513_v1 = vunpack.c.h.bf16 %v20345_v7  ;;  %v17335_v11 = vld [vmem:[%s20954_s5] ss:$0 sm:$0xff] }
0x3329   : > { %v10226_v38 = vpack.c.bf16 %v10220_v47, %v10219_v13  ;;  %16432 = vmatprep.subr.bf16.mxu0 %v17345_v37 }
0x332a   : > { %v10225_v3 = vpack.c.bf16 %v10218_v24, %v10217_v10  ;;  %v10516_v24 = vunpack.c.l.bf16 %v20358_v25 }
0x332c   : > { %16433 = vmatpush3.bf16.msra.mxu0 %v10225_v3  ;;  %v10517_v3 = vunpack.c.h.bf16 %v20358_v25 }
0x332d   : > { %16434 = vmatprep.subr.bf16.mxu0 %v17345_v37 }
0x3330   : > { %16435 = vmatpush3.bf16.msra.mxu0 %v10226_v38 }
0x3331   : > { %16440 = vmatprep.subr.bf16.mxu0 %v17334_v49 }
0x3333   : > { %16437 = vmatmul.mubr.msk.bf16.vlgmr.msra.gmra.mrb[176].mxu0 %vm687_vm3, %v20172_v31 }
0x3334   : > { %16441 = vmatpush3.bf16.msra.mxu0 %v17334_v49  ;;  %16444 = vmatprep.mubr.msk.bf16.mxu0 %vm544_vm2, %v20335_v28 }
0x3335   : > { %16442 = vmatprep.subr.bf16.mxu0 %v17444_v6 }
0x3338   : > { %16443 = vmatpush3.bf16.msra.mxu0 %v17444_v6 }
0x3339   : > { %16480 = vmatprep.subr.bf16.mxu0 %v17345_v37 }
0x333b   : > { %16445 = vmatmul.mubr.msk.bf16.vlgmr.msra.gmra.mrb[180].mxu0 %vm544_vm2, %v20345_v7  ;;  %v10514_v7 = vunpack.c.l.bf16 %v20349_v30 }
0x333c   : > { %16448 = vmatprep.mubr.msk.bf16.mxu0 %vm544_vm2, %v20349_v30 }
0x3343   : > { %16449 = vmatmul.mubr.msk.bf16.gmra.mrb[184].mxu0 %vm544_vm2, %v20358_v25 }
0x3344   : > { %16452 = vmatprep.mubr.msk.bf16.mxu0 %vm544_vm2, %v20361_v42 }
0x334b   : > { %16453 = vmatmul.mubr.msk.bf16.gmra.mrb[188].mxu0 %vm544_vm2, %v20368_v17 }
0x334c   : > { %16492 = vmatprep.mubr.msk.bf16.mxu0 %vm17346_vm4, %v17345_v37 }
0x3406   : > { %v10261_v6 = vpop.f32.mrb[176].mxu0 }
0x3407   : > { %10268 = vst.msk [vmem:[#allocation2 + $0x1e0] sm:$0xff] %vm544_vm2, %v10261_v6  ;;  %v16438_v15 = vpop.f32.mrb[177].mxu0 }
0x3408   : > { %v10264_v26 = vpop.f32.mrb[178].mxu0  ;;  %v10515_v15 = vunpack.c.h.bf16 %v20349_v30 }
0x3409   : > { %10269 = vst.msk [vmem:[#allocation2 + $0x1e8] sm:$0xff] %vm544_vm2, %v10264_v26  ;;  %v16439_v61 = vpop.f32.mrb[179].mxu0 }
0x340e   : > { %v16446_v18 = vpop.f32.mrb[180].mxu0 }
0x340f   : > { %v10364_v41 = vpop.f32.mrb[181].mxu0 }
0x3410   : > { %v16447_v29 = vpop.f32.mrb[182].mxu0 }
0x3411   : > { %v10412_v9 = vpack.c.bf16 %v16447_v29, %v16446_v18  ;;  %v10367_v55 = vpop.f32.mrb[183].mxu0 }
0x3412   : > { %v10411_v57 = vpack.c.bf16 %v10367_v55, %v10364_v41 }
0x3414   : > { %16456 = vmatprep.subr.bf16.mxu1 %v10411_v57 }
0x3415   : > { %16457 = vmatpush3.bf16.msra.mxu1 %v10411_v57 }
0x3416   : > { %v16450_v36 = vpop.f32.mrb[184].mxu0  ;;  %16458 = vmatprep.subr.bf16.mxu1 %v10412_v9 }
0x3417   : > { %v10380_v46 = vpop.f32.mrb[185].mxu0 }
0x3418   : > { %v16451_v27 = vpop.f32.mrb[186].mxu0 }
0x3419   : > { %v10414_v12 = vpack.c.bf16 %v16451_v27, %v16450_v36  ;;  %v10383_v34 = vpop.f32.mrb[187].mxu0  ;;  %16459 = vmatpush3.bf16.msra.mxu1 %v10412_v9 }
0x341a   : > { %v10413_v16 = vpack.c.bf16 %v10383_v34, %v10380_v46  ;;  %v10520_v34 = vunpack.c.l.bf16 %v20368_v17 }
0x341c   : > { %16460 = vmatprep.subr.bf16.mxu1 %v10413_v16 }
0x341d   : > { %16461 = vmatpush3.bf16.msra.mxu1 %v10413_v16 }
0x341e   : > { %v16454_v4 = vpop.f32.mrb[188].mxu0  ;;  %16462 = vmatprep.subr.bf16.mxu1 %v10414_v12 }
0x341f   : > { %v10396_v21 = vpop.f32.mrb[189].mxu0 }
0x3420   : > { %v16455_v54 = vpop.f32.mrb[190].mxu0 }
0x3421   : > { %v10416_v32 = vpack.c.bf16 %v16455_v54, %v16454_v4  ;;  %v10399_v51 = vpop.f32.mrb[191].mxu0  ;;  %16463 = vmatpush3.bf16.msra.mxu1 %v10414_v12  ;;  %v10521_v4 = vunpack.c.h.bf16 %v20368_v17 }
0x3422   : > { %v10415_v40 = vpack.c.bf16 %v10399_v51, %v10396_v21 }
0x3424   : > { %16464 = vmatprep.subr.bf16.mxu1 %v10415_v40 }
0x3425   : > { %16465 = vmatpush3.bf16.msra.mxu1 %v10415_v40  ;;  %v10519_v40 = vunpack.c.h.bf16 %v20361_v42 }
0x3426   : > { %16466 = vmatprep.subr.bf16.mxu1 %v10416_v32 }
0x3429   : > { %16467 = vmatpush3.bf16.msra.mxu1 %v10416_v32  ;;  %v10518_v32 = vunpack.c.l.bf16 %v20361_v42  ;;  %v10746_v42 = vld [vmem:[%s20956_s7] sm:$0x7] }
0x342c   : > { %16469 = vmatmul.mubr.msk.bf16.vlgmr.msra.gmra.mrb[176].mxu1 %vm687_vm3, %v20097_v60 }
0x342d   : > { %16472 = vmatprep.mubr.msk.bf16.mxu1 %vm687_vm3, %v20104_v53 }
0x3434   : > { %16473 = vmatmul.mubr.msk.bf16.gmra.mrb[180].mxu1 %vm687_vm3, %v20111_v45 }
0x3435   : > { %16476 = vmatprep.mubr.msk.bf16.mxu1 %vm687_vm3, %v20118_v56 }
0x343c   : > { %16477 = vmatmul.mubr.msk.bf16.gmra.mrb[184].mxu1 %vm687_vm3, %v20125_v8 }
0x34ff   : > { %v16470_v60 = vpop.f32.mrb[176].mxu1 }
0x3500   : > { %v10460_v53 = vadd.f32 %v20134_v39, %v16470_v60  ;;  %v10451_v45 = vpop.f32.mrb[177].mxu1 }
0x3501   : > { %v10452_v56 = vadd.f32 %v20134_v39, %v10451_v45  ;;  %v16471_v59 = vpop.f32.mrb[178].mxu1 }
0x3502   : > { %v10500_v8 = vmax.f32 %v10460_v53, 0.0  ;;  %v10463_v23 = vadd.f32 %v20134_v39, %v16471_v59  ;;  %v10454_v52 = vpop.f32.mrb[179].mxu1 }
0x3503   : > { %v10498_v0 = vmax.f32 %v10452_v56, 0.0  ;;  %v10455_v35 = vadd.f32 %v20134_v39, %v10454_v52  ;;  %v17045_v52 = vld [vmem:[%s20955_s6] sm:$0xff]  }
0x3504   : > { %v10501_v50 = vmax.f32 %v10463_v23, 0.0  ;;  %v10524_v14 = vadd.f32 %v10512_v33, %v10500_v8  ;;  %v17043_v23 = vld [vmem:[%s20394_s30] sm:$0xff]  }
0x3505   : > { %v10499_v62 = vmax.f32 %v10455_v35, 0.0  ;;  %v10522_v2 = vadd.f32 %v10510_v63, %v10498_v0  ;;  %v17044_v0 = vld [vmem:[%s20394_s30 + $0x8] sm:$0xff]   ;;  %v17046_v63 = vld [vmem:[%s20394_s30 + $0x10] sm:$0xff]  }
0x3506   : > { %v10525_v43 = vadd.f32 %v10513_v1, %v10501_v50  ;;  %v11005_v1 = vsel %vm564_vm1, %v10746_v42, 0  ;;  %v17049_v50 = vld [vmem:[%s20394_s30 + $0x28] sm:$0xff]  }
0x3507   : > { %v10523_v44 = vadd.f32 %v10511_v19, %v10499_v62  ;;  %v16474_v22 = vpop.f32.mrb[180].mxu1  ;;  %v17048_v19 = vld [vmem:[%s20394_s30 + $0x20] sm:$0xff]   ;;  %v17051_v62 = vld [vmem:[%s20394_s30 + $0x38] sm:$0xff]  }
0x3508   : > { %v10535_v20 = vpack.c.bf16 %v10525_v43, %v10524_v14  ;;  %v10476_v58 = vadd.f32 %v17335_v11, %v16474_v22  ;;  %v10467_v48 = vpop.f32.mrb[181].mxu1  ;;  %v17052_v14 = vld [vmem:[%s20394_s30 + $0x40] sm:$0xff]   ;;  %v17053_v43 = vld [vmem:[%s20394_s30 + $0x48] sm:$0xff]  }
0x3509   : > { %v10534_v13 = vpack.c.bf16 %v10523_v44, %v10522_v2  ;;  %v10468_v47 = vadd.f32 %v17335_v11, %v10467_v48  ;;  %v16475_v10 = vpop.f32.mrb[182].mxu1  ;;  %v17054_v2 = vld [vmem:[%s20394_s30 + $0x50] sm:$0xff]   ;;  %v17055_v44 = vld [vmem:[%s20394_s30 + $0x58] sm:$0xff]   ;;  %v17056_v22 = vld [vmem:[%s20394_s30 + $0x60] sm:$0xff]  }
0x350a   : > { %v10504_v39 = vmax.f32 %v10476_v58, 0.0  ;;  %v10479_v38 = vadd.f32 %v17335_v11, %v16475_v10  ;;  %v10470_v28 = vpop.f32.mrb[183].mxu1  ;;  %v17059_v58 = vld [vmem:[%s20394_s30 + $0x78] sm:$0xff]   ;;  %v17060_v48 = vld [vmem:[%s20394_s30 + $0x80] sm:$0xff]  }
0x350b   : > { %v10502_v49 = vmax.f32 %v10468_v47, 0.0  ;;  %v10471_v6 = vadd.f32 %v17335_v11, %v10470_v28  ;;  %16481 = vmatpush3.bf16.msra.mxu0 %v10534_v13  ;;  %v17061_v13 = vld [vmem:[%s20394_s30 + $0x88] sm:$0xff]   ;;  %v17063_v47 = vld [vmem:[%s20394_s30 + $0x90] sm:$0xff]   ;;  %v17064_v10 = vld [vmem:[%s20394_s30 + $0x98] sm:$0xff]  }
0x350c   : > { %v10505_v26 = vmax.f32 %v10479_v38, 0.0  ;;  %16482 = vmatprep.subr.bf16.mxu0 %v17345_v37  ;;  %v10528_v18 = vadd.f32 %v10516_v24, %v10504_v39  ;;  %v17065_v39 = vld [vmem:[%s20394_s30 + $0xa0] sm:$0xff]   ;;  %v17066_v24 = vld [vmem:[%s20394_s30 + $0xa8] sm:$0xff]   ;;  %v17067_v38 = vld [vmem:[%s20394_s30 + $0xb0] sm:$0xff]  }
0x350d   : > { %v10503_v61 = vmax.f32 %v10471_v6, 0.0  ;;  %v10526_v29 = vadd.f32 %v10514_v7, %v10502_v49  ;;  %v17069_v28 = vld [vmem:[%s20394_s30 + $0xc0] sm:$0xff]   ;;  %v17070_v49 = vld [vmem:[%s20394_s30 + $0xc8] sm:$0xff]   ;;  %v17071_v7 = vld [vmem:[%s20394_s30 + $0xd0] sm:$0xff]  }
0x350e   : > { %v10529_v41 = vadd.f32 %v10517_v3, %v10505_v26  ;;  %v17068_v3 = vld [vmem:[%s20394_s30 + $0xb8] sm:$0xff]   ;;  %v17074_v26 = vld [vmem:[%s20394_s30 + $0xe8] sm:$0xff]  }
0x350f   : > { %v10527_v9 = vadd.f32 %v10515_v15, %v10503_v61  ;;  %v16478_v55 = vpop.f32.mrb[184].mxu1  ;;  %16483 = vmatpush3.bf16.msra.mxu0 %v10535_v20  ;;  %v17057_v20 = vld [vmem:[%s20394_s30 + $0x68] sm:$0xff]   ;;  %v17072_v6 = vld [vmem:[%s20394_s30 + $0xd8] sm:$0xff]   ;;  %v17073_v15 = vld [vmem:[%s20394_s30 + $0xe0] sm:$0xff]  }
0x3510   : > { %v10537_v57 = vpack.c.bf16 %v10529_v41, %v10528_v18  ;;  %v10492_v25 = vadd.f32 %v17335_v11, %v16478_v55  ;;  %v10483_v36 = vpop.f32.mrb[185].mxu1  ;;  %16484 = vmatprep.subr.bf16.mxu0 %v17345_v37  ;;  %v17075_v61 = vld [vmem:[%s20394_s30 + $0xf0] sm:$0xff]   ;;  %v17076_v18 = vld [vmem:[%s20394_s30 + $0xf8] sm:$0xff]   ;;  %v10584_v41 = vld [vmem:[#allocation2 + $0x8] sm:$0xff] }
0x3511   : > { %v10536_v46 = vpack.c.bf16 %v10527_v9, %v10526_v29  ;;  %v10484_v27 = vadd.f32 %v17335_v11, %v10483_v36  ;;  %v16479_v12 = vpop.f32.mrb[186].mxu1  ;;  %v10583_v29 = vld [vmem:[#allocation2] sm:$0xff] }
0x3512   : > { %v10508_v30 = vmax.f32 %v10492_v25, 0.0  ;;  %v10495_v16 = vadd.f32 %v17335_v11, %v16479_v12  ;;  %v10486_v21 = vpop.f32.mrb[187].mxu1  ;;  %v10647_v9 = vpack.c.bf16 %v10584_v41, %v10583_v29  ;;  %v17077_v55 = vld [vmem:[%s20958_s9] sm:$0xff]   ;;  %v10586_v25 = vld [vmem:[#allocation2 + $0x18] sm:$0xff] }
0x3513   : > { %v10506_v54 = vmax.f32 %v10484_v27, 0.0  ;;  %v10487_v51 = vadd.f32 %v17335_v11, %v10486_v21  ;;  %16485 = vmatpush3.bf16.msra.mxu0 %v10536_v46  ;;  %v17058_v11 = vld [vmem:[%s20394_s30 + $0x70] sm:$0xff]   ;;  %16630 = vmatprep.subr.bf16.mxu1 %v17077_v55  ;;  %v10587_v36 = vld [vmem:[#allocation2 + $0x20] sm:$0xff]  ;;  %v10588_v46 = vld [vmem:[#allocation2 + $0x28] sm:$0xff] }
0x3514   : > { %v10509_v60 = vmax.f32 %v10495_v16, 0.0  ;;  %16486 = vmatprep.subr.bf16.mxu0 %v17345_v37  ;;  %v10532_v45 = vadd.f32 %v10520_v34, %v10508_v30  ;;  %16631 = vmatpush3.bf16.msra.mxu1 %v17077_v55  ;;  %v10585_v27 = vld [vmem:[#allocation2 + $0x10] sm:$0xff]  ;;  %v10649_v30 = vpack.c.bf16 %v10588_v46, %v10587_v36  ;;  %v10590_v34 = vld [vmem:[#allocation2 + $0x38] sm:$0xff]  ;;  %v10592_v16 = vld [vmem:[#allocation2 + $0x48] sm:$0xff] }
0x3515   : > { %v10507_v53 = vmax.f32 %v10487_v51, 0.0  ;;  %v10530_v59 = vadd.f32 %v10518_v32, %v10506_v54  ;;  %v10648_v12 = vpack.c.bf16 %v10586_v25, %v10585_v27  ;;  %v10591_v54 = vld [vmem:[#allocation2 + $0x40] sm:$0xff]  ;;  %v10593_v51 = vld [vmem:[#allocation2 + $0x50] sm:$0xff] }
0x3516   : > { %v10533_v56 = vadd.f32 %v10521_v4, %v10509_v60  ;;  %v10589_v4 = vld [vmem:[#allocation2 + $0x30] sm:$0xff]  ;;  %v10651_v32 = vpack.c.bf16 %v10592_v16, %v10591_v54  ;;  %v10596_v60 = vld [vmem:[#allocation2 + $0x68] sm:$0xff]  ;;  %v10630_v16 = vld [vmem:[#allocation2 + $0x178] sm:$0xff] }
0x3517   : > { %v10531_v8 = vadd.f32 %v10519_v40, %v10507_v53  ;;  %16487 = vmatpush3.bf16.msra.mxu0 %v10537_v57  ;;  %v17078_v57 = vld [vmem:[%s20958_s9 + $0x8] sm:$0xff]   ;;  %v10650_v21 = vpack.c.bf16 %v10590_v34, %v10589_v4  ;;  %v10594_v40 = vld [vmem:[#allocation2 + $0x58] sm:$0xff]  ;;  %v10625_v36 = vld [vmem:[#allocation2 + $0x150] sm:$0xff] }
0x3518   : > { %v10539_v33 = vpack.c.bf16 %v10533_v56, %v10532_v45  ;;  %16488 = vmatprep.subr.bf16.mxu0 %v17345_v37  ;;  %16632 = vmatprep.subr.bf16.mxu1 %v17078_v57  ;;  %v10652_v53 = vpack.c.bf16 %v10594_v40, %v10593_v51  ;;  %v10595_v45 = vld [vmem:[#allocation2 + $0x60] sm:$0xff]  ;;  %v10629_v34 = vld [vmem:[#allocation2 + $0x170] sm:$0xff]  ;;  %v10632_v4 = vld [vmem:[#allocation2 + $0x188] sm:$0xff] }
0x3519   : > { %v10538_v17 = vpack.c.bf16 %v10531_v8, %v10530_v59  ;;  %16633 = vmatpush3.bf16.msra.mxu1 %v17078_v57  ;;  %v10653_v56 = vpack.c.bf16 %v10596_v60, %v10595_v45  ;;  %v10598_v59 = vld [vmem:[#allocation2 + $0x78] sm:$0xff]  ;;  %v10599_v8 = vld [vmem:[#allocation2 + $0x80] sm:$0xff]  ;;  %v10628_v57 = vld [vmem:[#allocation2 + $0x168] sm:$0xff] }
0x351a   : > { %v10631_v54 = vld [vmem:[#allocation2 + $0x180] sm:$0xff]  ;;  %v10634_v51 = vld [vmem:[#allocation2 + $0x198] sm:$0xff]  ;;  %v10636_v60 = vld [vmem:[#allocation2 + $0x1a8] sm:$0xff] }
0x351b   : > { %16489 = vmatpush3.bf16.msra.mxu0 %v10538_v17  ;;  %v10597_v17 = vld [vmem:[#allocation2 + $0x70] sm:$0xff]  ;;  %v10635_v40 = vld [vmem:[#allocation2 + $0x1a0] sm:$0xff] }
0x351c   : > { %16490 = vmatprep.subr.bf16.mxu0 %v17345_v37  ;;  %v17062_v37 = vld [vmem:[%s20955_s6 + $0x8] ss:$0 sps:$4 sm:$0x77]  }
0x351d   : > { %v11402_v35 = vand.u32 %v17062_v37, %v17441_v5  ;;  %v17050_v5 = vld [vmem:[%s20394_s30 + $0x30] sm:$0xff]  }
0x351e   : > { %v10601_v37 = vld [vmem:[#allocation2 + $0x90] sm:$0xff] }
0x351f   : > { %16491 = vmatpush3.bf16.msra.mxu0 %v10539_v33  ;;  %v10600_v33 = vld [vmem:[#allocation2 + $0x88] sm:$0xff] }
0x3520   : > { %16830 = vmatprep.subr.msk.bf16.mxu0 %vm564_vm1, %v10746_v42  ;;  %v10654_v42 = vpack.c.bf16 %v10598_v59, %v10597_v17  ;;  %v10638_v59 = vld [vmem:[#allocation2 + $0x1b8] sm:$0xff] }
0x3522   : > { %16493 = vmatmul.mubr.msk.bf16.vlgmr.msra.gmra.mrb[192].mxu0 %vm687_vm3, %v20172_v31  ;;  %v17047_v31 = vld [vmem:[%s20394_s30 + $0x18] sm:$0xff]  }
0x3523   : > { %16497 = vmatpush3.bf16.msra.mxu0 %v11005_v1  ;;  %16498 = vmatprep.mubr.msk.bf16.mxu0 %vm10907_vm5, %v17043_v23  ;;  %v10655_v23 = vpack.c.bf16 %v10600_v33, %v10599_v8  ;;  %v10602_v1 = vld [vmem:[#allocation2 + $0x98] sm:$0xff]  ;;  %v10640_v8 = vld [vmem:[#allocation2 + $0x1c8] sm:$0xff]  ;;  %v10637_v33 = vld [vmem:[#allocation2 + $0x1b0] sm:$0xff] }
0x3524   : > { %16562 = vmatprep.subr.bf16.mxu0 %v17045_v52  ;;  %v10674_v17 = vpack.c.bf16 %v10638_v59, %v10637_v33 }
0x352a   : > { %16499 = vmatmul.mubr.msk.bf16.vlgmr.msra.gmra.mrb[196].mxu0 %vm10907_vm5, %v17044_v0  ;;  %v10656_v0 = vpack.c.bf16 %v10602_v1, %v10601_v37  ;;  %v10641_v1 = vld [vmem:[#allocation2 + $0x1d0] sm:$0xff]  ;;  %v10644_v37 = vld [vmem:[#allocation2 + $0x1e8] sm:$0xff] }
0x352b   : > { %16563 = vmatpush3.bf16.msra.mxu0 %v17045_v52  ;;  %16502 = vmatprep.mubr.msk.bf16.mxu0 %vm10907_vm5, %v17046_v63  ;;  %v10604_v52 = vld [vmem:[#allocation2 + $0xa8] sm:$0xff]  ;;  %v10603_v63 = vld [vmem:[#allocation2 + $0xa0] sm:$0xff] }
0x352c   : > { %16564 = vmatprep.subr.bf16.mxu0 %v11402_v35 }
0x352f   : > { %16565 = vmatpush3.bf16.msra.mxu0 %v11402_v35  ;;  %v10657_v35 = vpack.c.bf16 %v10604_v52, %v10603_v63  ;;  %v10642_v52 = vld [vmem:[#allocation2 + $0x1d8] sm:$0xff]  ;;  %v10643_v63 = vld [vmem:[#allocation2 + $0x1e0] sm:$0xff] }
0x3532   : > { %16503 = vmatmul.mubr.msk.bf16.gmra.mrb[200].mxu0 %vm10907_vm5, %v17047_v31  ;;  %v10605_v31 = vld [vmem:[#allocation2 + $0xb0] sm:$0xff] }
0x3533   : > { %16506 = vmatprep.mubr.msk.bf16.mxu0 %vm10907_vm5, %v17048_v19  ;;  %v10606_v19 = vld [vmem:[#allocation2 + $0xb8] sm:$0xff] }
0x353a   : > { %16507 = vmatmul.mubr.msk.bf16.gmra.mrb[204].mxu0 %vm10907_vm5, %v17049_v50  ;;  %v10608_v50 = vld [vmem:[#allocation2 + $0xc8] sm:$0xff] }
0x353b   : > { %16510 = vmatprep.mubr.msk.bf16.mxu0 %vm10907_vm5, %v17050_v5  ;;  %v10658_v5 = vpack.c.bf16 %v10606_v19, %v10605_v31 }
0x3542   : > { %16511 = vmatmul.mubr.msk.bf16.gmra.mrb[208].mxu0 %vm10907_vm5, %v17051_v62  ;;  %v10607_v62 = vld [vmem:[#allocation2 + $0xc0] sm:$0xff] }
0x3543   : > { %16514 = vmatprep.mubr.msk.bf16.mxu0 %vm10907_vm5, %v17052_v14  ;;  %v10659_v14 = vpack.c.bf16 %v10608_v50, %v10607_v62  ;;  %v20544_v62 = vld [vmem:[%s20957_s8] ss:$0 sm:$0xff] }
0x354a   : > { %16515 = vmatmul.mubr.msk.bf16.gmra.mrb[212].mxu0 %vm10907_vm5, %v17053_v43  ;;  %v10610_v43 = vld [vmem:[#allocation2 + $0xd8] sm:$0xff] }
0x354b   : > { %16518 = vmatprep.mubr.msk.bf16.mxu0 %vm10907_vm5, %v17054_v2  ;;  %v10611_v2 = vld [vmem:[#allocation2 + $0xe0] sm:$0xff] }
0x3552   : > { %16519 = vmatmul.mubr.msk.bf16.gmra.mrb[216].mxu0 %vm10907_vm5, %v17055_v44  ;;  %v10612_v44 = vld [vmem:[#allocation2 + $0xe8] sm:$0xff] }
0x3553   : > { %16522 = vmatprep.mubr.msk.bf16.mxu0 %vm10907_vm5, %v17056_v22  ;;  %v10609_v22 = vld [vmem:[#allocation2 + $0xd0] sm:$0xff] }
0x355a   : > { %16523 = vmatmul.mubr.msk.bf16.gmra.mrb[220].mxu0 %vm10907_vm5, %v17057_v20  ;;  %v10660_v20 = vpack.c.bf16 %v10610_v43, %v10609_v22 }
0x355b   : > { %16526 = vmatprep.mubr.msk.bf16.mxu0 %vm10907_vm5, %v17058_v11  ;;  %v10661_v11 = vpack.c.bf16 %v10612_v44, %v10611_v2 }
0x3562   : > { %16527 = vmatmul.mubr.msk.bf16.gmra.mrb[224].mxu0 %vm10907_vm5, %v17059_v58  ;;  %v10614_v58 = vld [vmem:[#allocation2 + $0xf8] sm:$0xff] }
0x3563   : > { %16530 = vmatprep.mubr.msk.bf16.mxu0 %vm10907_vm5, %v17060_v48  ;;  %v10616_v48 = vld [vmem:[#allocation2 + $0x108] sm:$0xff] }
0x356a   : > { %16531 = vmatmul.mubr.msk.bf16.gmra.mrb[228].mxu0 %vm10907_vm5, %v17061_v13  ;;  %v10613_v13 = vld [vmem:[#allocation2 + $0xf0] sm:$0xff] }
0x356b   : > { %16534 = vmatprep.mubr.msk.bf16.mxu0 %vm10907_vm5, %v17063_v47  ;;  %v10662_v47 = vpack.c.bf16 %v10614_v58, %v10613_v13 }
0x3572   : > { %16535 = vmatmul.mubr.msk.bf16.gmra.mrb[232].mxu0 %vm10907_vm5, %v17064_v10  ;;  %v10615_v10 = vld [vmem:[#allocation2 + $0x100] sm:$0xff] }
0x3573   : > { %16538 = vmatprep.mubr.msk.bf16.mxu0 %vm10907_vm5, %v17065_v39  ;;  %v10663_v39 = vpack.c.bf16 %v10616_v48, %v10615_v10 }
0x357a   : > { %16539 = vmatmul.mubr.msk.bf16.gmra.mrb[236].mxu0 %vm10907_vm5, %v17066_v24  ;;  %v10617_v24 = vld [vmem:[#allocation2 + $0x110] sm:$0xff] }
0x357b   : > { %16542 = vmatprep.mubr.msk.bf16.mxu0 %vm10907_vm5, %v17067_v38  ;;  %v10618_v38 = vld [vmem:[#allocation2 + $0x118] sm:$0xff] }
0x3582   : > { %16543 = vmatmul.mubr.msk.bf16.gmra.mrb[240].mxu0 %vm10907_vm5, %v17068_v3  ;;  %v10620_v3 = vld [vmem:[#allocation2 + $0x128] sm:$0xff] }
0x3583   : > { %16546 = vmatprep.mubr.msk.bf16.mxu0 %vm10907_vm5, %v17069_v28  ;;  %v10664_v28 = vpack.c.bf16 %v10618_v38, %v10617_v24 }
0x358a   : > { %16547 = vmatmul.mubr.msk.bf16.gmra.mrb[244].mxu0 %vm10907_vm5, %v17070_v49  ;;  %v10619_v49 = vld [vmem:[#allocation2 + $0x120] sm:$0xff] }
0x358b   : > { %16550 = vmatprep.mubr.msk.bf16.mxu0 %vm10907_vm5, %v17071_v7  ;;  %v10665_v7 = vpack.c.bf16 %v10620_v3, %v10619_v49  ;;  %v17080_v49 = vld [vmem:[%s20960_s11 + $0x8] sm:$0xff]  }
0x3592   : > { %16551 = vmatmul.mubr.msk.bf16.gmra.mrb[248].mxu0 %vm10907_vm5, %v17072_v6  ;;  %v10622_v6 = vld [vmem:[#allocation2 + $0x138] sm:$0xff] }
0x3593   : > { %16554 = vmatprep.mubr.msk.bf16.mxu0 %vm10907_vm5, %v17073_v15  ;;  %v10623_v15 = vld [vmem:[#allocation2 + $0x140] sm:$0xff] }
0x359a   : > { %16555 = vmatmul.mubr.msk.bf16.gmra.mrb[252].mxu0 %vm10907_vm5, %v17074_v26  ;;  %v10624_v26 = vld [vmem:[#allocation2 + $0x148] sm:$0xff] }
0x359b   : > { %16558 = vmatprep.mubr.msk.bf16.mxu0 %vm10907_vm5, %v17075_v61  ;;  %v10621_v61 = vld [vmem:[#allocation2 + $0x130] sm:$0xff]  ;;  %v10667_v41 = vpack.c.bf16 %v10624_v26, %v10623_v15 }
0x35a2   : > { %16559 = vmatmul.mubr.msk.bf16.gmra.mrb[0].mxu0 %vm10907_vm5, %v17076_v18  ;;  %v10666_v18 = vpack.c.bf16 %v10622_v6, %v10621_v61 }
0x35a3   : > { %16566 = vmatprep.mubr.msk.bf16.mxu0 %vm544_vm2, %v10647_v9  ;;  %v10626_v9 = vld [vmem:[#allocation2 + $0x158] sm:$0xff] }
0x35a4   : > { %v10668_v27 = vpack.c.bf16 %v10626_v9, %v10625_v36 }
0x35aa   : > { %16567 = vmatmul.mubr.msk.bf16.vlgmr.msra.gmra.mrb[196].mxu0 %vm544_vm2, %v10648_v12  ;;  %v10627_v12 = vld [vmem:[#allocation2 + $0x160] sm:$0xff] }
0x35ab   : > { %16570 = vmatprep.mubr.msk.bf16.mxu0 %vm544_vm2, %v10649_v30  ;;  %v10669_v30 = vpack.c.bf16 %v10628_v57, %v10627_v12 }
0x35b2   : > { %16571 = vmatmul.mubr.msk.bf16.gmra.mrb[200].mxu0 %vm544_vm2, %v10650_v21  ;;  %v10670_v21 = vpack.c.bf16 %v10630_v16, %v10629_v34 }
0x35b3   : > { %16574 = vmatprep.mubr.msk.bf16.mxu0 %vm544_vm2, %v10651_v32  ;;  %v10671_v32 = vpack.c.bf16 %v10632_v4, %v10631_v54 }
0x35ba   : > { %16575 = vmatmul.mubr.msk.bf16.gmra.mrb[204].mxu0 %vm544_vm2, %v10652_v53  ;;  %v10633_v53 = vld [vmem:[#allocation2 + $0x190] sm:$0xff] }
0x35bb   : > { %16578 = vmatprep.mubr.msk.bf16.mxu0 %vm544_vm2, %v10653_v56  ;;  %v10672_v45 = vpack.c.bf16 %v10634_v51, %v10633_v53  ;;  %v10673_v56 = vpack.c.bf16 %v10636_v60, %v10635_v40 }
0x35c2   : > { %16579 = vmatmul.mubr.msk.bf16.gmra.mrb[208].mxu0 %vm544_vm2, %v10654_v42  ;;  %v10639_v42 = vld [vmem:[#allocation2 + $0x1c0] sm:$0xff] }
0x35c3   : > { %16582 = vmatprep.mubr.msk.bf16.mxu0 %vm544_vm2, %v10655_v23  ;;  %v10675_v23 = vpack.c.bf16 %v10640_v8, %v10639_v42 }
0x35ca   : > { %16583 = vmatmul.mubr.msk.bf16.gmra.mrb[212].mxu0 %vm544_vm2, %v10656_v0  ;;  %v10676_v0 = vpack.c.bf16 %v10642_v52, %v10641_v1 }
0x35cb   : > { %16586 = vmatprep.mubr.msk.bf16.mxu0 %vm544_vm2, %v10657_v35  ;;  %v10677_v35 = vpack.c.bf16 %v10644_v37, %v10643_v63 }
0x35d2   : > { %16587 = vmatmul.mubr.msk.bf16.gmra.mrb[216].mxu0 %vm544_vm2, %v10658_v5  ;;  %v17079_v5 = vld [vmem:[%s20960_s11] sm:$0xff]  }
0x35d3   : > { %16590 = vmatprep.mubr.msk.bf16.mxu0 %vm544_vm2, %v10659_v14  ;;  %16698 = vmatprep.subr.bf16.mxu1 %v17079_v5 }
0x35da   : > { %16591 = vmatmul.mubr.msk.bf16.gmra.mrb[220].mxu0 %vm544_vm2, %v10660_v20 }
0x35db   : > { %16594 = vmatprep.mubr.msk.bf16.mxu0 %vm544_vm2, %v10661_v11 }
0x35e2   : > { %16595 = vmatmul.mubr.msk.bf16.gmra.mrb[224].mxu0 %vm544_vm2, %v10662_v47 }
0x35e3   : > { %16598 = vmatprep.mubr.msk.bf16.mxu0 %vm544_vm2, %v10663_v39 }
0x35ea   : > { %16599 = vmatmul.mubr.msk.bf16.gmra.mrb[228].mxu0 %vm544_vm2, %v10664_v28 }
0x35eb   : > { %16602 = vmatprep.mubr.msk.bf16.mxu0 %vm544_vm2, %v10665_v7 }
0x35f2   : > { %16603 = vmatmul.mubr.msk.bf16.gmra.mrb[232].mxu0 %vm544_vm2, %v10666_v18 }
0x35f3   : > { %16606 = vmatprep.mubr.msk.bf16.mxu0 %vm544_vm2, %v10667_v41 }
0x35f5   : > { %v10574_v29 = vpop.f32.mrb[192].mxu0 }
0x35f6   : > { %10581 = vst.msk [vmem:[#allocation2 + $0x1f0] sm:$0xff] %vm544_vm2, %v10574_v29  ;;  %v16494_v55 = vpop.f32.mrb[193].mxu0 }
0x35f7   : > { %v10577_v25 = vpop.f32.mrb[194].mxu0 }
0x35f8   : > { %10582 = vst.msk [vmem:[#allocation2 + $0x1f8] sm:$0xff] %vm544_vm2, %v10577_v25  ;;  %v16495_v46 = vpop.f32.mrb[195].mxu0 }
0x35fa   : > { %16607 = vmatmul.mubr.msk.bf16.gmra.mrb[236].mxu0 %vm544_vm2, %v10668_v27 }
0x35fb   : > { %16610 = vmatprep.mubr.msk.bf16.mxu0 %vm544_vm2, %v10669_v30 }
0x35fd   : > { %v10645_v19 = vld [vmem:[#allocation2 + $0x1f0] sm:$0xff] }
0x35ff   : > { %v10646_v31 = vld [vmem:[#allocation2 + $0x1f8] sm:$0xff] }
0x3600   : > { %v10678_v50 = vpack.c.bf16 %v10646_v31, %v10645_v19 }
0x3602   : > { %16611 = vmatmul.mubr.msk.bf16.gmra.mrb[240].mxu0 %vm544_vm2, %v10670_v21 }
0x3603   : > { %16614 = vmatprep.mubr.msk.bf16.mxu0 %vm544_vm2, %v10671_v32 }
0x360a   : > { %16615 = vmatmul.mubr.msk.bf16.gmra.mrb[244].mxu0 %vm544_vm2, %v10672_v45 }
0x360b   : > { %16618 = vmatprep.mubr.msk.bf16.mxu0 %vm544_vm2, %v10673_v56 }
0x3612   : > { %16619 = vmatmul.mubr.msk.bf16.gmra.mrb[248].mxu0 %vm544_vm2, %v10674_v17 }
0x3613   : > { %16622 = vmatprep.mubr.msk.bf16.mxu0 %vm544_vm2, %v10675_v23 }
0x361a   : > { %16623 = vmatmul.mubr.msk.bf16.gmra.mrb[252].mxu0 %vm544_vm2, %v10676_v0 }
0x361b   : > { %16626 = vmatprep.mubr.msk.bf16.mxu0 %vm544_vm2, %v10677_v35 }
0x3622   : > { %16627 = vmatmul.mubr.msk.bf16.gmra.mrb[0].mxu0 %vm544_vm2, %v10678_v50 }
0x367d   : > { %v16568_v14 = vpop.f32.mrb[196].mxu0 }
0x367e   : > { %v11702_v43 = vadd.f32 %v16568_v14, %v20544_v62  ;;  %v11438_v2 = vpop.f32.mrb[197].mxu0 }
0x367f   : > { %v11700_v44 = vadd.f32 %v20544_v62, %v11438_v2  ;;  %v16569_v22 = vpop.f32.mrb[198].mxu0 }
0x3680   : > { %v11703_v20 = vadd.f32 %v16569_v22, %v20544_v62  ;;  %v11441_v11 = vpop.f32.mrb[199].mxu0  ;;  %v11766_v48 = vmax.f32 %v11702_v43, 0.0 }
0x3681   : > { %v11701_v58 = vadd.f32 %v20544_v62, %v11441_v11  ;;  %v11764_v47 = vmax.f32 %v11700_v44, 0.0 }
0x3682   : > { %v11767_v13 = vmax.f32 %v11703_v20, 0.0 }
0x3683   : > { %v11765_v10 = vmax.f32 %v11701_v58, 0.0 }
0x3684   : > { %v11829_v39 = vpack.c.bf16 %v11767_v13, %v11766_v48 }
0x3685   : > { %v11828_v24 = vpack.c.bf16 %v11765_v10, %v11764_v47  ;;  %v16572_v38 = vpop.f32.mrb[200].mxu0 }
0x3686   : > { %v11706_v3 = vadd.f32 %v16572_v38, %v20544_v62  ;;  %v11454_v28 = vpop.f32.mrb[201].mxu0 }
0x3687   : > { %v11704_v7 = vadd.f32 %v20544_v62, %v11454_v28  ;;  %v16573_v6 = vpop.f32.mrb[202].mxu0  ;;  %16634 = vmatprep.mubr.msk.bf16.mxu1 %vm11883_vm6, %v11828_v24 }
0x3688   : > { %v11707_v15 = vadd.f32 %v16573_v6, %v20544_v62  ;;  %v11457_v26 = vpop.f32.mrb[203].mxu0  ;;  %16635 = vmatmul.mubr.msk.bf16.vlgmr.msra.gmra.mrb[188].mxu1 %vm11883_vm6, %v11829_v39  ;;  %v11770_v18 = vmax.f32 %v11706_v3, 0.0 }
0x3689   : > { %v11705_v61 = vadd.f32 %v20544_v62, %v11457_v26  ;;  %16699 = vmatpush3.bf16.msra.mxu1 %v17079_v5  ;;  %v11768_v29 = vmax.f32 %v11704_v7, 0.0 }
0x368a   : > { %v11771_v41 = vmax.f32 %v11707_v15, 0.0  ;;  %16700 = vmatprep.subr.bf16.mxu1 %v17080_v49 }
0x368b   : > { %v11769_v9 = vmax.f32 %v11705_v61, 0.0 }
0x368c   : > { %v11831_v55 = vpack.c.bf16 %v11771_v41, %v11770_v18 }
0x368d   : > { %v11830_v57 = vpack.c.bf16 %v11769_v9, %v11768_v29  ;;  %v16576_v25 = vpop.f32.mrb[204].mxu0  ;;  %16701 = vmatpush3.bf16.msra.mxu1 %v17080_v49 }
0x368e   : > { %v11710_v36 = vadd.f32 %v16576_v25, %v20544_v62  ;;  %v11470_v46 = vpop.f32.mrb[205].mxu0 }
0x368f   : > { %v11708_v27 = vadd.f32 %v20544_v62, %v11470_v46  ;;  %v16577_v12 = vpop.f32.mrb[206].mxu0  ;;  %16638 = vmatprep.mubr.msk.bf16.mxu1 %vm11883_vm6, %v11830_v57 }
0x3690   : > { %v11711_v30 = vadd.f32 %v16577_v12, %v20544_v62  ;;  %v11473_v34 = vpop.f32.mrb[207].mxu0  ;;  %16639 = vmatmul.mubr.msk.bf16.gmra.mrb[192].mxu1 %vm11883_vm6, %v11831_v55  ;;  %v11774_v4 = vmax.f32 %v11710_v36, 0.0 }
0x3691   : > { %v11709_v16 = vadd.f32 %v20544_v62, %v11473_v34  ;;  %v11772_v54 = vmax.f32 %v11708_v27, 0.0 }
0x3692   : > { %v11775_v21 = vmax.f32 %v11711_v30, 0.0 }
0x3693   : > { %v11773_v32 = vmax.f32 %v11709_v16, 0.0 }
0x3694   : > { %v11833_v51 = vpack.c.bf16 %v11775_v21, %v11774_v4 }
0x3695   : > { %v11832_v40 = vpack.c.bf16 %v11773_v32, %v11772_v54  ;;  %v16580_v60 = vpop.f32.mrb[208].mxu0 }
0x3696   : > { %v11714_v53 = vadd.f32 %v16580_v60, %v20544_v62  ;;  %v11486_v45 = vpop.f32.mrb[209].mxu0 }
0x3697   : > { %v11712_v56 = vadd.f32 %v20544_v62, %v11486_v45  ;;  %v16581_v59 = vpop.f32.mrb[210].mxu0  ;;  %16642 = vmatprep.mubr.msk.bf16.mxu1 %vm11883_vm6, %v11832_v40 }
0x3698   : > { %v11715_v8 = vadd.f32 %v16581_v59, %v20544_v62  ;;  %v11489_v33 = vpop.f32.mrb[211].mxu0  ;;  %16643 = vmatmul.mubr.msk.bf16.gmra.mrb[196].mxu1 %vm11883_vm6, %v11833_v51  ;;  %v11778_v42 = vmax.f32 %v11714_v53, 0.0 }
0x3699   : > { %v11713_v17 = vadd.f32 %v20544_v62, %v11489_v33  ;;  %v11776_v1 = vmax.f32 %v11712_v56, 0.0 }
0x369a   : > { %v11779_v23 = vmax.f32 %v11715_v8, 0.0 }
0x369b   : > { %v11777_v52 = vmax.f32 %v11713_v17, 0.0 }
0x369c   : > { %v11835_v37 = vpack.c.bf16 %v11779_v23, %v11778_v42 }
0x369d   : > { %v11834_v0 = vpack.c.bf16 %v11777_v52, %v11776_v1  ;;  %v16584_v63 = vpop.f32.mrb[212].mxu0 }
0x369e   : > { %v11718_v35 = vadd.f32 %v16584_v63, %v20544_v62  ;;  %v11502_v31 = vpop.f32.mrb[213].mxu0 }
0x369f   : > { %v11716_v19 = vadd.f32 %v20544_v62, %v11502_v31  ;;  %v16585_v50 = vpop.f32.mrb[214].mxu0  ;;  %16646 = vmatprep.mubr.msk.bf16.mxu1 %vm11883_vm6, %v11834_v0 }
0x36a0   : > { %v11719_v5 = vadd.f32 %v16585_v50, %v20544_v62  ;;  %v11505_v14 = vpop.f32.mrb[215].mxu0  ;;  %16647 = vmatmul.mubr.msk.bf16.gmra.mrb[200].mxu1 %vm11883_vm6, %v11835_v37  ;;  %v11782_v2 = vmax.f32 %v11718_v35, 0.0 }
0x36a1   : > { %v11717_v43 = vadd.f32 %v20544_v62, %v11505_v14  ;;  %v11780_v22 = vmax.f32 %v11716_v19, 0.0 }
0x36a2   : > { %v11783_v44 = vmax.f32 %v11719_v5, 0.0 }
0x36a3   : > { %v11781_v20 = vmax.f32 %v11717_v43, 0.0 }
0x36a4   : > { %v11837_v11 = vpack.c.bf16 %v11783_v44, %v11782_v2 }
0x36a5   : > { %v11836_v58 = vpack.c.bf16 %v11781_v20, %v11780_v22  ;;  %v16588_v48 = vpop.f32.mrb[216].mxu0 }
0x36a6   : > { %v11722_v13 = vadd.f32 %v16588_v48, %v20544_v62  ;;  %v11518_v47 = vpop.f32.mrb[217].mxu0 }
0x36a7   : > { %v11720_v10 = vadd.f32 %v20544_v62, %v11518_v47  ;;  %v16589_v39 = vpop.f32.mrb[218].mxu0  ;;  %16650 = vmatprep.mubr.msk.bf16.mxu1 %vm11883_vm6, %v11836_v58 }
0x36a8   : > { %v11723_v24 = vadd.f32 %v16589_v39, %v20544_v62  ;;  %v11521_v38 = vpop.f32.mrb[219].mxu0  ;;  %16651 = vmatmul.mubr.msk.bf16.gmra.mrb[204].mxu1 %vm11883_vm6, %v11837_v11  ;;  %v11786_v28 = vmax.f32 %v11722_v13, 0.0 }
0x36a9   : > { %v11721_v3 = vadd.f32 %v20544_v62, %v11521_v38  ;;  %v11784_v7 = vmax.f32 %v11720_v10, 0.0 }
0x36aa   : > { %v11787_v49 = vmax.f32 %v11723_v24, 0.0 }
0x36ab   : > { %v11785_v6 = vmax.f32 %v11721_v3, 0.0 }
0x36ac   : > { %v11839_v15 = vpack.c.bf16 %v11787_v49, %v11786_v28 }
0x36ad   : > { %v11838_v26 = vpack.c.bf16 %v11785_v6, %v11784_v7  ;;  %v16592_v61 = vpop.f32.mrb[220].mxu0 }
0x36ae   : > { %v11726_v18 = vadd.f32 %v16592_v61, %v20544_v62  ;;  %v11534_v41 = vpop.f32.mrb[221].mxu0 }
0x36af   : > { %v11724_v29 = vadd.f32 %v20544_v62, %v11534_v41  ;;  %v16593_v9 = vpop.f32.mrb[222].mxu0  ;;  %16654 = vmatprep.mubr.msk.bf16.mxu1 %vm11883_vm6, %v11838_v26 }
0x36b0   : > { %v11727_v55 = vadd.f32 %v16593_v9, %v20544_v62  ;;  %v11537_v57 = vpop.f32.mrb[223].mxu0  ;;  %16655 = vmatmul.mubr.msk.bf16.gmra.mrb[208].mxu1 %vm11883_vm6, %v11839_v15  ;;  %v11790_v36 = vmax.f32 %v11726_v18, 0.0 }
0x36b1   : > { %v11725_v25 = vadd.f32 %v20544_v62, %v11537_v57  ;;  %v11788_v27 = vmax.f32 %v11724_v29, 0.0 }
0x36b2   : > { %v11791_v46 = vmax.f32 %v11727_v55, 0.0 }
0x36b3   : > { %v11789_v12 = vmax.f32 %v11725_v25, 0.0 }
0x36b4   : > { %v11841_v30 = vpack.c.bf16 %v11791_v46, %v11790_v36 }
0x36b5   : > { %v11840_v34 = vpack.c.bf16 %v11789_v12, %v11788_v27  ;;  %v16596_v16 = vpop.f32.mrb[224].mxu0 }
0x36b6   : > { %v11730_v4 = vadd.f32 %v16596_v16, %v20544_v62  ;;  %v11550_v21 = vpop.f32.mrb[225].mxu0 }
0x36b7   : > { %v11728_v54 = vadd.f32 %v20544_v62, %v11550_v21  ;;  %v16597_v32 = vpop.f32.mrb[226].mxu0  ;;  %16658 = vmatprep.mubr.msk.bf16.mxu1 %vm11883_vm6, %v11840_v34 }
0x36b8   : > { %v11731_v51 = vadd.f32 %v16597_v32, %v20544_v62  ;;  %v11553_v40 = vpop.f32.mrb[227].mxu0  ;;  %16659 = vmatmul.mubr.msk.bf16.gmra.mrb[212].mxu1 %vm11883_vm6, %v11841_v30  ;;  %v11794_v53 = vmax.f32 %v11730_v4, 0.0 }
0x36b9   : > { %v11729_v60 = vadd.f32 %v20544_v62, %v11553_v40  ;;  %v11792_v56 = vmax.f32 %v11728_v54, 0.0 }
0x36ba   : > { %v11795_v45 = vmax.f32 %v11731_v51, 0.0 }
0x36bb   : > { %v11793_v59 = vmax.f32 %v11729_v60, 0.0 }
0x36bc   : > { %v11843_v8 = vpack.c.bf16 %v11795_v45, %v11794_v53 }
0x36bd   : > { %v11842_v33 = vpack.c.bf16 %v11793_v59, %v11792_v56  ;;  %v16600_v17 = vpop.f32.mrb[228].mxu0 }
0x36be   : > { %v11734_v42 = vadd.f32 %v16600_v17, %v20544_v62  ;;  %v11566_v23 = vpop.f32.mrb[229].mxu0 }
0x36bf   : > { %v11732_v1 = vadd.f32 %v20544_v62, %v11566_v23  ;;  %v16601_v52 = vpop.f32.mrb[230].mxu0  ;;  %16662 = vmatprep.mubr.msk.bf16.mxu1 %vm11883_vm6, %v11842_v33 }
0x36c0   : > { %v11735_v37 = vadd.f32 %v16601_v52, %v20544_v62  ;;  %v11569_v0 = vpop.f32.mrb[231].mxu0  ;;  %16663 = vmatmul.mubr.msk.bf16.gmra.mrb[216].mxu1 %vm11883_vm6, %v11843_v8  ;;  %v11798_v35 = vmax.f32 %v11734_v42, 0.0 }
0x36c1   : > { %v11733_v63 = vadd.f32 %v20544_v62, %v11569_v0  ;;  %v11796_v19 = vmax.f32 %v11732_v1, 0.0 }
0x36c2   : > { %v11799_v31 = vmax.f32 %v11735_v37, 0.0 }
0x36c3   : > { %v11797_v50 = vmax.f32 %v11733_v63, 0.0 }
0x36c4   : > { %v11845_v5 = vpack.c.bf16 %v11799_v31, %v11798_v35 }
0x36c5   : > { %v11844_v14 = vpack.c.bf16 %v11797_v50, %v11796_v19  ;;  %v16604_v43 = vpop.f32.mrb[232].mxu0 }
0x36c6   : > { %v11738_v2 = vadd.f32 %v16604_v43, %v20544_v62  ;;  %v11582_v44 = vpop.f32.mrb[233].mxu0 }
0x36c7   : > { %v11736_v22 = vadd.f32 %v20544_v62, %v11582_v44  ;;  %v16605_v20 = vpop.f32.mrb[234].mxu0  ;;  %16666 = vmatprep.mubr.msk.bf16.mxu1 %vm11883_vm6, %v11844_v14 }
0x36c8   : > { %v11739_v11 = vadd.f32 %v16605_v20, %v20544_v62  ;;  %v11585_v58 = vpop.f32.mrb[235].mxu0  ;;  %16667 = vmatmul.mubr.msk.bf16.gmra.mrb[220].mxu1 %vm11883_vm6, %v11845_v5  ;;  %v11802_v13 = vmax.f32 %v11738_v2, 0.0 }
0x36c9   : > { %v11737_v48 = vadd.f32 %v20544_v62, %v11585_v58  ;;  %v11800_v10 = vmax.f32 %v11736_v22, 0.0 }
0x36ca   : > { %v11803_v47 = vmax.f32 %v11739_v11, 0.0 }
0x36cb   : > { %v11801_v39 = vmax.f32 %v11737_v48, 0.0 }
0x36cc   : > { %v11847_v24 = vpack.c.bf16 %v11803_v47, %v11802_v13 }
0x36cd   : > { %v11846_v38 = vpack.c.bf16 %v11801_v39, %v11800_v10  ;;  %v16608_v3 = vpop.f32.mrb[236].mxu0 }
0x36ce   : > { %v11742_v28 = vadd.f32 %v16608_v3, %v20544_v62  ;;  %v11598_v49 = vpop.f32.mrb[237].mxu0 }
0x36cf   : > { %v11740_v7 = vadd.f32 %v20544_v62, %v11598_v49  ;;  %v16609_v6 = vpop.f32.mrb[238].mxu0  ;;  %16670 = vmatprep.mubr.msk.bf16.mxu1 %vm11883_vm6, %v11846_v38 }
0x36d0   : > { %v11743_v15 = vadd.f32 %v16609_v6, %v20544_v62  ;;  %v11601_v26 = vpop.f32.mrb[239].mxu0  ;;  %16671 = vmatmul.mubr.msk.bf16.gmra.mrb[224].mxu1 %vm11883_vm6, %v11847_v24  ;;  %v11806_v18 = vmax.f32 %v11742_v28, 0.0 }
0x36d1   : > { %v11741_v61 = vadd.f32 %v20544_v62, %v11601_v26  ;;  %v11804_v29 = vmax.f32 %v11740_v7, 0.0 }
0x36d2   : > { %v11807_v41 = vmax.f32 %v11743_v15, 0.0 }
0x36d3   : > { %v11805_v9 = vmax.f32 %v11741_v61, 0.0 }
0x36d4   : > { %v11849_v55 = vpack.c.bf16 %v11807_v41, %v11806_v18 }
0x36d5   : > { %v11848_v57 = vpack.c.bf16 %v11805_v9, %v11804_v29  ;;  %v16612_v25 = vpop.f32.mrb[240].mxu0 }
0x36d6   : > { %v11746_v36 = vadd.f32 %v16612_v25, %v20544_v62  ;;  %v11614_v46 = vpop.f32.mrb[241].mxu0 }
0x36d7   : > { %v11744_v27 = vadd.f32 %v20544_v62, %v11614_v46  ;;  %v16613_v12 = vpop.f32.mrb[242].mxu0  ;;  %16674 = vmatprep.mubr.msk.bf16.mxu1 %vm11883_vm6, %v11848_v57 }
0x36d8   : > { %v11747_v30 = vadd.f32 %v16613_v12, %v20544_v62  ;;  %v11617_v34 = vpop.f32.mrb[243].mxu0  ;;  %16675 = vmatmul.mubr.msk.bf16.gmra.mrb[228].mxu1 %vm11883_vm6, %v11849_v55  ;;  %v11810_v4 = vmax.f32 %v11746_v36, 0.0 }
0x36d9   : > { %v11745_v16 = vadd.f32 %v20544_v62, %v11617_v34  ;;  %v11808_v54 = vmax.f32 %v11744_v27, 0.0 }
0x36da   : > { %v11811_v21 = vmax.f32 %v11747_v30, 0.0 }
0x36db   : > { %v11809_v32 = vmax.f32 %v11745_v16, 0.0  ;;  %v20648_v16 = vld [vmem:[%s20959_s10] ss:$0 sm:$0xff] }
0x36dc   : > { %v11851_v51 = vpack.c.bf16 %v11811_v21, %v11810_v4 }
0x36dd   : > { %v11850_v40 = vpack.c.bf16 %v11809_v32, %v11808_v54  ;;  %v16616_v60 = vpop.f32.mrb[244].mxu0 }
0x36de   : > { %v11750_v53 = vadd.f32 %v16616_v60, %v20544_v62  ;;  %v11630_v45 = vpop.f32.mrb[245].mxu0 }
0x36df   : > { %v11748_v56 = vadd.f32 %v20544_v62, %v11630_v45  ;;  %v16617_v59 = vpop.f32.mrb[246].mxu0  ;;  %16678 = vmatprep.mubr.msk.bf16.mxu1 %vm11883_vm6, %v11850_v40 }
0x36e0   : > { %v11751_v8 = vadd.f32 %v16617_v59, %v20544_v62  ;;  %v11633_v33 = vpop.f32.mrb[247].mxu0  ;;  %16679 = vmatmul.mubr.msk.bf16.gmra.mrb[232].mxu1 %vm11883_vm6, %v11851_v51  ;;  %v11814_v42 = vmax.f32 %v11750_v53, 0.0 }
0x36e1   : > { %v11749_v17 = vadd.f32 %v20544_v62, %v11633_v33  ;;  %v11812_v1 = vmax.f32 %v11748_v56, 0.0 }
0x36e2   : > { %v11815_v23 = vmax.f32 %v11751_v8, 0.0 }
0x36e3   : > { %v11813_v52 = vmax.f32 %v11749_v17, 0.0 }
0x36e4   : > { %v11853_v37 = vpack.c.bf16 %v11815_v23, %v11814_v42 }
0x36e5   : > { %v11852_v0 = vpack.c.bf16 %v11813_v52, %v11812_v1  ;;  %v16620_v63 = vpop.f32.mrb[248].mxu0 }
0x36e6   : > { %v11754_v35 = vadd.f32 %v16620_v63, %v20544_v62  ;;  %v11646_v31 = vpop.f32.mrb[249].mxu0 }
0x36e7   : > { %v11752_v19 = vadd.f32 %v20544_v62, %v11646_v31  ;;  %v16621_v50 = vpop.f32.mrb[250].mxu0  ;;  %16682 = vmatprep.mubr.msk.bf16.mxu1 %vm11883_vm6, %v11852_v0 }
0x36e8   : > { %v11755_v5 = vadd.f32 %v16621_v50, %v20544_v62  ;;  %v11649_v14 = vpop.f32.mrb[251].mxu0  ;;  %16683 = vmatmul.mubr.msk.bf16.gmra.mrb[236].mxu1 %vm11883_vm6, %v11853_v37  ;;  %v11818_v2 = vmax.f32 %v11754_v35, 0.0 }
0x36e9   : > { %v11753_v43 = vadd.f32 %v20544_v62, %v11649_v14  ;;  %v11816_v22 = vmax.f32 %v11752_v19, 0.0 }
0x36ea   : > { %v11819_v44 = vmax.f32 %v11755_v5, 0.0 }
0x36eb   : > { %v11817_v20 = vmax.f32 %v11753_v43, 0.0 }
0x36ec   : > { %v11855_v11 = vpack.c.bf16 %v11819_v44, %v11818_v2 }
0x36ed   : > { %v11854_v58 = vpack.c.bf16 %v11817_v20, %v11816_v22  ;;  %v16624_v48 = vpop.f32.mrb[252].mxu0 }
0x36ee   : > { %v11758_v13 = vadd.f32 %v16624_v48, %v20544_v62  ;;  %v11662_v47 = vpop.f32.mrb[253].mxu0 }
0x36ef   : > { %v11756_v10 = vadd.f32 %v20544_v62, %v11662_v47  ;;  %v16625_v39 = vpop.f32.mrb[254].mxu0  ;;  %16686 = vmatprep.mubr.msk.bf16.mxu1 %vm11883_vm6, %v11854_v58 }
0x36f0   : > { %v11759_v24 = vadd.f32 %v16625_v39, %v20544_v62  ;;  %v11665_v38 = vpop.f32.mrb[255].mxu0  ;;  %16687 = vmatmul.mubr.msk.bf16.gmra.mrb[240].mxu1 %vm11883_vm6, %v11855_v11  ;;  %v11822_v28 = vmax.f32 %v11758_v13, 0.0 }
0x36f1   : > { %v11757_v3 = vadd.f32 %v20544_v62, %v11665_v38  ;;  %v11820_v7 = vmax.f32 %v11756_v10, 0.0 }
0x36f2   : > { %v11823_v49 = vmax.f32 %v11759_v24, 0.0 }
0x36f3   : > { %v11821_v6 = vmax.f32 %v11757_v3, 0.0 }
0x36f4   : > { %v11857_v15 = vpack.c.bf16 %v11823_v49, %v11822_v28 }
0x36f5   : > { %v11856_v26 = vpack.c.bf16 %v11821_v6, %v11820_v7  ;;  %v16628_v61 = vpop.f32.mrb[0].mxu0 }
0x36f6   : > { %v11762_v18 = vadd.f32 %v16628_v61, %v20544_v62  ;;  %v11678_v41 = vpop.f32.mrb[1].mxu0 }
0x36f7   : > { %v11760_v29 = vadd.f32 %v20544_v62, %v11678_v41  ;;  %v16629_v9 = vpop.f32.mrb[2].mxu0  ;;  %16690 = vmatprep.mubr.msk.bf16.mxu1 %vm11883_vm6, %v11856_v26 }
0x36f8   : > { %v11763_v55 = vadd.f32 %v16629_v9, %v20544_v62  ;;  %v11681_v57 = vpop.f32.mrb[3].mxu0  ;;  %16691 = vmatmul.mubr.msk.bf16.gmra.mrb[244].mxu1 %vm11883_vm6, %v11857_v15  ;;  %v11826_v36 = vmax.f32 %v11762_v18, 0.0 }
0x36f9   : > { %v11761_v25 = vadd.f32 %v20544_v62, %v11681_v57  ;;  %v11824_v27 = vmax.f32 %v11760_v29, 0.0 }
0x36fa   : > { %v11827_v46 = vmax.f32 %v11763_v55, 0.0 }
0x36fb   : > { %v11825_v12 = vmax.f32 %v11761_v25, 0.0 }
0x36fc   : > { %v11859_v30 = vpack.c.bf16 %v11827_v46, %v11826_v36 }
0x36fd   : > { %v11858_v34 = vpack.c.bf16 %v11825_v12, %v11824_v27 }
0x36ff   : > { %16694 = vmatprep.mubr.msk.bf16.mxu1 %vm11883_vm6, %v11858_v34 }
0x3700   : > { %16695 = vmatmul.mubr.msk.bf16.gmra.mrb[248].mxu1 %vm11883_vm6, %v11859_v30 }
0x375b   : > { %v16636_v4 = vpop.f32.mrb[188].mxu1 }
0x375c   : > { %v12023_v21 = vadd.f32 %v16636_v4, %v20648_v16  ;;  %v12014_v54 = vpop.f32.mrb[189].mxu1 }
0x375d   : > { %v12015_v62 = vadd.f32 %v20648_v16, %v12014_v54  ;;  %v16637_v32 = vpop.f32.mrb[190].mxu1 }
0x375e   : > { %v12026_v51 = vadd.f32 %v16637_v32, %v20648_v16  ;;  %v12017_v40 = vpop.f32.mrb[191].mxu1  ;;  %v12271_v53 = vmax.f32 %v12023_v21, 0.0 }
0x375f   : > { %v12018_v60 = vadd.f32 %v20648_v16, %v12017_v40  ;;  %v12269_v56 = vmax.f32 %v12015_v62, 0.0 }
0x3760   : > { %v12272_v45 = vmax.f32 %v12026_v51, 0.0 }
0x3761   : > { %v12270_v59 = vmax.f32 %v12018_v60, 0.0 }
0x3762   : > { %v12334_v8 = vpack.c.bf16 %v12272_v45, %v12271_v53 }
0x3763   : > { %v12333_v33 = vpack.c.bf16 %v12270_v59, %v12269_v56  ;;  %v16640_v17 = vpop.f32.mrb[192].mxu1 }
0x3764   : > { %v12039_v42 = vadd.f32 %v16640_v17, %v20648_v16  ;;  %v12030_v23 = vpop.f32.mrb[193].mxu1 }
0x3765   : > { %v12031_v1 = vadd.f32 %v20648_v16, %v12030_v23  ;;  %v16641_v52 = vpop.f32.mrb[194].mxu1  ;;  %16702 = vmatprep.mubr.msk.bf16.mxu1 %vm11883_vm6, %v12333_v33 }
0x3766   : > { %v12042_v37 = vadd.f32 %v16641_v52, %v20648_v16  ;;  %v12033_v0 = vpop.f32.mrb[195].mxu1  ;;  %16703 = vmatmul.mubr.msk.bf16.vlgmr.msra.gmra.mrb[252].mxu1 %vm11883_vm6, %v12334_v8  ;;  %v12275_v35 = vmax.f32 %v12039_v42, 0.0 }
0x3767   : > { %v12034_v63 = vadd.f32 %v20648_v16, %v12033_v0  ;;  %v12273_v19 = vmax.f32 %v12031_v1, 0.0 }
0x3768   : > { %v12276_v31 = vmax.f32 %v12042_v37, 0.0 }
0x3769   : > { %v12274_v50 = vmax.f32 %v12034_v63, 0.0 }
0x376a   : > { %v12336_v5 = vpack.c.bf16 %v12276_v31, %v12275_v35 }
0x376b   : > { %v12335_v14 = vpack.c.bf16 %v12274_v50, %v12273_v19  ;;  %v16644_v43 = vpop.f32.mrb[196].mxu1 }
0x376c   : > { %v12055_v2 = vadd.f32 %v16644_v43, %v20648_v16  ;;  %v12046_v44 = vpop.f32.mrb[197].mxu1 }
0x376d   : > { %v12047_v22 = vadd.f32 %v20648_v16, %v12046_v44  ;;  %v16645_v20 = vpop.f32.mrb[198].mxu1  ;;  %16706 = vmatprep.mubr.msk.bf16.mxu1 %vm11883_vm6, %v12335_v14 }
0x376e   : > { %v12058_v11 = vadd.f32 %v16645_v20, %v20648_v16  ;;  %v12049_v58 = vpop.f32.mrb[199].mxu1  ;;  %16707 = vmatmul.mubr.msk.bf16.gmra.mrb[0].mxu1 %vm11883_vm6, %v12336_v5  ;;  %v12279_v13 = vmax.f32 %v12055_v2, 0.0 }
0x376f   : > { %v12050_v48 = vadd.f32 %v20648_v16, %v12049_v58  ;;  %v12277_v10 = vmax.f32 %v12047_v22, 0.0 }
0x3770   : > { %v12280_v47 = vmax.f32 %v12058_v11, 0.0 }
0x3771   : > { %v12278_v39 = vmax.f32 %v12050_v48, 0.0 }
0x3772   : > { %v12338_v24 = vpack.c.bf16 %v12280_v47, %v12279_v13 }
0x3773   : > { %v12337_v38 = vpack.c.bf16 %v12278_v39, %v12277_v10  ;;  %v16648_v3 = vpop.f32.mrb[200].mxu1 }
0x3774   : > { %v12071_v28 = vadd.f32 %v16648_v3, %v20648_v16  ;;  %v12062_v49 = vpop.f32.mrb[201].mxu1 }
0x3775   : > { %v12063_v7 = vadd.f32 %v20648_v16, %v12062_v49  ;;  %v16649_v6 = vpop.f32.mrb[202].mxu1  ;;  %16710 = vmatprep.mubr.msk.bf16.mxu1 %vm11883_vm6, %v12337_v38 }
0x3776   : > { %v12074_v15 = vadd.f32 %v16649_v6, %v20648_v16  ;;  %v12065_v26 = vpop.f32.mrb[203].mxu1  ;;  %16711 = vmatmul.mubr.msk.bf16.gmra.mrb[4].mxu1 %vm11883_vm6, %v12338_v24  ;;  %v12283_v18 = vmax.f32 %v12071_v28, 0.0 }
0x3777   : > { %v12066_v61 = vadd.f32 %v20648_v16, %v12065_v26  ;;  %v12281_v29 = vmax.f32 %v12063_v7, 0.0 }
0x3778   : > { %v12284_v41 = vmax.f32 %v12074_v15, 0.0 }
0x3779   : > { %v12282_v9 = vmax.f32 %v12066_v61, 0.0 }
0x377a   : > { %v12340_v55 = vpack.c.bf16 %v12284_v41, %v12283_v18 }
0x377b   : > { %v12339_v57 = vpack.c.bf16 %v12282_v9, %v12281_v29  ;;  %v16652_v25 = vpop.f32.mrb[204].mxu1 }
0x377c   : > { %v12087_v36 = vadd.f32 %v16652_v25, %v20648_v16  ;;  %v12078_v46 = vpop.f32.mrb[205].mxu1 }
0x377d   : > { %v12079_v27 = vadd.f32 %v20648_v16, %v12078_v46  ;;  %v16653_v12 = vpop.f32.mrb[206].mxu1  ;;  %16714 = vmatprep.mubr.msk.bf16.mxu1 %vm11883_vm6, %v12339_v57 }
0x377e   : > { %v12090_v30 = vadd.f32 %v16653_v12, %v20648_v16  ;;  %v12081_v34 = vpop.f32.mrb[207].mxu1  ;;  %16715 = vmatmul.mubr.msk.bf16.gmra.mrb[8].mxu1 %vm11883_vm6, %v12340_v55  ;;  %v12287_v21 = vmax.f32 %v12087_v36, 0.0 }
0x377f   : > { %v12082_v4 = vadd.f32 %v20648_v16, %v12081_v34  ;;  %v12285_v62 = vmax.f32 %v12079_v27, 0.0 }
0x3780   : > { %v12288_v54 = vmax.f32 %v12090_v30, 0.0 }
0x3781   : > { %v12286_v32 = vmax.f32 %v12082_v4, 0.0 }
0x3782   : > { %v12342_v51 = vpack.c.bf16 %v12288_v54, %v12287_v21 }
0x3783   : > { %v12341_v40 = vpack.c.bf16 %v12286_v32, %v12285_v62  ;;  %v16656_v60 = vpop.f32.mrb[208].mxu1 }
0x3784   : > { %v12103_v53 = vadd.f32 %v16656_v60, %v20648_v16  ;;  %v12094_v45 = vpop.f32.mrb[209].mxu1 }
0x3785   : > { %v12095_v56 = vadd.f32 %v20648_v16, %v12094_v45  ;;  %v16657_v59 = vpop.f32.mrb[210].mxu1  ;;  %16718 = vmatprep.mubr.msk.bf16.mxu1 %vm11883_vm6, %v12341_v40 }
0x3786   : > { %v12106_v8 = vadd.f32 %v16657_v59, %v20648_v16  ;;  %v12097_v33 = vpop.f32.mrb[211].mxu1  ;;  %16719 = vmatmul.mubr.msk.bf16.gmra.mrb[12].mxu1 %vm11883_vm6, %v12342_v51  ;;  %v12291_v42 = vmax.f32 %v12103_v53, 0.0 }
0x3787   : > { %v12098_v17 = vadd.f32 %v20648_v16, %v12097_v33  ;;  %v12289_v1 = vmax.f32 %v12095_v56, 0.0 }
0x3788   : > { %v12292_v23 = vmax.f32 %v12106_v8, 0.0 }
0x3789   : > { %v12290_v52 = vmax.f32 %v12098_v17, 0.0 }
0x378a   : > { %v12344_v37 = vpack.c.bf16 %v12292_v23, %v12291_v42 }
0x378b   : > { %v12343_v0 = vpack.c.bf16 %v12290_v52, %v12289_v1  ;;  %v16660_v63 = vpop.f32.mrb[212].mxu1 }
0x378c   : > { %v12119_v35 = vadd.f32 %v16660_v63, %v20648_v16  ;;  %v12110_v31 = vpop.f32.mrb[213].mxu1 }
0x378d   : > { %v12111_v19 = vadd.f32 %v20648_v16, %v12110_v31  ;;  %v16661_v50 = vpop.f32.mrb[214].mxu1  ;;  %16722 = vmatprep.mubr.msk.bf16.mxu1 %vm11883_vm6, %v12343_v0 }
0x378e   : > { %v12122_v5 = vadd.f32 %v16661_v50, %v20648_v16  ;;  %v12113_v14 = vpop.f32.mrb[215].mxu1  ;;  %16723 = vmatmul.mubr.msk.bf16.gmra.mrb[16].mxu1 %vm11883_vm6, %v12344_v37  ;;  %v12295_v2 = vmax.f32 %v12119_v35, 0.0 }
0x378f   : > { %v12114_v43 = vadd.f32 %v20648_v16, %v12113_v14  ;;  %v12293_v22 = vmax.f32 %v12111_v19, 0.0 }
0x3790   : > { %v12296_v44 = vmax.f32 %v12122_v5, 0.0 }
0x3791   : > { %v12294_v20 = vmax.f32 %v12114_v43, 0.0 }
0x3792   : > { %v12346_v11 = vpack.c.bf16 %v12296_v44, %v12295_v2 }
0x3793   : > { %v12345_v58 = vpack.c.bf16 %v12294_v20, %v12293_v22  ;;  %v16664_v48 = vpop.f32.mrb[216].mxu1 }
0x3794   : > { %v12135_v13 = vadd.f32 %v16664_v48, %v20648_v16  ;;  %v12126_v47 = vpop.f32.mrb[217].mxu1 }
0x3795   : > { %v12127_v10 = vadd.f32 %v20648_v16, %v12126_v47  ;;  %v16665_v39 = vpop.f32.mrb[218].mxu1  ;;  %16726 = vmatprep.mubr.msk.bf16.mxu1 %vm11883_vm6, %v12345_v58 }
0x3796   : > { %v12138_v24 = vadd.f32 %v16665_v39, %v20648_v16  ;;  %v12129_v38 = vpop.f32.mrb[219].mxu1  ;;  %16727 = vmatmul.mubr.msk.bf16.gmra.mrb[20].mxu1 %vm11883_vm6, %v12346_v11  ;;  %v12299_v28 = vmax.f32 %v12135_v13, 0.0 }
0x3797   : > { %v12130_v3 = vadd.f32 %v20648_v16, %v12129_v38  ;;  %v12297_v7 = vmax.f32 %v12127_v10, 0.0 }
0x3798   : > { %v12300_v49 = vmax.f32 %v12138_v24, 0.0 }
0x3799   : > { %v12298_v6 = vmax.f32 %v12130_v3, 0.0 }
0x379a   : > { %v12348_v15 = vpack.c.bf16 %v12300_v49, %v12299_v28 }
0x379b   : > { %v12347_v26 = vpack.c.bf16 %v12298_v6, %v12297_v7  ;;  %v16668_v61 = vpop.f32.mrb[220].mxu1 }
0x379c   : > { %v12151_v18 = vadd.f32 %v16668_v61, %v20648_v16  ;;  %v12142_v41 = vpop.f32.mrb[221].mxu1 }
0x379d   : > { %v12143_v29 = vadd.f32 %v20648_v16, %v12142_v41  ;;  %v16669_v9 = vpop.f32.mrb[222].mxu1  ;;  %16730 = vmatprep.mubr.msk.bf16.mxu1 %vm11883_vm6, %v12347_v26 }
0x379e   : > { %v12154_v55 = vadd.f32 %v16669_v9, %v20648_v16  ;;  %v12145_v57 = vpop.f32.mrb[223].mxu1  ;;  %16731 = vmatmul.mubr.msk.bf16.gmra.mrb[24].mxu1 %vm11883_vm6, %v12348_v15  ;;  %v12303_v36 = vmax.f32 %v12151_v18, 0.0 }
0x379f   : > { %v12146_v25 = vadd.f32 %v20648_v16, %v12145_v57  ;;  %v12301_v27 = vmax.f32 %v12143_v29, 0.0 }
0x37a0   : > { %v12304_v46 = vmax.f32 %v12154_v55, 0.0 }
0x37a1   : > { %v12302_v12 = vmax.f32 %v12146_v25, 0.0 }
0x37a2   : > { %v12350_v30 = vpack.c.bf16 %v12304_v46, %v12303_v36 }
0x37a3   : > { %v12349_v34 = vpack.c.bf16 %v12302_v12, %v12301_v27  ;;  %v16672_v4 = vpop.f32.mrb[224].mxu1 }
0x37a4   : > { %v12167_v21 = vadd.f32 %v16672_v4, %v20648_v16  ;;  %v12158_v54 = vpop.f32.mrb[225].mxu1 }
0x37a5   : > { %v12159_v62 = vadd.f32 %v20648_v16, %v12158_v54  ;;  %v16673_v32 = vpop.f32.mrb[226].mxu1  ;;  %16734 = vmatprep.mubr.msk.bf16.mxu1 %vm11883_vm6, %v12349_v34 }
0x37a6   : > { %v12170_v51 = vadd.f32 %v16673_v32, %v20648_v16  ;;  %v12161_v40 = vpop.f32.mrb[227].mxu1  ;;  %16735 = vmatmul.mubr.msk.bf16.gmra.mrb[28].mxu1 %vm11883_vm6, %v12350_v30  ;;  %v12307_v53 = vmax.f32 %v12167_v21, 0.0 }
0x37a7   : > { %v12162_v60 = vadd.f32 %v20648_v16, %v12161_v40  ;;  %v12305_v56 = vmax.f32 %v12159_v62, 0.0 }
0x37a8   : > { %v12308_v45 = vmax.f32 %v12170_v51, 0.0 }
0x37a9   : > { %v12306_v59 = vmax.f32 %v12162_v60, 0.0 }
0x37aa   : > { %v12352_v8 = vpack.c.bf16 %v12308_v45, %v12307_v53 }
0x37ab   : > { %v12351_v33 = vpack.c.bf16 %v12306_v59, %v12305_v56  ;;  %v16676_v17 = vpop.f32.mrb[228].mxu1 }
0x37ac   : > { %v12183_v42 = vadd.f32 %v16676_v17, %v20648_v16  ;;  %v12174_v23 = vpop.f32.mrb[229].mxu1 }
0x37ad   : > { %v12175_v1 = vadd.f32 %v20648_v16, %v12174_v23  ;;  %v16677_v52 = vpop.f32.mrb[230].mxu1  ;;  %16738 = vmatprep.mubr.msk.bf16.mxu1 %vm11883_vm6, %v12351_v33 }
0x37ae   : > { %v12186_v37 = vadd.f32 %v16677_v52, %v20648_v16  ;;  %v12177_v0 = vpop.f32.mrb[231].mxu1  ;;  %16739 = vmatmul.mubr.msk.bf16.gmra.mrb[32].mxu1 %vm11883_vm6, %v12352_v8  ;;  %v12311_v35 = vmax.f32 %v12183_v42, 0.0 }
0x37af   : > { %v12178_v63 = vadd.f32 %v20648_v16, %v12177_v0  ;;  %v12309_v19 = vmax.f32 %v12175_v1, 0.0 }
0x37b0   : > { %v12312_v31 = vmax.f32 %v12186_v37, 0.0 }
0x37b1   : > { %v12310_v50 = vmax.f32 %v12178_v63, 0.0 }
0x37b2   : > { %v12354_v5 = vpack.c.bf16 %v12312_v31, %v12311_v35 }
0x37b3   : > { %v12353_v14 = vpack.c.bf16 %v12310_v50, %v12309_v19  ;;  %v16680_v43 = vpop.f32.mrb[232].mxu1 }
0x37b4   : > { %v12199_v2 = vadd.f32 %v16680_v43, %v20648_v16  ;;  %v12190_v44 = vpop.f32.mrb[233].mxu1 }
0x37b5   : > { %v12191_v22 = vadd.f32 %v20648_v16, %v12190_v44  ;;  %v16681_v20 = vpop.f32.mrb[234].mxu1  ;;  %16742 = vmatprep.mubr.msk.bf16.mxu1 %vm11883_vm6, %v12353_v14 }
0x37b6   : > { %v12202_v11 = vadd.f32 %v16681_v20, %v20648_v16  ;;  %v12193_v58 = vpop.f32.mrb[235].mxu1  ;;  %16743 = vmatmul.mubr.msk.bf16.gmra.mrb[36].mxu1 %vm11883_vm6, %v12354_v5  ;;  %v12315_v13 = vmax.f32 %v12199_v2, 0.0 }
0x37b7   : > { %v12194_v48 = vadd.f32 %v20648_v16, %v12193_v58  ;;  %v12313_v10 = vmax.f32 %v12191_v22, 0.0 }
0x37b8   : > { %v12316_v47 = vmax.f32 %v12202_v11, 0.0 }
0x37b9   : > { %v12314_v39 = vmax.f32 %v12194_v48, 0.0  ;;  %v20747_v48 = vld [vmem:[#allocation3] ss:$0 sm:$0xff] }
0x37ba   : > { %v12356_v24 = vpack.c.bf16 %v12316_v47, %v12315_v13 }
0x37bb   : > { %v12355_v38 = vpack.c.bf16 %v12314_v39, %v12313_v10  ;;  %v16684_v3 = vpop.f32.mrb[236].mxu1 }
0x37bc   : > { %v12215_v28 = vadd.f32 %v16684_v3, %v20648_v16  ;;  %v12206_v49 = vpop.f32.mrb[237].mxu1 }
0x37bd   : > { %v12207_v7 = vadd.f32 %v20648_v16, %v12206_v49  ;;  %v16685_v6 = vpop.f32.mrb[238].mxu1  ;;  %16746 = vmatprep.mubr.msk.bf16.mxu1 %vm11883_vm6, %v12355_v38 }
0x37be   : > { %v12218_v15 = vadd.f32 %v16685_v6, %v20648_v16  ;;  %v12209_v26 = vpop.f32.mrb[239].mxu1  ;;  %16747 = vmatmul.mubr.msk.bf16.gmra.mrb[40].mxu1 %vm11883_vm6, %v12356_v24  ;;  %v12319_v18 = vmax.f32 %v12215_v28, 0.0 }
0x37bf   : > { %v12210_v61 = vadd.f32 %v20648_v16, %v12209_v26  ;;  %v12317_v29 = vmax.f32 %v12207_v7, 0.0 }
0x37c0   : > { %v12320_v41 = vmax.f32 %v12218_v15, 0.0 }
0x37c1   : > { %v12318_v9 = vmax.f32 %v12210_v61, 0.0 }
0x37c2   : > { %v12358_v55 = vpack.c.bf16 %v12320_v41, %v12319_v18 }
0x37c3   : > { %v12357_v57 = vpack.c.bf16 %v12318_v9, %v12317_v29  ;;  %v16688_v25 = vpop.f32.mrb[240].mxu1 }
0x37c4   : > { %v12231_v36 = vadd.f32 %v16688_v25, %v20648_v16  ;;  %v12222_v46 = vpop.f32.mrb[241].mxu1 }
0x37c5   : > { %v12223_v27 = vadd.f32 %v20648_v16, %v12222_v46  ;;  %v16689_v12 = vpop.f32.mrb[242].mxu1  ;;  %16750 = vmatprep.mubr.msk.bf16.mxu1 %vm11883_vm6, %v12357_v57 }
0x37c6   : > { %v12234_v30 = vadd.f32 %v16689_v12, %v20648_v16  ;;  %v12225_v34 = vpop.f32.mrb[243].mxu1  ;;  %16751 = vmatmul.mubr.msk.bf16.gmra.mrb[44].mxu1 %vm11883_vm6, %v12358_v55  ;;  %v12323_v21 = vmax.f32 %v12231_v36, 0.0 }
0x37c7   : > { %v12226_v4 = vadd.f32 %v20648_v16, %v12225_v34  ;;  %v12321_v62 = vmax.f32 %v12223_v27, 0.0 }
0x37c8   : > { %v12324_v54 = vmax.f32 %v12234_v30, 0.0 }
0x37c9   : > { %v12322_v32 = vmax.f32 %v12226_v4, 0.0 }
0x37ca   : > { %v12360_v51 = vpack.c.bf16 %v12324_v54, %v12323_v21 }
0x37cb   : > { %v12359_v40 = vpack.c.bf16 %v12322_v32, %v12321_v62  ;;  %v16692_v60 = vpop.f32.mrb[244].mxu1 }
0x37cc   : > { %v12247_v53 = vadd.f32 %v16692_v60, %v20648_v16  ;;  %v12238_v45 = vpop.f32.mrb[245].mxu1 }
0x37cd   : > { %v12239_v56 = vadd.f32 %v20648_v16, %v12238_v45  ;;  %v16693_v59 = vpop.f32.mrb[246].mxu1  ;;  %16754 = vmatprep.mubr.msk.bf16.mxu1 %vm11883_vm6, %v12359_v40 }
0x37ce   : > { %v12250_v8 = vadd.f32 %v16693_v59, %v20648_v16  ;;  %v12241_v33 = vpop.f32.mrb[247].mxu1  ;;  %16755 = vmatmul.mubr.msk.bf16.gmra.mrb[48].mxu1 %vm11883_vm6, %v12360_v51  ;;  %v12327_v42 = vmax.f32 %v12247_v53, 0.0 }
0x37cf   : > { %v12242_v17 = vadd.f32 %v20648_v16, %v12241_v33  ;;  %v12325_v1 = vmax.f32 %v12239_v56, 0.0 }
0x37d0   : > { %v12328_v23 = vmax.f32 %v12250_v8, 0.0 }
0x37d1   : > { %v12326_v52 = vmax.f32 %v12242_v17, 0.0 }
0x37d2   : > { %v12362_v37 = vpack.c.bf16 %v12328_v23, %v12327_v42 }
0x37d3   : > { %v12361_v0 = vpack.c.bf16 %v12326_v52, %v12325_v1  ;;  %v16696_v63 = vpop.f32.mrb[248].mxu1 }
0x37d4   : > { %v12263_v35 = vadd.f32 %v16696_v63, %v20648_v16  ;;  %v12254_v31 = vpop.f32.mrb[249].mxu1 }
0x37d5   : > { %v12255_v19 = vadd.f32 %v20648_v16, %v12254_v31  ;;  %v16697_v50 = vpop.f32.mrb[250].mxu1  ;;  %16758 = vmatprep.mubr.msk.bf16.mxu1 %vm11883_vm6, %v12361_v0 }
0x37d6   : > { %v12266_v5 = vadd.f32 %v16697_v50, %v20648_v16  ;;  %v12257_v14 = vpop.f32.mrb[251].mxu1  ;;  %16759 = vmatmul.mubr.msk.bf16.gmra.mrb[52].mxu1 %vm11883_vm6, %v12362_v37  ;;  %v12331_v2 = vmax.f32 %v12263_v35, 0.0 }
0x37d7   : > { %v12258_v43 = vadd.f32 %v20648_v16, %v12257_v14  ;;  %v12329_v22 = vmax.f32 %v12255_v19, 0.0 }
0x37d8   : > { %v12332_v44 = vmax.f32 %v12266_v5, 0.0 }
0x37d9   : > { %v12330_v20 = vmax.f32 %v12258_v43, 0.0 }
0x37da   : > { %v12364_v11 = vpack.c.bf16 %v12332_v44, %v12331_v2 }
0x37db   : > { %v12363_v58 = vpack.c.bf16 %v12330_v20, %v12329_v22 }
0x37dd   : > { %16762 = vmatprep.mubr.msk.bf16.mxu1 %vm11883_vm6, %v12363_v58 }
0x37de   : > { %16763 = vmatmul.mubr.msk.bf16.gmra.mrb[56].mxu1 %vm11883_vm6, %v12364_v11 }
0x3839   : > { %v16704_v16 = vpop.f32.mrb[252].mxu1 }
0x383a   : > { %v12527_v13 = vadd.f32 %v16704_v16, %v20747_v48  ;;  %v12518_v47 = vpop.f32.mrb[253].mxu1 }
0x383b   : > { %v12519_v10 = vadd.f32 %v20747_v48, %v12518_v47  ;;  %v16705_v39 = vpop.f32.mrb[254].mxu1 }
0x383c   : > { %12776 = vst.msk [vmem:[%s20752_s20 + $0x10] sm:$0xff] %vm12773_vm7, %v12527_v13  ;;  %v12530_v24 = vadd.f32 %v16705_v39, %v20747_v48  ;;  %v12521_v38 = vpop.f32.mrb[255].mxu1 }
0x383d   : > { %12774 = vst.msk [vmem:[%s20752_s20] sm:$0xff] %vm12773_vm7, %v12519_v10  ;;  %v12522_v3 = vadd.f32 %v20747_v48, %v12521_v38 }
0x383e   : > { %12777 = vst.msk [vmem:[%s20752_s20 + $0x18] sm:$0xff] %vm12773_vm7, %v12530_v24 }
0x383f   : > { %12775 = vst.msk [vmem:[%s20752_s20 + $0x8] sm:$0xff] %vm12773_vm7, %v12522_v3 }
0x3841   : > { %v16708_v28 = vpop.f32.mrb[0].mxu1 }
0x3842   : > { %v12543_v49 = vadd.f32 %v16708_v28, %v20747_v48  ;;  %v12534_v7 = vpop.f32.mrb[1].mxu1 }
0x3843   : > { %v12535_v6 = vadd.f32 %v20747_v48, %v12534_v7  ;;  %v16709_v15 = vpop.f32.mrb[2].mxu1 }
0x3844   : > { %12780 = vst.msk [vmem:[%s20752_s20 + $0x30] sm:$0xff] %vm12773_vm7, %v12543_v49  ;;  %v12546_v26 = vadd.f32 %v16709_v15, %v20747_v48  ;;  %v12537_v61 = vpop.f32.mrb[3].mxu1 }
0x3845   : > { %12778 = vst.msk [vmem:[%s20752_s20 + $0x20] sm:$0xff] %vm12773_vm7, %v12535_v6  ;;  %v12538_v18 = vadd.f32 %v20747_v48, %v12537_v61 }
0x3846   : > { %12781 = vst.msk [vmem:[%s20752_s20 + $0x38] sm:$0xff] %vm12773_vm7, %v12546_v26 }
0x3847   : > { %12779 = vst.msk [vmem:[%s20752_s20 + $0x28] sm:$0xff] %vm12773_vm7, %v12538_v18 }
0x3849   : > { %v16712_v41 = vpop.f32.mrb[4].mxu1 }
0x384a   : > { %v12559_v29 = vadd.f32 %v16712_v41, %v20747_v48  ;;  %v12550_v9 = vpop.f32.mrb[5].mxu1 }
0x384b   : > { %v12551_v55 = vadd.f32 %v20747_v48, %v12550_v9  ;;  %v16713_v57 = vpop.f32.mrb[6].mxu1 }
0x384c   : > { %12784 = vst.msk [vmem:[%s20752_s20 + $0x50] sm:$0xff] %vm12773_vm7, %v12559_v29  ;;  %v12562_v25 = vadd.f32 %v16713_v57, %v20747_v48  ;;  %v12553_v36 = vpop.f32.mrb[7].mxu1 }
0x384d   : > { %12782 = vst.msk [vmem:[%s20752_s20 + $0x40] sm:$0xff] %vm12773_vm7, %v12551_v55  ;;  %v12554_v46 = vadd.f32 %v20747_v48, %v12553_v36 }
0x384e   : > { %12785 = vst.msk [vmem:[%s20752_s20 + $0x58] sm:$0xff] %vm12773_vm7, %v12562_v25 }
0x384f   : > { %12783 = vst.msk [vmem:[%s20752_s20 + $0x48] sm:$0xff] %vm12773_vm7, %v12554_v46 }
0x3851   : > { %v16716_v27 = vpop.f32.mrb[8].mxu1 }
0x3852   : > { %v12575_v12 = vadd.f32 %v16716_v27, %v20747_v48  ;;  %v12566_v30 = vpop.f32.mrb[9].mxu1 }
0x3853   : > { %v12567_v34 = vadd.f32 %v20747_v48, %v12566_v30  ;;  %v16717_v4 = vpop.f32.mrb[10].mxu1 }
0x3854   : > { %12788 = vst.msk [vmem:[%s20752_s20 + $0x70] sm:$0xff] %vm12773_vm7, %v12575_v12  ;;  %v12578_v21 = vadd.f32 %v16717_v4, %v20747_v48  ;;  %v12569_v54 = vpop.f32.mrb[11].mxu1 }
0x3855   : > { %12786 = vst.msk [vmem:[%s20752_s20 + $0x60] sm:$0xff] %vm12773_vm7, %v12567_v34  ;;  %v12570_v62 = vadd.f32 %v20747_v48, %v12569_v54 }
0x3856   : > { %12789 = vst.msk [vmem:[%s20752_s20 + $0x78] sm:$0xff] %vm12773_vm7, %v12578_v21 }
0x3857   : > { %12787 = vst.msk [vmem:[%s20752_s20 + $0x68] sm:$0xff] %vm12773_vm7, %v12570_v62 }
0x3859   : > { %v16720_v32 = vpop.f32.mrb[12].mxu1 }
0x385a   : > { %v12591_v51 = vadd.f32 %v16720_v32, %v20747_v48  ;;  %v12582_v40 = vpop.f32.mrb[13].mxu1 }
0x385b   : > { %v12583_v60 = vadd.f32 %v20747_v48, %v12582_v40  ;;  %v16721_v53 = vpop.f32.mrb[14].mxu1 }
0x385c   : > { %12792 = vst.msk [vmem:[%s20752_s20 + $0x90] sm:$0xff] %vm12773_vm7, %v12591_v51  ;;  %v12594_v45 = vadd.f32 %v16721_v53, %v20747_v48  ;;  %v12585_v56 = vpop.f32.mrb[15].mxu1 }
0x385d   : > { %12790 = vst.msk [vmem:[%s20752_s20 + $0x80] sm:$0xff] %vm12773_vm7, %v12583_v60  ;;  %v12586_v59 = vadd.f32 %v20747_v48, %v12585_v56 }
0x385e   : > { %12793 = vst.msk [vmem:[%s20752_s20 + $0x98] sm:$0xff] %vm12773_vm7, %v12594_v45 }
0x385f   : > { %12791 = vst.msk [vmem:[%s20752_s20 + $0x88] sm:$0xff] %vm12773_vm7, %v12586_v59 }
0x3861   : > { %v16724_v8 = vpop.f32.mrb[16].mxu1 }
0x3862   : > { %v12607_v33 = vadd.f32 %v16724_v8, %v20747_v48  ;;  %v12598_v17 = vpop.f32.mrb[17].mxu1 }
0x3863   : > { %v12599_v42 = vadd.f32 %v20747_v48, %v12598_v17  ;;  %v16725_v23 = vpop.f32.mrb[18].mxu1 }
0x3864   : > { %12796 = vst.msk [vmem:[%s20752_s20 + $0xb0] sm:$0xff] %vm12773_vm7, %v12607_v33  ;;  %v12610_v1 = vadd.f32 %v16725_v23, %v20747_v48  ;;  %v12601_v52 = vpop.f32.mrb[19].mxu1 }
0x3865   : > { %12794 = vst.msk [vmem:[%s20752_s20 + $0xa0] sm:$0xff] %vm12773_vm7, %v12599_v42  ;;  %v12602_v37 = vadd.f32 %v20747_v48, %v12601_v52 }
0x3866   : > { %12797 = vst.msk [vmem:[%s20752_s20 + $0xb8] sm:$0xff] %vm12773_vm7, %v12610_v1 }
0x3867   : > { %12795 = vst.msk [vmem:[%s20752_s20 + $0xa8] sm:$0xff] %vm12773_vm7, %v12602_v37 }
0x3869   : > { %v16728_v0 = vpop.f32.mrb[20].mxu1 }
0x386a   : > { %v12623_v63 = vadd.f32 %v16728_v0, %v20747_v48  ;;  %v12614_v35 = vpop.f32.mrb[21].mxu1 }
0x386b   : > { %v12615_v31 = vadd.f32 %v20747_v48, %v12614_v35  ;;  %v16729_v19 = vpop.f32.mrb[22].mxu1 }
0x386c   : > { %12800 = vst.msk [vmem:[%s20752_s20 + $0xd0] sm:$0xff] %vm12773_vm7, %v12623_v63  ;;  %v12626_v50 = vadd.f32 %v16729_v19, %v20747_v48  ;;  %v12617_v5 = vpop.f32.mrb[23].mxu1 }
0x386d   : > { %12798 = vst.msk [vmem:[%s20752_s20 + $0xc0] sm:$0xff] %vm12773_vm7, %v12615_v31  ;;  %v12618_v14 = vadd.f32 %v20747_v48, %v12617_v5 }
0x386e   : > { %12801 = vst.msk [vmem:[%s20752_s20 + $0xd8] sm:$0xff] %vm12773_vm7, %v12626_v50 }
0x386f   : > { %12799 = vst.msk [vmem:[%s20752_s20 + $0xc8] sm:$0xff] %vm12773_vm7, %v12618_v14 }
0x3871   : > { %v16732_v43 = vpop.f32.mrb[24].mxu1 }
0x3872   : > { %v12639_v2 = vadd.f32 %v16732_v43, %v20747_v48  ;;  %v12630_v44 = vpop.f32.mrb[25].mxu1 }
0x3873   : > { %v12631_v22 = vadd.f32 %v20747_v48, %v12630_v44  ;;  %v16733_v20 = vpop.f32.mrb[26].mxu1 }
0x3874   : > { %12804 = vst.msk [vmem:[%s20752_s20 + $0xf0] sm:$0xff] %vm12773_vm7, %v12639_v2  ;;  %v12642_v11 = vadd.f32 %v16733_v20, %v20747_v48  ;;  %v12633_v58 = vpop.f32.mrb[27].mxu1 }
0x3875   : > { %12802 = vst.msk [vmem:[%s20752_s20 + $0xe0] sm:$0xff] %vm12773_vm7, %v12631_v22  ;;  %v12634_v16 = vadd.f32 %v20747_v48, %v12633_v58 }
0x3876   : > { %12805 = vst.msk [vmem:[%s20752_s20 + $0xf8] sm:$0xff] %vm12773_vm7, %v12642_v11 }
0x3877   : > { %12803 = vst.msk [vmem:[%s20752_s20 + $0xe8] sm:$0xff] %vm12773_vm7, %v12634_v16 }
0x3879   : > { %v16736_v13 = vpop.f32.mrb[28].mxu1 }
0x387a   : > { %v12655_v47 = vadd.f32 %v16736_v13, %v20747_v48  ;;  %v12646_v10 = vpop.f32.mrb[29].mxu1 }
0x387b   : > { %v12647_v39 = vadd.f32 %v20747_v48, %v12646_v10  ;;  %v16737_v24 = vpop.f32.mrb[30].mxu1 }
0x387c   : > { %12808 = vst.msk [vmem:[%s20752_s20 + $0x110] sm:$0xff] %vm12773_vm7, %v12655_v47  ;;  %v12658_v38 = vadd.f32 %v16737_v24, %v20747_v48  ;;  %v12649_v3 = vpop.f32.mrb[31].mxu1 }
0x387d   : > { %12806 = vst.msk [vmem:[%s20752_s20 + $0x100] sm:$0xff] %vm12773_vm7, %v12647_v39  ;;  %v12650_v28 = vadd.f32 %v20747_v48, %v12649_v3 }
0x387e   : > { %12809 = vst.msk [vmem:[%s20752_s20 + $0x118] sm:$0xff] %vm12773_vm7, %v12658_v38 }
0x387f   : > { %12807 = vst.msk [vmem:[%s20752_s20 + $0x108] sm:$0xff] %vm12773_vm7, %v12650_v28 }
0x3881   : > { %v16740_v49 = vpop.f32.mrb[32].mxu1 }
0x3882   : > { %v12671_v7 = vadd.f32 %v16740_v49, %v20747_v48  ;;  %v12662_v6 = vpop.f32.mrb[33].mxu1 }
0x3883   : > { %v12663_v15 = vadd.f32 %v20747_v48, %v12662_v6  ;;  %v16741_v26 = vpop.f32.mrb[34].mxu1 }
0x3884   : > { %12812 = vst.msk [vmem:[%s20752_s20 + $0x130] sm:$0xff] %vm12773_vm7, %v12671_v7  ;;  %v12674_v61 = vadd.f32 %v16741_v26, %v20747_v48  ;;  %v12665_v18 = vpop.f32.mrb[35].mxu1 }
0x3885   : > { %12810 = vst.msk [vmem:[%s20752_s20 + $0x120] sm:$0xff] %vm12773_vm7, %v12663_v15  ;;  %v12666_v41 = vadd.f32 %v20747_v48, %v12665_v18 }
0x3886   : > { %12813 = vst.msk [vmem:[%s20752_s20 + $0x138] sm:$0xff] %vm12773_vm7, %v12674_v61 }
0x3887   : > { %12811 = vst.msk [vmem:[%s20752_s20 + $0x128] sm:$0xff] %vm12773_vm7, %v12666_v41 }
0x3889   : > { %v16744_v29 = vpop.f32.mrb[36].mxu1 }
0x388a   : > { %v12687_v9 = vadd.f32 %v16744_v29, %v20747_v48  ;;  %v12678_v55 = vpop.f32.mrb[37].mxu1 }
0x388b   : > { %v12679_v57 = vadd.f32 %v20747_v48, %v12678_v55  ;;  %v16745_v25 = vpop.f32.mrb[38].mxu1 }
0x388c   : > { %12816 = vst.msk [vmem:[%s20752_s20 + $0x150] sm:$0xff] %vm12773_vm7, %v12687_v9  ;;  %v12690_v36 = vadd.f32 %v16745_v25, %v20747_v48  ;;  %v12681_v46 = vpop.f32.mrb[39].mxu1 }
0x388d   : > { %12814 = vst.msk [vmem:[%s20752_s20 + $0x140] sm:$0xff] %vm12773_vm7, %v12679_v57  ;;  %v12682_v27 = vadd.f32 %v20747_v48, %v12681_v46 }
0x388e   : > { %12817 = vst.msk [vmem:[%s20752_s20 + $0x158] sm:$0xff] %vm12773_vm7, %v12690_v36 }
0x388f   : > { %12815 = vst.msk [vmem:[%s20752_s20 + $0x148] sm:$0xff] %vm12773_vm7, %v12682_v27 }
0x3891   : > { %v16748_v12 = vpop.f32.mrb[40].mxu1 }
0x3892   : > { %v12703_v30 = vadd.f32 %v16748_v12, %v20747_v48  ;;  %v12694_v34 = vpop.f32.mrb[41].mxu1 }
0x3893   : > { %v12695_v4 = vadd.f32 %v20747_v48, %v12694_v34  ;;  %v16749_v21 = vpop.f32.mrb[42].mxu1 }
0x3894   : > { %12820 = vst.msk [vmem:[%s20752_s20 + $0x170] sm:$0xff] %vm12773_vm7, %v12703_v30  ;;  %v12706_v54 = vadd.f32 %v16749_v21, %v20747_v48  ;;  %v12697_v62 = vpop.f32.mrb[43].mxu1 }
0x3895   : > { %12818 = vst.msk [vmem:[%s20752_s20 + $0x160] sm:$0xff] %vm12773_vm7, %v12695_v4  ;;  %v12698_v32 = vadd.f32 %v20747_v48, %v12697_v62 }
0x3896   : > { %12821 = vst.msk [vmem:[%s20752_s20 + $0x178] sm:$0xff] %vm12773_vm7, %v12706_v54 }
0x3897   : > { %12819 = vst.msk [vmem:[%s20752_s20 + $0x168] sm:$0xff] %vm12773_vm7, %v12698_v32 }
0x3899   : > { %v16752_v51 = vpop.f32.mrb[44].mxu1 }
0x389a   : > { %v12719_v40 = vadd.f32 %v16752_v51, %v20747_v48  ;;  %v12710_v60 = vpop.f32.mrb[45].mxu1 }
0x389b   : > { %v12711_v53 = vadd.f32 %v20747_v48, %v12710_v60  ;;  %v16753_v45 = vpop.f32.mrb[46].mxu1 }
0x389c   : > { %12824 = vst.msk [vmem:[%s20752_s20 + $0x190] sm:$0xff] %vm12773_vm7, %v12719_v40  ;;  %v12722_v56 = vadd.f32 %v16753_v45, %v20747_v48  ;;  %v12713_v59 = vpop.f32.mrb[47].mxu1 }
0x389d   : > { %12822 = vst.msk [vmem:[%s20752_s20 + $0x180] sm:$0xff] %vm12773_vm7, %v12711_v53  ;;  %v12714_v8 = vadd.f32 %v20747_v48, %v12713_v59 }
0x389e   : > { %12825 = vst.msk [vmem:[%s20752_s20 + $0x198] sm:$0xff] %vm12773_vm7, %v12722_v56 }
0x389f   : > { %12823 = vst.msk [vmem:[%s20752_s20 + $0x188] sm:$0xff] %vm12773_vm7, %v12714_v8 }
0x38a1   : > { %v16756_v33 = vpop.f32.mrb[48].mxu1 }
0x38a2   : > { %v12735_v17 = vadd.f32 %v16756_v33, %v20747_v48  ;;  %v12726_v42 = vpop.f32.mrb[49].mxu1 }
0x38a3   : > { %v12727_v23 = vadd.f32 %v20747_v48, %v12726_v42  ;;  %v16757_v1 = vpop.f32.mrb[50].mxu1 }
0x38a4   : > { %12828 = vst.msk [vmem:[%s20752_s20 + $0x1b0] sm:$0xff] %vm12773_vm7, %v12735_v17  ;;  %v12738_v52 = vadd.f32 %v16757_v1, %v20747_v48  ;;  %v12729_v37 = vpop.f32.mrb[51].mxu1 }
0x38a5   : > { %12826 = vst.msk [vmem:[%s20752_s20 + $0x1a0] sm:$0xff] %vm12773_vm7, %v12727_v23  ;;  %v12730_v0 = vadd.f32 %v20747_v48, %v12729_v37 }
0x38a6   : > { %12829 = vst.msk [vmem:[%s20752_s20 + $0x1b8] sm:$0xff] %vm12773_vm7, %v12738_v52 }
0x38a7   : > { %12827 = vst.msk [vmem:[%s20752_s20 + $0x1a8] sm:$0xff] %vm12773_vm7, %v12730_v0 }
0x38a9   : > { %v16760_v63 = vpop.f32.mrb[52].mxu1 }
0x38aa   : > { %v12751_v35 = vadd.f32 %v16760_v63, %v20747_v48  ;;  %v12742_v31 = vpop.f32.mrb[53].mxu1 }
0x38ab   : > { %v12743_v19 = vadd.f32 %v20747_v48, %v12742_v31  ;;  %v16761_v50 = vpop.f32.mrb[54].mxu1 }
0x38ac   : > { %12832 = vst.msk [vmem:[%s20752_s20 + $0x1d0] sm:$0xff] %vm12773_vm7, %v12751_v35  ;;  %v12754_v5 = vadd.f32 %v16761_v50, %v20747_v48  ;;  %v12745_v14 = vpop.f32.mrb[55].mxu1 }
0x38ad   : > { %12830 = vst.msk [vmem:[%s20752_s20 + $0x1c0] sm:$0xff] %vm12773_vm7, %v12743_v19  ;;  %v12746_v43 = vadd.f32 %v20747_v48, %v12745_v14 }
0x38ae   : > { %12833 = vst.msk [vmem:[%s20752_s20 + $0x1d8] sm:$0xff] %vm12773_vm7, %v12754_v5 }
0x38af   : > { %12831 = vst.msk [vmem:[%s20752_s20 + $0x1c8] sm:$0xff] %vm12773_vm7, %v12746_v43 }
0x38b1   : > { %v16764_v2 = vpop.f32.mrb[56].mxu1 }
0x38b2   : > { %v12767_v44 = vadd.f32 %v16764_v2, %v20747_v48  ;;  %v12758_v22 = vpop.f32.mrb[57].mxu1 }
0x38b3   : > { %v12759_v20 = vadd.f32 %v20747_v48, %v12758_v22  ;;  %v16765_v11 = vpop.f32.mrb[58].mxu1 }
0x38b4   : > { %12836 = vst.msk [vmem:[%s20752_s20 + $0x1f0] sm:$0xff] %vm12773_vm7, %v12767_v44  ;;  %v12770_v58 = vadd.f32 %v16765_v11, %v20747_v48  ;;  %v12761_v16 = vpop.f32.mrb[59].mxu1 }
0x38b5   : > { %12834 = vst.msk [vmem:[%s20752_s20 + $0x1e0] sm:$0xff] %vm12773_vm7, %v12759_v20  ;;  %v12762_v13 = vadd.f32 %v20747_v48, %v12761_v16 }
0x38b6   : > { %12837 = vst.msk [vmem:[%s20752_s20 + $0x1f8] sm:$0xff] %vm12773_vm7, %v12770_v58 }
0x38b7   : > { %12835 = vst.msk [vmem:[%s20752_s20 + $0x1e8] sm:$0xff] %vm12773_vm7, %v12762_v13 }
0x38b8 PF: > { %s25_s27 = sadd.s32 1, %s17342_s27  }
0x38b9   : > { %p22_p5 = scmp.ge.s32.totalorder %s25_s27, 4  }
0x38bb   :  { %24 = sbr.rel (!%p22_p5) target bundleno = 3 (0x3), region = 105 }

</bundles_post_ra>
